<compile_context>
chip_gen: v5e
topology: v5e:2x2
jax: 0.10.0
libtpu: 0.0.40
codegen_flags: <defaults>
</compile_context>

<pallas_src>
import functools

import jax
import jax.numpy as jnp
import numpy as np
from jax.experimental import pallas as pl
from jax.experimental.pallas import tpu as pltpu

_VMEM_LIMIT = 32 * 1024 * 1024


# ---------------------------------------------------------------------------
# fused conv1 + pool + relu + conv2 + pool + relu kernel
# ---------------------------------------------------------------------------
def _convnet_kernel(x_ref, w1_ref, b1_ref, w2_ref, b2_ref, o_ref,
                    s2_ref, p1_ref, acc0_ref, acc1_ref, *, tb):
    # x_ref : (tb*64, 64)  bf16   conv1 LHS, per-image 64 rows (r = U*8+V),
    #                              lanes = 4 block-shifts x 16 sub-pixels
    # w1_ref: (64, 512)    bf16   conv1 weights, 4 pool-member 128-lane tiles
    # b1_ref: (1, 128)     f32    conv1 bias tiled over the 4 dest lane groups
    # w2_ref: (8, 128, 128) bf16  conv2 weights, [pi*4 + q]
    # b2_ref: (1, 64)      f32
    # o_ref : (tb*64, 64)  bf16   pooled conv2 activations (fc-ready)
    rows = tb * 64

    # rows with V==7 or U==7 inside each 64-row image block are padding/garbage
    r = jax.lax.broadcasted_iota(jnp.int32, (rows, 1), 0)
    valid = ((r & 7) < 7) & ((r & 63) < 56)

    # ---- conv1: one K=64 matmul per pool member, running max (= 2x2 pool) ----
    x = x_ref[...]
    p1_ref[...] = jnp.dot(x, w1_ref[:, 0:128],
                          preferred_element_type=jnp.float32)
    for p in range(1, 4):
        p1_ref[...] = jnp.maximum(
            p1_ref[...],
            jnp.dot(x, w1_ref[:, p * 128:(p + 1) * 128],
                    preferred_element_type=jnp.float32))
    pooled1 = jnp.maximum(p1_ref[...] + b1_ref[...], 0.0)   # bias + ReLU
    pooled1 = jnp.where(valid, pooled1, 0.0)                 # zero garbage rows

    # ---- scatter into conv2's space-to-depth zero-padded input (VMEM) -------
    # pooled group (mi,nj) (lanes g*32..g*32+32, g = (1-mi)*2+(1-nj)) goes to
    # the same lane group of s2 at a constant row offset mi*8+nj.
    s2_ref[...] = jnp.zeros_like(s2_ref)
    for mi in range(2):
        for nj in range(2):
            g = (1 - mi) * 2 + (1 - nj)
            s2_ref[pl.ds(mi * 8 + nj, rows), pl.ds(g * 32, 32)] = (
                pooled1[:, g * 32:(g + 1) * 32])

    # ---- conv2: 4 shifted K=128 matmuls per output-parity pair ---------------
    for q in range(4):
        qoff = (q // 2) * 8 + (q % 2)
        lhs = s2_ref[pl.ds(qoff, rows), :].astype(jnp.bfloat16)
        p0 = jnp.dot(lhs, w2_ref[q], preferred_element_type=jnp.float32)
        p1 = jnp.dot(lhs, w2_ref[4 + q], preferred_element_type=jnp.float32)
        if q == 0:
            acc0_ref[...] = p0
            acc1_ref[...] = p1
        else:
            acc0_ref[...] += p0
            acc1_ref[...] += p1

    # ---- 2x2 max-pool over the 4 output parities + bias + relu + mask --------
    a0 = acc0_ref[...]
    a1 = acc1_ref[...]
    m = jnp.maximum(jnp.maximum(a0[:, 0:64], a0[:, 64:128]),
                    jnp.maximum(a1[:, 0:64], a1[:, 64:128]))
    m = jnp.maximum(m + b2_ref[...], 0.0)
    m = jnp.where(valid, m, 0.0)
    o_ref[...] = m.astype(o_ref.dtype)


def conv_fused(l1, w1, b1, w2, b2, *, tb):
    rows_total = l1.shape[0]            # n_pad * 64
    n_img = rows_total // 64
    rows = tb * 64
    kernel = functools.partial(_convnet_kernel, tb=tb)
    return pl.pallas_call(
        kernel,
        out_shape=jax.ShapeDtypeStruct((rows_total, 64), jnp.bfloat16),
        grid=(n_img // tb,),
        in_specs=[
            pl.BlockSpec((rows, 64), lambda i: (i, 0)),
            pl.BlockSpec((64, 512), lambda i: (0, 0)),       # resident weights
            pl.BlockSpec((1, 128), lambda i: (0, 0)),
            pl.BlockSpec((8, 128, 128), lambda i: (0, 0, 0)),
            pl.BlockSpec((1, 64), lambda i: (0, 0)),
        ],
        out_specs=pl.BlockSpec((rows, 64), lambda i: (i, 0)),
        scratch_shapes=[
            pltpu.VMEM((rows + 16, 128), jnp.float32),   # conv2 s2d padded grid
            pltpu.VMEM((rows, 128), jnp.float32),        # conv1 pooled max
            pltpu.VMEM((rows, 128), jnp.float32),        # conv2 acc (pi=0)
            pltpu.VMEM((rows, 128), jnp.float32),        # conv2 acc (pi=1)
        ],
        compiler_params=pltpu.CompilerParams(
            dimension_semantics=("parallel",),           # batch-parallel (2 TCs)
            vmem_limit_bytes=_VMEM_LIMIT,
        ),
    )(l1, w1, b1, w2, b2)


# ---------------------------------------------------------------------------
# fused fc1(relu) + fc2 kernel, lane-dense (128-wide) output
# ---------------------------------------------------------------------------
def _fc_fused_kernel(x_ref, w1_ref, b1_ref, w2_ref, b2_ref, o_ref):
    h = jnp.dot(x_ref[...], w1_ref[...], preferred_element_type=jnp.float32)
    h = jnp.maximum(h + b1_ref[...], 0.0).astype(jnp.bfloat16)
    o = jnp.dot(h, w2_ref[...], preferred_element_type=jnp.float32)
    o_ref[...] = (o + b2_ref[...]).astype(o_ref.dtype)


def fc_fused(x, w1, b1, w2, b2, *, tm):
    n, k = x.shape
    return pl.pallas_call(
        _fc_fused_kernel,
        out_shape=jax.ShapeDtypeStruct((n, 128), jnp.float32),
        grid=(n // tm,),
        in_specs=[
            pl.BlockSpec((tm, k), lambda i: (i, 0)),
            pl.BlockSpec((k, 128), lambda i: (0, 0)),
            pl.BlockSpec((1, 128), lambda i: (0, 0)),
            pl.BlockSpec((128, 128), lambda i: (0, 0)),
            pl.BlockSpec((1, 128), lambda i: (0, 0)),
        ],
        out_specs=pl.BlockSpec((tm, 128), lambda i: (i, 0)),
        compiler_params=pltpu.CompilerParams(
            dimension_semantics=("parallel",),
            vmem_limit_bytes=_VMEM_LIMIT,
        ),
    )(x, w1, b1, w2, b2)


# ---------------------------------------------------------------------------
# one-time weight preparation (outside the hot path)
# ---------------------------------------------------------------------------
def prepare_params(params):
    # ---- conv1: (16 sub-pixel x 4 shifts) -> (4 pool members x dest group x c)
    w1 = np.asarray(params["w1"], np.float32)                # (32, 1, 3, 3)
    W1 = np.zeros((64, 512), np.float32)
    for m_ in range(4):
        for n_ in range(4):
            p_pool = (m_ % 2) * 2 + (n_ % 2)                 # pool member tile
            g_dest = (1 - m_ // 2) * 2 + (1 - n_ // 2)       # conv2 s2d lane grp
            col0 = p_pool * 128 + g_dest * 32
            for qi in range(2):
                for qj in range(2):
                    for ri in range(4):
                        for rj in range(4):
                            dy = 4 * qi + ri - m_
                            dx = 4 * qj + rj - n_
                            if 0 <= dy < 3 and 0 <= dx < 3:
                                k = (qi * 2 + qj) * 16 + ri * 4 + rj
                                W1[k, col0:col0 + 32] = w1[:, 0, dy, dx]
    b1v = np.tile(np.asarray(params["b1"], np.float32), 4).reshape(1, 128)

    # ---- conv2: s2d(2x2) lane groups -> (pj, c_out) per (pi, shift q) ---------
    w2 = np.asarray(params["w2"], np.float32)                # (64, 32, 3, 3)
    W2 = np.zeros((2, 4, 128, 128), np.float32)
    for pi in range(2):
        for qi in range(2):
            for qj in range(2):
                q = qi * 2 + qj
                for ri in range(2):
                    for rj in range(2):
                        for pj in range(2):
                            dy = 2 * qi + ri - pi
                            dx = 2 * qj + rj - pj
                            if 0 <= dy < 3 and 0 <= dx < 3:
                                k0 = (ri * 2 + rj) * 32
                                c0 = pj * 64
                                W2[pi, q, k0:k0 + 32, c0:c0 + 64] = (
                                    w2[:, :, dy, dx].T)       # [c_in, c_out]
    W2 = W2.reshape(8, 128, 128)
    b2v = np.asarray(params["b2"], np.float32).reshape(1, 64)

    # ---- fc1: permute PyTorch CHW-flatten columns to (r=oi*8+oj, c) order ----
    wfc1 = np.asarray(params["wfc1"], np.float32)            # (128, 3136)
    f = np.arange(64 * 64)
    c = f % 64
    rr = f // 64
    oi = rr // 8
    oj = rr % 8
    src = c * 49 + oi * 7 + oj
    ok = (oi < 7) & (oj < 7)
    wf1 = np.where(ok[:, None], wfc1.T[np.where(ok, src, 0), :], 0.0)  # (4096,128)
    bf1 = np.asarray(params["bfc1"], np.float32).reshape(1, 128)

    # ---- fc2: pad 10 classes up to 128 lanes (unmasked lane-dense stores) ----
    wfc2 = np.asarray(params["wfc2"], np.float32)            # (10, 128)
    wf2 = np.zeros((128, 128), np.float32)
    wf2[:, :10] = wfc2.T
    bf2 = np.zeros((1, 128), np.float32)
    bf2[0, :10] = np.asarray(params["bfc2"], np.float32)

    return {
        "w1": jnp.asarray(W1, jnp.bfloat16), "b1": jnp.asarray(b1v),
        "w2": jnp.asarray(W2, jnp.bfloat16), "b2": jnp.asarray(b2v),
        "wfc1": jnp.asarray(wf1, jnp.bfloat16), "bfc1": jnp.asarray(bf1),
        "wfc2": jnp.asarray(wf2, jnp.bfloat16), "bfc2": jnp.asarray(bf2),
    }


# ---------------------------------------------------------------------------
# full forward pass (matches PyTorch CNN.forward semantics)
# ---------------------------------------------------------------------------
def _pick_tile(n, candidates):
    for c in candidates:
        if n % c == 0:
            return c
    return candidates[-1]


def cnn_forward(x_nchw, prepared):
    n = x_nchw.shape[0]
    n_pad = ((n + 7) // 8) * 8                    # guard against odd batches
    tb = _pick_tile(n_pad, (32, 16, 8))           # images per conv step
    tm = _pick_tile(n_pad, (512, 256, 128, 64, 32, 16, 8))   # rows per fc step

    # cheap wrapper glue: pad, 4x4 space-to-depth, 4-shift lane concat (K=64)
    img = x_nchw[:, 0, :, :]
    if n_pad != n:
        img = jnp.pad(img, ((0, n_pad - n), (0, 0), (0, 0)))
    P = jnp.pad(img, ((0, 0), (1, 3), (1, 3)))                      # (N,32,32)
    X4 = P.reshape(n_pad, 8, 4, 8, 4).transpose(0, 1, 3, 2, 4)
    X4 = X4.reshape(n_pad, 64, 16)
    X4 = jnp.pad(X4, ((0, 0), (0, 16), (0, 0)))                     # (N,80,16)
    L1 = jnp.concatenate([X4[:, o:o + 64, :] for o in (0, 1, 8, 9)], axis=-1)
    L1 = L1.reshape(n_pad * 64, 64).astype(jnp.bfloat16)

    # fused conv1+pool+relu+conv2+pool+relu  ->  (N*64, 64) fc-ready activations
    h2 = conv_fused(L1, prepared["w1"], prepared["b1"],
                    prepared["w2"], prepared["b2"], tb=tb)

    xfc = h2.reshape(n_pad, 64 * 64)              # free row-major reshape
    logits = fc_fused(xfc, prepared["wfc1"], prepared["bfc1"],
                      prepared["wfc2"], prepared["bfc2"], tm=tm)
    return logits[:n, :10]


def init_params(key):
    ks = jax.random.split(key, 8)
    scale = 0.05
    return {
        # PyTorch Conv2d weight layout: (C_out, C_in, kH, kW)
        "w1": scale * jax.random.normal(ks[0], (32, 1, 3, 3), jnp.float32),
        "b1": scale * jax.random.normal(ks[1], (32,), jnp.float32),
        "w2": scale * jax.random.normal(ks[2], (64, 32, 3, 3), jnp.float32),
        "b2": scale * jax.random.normal(ks[3], (64,), jnp.float32),
        # PyTorch Linear weight layout: (out_features, in_features)
        "wfc1": scale * jax.random.normal(ks[4], (128, 64 * 7 * 7), jnp.float32),
        "bfc1": scale * jax.random.normal(ks[5], (128,), jnp.float32),
        "wfc2": scale * jax.random.normal(ks[6], (10, 128), jnp.float32),
        "bfc2": scale * jax.random.normal(ks[7], (10,), jnp.float32),
    }


if __name__ == "__main__":
    key = jax.random.PRNGKey(0)
    k_x, k_p = jax.random.split(key)
    # MNIST-shaped input implied by fc1 = Linear(64*7*7, 128): (N, 1, 28, 28)
    x = jax.random.normal(k_x, (2, 1, 28, 28), jnp.float32)
    params = init_params(k_p)
    prepared = prepare_params(params)             # one-time weight transform

    fwd = jax.jit(cnn_forward)
    out = fwd(x, prepared)
    jax.block_until_ready(out)
    assert out.shape == (2, 10), out.shape
    assert out.dtype == jnp.float32
    print("KERNEL_OK")
</pallas_src>

<mosaic_0001>
module attributes {stable_mosaic.version = 11 : i64} {
  func.func @_convnet_kernel(%arg0: i32, %arg1: memref<512x64xbf16, #tpu.memory_space<vmem>>, %arg2: memref<64x512xbf16, #tpu.memory_space<vmem>>, %arg3: memref<1x128xf32, #tpu.memory_space<vmem>>, %arg4: memref<8x128x128xbf16, #tpu.memory_space<vmem>>, %arg5: memref<1x64xf32, #tpu.memory_space<vmem>>, %arg6: memref<512x64xbf16, #tpu.memory_space<vmem>>, %arg7: memref<528x128xf32, #tpu.memory_space<vmem>>, %arg8: memref<512x128xf32, #tpu.memory_space<vmem>>, %arg9: memref<512x128xf32, #tpu.memory_space<vmem>>, %arg10: memref<512x128xf32, #tpu.memory_space<vmem>>) attributes {dimension_semantics = [#tpu.dimension_semantics<parallel>], iteration_bounds = array<i64: 1>, scalar_prefetch = 0 : i64, scratch_operands = 4 : i64, tpu.core_type = #tpu.core_type<tc>, window_params = [{transform_indices = @transform_0, window_bounds = array<i64: 512, 64>}, {pipeline_mode = #tpu.pipeline_mode<synchronous>, transform_indices = @transform_1, window_bounds = array<i64: 64, 512>}, {pipeline_mode = #tpu.pipeline_mode<synchronous>, transform_indices = @transform_2, window_bounds = array<i64: 1, 128>}, {pipeline_mode = #tpu.pipeline_mode<synchronous>, transform_indices = @transform_3, window_bounds = array<i64: 8, 128, 128>}, {pipeline_mode = #tpu.pipeline_mode<synchronous>, transform_indices = @transform_4, window_bounds = array<i64: 1, 64>}, {transform_indices = @transform_5, window_bounds = array<i64: 512, 64>}]} {
    %0 = tpu.iota {dimensions = array<i32: 0>} : vector<512x1xi32>
    %c7_i32 = arith.constant 7 : i32
    %1 = vector.broadcast %c7_i32 : i32 to vector<512x1xi32>
    %2 = arith.andi %0, %1 : vector<512x1xi32>
    %c7_i32_0 = arith.constant 7 : i32
    %3 = vector.broadcast %c7_i32_0 : i32 to vector<512x1xi32>
    %4 = arith.cmpi slt, %2, %3 : vector<512x1xi32>
    %c63_i32 = arith.constant 63 : i32
    %5 = vector.broadcast %c63_i32 : i32 to vector<512x1xi32>
    %6 = arith.andi %0, %5 : vector<512x1xi32>
    %c56_i32 = arith.constant 56 : i32
    %7 = vector.broadcast %c56_i32 : i32 to vector<512x1xi32>
    %8 = arith.cmpi slt, %6, %7 : vector<512x1xi32>
    %9 = arith.andi %4, %8 : vector<512x1xi1>
    %c0 = arith.constant 0 : index
    %c0_1 = arith.constant 0 : index
    %10 = vector.load %arg1[%c0, %c0_1] : memref<512x64xbf16, #tpu.memory_space<vmem>>, vector<512x64xbf16>
    %c0_2 = arith.constant 0 : index
    %c0_3 = arith.constant 0 : index
    %11 = vector.load %arg2[%c0_2, %c0_3] : memref<64x512xbf16, #tpu.memory_space<vmem>>, vector<64x128xbf16>
    %cst = arith.constant dense<0.000000e+00> : vector<512x128xf32>
    %12 = tpu.matmul %10, %11, %cst {dimension_numbers = #tpu.dot_dimension_numbers<[1], [0], [0], [1], [0, 0, 1, 1], [], []>} : vector<512x64xbf16>, vector<64x128xbf16>, vector<512x128xf32> -> vector<512x128xf32>
    %c0_4 = arith.constant 0 : index
    %c0_5 = arith.constant 0 : index
    %13 = vector.load %arg8[%c0_4, %c0_5] : memref<512x128xf32, #tpu.memory_space<vmem>>, vector<512x128xf32>
    tpu.vector_store %arg8[%c0_4, %c0_5], %12 {strides = array<i32>} : memref<512x128xf32, #tpu.memory_space<vmem>>, vector<512x128xf32>,
    %c0_6 = arith.constant 0 : index
    %c0_7 = arith.constant 0 : index
    %14 = vector.load %arg8[%c0_6, %c0_7] : memref<512x128xf32, #tpu.memory_space<vmem>>, vector<512x128xf32>
    %c0_8 = arith.constant 0 : index
    %c128 = arith.constant 128 : index
    %15 = vector.load %arg2[%c0_8, %c128] : memref<64x512xbf16, #tpu.memory_space<vmem>>, vector<64x128xbf16>
    %cst_9 = arith.constant dense<0.000000e+00> : vector<512x128xf32>
    %16 = tpu.matmul %10, %15, %cst_9 {dimension_numbers = #tpu.dot_dimension_numbers<[1], [0], [0], [1], [0, 0, 1, 1], [], []>} : vector<512x64xbf16>, vector<64x128xbf16>, vector<512x128xf32> -> vector<512x128xf32>
    %17 = arith.maximumf %14, %16 : vector<512x128xf32>
    %c0_10 = arith.constant 0 : index
    %c0_11 = arith.constant 0 : index
    %18 = vector.load %arg8[%c0_10, %c0_11] : memref<512x128xf32, #tpu.memory_space<vmem>>, vector<512x128xf32>
    tpu.vector_store %arg8[%c0_10, %c0_11], %17 {strides = array<i32>} : memref<512x128xf32, #tpu.memory_space<vmem>>, vector<512x128xf32>,
    %c0_12 = arith.constant 0 : index
    %c0_13 = arith.constant 0 : index
    %19 = vector.load %arg8[%c0_12, %c0_13] : memref<512x128xf32, #tpu.memory_space<vmem>>, vector<512x128xf32>
    %c0_14 = arith.constant 0 : index
    %c256 = arith.constant 256 : index
    %20 = vector.load %arg2[%c0_14, %c256] : memref<64x512xbf16, #tpu.memory_space<vmem>>, vector<64x128xbf16>
    %cst_15 = arith.constant dense<0.000000e+00> : vector<512x128xf32>
    %21 = tpu.matmul %10, %20, %cst_15 {dimension_numbers = #tpu.dot_dimension_numbers<[1], [0], [0], [1], [0, 0, 1, 1], [], []>} : vector<512x64xbf16>, vector<64x128xbf16>, vector<512x128xf32> -> vector<512x128xf32>
    %22 = arith.maximumf %19, %21 : vector<512x128xf32>
    %c0_16 = arith.constant 0 : index
    %c0_17 = arith.constant 0 : index
    %23 = vector.load %arg8[%c0_16, %c0_17] : memref<512x128xf32, #tpu.memory_space<vmem>>, vector<512x128xf32>
    tpu.vector_store %arg8[%c0_16, %c0_17], %22 {strides = array<i32>} : memref<512x128xf32, #tpu.memory_space<vmem>>, vector<512x128xf32>,
    %c0_18 = arith.constant 0 : index
    %c0_19 = arith.constant 0 : index
    %24 = vector.load %arg8[%c0_18, %c0_19] : memref<512x128xf32, #tpu.memory_space<vmem>>, vector<512x128xf32>
    %c0_20 = arith.constant 0 : index
    %c384 = arith.constant 384 : index
    %25 = vector.load %arg2[%c0_20, %c384] : memref<64x512xbf16, #tpu.memory_space<vmem>>, vector<64x128xbf16>
    %cst_21 = arith.constant dense<0.000000e+00> : vector<512x128xf32>
    %26 = tpu.matmul %10, %25, %cst_21 {dimension_numbers = #tpu.dot_dimension_numbers<[1], [0], [0], [1], [0, 0, 1, 1], [], []>} : vector<512x64xbf16>, vector<64x128xbf16>, vector<512x128xf32> -> vector<512x128xf32>
    %27 = arith.maximumf %24, %26 : vector<512x128xf32>
    %c0_22 = arith.constant 0 : index
    %c0_23 = arith.constant 0 : index
    %28 = vector.load %arg8[%c0_22, %c0_23] : memref<512x128xf32, #tpu.memory_space<vmem>>, vector<512x128xf32>
    tpu.vector_store %arg8[%c0_22, %c0_23], %27 {strides = array<i32>} : memref<512x128xf32, #tpu.memory_space<vmem>>, vector<512x128xf32>,
    %c0_24 = arith.constant 0 : index
    %c0_25 = arith.constant 0 : index
    %29 = vector.load %arg8[%c0_24, %c0_25] : memref<512x128xf32, #tpu.memory_space<vmem>>, vector<512x128xf32>
    %c0_26 = arith.constant 0 : index
    %c0_27 = arith.constant 0 : index
    %30 = vector.load %arg3[%c0_26, %c0_27] : memref<1x128xf32, #tpu.memory_space<vmem>>, vector<1x128xf32>
    %31 = vector.broadcast %30 : vector<1x128xf32> to vector<512x128xf32>
    %32 = arith.addf %29, %31 : vector<512x128xf32>
    %cst_28 = arith.constant 0.000000e+00 : f32
    %33 = vector.broadcast %cst_28 : f32 to vector<512x128xf32>
    %34 = arith.maximumf %32, %33 : vector<512x128xf32>
    %cst_29 = arith.constant 0.000000e+00 : f32
    %35 = vector.shape_cast %9 : vector<512x1xi1> to vector<512x1xi1>
    %36 = vector.broadcast %35 : vector<512x1xi1> to vector<512x128xi1>
    %37 = vector.broadcast %cst_29 : f32 to vector<512x128xf32>
    %38 = arith.select %36, %34, %37 : vector<512x128xi1>, vector<512x128xf32>
    %cst_30 = arith.constant 0.000000e+00 : f32
    %39 = vector.broadcast %cst_30 : f32 to vector<528x128xf32>
    %c0_31 = arith.constant 0 : index
    %c0_32 = arith.constant 0 : index
    %40 = vector.load %arg7[%c0_31, %c0_32] : memref<528x128xf32, #tpu.memory_space<vmem>>, vector<528x128xf32>
    tpu.vector_store %arg7[%c0_31, %c0_32], %39 {strides = array<i32>} : memref<528x128xf32, #tpu.memory_space<vmem>>, vector<528x128xf32>,
    %41 = vector.extract_strided_slice %38 {offsets = [0, 96], sizes = [512, 32], strides = [1, 1]} : vector<512x128xf32> to vector<512x32xf32>
    %c0_33 = arith.constant 0 : index
    %c96 = arith.constant 96 : index
    %42 = vector.load %arg7[%c0_33, %c96] : memref<528x128xf32, #tpu.memory_space<vmem>>, vector<512x32xf32>
    tpu.vector_store %arg7[%c0_33, %c96], %41 {strides = array<i32>} : memref<528x128xf32, #tpu.memory_space<vmem>>, vector<512x32xf32>,
    %43 = vector.extract_strided_slice %38 {offsets = [0, 64], sizes = [512, 32], strides = [1, 1]} : vector<512x128xf32> to vector<512x32xf32>
    %c1 = arith.constant 1 : index
    %c64 = arith.constant 64 : index
    %44 = vector.load %arg7[%c1, %c64] : memref<528x128xf32, #tpu.memory_space<vmem>>, vector<512x32xf32>
    tpu.vector_store %arg7[%c1, %c64], %43 {strides = array<i32>} : memref<528x128xf32, #tpu.memory_space<vmem>>, vector<512x32xf32>,
    %45 = vector.extract_strided_slice %38 {offsets = [0, 32], sizes = [512, 32], strides = [1, 1]} : vector<512x128xf32> to vector<512x32xf32>
    %c8 = arith.constant 8 : index
    %c32 = arith.constant 32 : index
    %46 = vector.load %arg7[%c8, %c32] : memref<528x128xf32, #tpu.memory_space<vmem>>, vector<512x32xf32>
    tpu.vector_store %arg7[%c8, %c32], %45 {strides = array<i32>} : memref<528x128xf32, #tpu.memory_space<vmem>>, vector<512x32xf32>,
    %47 = vector.extract_strided_slice %38 {offsets = [0, 0], sizes = [512, 32], strides = [1, 1]} : vector<512x128xf32> to vector<512x32xf32>
    %c9 = arith.constant 9 : index
    %c0_34 = arith.constant 0 : index
    %48 = vector.load %arg7[%c9, %c0_34] : memref<528x128xf32, #tpu.memory_space<vmem>>, vector<512x32xf32>
    tpu.vector_store %arg7[%c9, %c0_34], %47 {strides = array<i32>} : memref<528x128xf32, #tpu.memory_space<vmem>>, vector<512x32xf32>,
    %c0_35 = arith.constant 0 : index
    %c0_36 = arith.constant 0 : index
    %49 = vector.load %arg7[%c0_35, %c0_36] : memref<528x128xf32, #tpu.memory_space<vmem>>, vector<512x128xf32>
    %50 = arith.truncf %49 : vector<512x128xf32> to vector<512x128xbf16>
    %c0_37 = arith.constant 0 : index
    %c0_38 = arith.constant 0 : index
    %c0_39 = arith.constant 0 : index
    %51 = vector.load %arg4[%c0_37, %c0_38, %c0_39] : memref<8x128x128xbf16, #tpu.memory_space<vmem>>, vector<1x128x128xbf16>
    %52 = vector.shape_cast %51 : vector<1x128x128xbf16> to vector<128x128xbf16>
    %cst_40 = arith.constant dense<0.000000e+00> : vector<512x128xf32>
    %53 = tpu.matmul %50, %52, %cst_40 {dimension_numbers = #tpu.dot_dimension_numbers<[1], [0], [0], [1], [0, 0, 1, 1], [], []>} : vector<512x128xbf16>, vector<128x128xbf16>, vector<512x128xf32> -> vector<512x128xf32>
    %c4 = arith.constant 4 : index
    %c0_41 = arith.constant 0 : index
    %c0_42 = arith.constant 0 : index
    %54 = vector.load %arg4[%c4, %c0_41, %c0_42] : memref<8x128x128xbf16, #tpu.memory_space<vmem>>, vector<1x128x128xbf16>
    %55 = vector.shape_cast %54 : vector<1x128x128xbf16> to vector<128x128xbf16>
    %cst_43 = arith.constant dense<0.000000e+00> : vector<512x128xf32>
    %56 = tpu.matmul %50, %55, %cst_43 {dimension_numbers = #tpu.dot_dimension_numbers<[1], [0], [0], [1], [0, 0, 1, 1], [], []>} : vector<512x128xbf16>, vector<128x128xbf16>, vector<512x128xf32> -> vector<512x128xf32>
    %c0_44 = arith.constant 0 : index
    %c0_45 = arith.constant 0 : index
    %57 = vector.load %arg9[%c0_44, %c0_45] : memref<512x128xf32, #tpu.memory_space<vmem>>, vector<512x128xf32>
    tpu.vector_store %arg9[%c0_44, %c0_45], %53 {strides = array<i32>} : memref<512x128xf32, #tpu.memory_space<vmem>>, vector<512x128xf32>,
    %c0_46 = arith.constant 0 : index
    %c0_47 = arith.constant 0 : index
    %58 = vector.load %arg10[%c0_46, %c0_47] : memref<512x128xf32, #tpu.memory_space<vmem>>, vector<512x128xf32>
    tpu.vector_store %arg10[%c0_46, %c0_47], %56 {strides = array<i32>} : memref<512x128xf32, #tpu.memory_space<vmem>>, vector<512x128xf32>,
    %c1_48 = arith.constant 1 : index
    %c0_49 = arith.constant 0 : index
    %59 = vector.load %arg7[%c1_48, %c0_49] : memref<528x128xf32, #tpu.memory_space<vmem>>, vector<512x128xf32>
    %60 = arith.truncf %59 : vector<512x128xf32> to vector<512x128xbf16>
    %c1_50 = arith.constant 1 : index
    %c0_51 = arith.constant 0 : index
    %c0_52 = arith.constant 0 : index
    %61 = vector.load %arg4[%c1_50, %c0_51, %c0_52] : memref<8x128x128xbf16, #tpu.memory_space<vmem>>, vector<1x128x128xbf16>
    %62 = vector.shape_cast %61 : vector<1x128x128xbf16> to vector<128x128xbf16>
    %cst_53 = arith.constant dense<0.000000e+00> : vector<512x128xf32>
    %63 = tpu.matmul %60, %62, %cst_53 {dimension_numbers = #tpu.dot_dimension_numbers<[1], [0], [0], [1], [0, 0, 1, 1], [], []>} : vector<512x128xbf16>, vector<128x128xbf16>, vector<512x128xf32> -> vector<512x128xf32>
    %c5 = arith.constant 5 : index
    %c0_54 = arith.constant 0 : index
    %c0_55 = arith.constant 0 : index
    %64 = vector.load %arg4[%c5, %c0_54, %c0_55] : memref<8x128x128xbf16, #tpu.memory_space<vmem>>, vector<1x128x128xbf16>
    %65 = vector.shape_cast %64 : vector<1x128x128xbf16> to vector<128x128xbf16>
    %cst_56 = arith.constant dense<0.000000e+00> : vector<512x128xf32>
    %66 = tpu.matmul %60, %65, %cst_56 {dimension_numbers = #tpu.dot_dimension_numbers<[1], [0], [0], [1], [0, 0, 1, 1], [], []>} : vector<512x128xbf16>, vector<128x128xbf16>, vector<512x128xf32> -> vector<512x128xf32>
    %c0_57 = arith.constant 0 : index
    %c0_58 = arith.constant 0 : index
    %67 = vector.load %arg9[%c0_57, %c0_58] : memref<512x128xf32, #tpu.memory_space<vmem>>, vector<512x128xf32>
    %68 = arith.addf %67, %63 : vector<512x128xf32>
    %c0_59 = arith.constant 0 : index
    %c0_60 = arith.constant 0 : index
    %69 = vector.load %arg9[%c0_59, %c0_60] : memref<512x128xf32, #tpu.memory_space<vmem>>, vector<512x128xf32>
    tpu.vector_store %arg9[%c0_59, %c0_60], %68 {strides = array<i32>} : memref<512x128xf32, #tpu.memory_space<vmem>>, vector<512x128xf32>,
    %c0_61 = arith.constant 0 : index
    %c0_62 = arith.constant 0 : index
    %70 = vector.load %arg10[%c0_61, %c0_62] : memref<512x128xf32, #tpu.memory_space<vmem>>, vector<512x128xf32>
    %71 = arith.addf %70, %66 : vector<512x128xf32>
    %c0_63 = arith.constant 0 : index
    %c0_64 = arith.constant 0 : index
    %72 = vector.load %arg10[%c0_63, %c0_64] : memref<512x128xf32, #tpu.memory_space<vmem>>, vector<512x128xf32>
    tpu.vector_store %arg10[%c0_63, %c0_64], %71 {strides = array<i32>} : memref<512x128xf32, #tpu.memory_space<vmem>>, vector<512x128xf32>,
    %c8_65 = arith.constant 8 : index
    %c0_66 = arith.constant 0 : index
    %73 = vector.load %arg7[%c8_65, %c0_66] : memref<528x128xf32, #tpu.memory_space<vmem>>, vector<512x128xf32>
    %74 = arith.truncf %73 : vector<512x128xf32> to vector<512x128xbf16>
    %c2 = arith.constant 2 : index
    %c0_67 = arith.constant 0 : index
    %c0_68 = arith.constant 0 : index
    %75 = vector.load %arg4[%c2, %c0_67, %c0_68] : memref<8x128x128xbf16, #tpu.memory_space<vmem>>, vector<1x128x128xbf16>
    %76 = vector.shape_cast %75 : vector<1x128x128xbf16> to vector<128x128xbf16>
    %cst_69 = arith.constant dense<0.000000e+00> : vector<512x128xf32>
    %77 = tpu.matmul %74, %76, %cst_69 {dimension_numbers = #tpu.dot_dimension_numbers<[1], [0], [0], [1], [0, 0, 1, 1], [], []>} : vector<512x128xbf16>, vector<128x128xbf16>, vector<512x128xf32> -> vector<512x128xf32>
    %c6 = arith.constant 6 : index
    %c0_70 = arith.constant 0 : index
    %c0_71 = arith.constant 0 : index
    %78 = vector.load %arg4[%c6, %c0_70, %c0_71] : memref<8x128x128xbf16, #tpu.memory_space<vmem>>, vector<1x128x128xbf16>
    %79 = vector.shape_cast %78 : vector<1x128x128xbf16> to vector<128x128xbf16>
    %cst_72 = arith.constant dense<0.000000e+00> : vector<512x128xf32>
    %80 = tpu.matmul %74, %79, %cst_72 {dimension_numbers = #tpu.dot_dimension_numbers<[1], [0], [0], [1], [0, 0, 1, 1], [], []>} : vector<512x128xbf16>, vector<128x128xbf16>, vector<512x128xf32> -> vector<512x128xf32>
    %c0_73 = arith.constant 0 : index
    %c0_74 = arith.constant 0 : index
    %81 = vector.load %arg9[%c0_73, %c0_74] : memref<512x128xf32, #tpu.memory_space<vmem>>, vector<512x128xf32>
    %82 = arith.addf %81, %77 : vector<512x128xf32>
    %c0_75 = arith.constant 0 : index
    %c0_76 = arith.constant 0 : index
    %83 = vector.load %arg9[%c0_75, %c0_76] : memref<512x128xf32, #tpu.memory_space<vmem>>, vector<512x128xf32>
    tpu.vector_store %arg9[%c0_75, %c0_76], %82 {strides = array<i32>} : memref<512x128xf32, #tpu.memory_space<vmem>>, vector<512x128xf32>,
    %c0_77 = arith.constant 0 : index
    %c0_78 = arith.constant 0 : index
    %84 = vector.load %arg10[%c0_77, %c0_78] : memref<512x128xf32, #tpu.memory_space<vmem>>, vector<512x128xf32>
    %85 = arith.addf %84, %80 : vector<512x128xf32>
    %c0_79 = arith.constant 0 : index
    %c0_80 = arith.constant 0 : index
    %86 = vector.load %arg10[%c0_79, %c0_80] : memref<512x128xf32, #tpu.memory_space<vmem>>, vector<512x128xf32>
    tpu.vector_store %arg10[%c0_79, %c0_80], %85 {strides = array<i32>} : memref<512x128xf32, #tpu.memory_space<vmem>>, vector<512x128xf32>,
    %c9_81 = arith.constant 9 : index
    %c0_82 = arith.constant 0 : index
    %87 = vector.load %arg7[%c9_81, %c0_82] : memref<528x128xf32, #tpu.memory_space<vmem>>, vector<512x128xf32>
    %88 = arith.truncf %87 : vector<512x128xf32> to vector<512x128xbf16>
    %c3 = arith.constant 3 : index
    %c0_83 = arith.constant 0 : index
    %c0_84 = arith.constant 0 : index
    %89 = vector.load %arg4[%c3, %c0_83, %c0_84] : memref<8x128x128xbf16, #tpu.memory_space<vmem>>, vector<1x128x128xbf16>
    %90 = vector.shape_cast %89 : vector<1x128x128xbf16> to vector<128x128xbf16>
    %cst_85 = arith.constant dense<0.000000e+00> : vector<512x128xf32>
    %91 = tpu.matmul %88, %90, %cst_85 {dimension_numbers = #tpu.dot_dimension_numbers<[1], [0], [0], [1], [0, 0, 1, 1], [], []>} : vector<512x128xbf16>, vector<128x128xbf16>, vector<512x128xf32> -> vector<512x128xf32>
    %c7 = arith.constant 7 : index
    %c0_86 = arith.constant 0 : index
    %c0_87 = arith.constant 0 : index
    %92 = vector.load %arg4[%c7, %c0_86, %c0_87] : memref<8x128x128xbf16, #tpu.memory_space<vmem>>, vector<1x128x128xbf16>
    %93 = vector.shape_cast %92 : vector<1x128x128xbf16> to vector<128x128xbf16>
    %cst_88 = arith.constant dense<0.000000e+00> : vector<512x128xf32>
    %94 = tpu.matmul %88, %93, %cst_88 {dimension_numbers = #tpu.dot_dimension_numbers<[1], [0], [0], [1], [0, 0, 1, 1], [], []>} : vector<512x128xbf16>, vector<128x128xbf16>, vector<512x128xf32> -> vector<512x128xf32>
    %c0_89 = arith.constant 0 : index
    %c0_90 = arith.constant 0 : index
    %95 = vector.load %arg9[%c0_89, %c0_90] : memref<512x128xf32, #tpu.memory_space<vmem>>, vector<512x128xf32>
    %96 = arith.addf %95, %91 : vector<512x128xf32>
    %c0_91 = arith.constant 0 : index
    %c0_92 = arith.constant 0 : index
    %97 = vector.load %arg9[%c0_91, %c0_92] : memref<512x128xf32, #tpu.memory_space<vmem>>, vector<512x128xf32>
    tpu.vector_store %arg9[%c0_91, %c0_92], %96 {strides = array<i32>} : memref<512x128xf32, #tpu.memory_space<vmem>>, vector<512x128xf32>,
    %c0_93 = arith.constant 0 : index
    %c0_94 = arith.constant 0 : index
    %98 = vector.load %arg10[%c0_93, %c0_94] : memref<512x128xf32, #tpu.memory_space<vmem>>, vector<512x128xf32>
    %99 = arith.addf %98, %94 : vector<512x128xf32>
    %c0_95 = arith.constant 0 : index
    %c0_96 = arith.constant 0 : index
    %100 = vector.load %arg10[%c0_95, %c0_96] : memref<512x128xf32, #tpu.memory_space<vmem>>, vector<512x128xf32>
    tpu.vector_store %arg10[%c0_95, %c0_96], %99 {strides = array<i32>} : memref<512x128xf32, #tpu.memory_space<vmem>>, vector<512x128xf32>,
    %c0_97 = arith.constant 0 : index
    %c0_98 = arith.constant 0 : index
    %101 = vector.load %arg9[%c0_97, %c0_98] : memref<512x128xf32, #tpu.memory_space<vmem>>, vector<512x128xf32>
    %c0_99 = arith.constant 0 : index
    %c0_100 = arith.constant 0 : index
    %102 = vector.load %arg10[%c0_99, %c0_100] : memref<512x128xf32, #tpu.memory_space<vmem>>, vector<512x128xf32>
    %103 = vector.extract_strided_slice %101 {offsets = [0, 0], sizes = [512, 64], strides = [1, 1]} : vector<512x128xf32> to vector<512x64xf32>
    %104 = vector.extract_strided_slice %101 {offsets = [0, 64], sizes = [512, 64], strides = [1, 1]} : vector<512x128xf32> to vector<512x64xf32>
    %105 = arith.maximumf %103, %104 : vector<512x64xf32>
    %106 = vector.extract_strided_slice %102 {offsets = [0, 0], sizes = [512, 64], strides = [1, 1]} : vector<512x128xf32> to vector<512x64xf32>
    %107 = vector.extract_strided_slice %102 {offsets = [0, 64], sizes = [512, 64], strides = [1, 1]} : vector<512x128xf32> to vector<512x64xf32>
    %108 = arith.maximumf %106, %107 : vector<512x64xf32>
    %109 = arith.maximumf %105, %108 : vector<512x64xf32>
    %c0_101 = arith.constant 0 : index
    %c0_102 = arith.constant 0 : index
    %110 = vector.load %arg5[%c0_101, %c0_102] : memref<1x64xf32, #tpu.memory_space<vmem>>, vector<1x64xf32>
    %111 = vector.broadcast %110 : vector<1x64xf32> to vector<512x64xf32>
    %112 = arith.addf %109, %111 : vector<512x64xf32>
    %cst_103 = arith.constant 0.000000e+00 : f32
    %113 = vector.broadcast %cst_103 : f32 to vector<512x64xf32>
    %114 = arith.maximumf %112, %113 : vector<512x64xf32>
    %cst_104 = arith.constant 0.000000e+00 : f32
    %115 = vector.shape_cast %9 : vector<512x1xi1> to vector<512x1xi1>
    %116 = vector.broadcast %115 : vector<512x1xi1> to vector<512x64xi1>
    %117 = vector.broadcast %cst_104 : f32 to vector<512x64xf32>
    %118 = arith.select %116, %114, %117 : vector<512x64xi1>, vector<512x64xf32>
    %119 = arith.truncf %118 : vector<512x64xf32> to vector<512x64xbf16>
    %c0_105 = arith.constant 0 : index
    %c0_106 = arith.constant 0 : index
    %120 = vector.load %arg6[%c0_105, %c0_106] : memref<512x64xbf16, #tpu.memory_space<vmem>>, vector<512x64xbf16>
    tpu.vector_store %arg6[%c0_105, %c0_106], %119 {strides = array<i32>} : memref<512x64xbf16, #tpu.memory_space<vmem>>, vector<512x64xbf16>,
    return
  }
  func.func @transform_0(%arg0: i32) -> (i32, i32) {
    %c0_i32 = arith.constant 0 : i32
    %c0_i32_0 = arith.constant 0 : i32
    return %arg0, %c0_i32 : i32, i32
  }
  func.func @transform_1(%arg0: i32) -> (i32, i32) {
    %c0_i32 = arith.constant 0 : i32
    %c0_i32_0 = arith.constant 0 : i32
    %c0_i32_1 = arith.constant 0 : i32
    return %c0_i32, %c0_i32_0 : i32, i32
  }
  func.func @transform_2(%arg0: i32) -> (i32, i32) {
    %c0_i32 = arith.constant 0 : i32
    %c0_i32_0 = arith.constant 0 : i32
    %c0_i32_1 = arith.constant 0 : i32
    return %c0_i32, %c0_i32_0 : i32, i32
  }
  func.func @transform_3(%arg0: i32) -> (i32, i32, i32) {
    %c0_i32 = arith.constant 0 : i32
    %c0_i32_0 = arith.constant 0 : i32
    %c0_i32_1 = arith.constant 0 : i32
    %c0_i32_2 = arith.constant 0 : i32
    return %c0_i32, %c0_i32_0, %c0_i32_1 : i32, i32, i32
  }
  func.func @transform_4(%arg0: i32) -> (i32, i32) {
    %c0_i32 = arith.constant 0 : i32
    %c0_i32_0 = arith.constant 0 : i32
    %c0_i32_1 = arith.constant 0 : i32
    return %c0_i32, %c0_i32_0 : i32, i32
  }
  func.func @transform_5(%arg0: i32) -> (i32, i32) {
    %c0_i32 = arith.constant 0 : i32
    %c0_i32_0 = arith.constant 0 : i32
    return %arg0, %c0_i32 : i32, i32
  }
}

module attributes {stable_mosaic.version = 11 : i64} {
  func.func @_fc_fused_kernel(%arg0: i32, %arg1: memref<8x4096xbf16, #tpu.memory_space<vmem>>, %arg2: memref<4096x128xbf16, #tpu.memory_space<vmem>>, %arg3: memref<1x128xf32, #tpu.memory_space<vmem>>, %arg4: memref<128x128xbf16, #tpu.memory_space<vmem>>, %arg5: memref<1x128xf32, #tpu.memory_space<vmem>>, %arg6: memref<8x128xf32, #tpu.memory_space<vmem>>) attributes {dimension_semantics = [#tpu.dimension_semantics<parallel>], iteration_bounds = array<i64: 1>, scalar_prefetch = 0 : i64, scratch_operands = 0 : i64, tpu.core_type = #tpu.core_type<tc>, window_params = [{transform_indices = @transform_0, window_bounds = array<i64: 8, 4096>}, {pipeline_mode = #tpu.pipeline_mode<synchronous>, transform_indices = @transform_1, window_bounds = array<i64: 4096, 128>}, {pipeline_mode = #tpu.pipeline_mode<synchronous>, transform_indices = @transform_2, window_bounds = array<i64: 1, 128>}, {pipeline_mode = #tpu.pipeline_mode<synchronous>, transform_indices = @transform_3, window_bounds = array<i64: 128, 128>}, {pipeline_mode = #tpu.pipeline_mode<synchronous>, transform_indices = @transform_4, window_bounds = array<i64: 1, 128>}, {transform_indices = @transform_5, window_bounds = array<i64: 8, 128>}]} {
    %c0 = arith.constant 0 : index
    %c0_0 = arith.constant 0 : index
    %0 = vector.load %arg1[%c0, %c0_0] : memref<8x4096xbf16, #tpu.memory_space<vmem>>, vector<8x4096xbf16>
    %c0_1 = arith.constant 0 : index
    %c0_2 = arith.constant 0 : index
    %1 = vector.load %arg2[%c0_1, %c0_2] : memref<4096x128xbf16, #tpu.memory_space<vmem>>, vector<4096x128xbf16>
    %cst = arith.constant dense<0.000000e+00> : vector<8x128xf32>
    %2 = tpu.matmul %0, %1, %cst {dimension_numbers = #tpu.dot_dimension_numbers<[1], [0], [0], [1], [0, 0, 1, 1], [], []>} : vector<8x4096xbf16>, vector<4096x128xbf16>, vector<8x128xf32> -> vector<8x128xf32>
    %c0_3 = arith.constant 0 : index
    %c0_4 = arith.constant 0 : index
    %3 = vector.load %arg3[%c0_3, %c0_4] : memref<1x128xf32, #tpu.memory_space<vmem>>, vector<1x128xf32>
    %4 = vector.broadcast %3 : vector<1x128xf32> to vector<8x128xf32>
    %5 = arith.addf %2, %4 : vector<8x128xf32>
    %cst_5 = arith.constant 0.000000e+00 : f32
    %6 = vector.broadcast %cst_5 : f32 to vector<8x128xf32>
    %7 = arith.maximumf %5, %6 : vector<8x128xf32>
    %8 = arith.truncf %7 : vector<8x128xf32> to vector<8x128xbf16>
    %c0_6 = arith.constant 0 : index
    %c0_7 = arith.constant 0 : index
    %9 = vector.load %arg4[%c0_6, %c0_7] : memref<128x128xbf16, #tpu.memory_space<vmem>>, vector<128x128xbf16>
    %cst_8 = arith.constant dense<0.000000e+00> : vector<8x128xf32>
    %10 = tpu.matmul %8, %9, %cst_8 {dimension_numbers = #tpu.dot_dimension_numbers<[1], [0], [0], [1], [0, 0, 1, 1], [], []>} : vector<8x128xbf16>, vector<128x128xbf16>, vector<8x128xf32> -> vector<8x128xf32>
    %c0_9 = arith.constant 0 : index
    %c0_10 = arith.constant 0 : index
    %11 = vector.load %arg5[%c0_9, %c0_10] : memref<1x128xf32, #tpu.memory_space<vmem>>, vector<1x128xf32>
    %12 = vector.broadcast %11 : vector<1x128xf32> to vector<8x128xf32>
    %13 = arith.addf %10, %12 : vector<8x128xf32>
    %c0_11 = arith.constant 0 : index
    %c0_12 = arith.constant 0 : index
    %14 = vector.load %arg6[%c0_11, %c0_12] : memref<8x128xf32, #tpu.memory_space<vmem>>, vector<8x128xf32>
    tpu.vector_store %arg6[%c0_11, %c0_12], %13 {strides = array<i32>} : memref<8x128xf32, #tpu.memory_space<vmem>>, vector<8x128xf32>,
    return
  }
  func.func @transform_0(%arg0: i32) -> (i32, i32) {
    %c0_i32 = arith.constant 0 : i32
    %c0_i32_0 = arith.constant 0 : i32
    return %arg0, %c0_i32 : i32, i32
  }
  func.func @transform_1(%arg0: i32) -> (i32, i32) {
    %c0_i32 = arith.constant 0 : i32
    %c0_i32_0 = arith.constant 0 : i32
    %c0_i32_1 = arith.constant 0 : i32
    return %c0_i32, %c0_i32_0 : i32, i32
  }
  func.func @transform_2(%arg0: i32) -> (i32, i32) {
    %c0_i32 = arith.constant 0 : i32
    %c0_i32_0 = arith.constant 0 : i32
    %c0_i32_1 = arith.constant 0 : i32
    return %c0_i32, %c0_i32_0 : i32, i32
  }
  func.func @transform_3(%arg0: i32) -> (i32, i32) {
    %c0_i32 = arith.constant 0 : i32
    %c0_i32_0 = arith.constant 0 : i32
    %c0_i32_1 = arith.constant 0 : i32
    return %c0_i32, %c0_i32_0 : i32, i32
  }
  func.func @transform_4(%arg0: i32) -> (i32, i32) {
    %c0_i32 = arith.constant 0 : i32
    %c0_i32_0 = arith.constant 0 : i32
    %c0_i32_1 = arith.constant 0 : i32
    return %c0_i32, %c0_i32_0 : i32, i32
  }
  func.func @transform_5(%arg0: i32) -> (i32, i32) {
    %c0_i32 = arith.constant 0 : i32
    %c0_i32_0 = arith.constant 0 : i32
    return %arg0, %c0_i32 : i32, i32
  }
}

</mosaic_0001>

<bundles_post_ra>
// kernel: cnn_forward.3
= control target key start
LH: loop header
LB: loop body
LE: loop exit
PB: predicated region body
PF: predicated region fallthrough
CT: control target
= control target key end

     0   :  { %s4911_s1 = inlined_call_operand.vmem [shape: bf16[4096,128], index: 1, kind: input, shape index: {}]   ;;  %s4912_s0 = inlined_call_operand.vmem [shape: bf16[8,4096], index: 0, kind: input, shape index: {}]   ;;  %s4913_s2 = inlined_call_operand.vmem [shape: f32[1,128], index: 2, kind: input, shape index: {}]   ;;  %s4914_s4 = inlined_call_operand.vmem [shape: f32[1,128], index: 4, kind: input, shape index: {}]   ;;  %s4915_s3 = inlined_call_operand.vmem [shape: bf16[128,128], index: 3, kind: input, shape index: {}]   ;;  %s4916_s5 = inlined_call_operand.vmem [shape: f32[8,128], index: 5, kind: output, shape index: {}]  }
   0x1   :  { %v3767_v0 = vld [vmem:[%s4911_s1 + $0x38] sm:$0xff]  ;;  %v3766_v4 = vld [vmem:[%s4911_s1 + $0x30] sm:$0xff]  ;;  %v3765_v8 = vld [vmem:[%s4911_s1 + $0x28] sm:$0xff] }
   0x2   :  { %v3775_v1 = vld [vmem:[%s4911_s1 + $0x78] sm:$0xff]  ;;  %2200 = vmatpush.bf16.msra.mxu0 %v3767_v0  ;;  %v3774_v5 = vld [vmem:[%s4911_s1 + $0x70] sm:$0xff]  ;;  %v3773_v9 = vld [vmem:[%s4911_s1 + $0x68] sm:$0xff] }
   0x3   :  { %v3783_v2 = vld [vmem:[%s4911_s1 + $0xb8] sm:$0xff]  ;;  %2213 = vmatpush.bf16.msra.mxu1 %v3775_v1  ;;  %v3782_v6 = vld [vmem:[%s4911_s1 + $0xb0] sm:$0xff]  ;;  %v3781_v10 = vld [vmem:[%s4911_s1 + $0xa8] sm:$0xff] }
   0x4   :  { %v3791_v3 = vld [vmem:[%s4911_s1 + $0xf8] sm:$0xff]  ;;  %2226 = vmatpush.bf16.msra.mxu2 %v3783_v2  ;;  %v3790_v7 = vld [vmem:[%s4911_s1 + $0xf0] sm:$0xff]  ;;  %v3789_v11 = vld [vmem:[%s4911_s1 + $0xe8] sm:$0xff] }
   0x5   :  { %2239 = vmatpush.bf16.msra.mxu3 %v3791_v3  ;;  %v3764_v12 = vld [vmem:[%s4911_s1 + $0x20] sm:$0xff]  ;;  %v3763_v16 = vld [vmem:[%s4911_s1 + $0x18] sm:$0xff]  ;;  %v3762_v20 = vld [vmem:[%s4911_s1 + $0x10] sm:$0xff] }
   0x6   :  { %2201 = vmatpush.bf16.msra.mxu0 %v3766_v4  ;;  %v3772_v13 = vld [vmem:[%s4911_s1 + $0x60] sm:$0xff]  ;;  %v3771_v17 = vld [vmem:[%s4911_s1 + $0x58] sm:$0xff]  ;;  %v3770_v21 = vld [vmem:[%s4911_s1 + $0x50] sm:$0xff] }
   0x7   :  { %2214 = vmatpush.bf16.msra.mxu1 %v3774_v5  ;;  %v3780_v14 = vld [vmem:[%s4911_s1 + $0xa0] sm:$0xff]  ;;  %v3779_v18 = vld [vmem:[%s4911_s1 + $0x98] sm:$0xff]  ;;  %v3778_v22 = vld [vmem:[%s4911_s1 + $0x90] sm:$0xff] }
   0x8   :  { %2227 = vmatpush.bf16.msra.mxu2 %v3782_v6  ;;  %v3788_v15 = vld [vmem:[%s4911_s1 + $0xe0] sm:$0xff]  ;;  %v3787_v19 = vld [vmem:[%s4911_s1 + $0xd8] sm:$0xff]  ;;  %v3786_v23 = vld [vmem:[%s4911_s1 + $0xd0] sm:$0xff] }
   0x9   :  { %2240 = vmatpush.bf16.msra.mxu3 %v3790_v7  ;;  %v3761_v24 = vld [vmem:[%s4911_s1 + $0x8] sm:$0xff]  ;;  %v20_v29 = vld [vmem:[%s4912_s0] sm:$0xff]  ;;  %v3799_v38 = vld [vmem:[%s4911_s1 + $0x138] sm:$0xff] }
   0xa   :  { %2202 = vmatpush.bf16.msra.mxu0 %v3765_v8  ;;  %v3769_v25 = vld [vmem:[%s4911_s1 + $0x48] sm:$0xff]  ;;  %v3760_v30 = vld [vmem:[%s4911_s1] sm:$0xff]  ;;  %v568_v33 = vunpack.c.l.b16 %v20_v29  ;;  %v569_v37 = vunpack.c.h.b16 %v20_v29  ;;  %v3807_v39 = vld [vmem:[%s4911_s1 + $0x178] sm:$0xff] }
   0xb   :  { %2215 = vmatpush.bf16.msra.mxu1 %v3773_v9  ;;  %v3777_v26 = vld [vmem:[%s4911_s1 + $0x88] sm:$0xff]  ;;  %v3768_v31 = vld [vmem:[%s4911_s1 + $0x40] sm:$0xff]  ;;  %v3815_v40 = vld [vmem:[%s4911_s1 + $0x1b8] sm:$0xff] }
   0xc   :  { %2228 = vmatpush.bf16.msra.mxu2 %v3781_v10  ;;  %v3785_v27 = vld [vmem:[%s4911_s1 + $0xc8] sm:$0xff]  ;;  %v3776_v34 = vld [vmem:[%s4911_s1 + $0x80] sm:$0xff]  ;;  %v3823_v41 = vld [vmem:[%s4911_s1 + $0x1f8] sm:$0xff]  ;;  %v600_v43 = vpack.c.b16 %v568_v33, %v568_v33  ;;  %v601_v45 = vpack.c.b16 %v569_v37, %v569_v37 }
   0xd   :  { %2241 = vmatpush.bf16.msra.mxu3 %v3789_v11  ;;  %v21_v28 = vld [vmem:[%s4912_s0 + $0x8] sm:$0xff]  ;;  %v3784_v35 = vld [vmem:[%s4911_s1 + $0xc0] sm:$0xff]  ;;  %v3798_v46 = vld [vmem:[%s4911_s1 + $0x130] sm:$0xff] }
   0xe   :  { %2203 = vmatpush.bf16.msra.mxu0 %v3764_v12  ;;  %v570_v32 = vunpack.c.l.b16 %v21_v28  ;;  %v571_v36 = vunpack.c.h.b16 %v21_v28  ;;  %v3806_v47 = vld [vmem:[%s4911_s1 + $0x170] sm:$0xff]  ;;  %v3797_v50 = vld [vmem:[%s4911_s1 + $0x128] sm:$0xff]  ;;  %v3796_v54 = vld [vmem:[%s4911_s1 + $0x120] sm:$0xff] }
   0xf   :  { %2216 = vmatpush.bf16.msra.mxu1 %v3772_v13  ;;  %v3814_v48 = vld [vmem:[%s4911_s1 + $0x1b0] sm:$0xff]  ;;  %v3805_v51 = vld [vmem:[%s4911_s1 + $0x168] sm:$0xff]  ;;  %v3804_v55 = vld [vmem:[%s4911_s1 + $0x160] sm:$0xff] }
  0x10   :  { %2229 = vmatpush.bf16.msra.mxu2 %v3780_v14  ;;  %v602_v42 = vpack.c.b16 %v570_v32, %v570_v32  ;;  %v603_v44 = vpack.c.b16 %v571_v36, %v571_v36  ;;  %v3822_v49 = vld [vmem:[%s4911_s1 + $0x1f0] sm:$0xff]  ;;  %v3813_v52 = vld [vmem:[%s4911_s1 + $0x1a8] sm:$0xff]  ;;  %v3812_v56 = vld [vmem:[%s4911_s1 + $0x1a0] sm:$0xff] }
  0x11   :  { %2242 = vmatpush.bf16.msra.mxu3 %v3788_v15  ;;  %v3821_v53 = vld [vmem:[%s4911_s1 + $0x1e8] sm:$0xff]  ;;  %v3820_v57 = vld [vmem:[%s4911_s1 + $0x1e0] sm:$0xff]  ;;  %v3795_v58 = vld [vmem:[%s4911_s1 + $0x118] sm:$0xff] }
  0x12   :  { %2204 = vmatpush.bf16.msra.mxu0 %v3763_v16  ;;  %v3803_v59 = vld [vmem:[%s4911_s1 + $0x158] sm:$0xff]  ;;  %v3794_v62 = vld [vmem:[%s4911_s1 + $0x110] sm:$0xff]  ;;  %v3793_v2 = vld [vmem:[%s4911_s1 + $0x108] sm:$0xff] }
  0x13   :  { %2217 = vmatpush.bf16.msra.mxu1 %v3771_v17  ;;  %v3811_v60 = vld [vmem:[%s4911_s1 + $0x198] sm:$0xff]  ;;  %v3802_v63 = vld [vmem:[%s4911_s1 + $0x150] sm:$0xff]  ;;  %v3801_v3 = vld [vmem:[%s4911_s1 + $0x148] sm:$0xff] }
  0x14   :  { %2230 = vmatpush.bf16.msra.mxu2 %v3779_v18  ;;  %v3819_v61 = vld [vmem:[%s4911_s1 + $0x1d8] sm:$0xff]  ;;  %v3810_v0 = vld [vmem:[%s4911_s1 + $0x190] sm:$0xff]  ;;  %v3809_v4 = vld [vmem:[%s4911_s1 + $0x188] sm:$0xff] }
  0x15   :  { %2243 = vmatpush.bf16.msra.mxu3 %v3787_v19  ;;  %v3818_v1 = vld [vmem:[%s4911_s1 + $0x1d0] sm:$0xff]  ;;  %v3817_v5 = vld [vmem:[%s4911_s1 + $0x1c8] sm:$0xff]  ;;  %v23_v6 = vld [vmem:[%s4912_s0 + $0x18] sm:$0xff] }
  0x16   :  { %2205 = vmatpush.bf16.msra.mxu0 %v3762_v20  ;;  %v22_v7 = vld [vmem:[%s4912_s0 + $0x10] sm:$0xff]  ;;  %v3792_v8 = vld [vmem:[%s4911_s1 + $0x100] sm:$0xff]  ;;  %v574_v10 = vunpack.c.l.b16 %v23_v6  ;;  %v575_v14 = vunpack.c.h.b16 %v23_v6  ;;  %v3831_v16 = vld [vmem:[%s4911_s1 + $0x238] sm:$0xff] }
  0x17   :  { %2218 = vmatpush.bf16.msra.mxu1 %v3770_v21  ;;  %v3800_v9 = vld [vmem:[%s4911_s1 + $0x140] sm:$0xff]  ;;  %v572_v11 = vunpack.c.l.b16 %v22_v7  ;;  %v573_v15 = vunpack.c.h.b16 %v22_v7  ;;  %v3839_v17 = vld [vmem:[%s4911_s1 + $0x278] sm:$0xff]  ;;  %v3829_v28 = vld [vmem:[%s4911_s1 + $0x228] sm:$0xff] }
  0x18   :  { %2231 = vmatpush.bf16.msra.mxu2 %v3778_v22  ;;  %v3808_v12 = vld [vmem:[%s4911_s1 + $0x180] sm:$0xff]  ;;  %v3847_v18 = vld [vmem:[%s4911_s1 + $0x2b8] sm:$0xff]  ;;  %v606_v20 = vpack.c.b16 %v574_v10, %v574_v10  ;;  %v607_v22 = vpack.c.b16 %v575_v14, %v575_v14  ;;  %v3837_v29 = vld [vmem:[%s4911_s1 + $0x268] sm:$0xff] }
  0x19   :  { %2244 = vmatpush.bf16.msra.mxu3 %v3786_v23  ;;  %v3816_v13 = vld [vmem:[%s4911_s1 + $0x1c0] sm:$0xff]  ;;  %v3855_v19 = vld [vmem:[%s4911_s1 + $0x2f8] sm:$0xff]  ;;  %v604_v21 = vpack.c.b16 %v572_v11, %v572_v11  ;;  %v605_v23 = vpack.c.b16 %v573_v15, %v573_v15  ;;  %v3861_v6 = vld [vmem:[%s4911_s1 + $0x328] sm:$0xff] }
  0x1a   :  { %2206 = vmatpush.bf16.msra.mxu0 %v3761_v24  ;;  %v3830_v24 = vld [vmem:[%s4911_s1 + $0x230] sm:$0xff]  ;;  %v3828_v32 = vld [vmem:[%s4911_s1 + $0x220] sm:$0xff]  ;;  %v3827_v36 = vld [vmem:[%s4911_s1 + $0x218] sm:$0xff] }
  0x1b   :  { %2219 = vmatpush.bf16.msra.mxu1 %v3769_v25  ;;  %v3838_v25 = vld [vmem:[%s4911_s1 + $0x270] sm:$0xff]  ;;  %v3836_v33 = vld [vmem:[%s4911_s1 + $0x260] sm:$0xff]  ;;  %v3835_v37 = vld [vmem:[%s4911_s1 + $0x258] sm:$0xff] }
  0x1c   :  { %2232 = vmatpush.bf16.msra.mxu2 %v3777_v26  ;;  %v3846_v26 = vld [vmem:[%s4911_s1 + $0x2b0] sm:$0xff]  ;;  %v3869_v7 = vld [vmem:[%s4911_s1 + $0x368] sm:$0xff]  ;;  %v3860_v10 = vld [vmem:[%s4911_s1 + $0x320] sm:$0xff] }
  0x1d   :  { %2245 = vmatpush.bf16.msra.mxu3 %v3785_v27  ;;  %v3854_v27 = vld [vmem:[%s4911_s1 + $0x2f0] sm:$0xff]  ;;  %v3868_v11 = vld [vmem:[%s4911_s1 + $0x360] sm:$0xff]  ;;  %v3859_v14 = vld [vmem:[%s4911_s1 + $0x318] sm:$0xff] }
  0x1e   :  { %2207 = vmatpush.bf16.msra.mxu0 %v3760_v30  ;;  %v3845_v30 = vld [vmem:[%s4911_s1 + $0x2a8] sm:$0xff]  ;;  %v3867_v15 = vld [vmem:[%s4911_s1 + $0x358] sm:$0xff] }
  0x1f   :  { %2220 = vmatpush.bf16.msra.mxu1 %v3768_v31  ;;  %v3853_v31 = vld [vmem:[%s4911_s1 + $0x2e8] sm:$0xff] }
  0x20   :  { %2233 = vmatpush.bf16.msra.mxu2 %v3776_v34  ;;  %v3844_v34 = vld [vmem:[%s4911_s1 + $0x2a0] sm:$0xff] }
  0x21   :  { %2246 = vmatpush.bf16.msra.mxu3 %v3784_v35  ;;  %2208 = vmatmul.bf16.vlgmr.msra.gmra.mxu0 %v600_v43  ;;  %v3852_v35 = vld [vmem:[%s4911_s1 + $0x2e0] sm:$0xff]  ;;  %v3850_v43 = vld [vmem:[%s4911_s1 + $0x2d0] sm:$0xff] }
  0x22   :  { %2252 = vmatpush.bf16.msrb.mxu0 %v3799_v38  ;;  %2221 = vmatmul.bf16.vlgmr.msra.gmra.mxu1 %v601_v45  ;;  %v3843_v38 = vld [vmem:[%s4911_s1 + $0x298] sm:$0xff]  ;;  %v3833_v45 = vld [vmem:[%s4911_s1 + $0x248] sm:$0xff] }
  0x23   :  { %2265 = vmatpush.bf16.msrb.mxu1 %v3807_v39  ;;  %2234 = vmatmul.bf16.vlgmr.msra.gmra.mxu2 %v602_v42  ;;  %v3851_v39 = vld [vmem:[%s4911_s1 + $0x2d8] sm:$0xff]  ;;  %v3842_v42 = vld [vmem:[%s4911_s1 + $0x290] sm:$0xff] }
  0x24   :  { %2278 = vmatpush.bf16.msrb.mxu2 %v3815_v40  ;;  %2247 = vmatmul.bf16.vlgmr.msra.gmra.mxu3 %v603_v44  ;;  %v3826_v40 = vld [vmem:[%s4911_s1 + $0x210] sm:$0xff]  ;;  %v3825_v44 = vld [vmem:[%s4911_s1 + $0x208] sm:$0xff] }
  0x25   :  { %2291 = vmatpush.bf16.msrb.mxu3 %v3823_v41  ;;  %v3834_v41 = vld [vmem:[%s4911_s1 + $0x250] sm:$0xff] }
  0x26   :  { %2253 = vmatpush.bf16.msrb.mxu0 %v3798_v46  ;;  %v3841_v46 = vld [vmem:[%s4911_s1 + $0x288] sm:$0xff] }
  0x27   :  { %2266 = vmatpush.bf16.msrb.mxu1 %v3806_v47  ;;  %v3849_v47 = vld [vmem:[%s4911_s1 + $0x2c8] sm:$0xff] }
  0x28   :  { %2279 = vmatpush.bf16.msrb.mxu2 %v3814_v48  ;;  %v24_v48 = vld [vmem:[%s4912_s0 + $0x20] sm:$0xff] }
  0x29   :  { %2292 = vmatpush.bf16.msrb.mxu3 %v3822_v49  ;;  %v25_v49 = vld [vmem:[%s4912_s0 + $0x28] sm:$0xff] }
  0x2a   :  { %2254 = vmatpush.bf16.msrb.mxu0 %v3797_v50  ;;  %v3824_v50 = vld [vmem:[%s4911_s1 + $0x200] sm:$0xff] }
  0x2b   :  { %2267 = vmatpush.bf16.msrb.mxu1 %v3805_v51  ;;  %v3832_v51 = vld [vmem:[%s4911_s1 + $0x240] sm:$0xff] }
  0x2c   :  { %2280 = vmatpush.bf16.msrb.mxu2 %v3813_v52  ;;  %v576_v52 = vunpack.c.l.b16 %v24_v48 }
  0x2d   :  { %2293 = vmatpush.bf16.msrb.mxu3 %v3821_v53  ;;  %v578_v53 = vunpack.c.l.b16 %v25_v49 }
  0x2e   :  { %2255 = vmatpush.bf16.msrb.mxu0 %v3796_v54  ;;  %v3840_v54 = vld [vmem:[%s4911_s1 + $0x280] sm:$0xff] }
  0x2f   :  { %2268 = vmatpush.bf16.msrb.mxu1 %v3804_v55  ;;  %v3848_v55 = vld [vmem:[%s4911_s1 + $0x2c0] sm:$0xff] }
  0x30   :  { %2281 = vmatpush.bf16.msrb.mxu2 %v3812_v56  ;;  %v577_v56 = vunpack.c.h.b16 %v24_v48  ;;  %v3893_v48 = vld [vmem:[%s4911_s1 + $0x428] sm:$0xff] }
  0x31   :  { %2294 = vmatpush.bf16.msrb.mxu3 %v3820_v57  ;;  %v579_v57 = vunpack.c.h.b16 %v25_v49  ;;  %v3901_v49 = vld [vmem:[%s4911_s1 + $0x468] sm:$0xff] }
  0x32   :  { %2256 = vmatpush.bf16.msrb.mxu0 %v3795_v58  ;;  %v3863_v58 = vld [vmem:[%s4911_s1 + $0x338] sm:$0xff] }
  0x33   :  { %2269 = vmatpush.bf16.msrb.mxu1 %v3803_v59  ;;  %v3871_v59 = vld [vmem:[%s4911_s1 + $0x378] sm:$0xff] }
  0x34   :  { %2282 = vmatpush.bf16.msrb.mxu2 %v3811_v60  ;;  %v3879_v60 = vld [vmem:[%s4911_s1 + $0x3b8] sm:$0xff] }
  0x35   :  { %2295 = vmatpush.bf16.msrb.mxu3 %v3819_v61  ;;  %v3887_v61 = vld [vmem:[%s4911_s1 + $0x3f8] sm:$0xff] }
  0x36   :  { %2257 = vmatpush.bf16.msrb.mxu0 %v3794_v62  ;;  %v608_v62 = vpack.c.b16 %v576_v52, %v576_v52  ;;  %v3892_v52 = vld [vmem:[%s4911_s1 + $0x420] sm:$0xff] }
  0x37   :  { %2270 = vmatpush.bf16.msrb.mxu1 %v3802_v63  ;;  %v610_v63 = vpack.c.b16 %v578_v53, %v578_v53  ;;  %v3900_v53 = vld [vmem:[%s4911_s1 + $0x460] sm:$0xff] }
  0x38   :  { %2283 = vmatpush.bf16.msrb.mxu2 %v3810_v0  ;;  %v609_v0 = vpack.c.b16 %v577_v56, %v577_v56  ;;  %v3891_v56 = vld [vmem:[%s4911_s1 + $0x418] sm:$0xff] }
  0x39   :  { %2296 = vmatpush.bf16.msrb.mxu3 %v3818_v1  ;;  %v611_v1 = vpack.c.b16 %v579_v57, %v579_v57  ;;  %v3899_v57 = vld [vmem:[%s4911_s1 + $0x458] sm:$0xff] }
  0x3a   :  { %2258 = vmatpush.bf16.msrb.mxu0 %v3793_v2  ;;  %v3862_v2 = vld [vmem:[%s4911_s1 + $0x330] sm:$0xff] }
  0x3b   :  { %2271 = vmatpush.bf16.msrb.mxu1 %v3801_v3  ;;  %v3870_v3 = vld [vmem:[%s4911_s1 + $0x370] sm:$0xff] }
  0x3c   :  { %2284 = vmatpush.bf16.msrb.mxu2 %v3809_v4  ;;  %v3878_v4 = vld [vmem:[%s4911_s1 + $0x3b0] sm:$0xff] }
  0x3d   :  { %2297 = vmatpush.bf16.msrb.mxu3 %v3817_v5  ;;  %v3886_v5 = vld [vmem:[%s4911_s1 + $0x3f0] sm:$0xff] }
  0x3e   :  { %2259 = vmatpush.bf16.msrb.mxu0 %v3792_v8  ;;  %v3877_v8 = vld [vmem:[%s4911_s1 + $0x3a8] sm:$0xff] }
  0x3f   :  { %2272 = vmatpush.bf16.msrb.mxu1 %v3800_v9  ;;  %v3885_v9 = vld [vmem:[%s4911_s1 + $0x3e8] sm:$0xff] }
  0x40   :  { %2285 = vmatpush.bf16.msrb.mxu2 %v3808_v12  ;;  %v3876_v12 = vld [vmem:[%s4911_s1 + $0x3a0] sm:$0xff] }
  0x41   :  { %2298 = vmatpush.bf16.msrb.mxu3 %v3816_v13  ;;  %2260 = vmatmul.bf16.vlgmr.msrb.gmra.mxu0 %v604_v21  ;;  %v3884_v13 = vld [vmem:[%s4911_s1 + $0x3e0] sm:$0xff]  ;;  %v3882_v21 = vld [vmem:[%s4911_s1 + $0x3d0] sm:$0xff] }
  0x42   :  { %2304 = vmatpush.bf16.msra.mxu0 %v3831_v16  ;;  %2273 = vmatmul.bf16.vlgmr.msrb.gmra.mxu1 %v605_v23  ;;  %v3875_v16 = vld [vmem:[%s4911_s1 + $0x398] sm:$0xff]  ;;  %v3865_v23 = vld [vmem:[%s4911_s1 + $0x348] sm:$0xff] }
  0x43   :  { %2317 = vmatpush.bf16.msra.mxu1 %v3839_v17  ;;  %2286 = vmatmul.bf16.vlgmr.msrb.gmra.mxu2 %v606_v20  ;;  %v3883_v17 = vld [vmem:[%s4911_s1 + $0x3d8] sm:$0xff]  ;;  %v3874_v20 = vld [vmem:[%s4911_s1 + $0x390] sm:$0xff] }
  0x44   :  { %2330 = vmatpush.bf16.msra.mxu2 %v3847_v18  ;;  %2299 = vmatmul.bf16.vlgmr.msrb.gmra.mxu3 %v607_v22  ;;  %v3858_v18 = vld [vmem:[%s4911_s1 + $0x310] sm:$0xff]  ;;  %v3857_v22 = vld [vmem:[%s4911_s1 + $0x308] sm:$0xff] }
  0x45   :  { %2343 = vmatpush.bf16.msra.mxu3 %v3855_v19  ;;  %v3866_v19 = vld [vmem:[%s4911_s1 + $0x350] sm:$0xff] }
  0x46   :  { %2305 = vmatpush.bf16.msra.mxu0 %v3830_v24  ;;  %v3873_v24 = vld [vmem:[%s4911_s1 + $0x388] sm:$0xff] }
  0x47   :  { %2318 = vmatpush.bf16.msra.mxu1 %v3838_v25  ;;  %v3881_v25 = vld [vmem:[%s4911_s1 + $0x3c8] sm:$0xff] }
  0x48   :  { %2331 = vmatpush.bf16.msra.mxu2 %v3846_v26  ;;  %v26_v26 = vld [vmem:[%s4912_s0 + $0x30] sm:$0xff] }
  0x49   :  { %2344 = vmatpush.bf16.msra.mxu3 %v3854_v27  ;;  %v27_v27 = vld [vmem:[%s4912_s0 + $0x38] sm:$0xff] }
  0x4a   :  { %2306 = vmatpush.bf16.msra.mxu0 %v3829_v28  ;;  %v3856_v28 = vld [vmem:[%s4911_s1 + $0x300] sm:$0xff] }
  0x4b   :  { %2319 = vmatpush.bf16.msra.mxu1 %v3837_v29  ;;  %v3864_v29 = vld [vmem:[%s4911_s1 + $0x340] sm:$0xff] }
  0x4c   :  { %2332 = vmatpush.bf16.msra.mxu2 %v3845_v30  ;;  %v580_v30 = vunpack.c.l.b16 %v26_v26 }
  0x4d   :  { %2345 = vmatpush.bf16.msra.mxu3 %v3853_v31  ;;  %v582_v31 = vunpack.c.l.b16 %v27_v27 }
  0x4e   :  { %2307 = vmatpush.bf16.msra.mxu0 %v3828_v32  ;;  %v3872_v32 = vld [vmem:[%s4911_s1 + $0x380] sm:$0xff] }
  0x4f   :  { %2320 = vmatpush.bf16.msra.mxu1 %v3836_v33  ;;  %v3880_v33 = vld [vmem:[%s4911_s1 + $0x3c0] sm:$0xff] }
  0x50   :  { %2333 = vmatpush.bf16.msra.mxu2 %v3844_v34  ;;  %v581_v34 = vunpack.c.h.b16 %v26_v26  ;;  %v3925_v26 = vld [vmem:[%s4911_s1 + $0x528] sm:$0xff] }
  0x51   :  { %2346 = vmatpush.bf16.msra.mxu3 %v3852_v35  ;;  %v583_v35 = vunpack.c.h.b16 %v27_v27  ;;  %v3933_v27 = vld [vmem:[%s4911_s1 + $0x568] sm:$0xff] }
  0x52   :  { %2308 = vmatpush.bf16.msra.mxu0 %v3827_v36  ;;  %v3895_v36 = vld [vmem:[%s4911_s1 + $0x438] sm:$0xff] }
  0x53   :  { %2321 = vmatpush.bf16.msra.mxu1 %v3835_v37  ;;  %v3903_v37 = vld [vmem:[%s4911_s1 + $0x478] sm:$0xff] }
  0x54   :  { %2334 = vmatpush.bf16.msra.mxu2 %v3843_v38  ;;  %v3911_v38 = vld [vmem:[%s4911_s1 + $0x4b8] sm:$0xff] }
  0x55   :  { %2347 = vmatpush.bf16.msra.mxu3 %v3851_v39  ;;  %v3919_v39 = vld [vmem:[%s4911_s1 + $0x4f8] sm:$0xff] }
  0x56   :  { %2309 = vmatpush.bf16.msra.mxu0 %v3826_v40  ;;  %v612_v40 = vpack.c.b16 %v580_v30, %v580_v30  ;;  %v3949_v30 = vld [vmem:[%s4911_s1 + $0x5e8] sm:$0xff] }
  0x57   :  { %2322 = vmatpush.bf16.msra.mxu1 %v3834_v41  ;;  %v614_v41 = vpack.c.b16 %v582_v31, %v582_v31 }
  0x58   :  { %2335 = vmatpush.bf16.msra.mxu2 %v3842_v42  ;;  %v613_v42 = vpack.c.b16 %v581_v34, %v581_v34 }
  0x59   :  { %2348 = vmatpush.bf16.msra.mxu3 %v3850_v43  ;;  %v615_v43 = vpack.c.b16 %v583_v35, %v583_v35 }
  0x5a   :  { %2310 = vmatpush.bf16.msra.mxu0 %v3825_v44  ;;  %v3894_v44 = vld [vmem:[%s4911_s1 + $0x430] sm:$0xff] }
  0x5b   :  { %2323 = vmatpush.bf16.msra.mxu1 %v3833_v45  ;;  %v3902_v45 = vld [vmem:[%s4911_s1 + $0x470] sm:$0xff] }
  0x5c   :  { %2336 = vmatpush.bf16.msra.mxu2 %v3841_v46  ;;  %v3910_v46 = vld [vmem:[%s4911_s1 + $0x4b0] sm:$0xff] }
  0x5d   :  { %2349 = vmatpush.bf16.msra.mxu3 %v3849_v47  ;;  %v3918_v47 = vld [vmem:[%s4911_s1 + $0x4f0] sm:$0xff] }
  0x5e   :  { %2311 = vmatpush.bf16.msra.mxu0 %v3824_v50  ;;  %v3909_v50 = vld [vmem:[%s4911_s1 + $0x4a8] sm:$0xff] }
  0x5f   :  { %2324 = vmatpush.bf16.msra.mxu1 %v3832_v51  ;;  %v3917_v51 = vld [vmem:[%s4911_s1 + $0x4e8] sm:$0xff] }
  0x60   :  { %2337 = vmatpush.bf16.msra.mxu2 %v3840_v54  ;;  %v3908_v54 = vld [vmem:[%s4911_s1 + $0x4a0] sm:$0xff] }
  0x61   :  { %2350 = vmatpush.bf16.msra.mxu3 %v3848_v55  ;;  %2312 = vmatmul.bf16.vlgmr.msra.gmra.mxu0 %v608_v62  ;;  %v3916_v55 = vld [vmem:[%s4911_s1 + $0x4e0] sm:$0xff]  ;;  %v3906_v62 = vld [vmem:[%s4911_s1 + $0x490] sm:$0xff] }
  0x62   :  { %2356 = vmatpush.bf16.msrb.mxu0 %v3863_v58  ;;  %2325 = vmatmul.bf16.vlgmr.msra.gmra.mxu1 %v609_v0  ;;  %v3907_v58 = vld [vmem:[%s4911_s1 + $0x498] sm:$0xff]  ;;  %v3889_v0 = vld [vmem:[%s4911_s1 + $0x408] sm:$0xff] }
  0x63   :  { %2369 = vmatpush.bf16.msrb.mxu1 %v3871_v59  ;;  %2338 = vmatmul.bf16.vlgmr.msra.gmra.mxu2 %v610_v63  ;;  %v3915_v59 = vld [vmem:[%s4911_s1 + $0x4d8] sm:$0xff]  ;;  %v3914_v63 = vld [vmem:[%s4911_s1 + $0x4d0] sm:$0xff] }
  0x64   :  { %2382 = vmatpush.bf16.msrb.mxu2 %v3879_v60  ;;  %2351 = vmatmul.bf16.vlgmr.msra.gmra.mxu3 %v611_v1  ;;  %v3890_v60 = vld [vmem:[%s4911_s1 + $0x410] sm:$0xff]  ;;  %v3897_v1 = vld [vmem:[%s4911_s1 + $0x448] sm:$0xff] }
  0x65   :  { %2395 = vmatpush.bf16.msrb.mxu3 %v3887_v61  ;;  %v3898_v61 = vld [vmem:[%s4911_s1 + $0x450] sm:$0xff] }
  0x66   :  { %2357 = vmatpush.bf16.msrb.mxu0 %v3862_v2  ;;  %v3905_v2 = vld [vmem:[%s4911_s1 + $0x488] sm:$0xff] }
  0x67   :  { %2370 = vmatpush.bf16.msrb.mxu1 %v3870_v3  ;;  %v3913_v3 = vld [vmem:[%s4911_s1 + $0x4c8] sm:$0xff] }
  0x68   :  { %2383 = vmatpush.bf16.msrb.mxu2 %v3878_v4  ;;  %v28_v4 = vld [vmem:[%s4912_s0 + $0x40] sm:$0xff] }
  0x69   :  { %2396 = vmatpush.bf16.msrb.mxu3 %v3886_v5  ;;  %v29_v5 = vld [vmem:[%s4912_s0 + $0x48] sm:$0xff] }
  0x6a   :  { %2358 = vmatpush.bf16.msrb.mxu0 %v3861_v6  ;;  %v3888_v6 = vld [vmem:[%s4911_s1 + $0x400] sm:$0xff] }
  0x6b   :  { %2371 = vmatpush.bf16.msrb.mxu1 %v3869_v7  ;;  %v3896_v7 = vld [vmem:[%s4911_s1 + $0x440] sm:$0xff] }
  0x6c   :  { %2384 = vmatpush.bf16.msrb.mxu2 %v3877_v8  ;;  %v584_v8 = vunpack.c.l.b16 %v28_v4 }
  0x6d   :  { %2397 = vmatpush.bf16.msrb.mxu3 %v3885_v9  ;;  %v586_v9 = vunpack.c.l.b16 %v29_v5 }
  0x6e   :  { %2359 = vmatpush.bf16.msrb.mxu0 %v3860_v10  ;;  %v3904_v10 = vld [vmem:[%s4911_s1 + $0x480] sm:$0xff] }
  0x6f   :  { %2372 = vmatpush.bf16.msrb.mxu1 %v3868_v11  ;;  %v3912_v11 = vld [vmem:[%s4911_s1 + $0x4c0] sm:$0xff] }
  0x70   :  { %2385 = vmatpush.bf16.msrb.mxu2 %v3876_v12  ;;  %v585_v12 = vunpack.c.h.b16 %v28_v4 }
  0x71   :  { %2398 = vmatpush.bf16.msrb.mxu3 %v3884_v13  ;;  %v587_v13 = vunpack.c.h.b16 %v29_v5  ;;  %v3959_v5 = vld [vmem:[%s4911_s1 + $0x638] sm:$0xff] }
  0x72   :  { %2360 = vmatpush.bf16.msrb.mxu0 %v3859_v14  ;;  %v3927_v14 = vld [vmem:[%s4911_s1 + $0x538] sm:$0xff] }
  0x73   :  { %2373 = vmatpush.bf16.msrb.mxu1 %v3867_v15  ;;  %v3935_v15 = vld [vmem:[%s4911_s1 + $0x578] sm:$0xff] }
  0x74   :  { %2386 = vmatpush.bf16.msrb.mxu2 %v3875_v16  ;;  %v3943_v16 = vld [vmem:[%s4911_s1 + $0x5b8] sm:$0xff] }
  0x75   :  { %2399 = vmatpush.bf16.msrb.mxu3 %v3883_v17  ;;  %v3951_v17 = vld [vmem:[%s4911_s1 + $0x5f8] sm:$0xff] }
  0x76   :  { %2361 = vmatpush.bf16.msrb.mxu0 %v3858_v18  ;;  %v616_v18 = vpack.c.b16 %v584_v8, %v584_v8  ;;  %v3983_v8 = vld [vmem:[%s4911_s1 + $0x6f8] sm:$0xff] }
  0x77   :  { %2374 = vmatpush.bf16.msrb.mxu1 %v3866_v19  ;;  %v618_v19 = vpack.c.b16 %v586_v9, %v586_v9 }
  0x78   :  { %2387 = vmatpush.bf16.msrb.mxu2 %v3874_v20  ;;  %v617_v20 = vpack.c.b16 %v585_v12, %v585_v12 }
  0x79   :  { %2400 = vmatpush.bf16.msrb.mxu3 %v3882_v21  ;;  %v619_v21 = vpack.c.b16 %v587_v13, %v587_v13  ;;  %v3958_v13 = vld [vmem:[%s4911_s1 + $0x630] sm:$0xff] }
  0x7a   :  { %2362 = vmatpush.bf16.msrb.mxu0 %v3857_v22  ;;  %v3926_v22 = vld [vmem:[%s4911_s1 + $0x530] sm:$0xff] }
  0x7b   :  { %2375 = vmatpush.bf16.msrb.mxu1 %v3865_v23  ;;  %v3934_v23 = vld [vmem:[%s4911_s1 + $0x570] sm:$0xff] }
  0x7c   :  { %2388 = vmatpush.bf16.msrb.mxu2 %v3873_v24  ;;  %v3942_v24 = vld [vmem:[%s4911_s1 + $0x5b0] sm:$0xff] }
  0x7d   :  { %2401 = vmatpush.bf16.msrb.mxu3 %v3881_v25  ;;  %v3950_v25 = vld [vmem:[%s4911_s1 + $0x5f0] sm:$0xff] }
  0x7e   :  { %2363 = vmatpush.bf16.msrb.mxu0 %v3856_v28  ;;  %v4024_v28 = vld [vmem:[%s4913_s2] ss:$0 sm:$0xff] }
  0x7f   :  { %2376 = vmatpush.bf16.msrb.mxu1 %v3864_v29  ;;  %v3941_v29 = vld [vmem:[%s4911_s1 + $0x5a8] sm:$0xff] }
  0x80   :  { %2389 = vmatpush.bf16.msrb.mxu2 %v3872_v32  ;;  %v3924_v32 = vld [vmem:[%s4911_s1 + $0x520] sm:$0xff] }
  0x81   :  { %2402 = vmatpush.bf16.msrb.mxu3 %v3880_v33  ;;  %2364 = vmatmul.bf16.vlgmr.msrb.gmra.mxu0 %v612_v40  ;;  %v3932_v33 = vld [vmem:[%s4911_s1 + $0x560] sm:$0xff]  ;;  %v3931_v40 = vld [vmem:[%s4911_s1 + $0x558] sm:$0xff] }
  0x82   :  { %2408 = vmatpush.bf16.msra.mxu0 %v3895_v36  ;;  %2377 = vmatmul.bf16.vlgmr.msrb.gmra.mxu1 %v613_v42  ;;  %v3940_v36 = vld [vmem:[%s4911_s1 + $0x5a0] sm:$0xff]  ;;  %v3947_v42 = vld [vmem:[%s4911_s1 + $0x5d8] sm:$0xff] }
  0x83   :  { %2421 = vmatpush.bf16.msra.mxu1 %v3903_v37  ;;  %2390 = vmatmul.bf16.vlgmr.msrb.gmra.mxu2 %v614_v41  ;;  %v3948_v37 = vld [vmem:[%s4911_s1 + $0x5e0] sm:$0xff]  ;;  %v3939_v41 = vld [vmem:[%s4911_s1 + $0x598] sm:$0xff] }
  0x84   :  { %2434 = vmatpush.bf16.msra.mxu2 %v3911_v38  ;;  %2403 = vmatmul.bf16.vlgmr.msrb.gmra.mxu3 %v615_v43 }
  0x85   :  { %2447 = vmatpush.bf16.msra.mxu3 %v3919_v39  ;;  %v3923_v39 = vld [vmem:[%s4911_s1 + $0x518] sm:$0xff] }
  0x86   :  { %2409 = vmatpush.bf16.msra.mxu0 %v3894_v44 }
  0x87   :  { %2422 = vmatpush.bf16.msra.mxu1 %v3902_v45 }
  0x88   :  { %2435 = vmatpush.bf16.msra.mxu2 %v3910_v46 }
  0x89   :  { %2448 = vmatpush.bf16.msra.mxu3 %v3918_v47  ;;  %v3922_v47 = vld [vmem:[%s4911_s1 + $0x510] sm:$0xff] }
  0x8a   :  { %2410 = vmatpush.bf16.msra.mxu0 %v3893_v48  ;;  %v3930_v48 = vld [vmem:[%s4911_s1 + $0x550] sm:$0xff] }
  0x8b   :  { %2423 = vmatpush.bf16.msra.mxu1 %v3901_v49 }
  0x8c   :  { %2436 = vmatpush.bf16.msra.mxu2 %v3909_v50 }
  0x8d   :  { %2449 = vmatpush.bf16.msra.mxu3 %v3917_v51  ;;  %v3938_v51 = vld [vmem:[%s4911_s1 + $0x590] sm:$0xff] }
  0x8e   :  { %2411 = vmatpush.bf16.msra.mxu0 %v3892_v52  ;;  %v3946_v52 = vld [vmem:[%s4911_s1 + $0x5d0] sm:$0xff] }
  0x8f   :  { %2424 = vmatpush.bf16.msra.mxu1 %v3900_v53  ;;  %v3921_v53 = vld [vmem:[%s4911_s1 + $0x508] sm:$0xff] }
  0x90   :  { %2437 = vmatpush.bf16.msra.mxu2 %v3908_v54  ;;  %v3929_v54 = vld [vmem:[%s4911_s1 + $0x548] sm:$0xff] }
  0x91   :  { %2450 = vmatpush.bf16.msra.mxu3 %v3916_v55  ;;  %v3937_v55 = vld [vmem:[%s4911_s1 + $0x588] sm:$0xff] }
  0x92   :  { %2412 = vmatpush.bf16.msra.mxu0 %v3891_v56  ;;  %v3945_v56 = vld [vmem:[%s4911_s1 + $0x5c8] sm:$0xff] }
  0x93   :  { %2425 = vmatpush.bf16.msra.mxu1 %v3899_v57  ;;  %v30_v57 = vld [vmem:[%s4912_s0 + $0x50] sm:$0xff] }
  0x94   :  { %2438 = vmatpush.bf16.msra.mxu2 %v3907_v58  ;;  %v31_v58 = vld [vmem:[%s4912_s0 + $0x58] sm:$0xff] }
  0x95   :  { %2451 = vmatpush.bf16.msra.mxu3 %v3915_v59  ;;  %v591_v4 = vunpack.c.h.b16 %v31_v58 }
  0x96   :  { %2413 = vmatpush.bf16.msra.mxu0 %v3890_v60 }
  0x97   :  { %2426 = vmatpush.bf16.msra.mxu1 %v3898_v61  ;;  %v3920_v61 = vld [vmem:[%s4911_s1 + $0x500] sm:$0xff]  ;;  %v623_v12 = vpack.c.b16 %v591_v4, %v591_v4  ;;  %v3998_v4 = vld [vmem:[%s4911_s1 + $0x770] sm:$0xff] }
  0x98   :  { %2439 = vmatpush.bf16.msra.mxu2 %v3906_v62  ;;  %v3928_v62 = vld [vmem:[%s4911_s1 + $0x540] sm:$0xff] }
  0x99   :  { %2452 = vmatpush.bf16.msra.mxu3 %v3914_v63  ;;  %v588_v63 = vunpack.c.l.b16 %v30_v57 }
  0x9a   :  { %2414 = vmatpush.bf16.msra.mxu0 %v3889_v0  ;;  %v590_v0 = vunpack.c.l.b16 %v31_v58 }
  0x9b   :  { %2427 = vmatpush.bf16.msra.mxu1 %v3897_v1  ;;  %v3936_v1 = vld [vmem:[%s4911_s1 + $0x580] sm:$0xff]  ;;  %v620_v9 = vpack.c.b16 %v588_v63, %v588_v63 }
  0x9c   :  { %2440 = vmatpush.bf16.msra.mxu2 %v3905_v2  ;;  %v3944_v2 = vld [vmem:[%s4911_s1 + $0x5c0] sm:$0xff] }
  0x9d   :  { %2453 = vmatpush.bf16.msra.mxu3 %v3913_v3  ;;  %v589_v3 = vunpack.c.h.b16 %v30_v57 }
  0x9e   :  { %2415 = vmatpush.bf16.msra.mxu0 %v3888_v6  ;;  %v2209_v31 = vpop.f32.mrf.mxu0  ;;  %v3967_v6 = vld [vmem:[%s4911_s1 + $0x678] sm:$0xff] }
  0x9f   :  { %2428 = vmatpush.bf16.msra.mxu1 %v3896_v7  ;;  %v2210_v34 = vadd.f32 %v4024_v28, %v2209_v31  ;;  %v2222_v35 = vpop.f32.mrf.mxu1  ;;  %v3975_v7 = vld [vmem:[%s4911_s1 + $0x6b8] sm:$0xff] }
  0xa0   :  { %2441 = vmatpush.bf16.msra.mxu2 %v3904_v10  ;;  %v622_v10 = vpack.c.b16 %v590_v0, %v590_v0  ;;  %v3971_v31 = vld [vmem:[%s4911_s1 + $0x698] sm:$0xff] }
  0xa1   :  { %2454 = vmatpush.bf16.msra.mxu3 %v3912_v11  ;;  %2416 = vmatmul.bf16.vlgmr.msra.gmra.mxu0 %v616_v18  ;;  %v2223_v38 = vadd.f32 %v2222_v35, %v2210_v34  ;;  %v621_v11 = vpack.c.b16 %v589_v3, %v589_v3  ;;  %v3965_v18 = vld [vmem:[%s4911_s1 + $0x668] sm:$0xff]  ;;  %v3990_v3 = vld [vmem:[%s4911_s1 + $0x730] sm:$0xff] }
  0xa2   :  { %2460 = vmatpush.bf16.msrb.mxu0 %v3927_v14  ;;  %2429 = vmatmul.bf16.vlgmr.msra.gmra.mxu1 %v617_v20  ;;  %v3966_v14 = vld [vmem:[%s4911_s1 + $0x670] sm:$0xff]  ;;  %v3981_v20 = vld [vmem:[%s4911_s1 + $0x6e8] sm:$0xff] }
  0xa3   :  { %2473 = vmatpush.bf16.msrb.mxu1 %v3935_v15  ;;  %2442 = vmatmul.bf16.vlgmr.msra.gmra.mxu2 %v618_v19  ;;  %v3974_v15 = vld [vmem:[%s4911_s1 + $0x6b0] sm:$0xff]  ;;  %v3973_v19 = vld [vmem:[%s4911_s1 + $0x6a8] sm:$0xff] }
  0xa4   :  { %2486 = vmatpush.bf16.msrb.mxu2 %v3943_v16  ;;  %2455 = vmatmul.bf16.vlgmr.msra.gmra.mxu3 %v619_v21  ;;  %v3982_v16 = vld [vmem:[%s4911_s1 + $0x6f0] sm:$0xff] }
  0xa5   :  { %2499 = vmatpush.bf16.msrb.mxu3 %v3951_v17  ;;  %v3957_v17 = vld [vmem:[%s4911_s1 + $0x628] sm:$0xff] }
  0xa6   :  { %2461 = vmatpush.bf16.msrb.mxu0 %v3926_v22  ;;  %v2235_v43 = vpop.f32.mrf.mxu2  ;;  %v2211_v46 = vpop.f32.mrf.mxu0  ;;  %v3956_v22 = vld [vmem:[%s4911_s1 + $0x620] sm:$0xff] }
  0xa7   :  { %2474 = vmatpush.bf16.msrb.mxu1 %v3934_v23  ;;  %v2236_v44 = vadd.f32 %v2235_v43, %v2223_v38  ;;  %v2248_v45 = vpop.f32.mrf.mxu3  ;;  %v2224_v50 = vpop.f32.mrf.mxu1  ;;  %v3964_v23 = vld [vmem:[%s4911_s1 + $0x660] sm:$0xff]  ;;  %v3962_v38 = vld [vmem:[%s4911_s1 + $0x650] sm:$0xff]  ;;  %v3953_v43 = vld [vmem:[%s4911_s1 + $0x608] sm:$0xff] }
  0xa8   :  { %2487 = vmatpush.bf16.msrb.mxu2 %v3942_v24  ;;  %v3977_v46 = vld [vmem:[%s4911_s1 + $0x6c8] sm:$0xff] }
  0xa9   :  { %2500 = vmatpush.bf16.msrb.mxu3 %v3950_v25  ;;  %v4635_v49 = vadd.f32 %v2248_v45, %v2236_v44  ;;  %v3961_v44 = vld [vmem:[%s4911_s1 + $0x648] sm:$0xff] }
  0xaa   :  { %2462 = vmatpush.bf16.msrb.mxu0 %v3925_v26  ;;  %v3972_v26 = vld [vmem:[%s4911_s1 + $0x6a0] sm:$0xff]  ;;  %v3969_v45 = vld [vmem:[%s4911_s1 + $0x688] sm:$0xff] }
  0xab   :  { %2475 = vmatpush.bf16.msrb.mxu1 %v3933_v27  ;;  %v3980_v27 = vld [vmem:[%s4911_s1 + $0x6e0] sm:$0xff] }
  0xac   :  { %2488 = vmatpush.bf16.msrb.mxu2 %v3941_v29  ;;  %v3955_v29 = vld [vmem:[%s4911_s1 + $0x618] sm:$0xff] }
  0xad   :  { %2501 = vmatpush.bf16.msrb.mxu3 %v3949_v30  ;;  %v3963_v30 = vld [vmem:[%s4911_s1 + $0x658] sm:$0xff] }
  0xae   :  { %2463 = vmatpush.bf16.msrb.mxu0 %v3924_v32  ;;  %v2237_v59 = vpop.f32.mrf.mxu2  ;;  %v3979_v32 = vld [vmem:[%s4911_s1 + $0x6d8] sm:$0xff] }
  0xaf   :  { %2476 = vmatpush.bf16.msrb.mxu1 %v3932_v33  ;;  %v2250_v60 = vpop.f32.mrf.mxu3  ;;  %v3991_v59 = vld [vmem:[%s4911_s1 + $0x738] sm:$0xff] }
  0xb0   :  { %2489 = vmatpush.bf16.msrb.mxu2 %v3940_v36  ;;  %v3999_v60 = vld [vmem:[%s4911_s1 + $0x778] sm:$0xff] }
  0xb1   :  { %2502 = vmatpush.bf16.msrb.mxu3 %v3948_v37  ;;  %v3954_v37 = vld [vmem:[%s4911_s1 + $0x610] sm:$0xff] }
  0xb2   :  { %2464 = vmatpush.bf16.msrb.mxu0 %v3923_v39 }
  0xb3   :  { %2477 = vmatpush.bf16.msrb.mxu1 %v3931_v40 }
  0xb4   :  { %2490 = vmatpush.bf16.msrb.mxu2 %v3939_v41  ;;  %v3970_v41 = vld [vmem:[%s4911_s1 + $0x690] sm:$0xff] }
  0xb5   :  { %2503 = vmatpush.bf16.msrb.mxu3 %v3947_v42  ;;  %v3978_v42 = vld [vmem:[%s4911_s1 + $0x6d0] sm:$0xff] }
  0xb6   :  { %2465 = vmatpush.bf16.msrb.mxu0 %v3922_v47  ;;  %v32_v47 = vld [vmem:[%s4912_s0 + $0x60] sm:$0xff] }
  0xb7   :  { %2478 = vmatpush.bf16.msrb.mxu1 %v3930_v48  ;;  %v33_v48 = vld [vmem:[%s4912_s0 + $0x68] sm:$0xff]  ;;  %v593_v57 = vunpack.c.h.b16 %v32_v47 }
  0xb8   :  { %2491 = vmatpush.bf16.msrb.mxu2 %v3938_v51  ;;  %v3952_v51 = vld [vmem:[%s4911_s1 + $0x600] sm:$0xff]  ;;  %v595_v58 = vunpack.c.h.b16 %v33_v48 }
  0xb9   :  { %2504 = vmatpush.bf16.msrb.mxu3 %v3946_v52  ;;  %v3960_v52 = vld [vmem:[%s4911_s1 + $0x640] sm:$0xff] }
  0xba   :  { %2466 = vmatpush.bf16.msrb.mxu0 %v3921_v53  ;;  %v592_v53 = vunpack.c.l.b16 %v32_v47  ;;  %v4000_v47 = vld [vmem:[%s4911_s1 + $0x780] sm:$0xff] }
  0xbb   :  { %2479 = vmatpush.bf16.msrb.mxu1 %v3929_v54  ;;  %v594_v54 = vunpack.c.l.b16 %v33_v48  ;;  %v4008_v48 = vld [vmem:[%s4911_s1 + $0x7c0] sm:$0xff] }
  0xbc   :  { %2492 = vmatpush.bf16.msrb.mxu2 %v3937_v55  ;;  %v3968_v55 = vld [vmem:[%s4911_s1 + $0x680] sm:$0xff]  ;;  %v624_v63 = vpack.c.b16 %v592_v53, %v592_v53 }
  0xbd   :  { %2505 = vmatpush.bf16.msrb.mxu3 %v3945_v56  ;;  %v3976_v56 = vld [vmem:[%s4911_s1 + $0x6c0] sm:$0xff]  ;;  %v626_v0 = vpack.c.b16 %v594_v54, %v594_v54 }
  0xbe   :  { %2467 = vmatpush.bf16.msrb.mxu0 %v3920_v61  ;;  %v2261_v21 = vpop.f32.mrf.mxu0  ;;  %v4007_v61 = vld [vmem:[%s4911_s1 + $0x7b8] sm:$0xff] }
  0xbf   :  { %2480 = vmatpush.bf16.msrb.mxu1 %v3928_v62  ;;  %v2262_v24 = vadd.f32 %v2261_v21, %v4635_v49  ;;  %v2274_v25 = vpop.f32.mrf.mxu1  ;;  %v4015_v62 = vld [vmem:[%s4911_s1 + $0x7f8] sm:$0xff] }
  0xc0   :  { %2493 = vmatpush.bf16.msrb.mxu2 %v3936_v1  ;;  %v625_v1 = vpack.c.b16 %v593_v57, %v593_v57  ;;  %v4003_v21 = vld [vmem:[%s4911_s1 + $0x798] sm:$0xff] }
  0xc1   :  { %2506 = vmatpush.bf16.msrb.mxu3 %v3944_v2  ;;  %2468 = vmatmul.bf16.vlgmr.msrb.gmra.mxu0 %v620_v9  ;;  %v2275_v28 = vadd.f32 %v2274_v25, %v2262_v24  ;;  %v627_v2 = vpack.c.b16 %v595_v58, %v595_v58  ;;  %v4005_v9 = vld [vmem:[%s4911_s1 + $0x7a8] sm:$0xff] }
  0xc2   :  { %2512 = vmatpush.bf16.msra.mxu0 %v3959_v5  ;;  %2481 = vmatmul.bf16.vlgmr.msrb.gmra.mxu1 %v621_v11  ;;  %v4006_v5 = vld [vmem:[%s4911_s1 + $0x7b0] sm:$0xff] }
  0xc3   :  { %2525 = vmatpush.bf16.msra.mxu1 %v3967_v6  ;;  %2494 = vmatmul.bf16.vlgmr.msrb.gmra.mxu2 %v622_v10  ;;  %v4014_v6 = vld [vmem:[%s4911_s1 + $0x7f0] sm:$0xff]  ;;  %v4013_v10 = vld [vmem:[%s4911_s1 + $0x7e8] sm:$0xff] }
  0xc4   :  { %2538 = vmatpush.bf16.msra.mxu2 %v3975_v7  ;;  %2507 = vmatmul.bf16.vlgmr.msrb.gmra.mxu3 %v623_v12  ;;  %v3989_v7 = vld [vmem:[%s4911_s1 + $0x728] sm:$0xff] }
  0xc5   :  { %2551 = vmatpush.bf16.msra.mxu3 %v3983_v8  ;;  %v3997_v8 = vld [vmem:[%s4911_s1 + $0x768] sm:$0xff] }
  0xc6   :  { %2513 = vmatpush.bf16.msra.mxu0 %v3958_v13  ;;  %v2287_v33 = vpop.f32.mrf.mxu2  ;;  %v2263_v36 = vpop.f32.mrf.mxu0  ;;  %v3988_v13 = vld [vmem:[%s4911_s1 + $0x720] sm:$0xff] }
  0xc7   :  { %2526 = vmatpush.bf16.msra.mxu1 %v3966_v14  ;;  %v2288_v34 = vadd.f32 %v2287_v33, %v2275_v28  ;;  %v2300_v35 = vpop.f32.mrf.mxu3  ;;  %v2276_v40 = vpop.f32.mrf.mxu1  ;;  %v3996_v14 = vld [vmem:[%s4911_s1 + $0x760] sm:$0xff]  ;;  %v3986_v28 = vld [vmem:[%s4911_s1 + $0x710] sm:$0xff]  ;;  %v3985_v33 = vld [vmem:[%s4911_s1 + $0x708] sm:$0xff] }
  0xc8   :  { %2539 = vmatpush.bf16.msra.mxu2 %v3974_v15  ;;  %v4001_v36 = vld [vmem:[%s4911_s1 + $0x788] sm:$0xff] }
  0xc9   :  { %2552 = vmatpush.bf16.msra.mxu3 %v3982_v16  ;;  %v4740_v39 = vadd.f32 %v2300_v35, %v2288_v34  ;;  %v4004_v16 = vld [vmem:[%s4911_s1 + $0x7a0] sm:$0xff]  ;;  %v3993_v34 = vld [vmem:[%s4911_s1 + $0x748] sm:$0xff]  ;;  %v34_v35 = vld [vmem:[%s4912_s0 + $0x70] sm:$0xff] }
  0xca   :  { %2514 = vmatpush.bf16.msra.mxu0 %v3957_v17  ;;  %v4012_v17 = vld [vmem:[%s4911_s1 + $0x7e0] sm:$0xff] }
  0xcb   :  { %2527 = vmatpush.bf16.msra.mxu1 %v3965_v18 }
  0xcc   :  { %2540 = vmatpush.bf16.msra.mxu2 %v3973_v19  ;;  %v3987_v19 = vld [vmem:[%s4911_s1 + $0x718] sm:$0xff] }
  0xcd   :  { %2553 = vmatpush.bf16.msra.mxu3 %v3981_v20  ;;  %v3995_v20 = vld [vmem:[%s4911_s1 + $0x758] sm:$0xff] }
  0xce   :  { %2515 = vmatpush.bf16.msra.mxu0 %v3956_v22  ;;  %v2289_v49 = vpop.f32.mrf.mxu2  ;;  %v4011_v22 = vld [vmem:[%s4911_s1 + $0x7d8] sm:$0xff] }
  0xcf   :  { %2528 = vmatpush.bf16.msra.mxu1 %v3964_v23  ;;  %v2302_v50 = vpop.f32.mrf.mxu3 }
  0xd0   :  { %2541 = vmatpush.bf16.msra.mxu2 %v3972_v26 }
  0xd1   :  { %2554 = vmatpush.bf16.msra.mxu3 %v3980_v27 }
  0xd2   :  { %2516 = vmatpush.bf16.msra.mxu0 %v3955_v29  ;;  %v3994_v29 = vld [vmem:[%s4911_s1 + $0x750] sm:$0xff] }
  0xd3   :  { %2529 = vmatpush.bf16.msra.mxu1 %v3963_v30 }
  0xd4   :  { %2542 = vmatpush.bf16.msra.mxu2 %v3971_v31  ;;  %v4002_v31 = vld [vmem:[%s4911_s1 + $0x790] sm:$0xff] }
  0xd5   :  { %2555 = vmatpush.bf16.msra.mxu3 %v3979_v32  ;;  %v4010_v32 = vld [vmem:[%s4911_s1 + $0x7d0] sm:$0xff] }
  0xd6   :  { %2517 = vmatpush.bf16.msra.mxu0 %v3954_v37  ;;  %v4009_v37 = vld [vmem:[%s4911_s1 + $0x7c8] sm:$0xff] }
  0xd7   :  { %2530 = vmatpush.bf16.msra.mxu1 %v3962_v38  ;;  %v35_v38 = vld [vmem:[%s4912_s0 + $0x78] sm:$0xff] }
  0xd8   :  { %2543 = vmatpush.bf16.msra.mxu2 %v3970_v41  ;;  %v596_v41 = vunpack.c.l.b16 %v34_v35 }
  0xd9   :  { %2556 = vmatpush.bf16.msra.mxu3 %v3978_v42  ;;  %v597_v42 = vunpack.c.h.b16 %v34_v35 }
  0xda   :  { %2518 = vmatpush.bf16.msra.mxu0 %v3953_v43  ;;  %v3984_v43 = vld [vmem:[%s4911_s1 + $0x700] sm:$0xff]  ;;  %v628_v49 = vpack.c.b16 %v596_v41, %v596_v41 }
  0xdb   :  { %2531 = vmatpush.bf16.msra.mxu1 %v3961_v44  ;;  %v3992_v44 = vld [vmem:[%s4911_s1 + $0x740] sm:$0xff]  ;;  %v629_v50 = vpack.c.b16 %v597_v42, %v597_v42 }
  0xdc   :  { %2544 = vmatpush.bf16.msra.mxu2 %v3969_v45  ;;  %v598_v45 = vunpack.c.l.b16 %v35_v38 }
  0xdd   :  { %2557 = vmatpush.bf16.msra.mxu3 %v3977_v46  ;;  %v599_v46 = vunpack.c.h.b16 %v35_v38 }
  0xde   :  { %2519 = vmatpush.bf16.msra.mxu0 %v3952_v51  ;;  %v2313_v11 = vpop.f32.mrf.mxu0  ;;  %v630_v51 = vpack.c.b16 %v598_v45, %v598_v45 }
  0xdf   :  { %2532 = vmatpush.bf16.msra.mxu1 %v3960_v52  ;;  %v2314_v12 = vadd.f32 %v2313_v11, %v4740_v39  ;;  %v2326_v15 = vpop.f32.mrf.mxu1  ;;  %v631_v52 = vpack.c.b16 %v599_v46, %v599_v46 }
  0xe0   :  { %2545 = vmatpush.bf16.msra.mxu2 %v3968_v55 }
  0xe1   :  { %2558 = vmatpush.bf16.msra.mxu3 %v3976_v56  ;;  %2520 = vmatmul.bf16.vlgmr.msra.gmra.mxu0 %v624_v63  ;;  %v2327_v18 = vadd.f32 %v2326_v15, %v2314_v12 }
  0xe2   :  { %2564 = vmatpush.bf16.msrb.mxu0 %v3991_v59  ;;  %2533 = vmatmul.bf16.vlgmr.msra.gmra.mxu1 %v625_v1 }
  0xe3   :  { %2577 = vmatpush.bf16.msrb.mxu1 %v3999_v60  ;;  %2546 = vmatmul.bf16.vlgmr.msra.gmra.mxu2 %v626_v0 }
  0xe4   :  { %2590 = vmatpush.bf16.msrb.mxu2 %v4007_v61  ;;  %2559 = vmatmul.bf16.vlgmr.msra.gmra.mxu3 %v627_v2 }
  0xe5   :  { %2603 = vmatpush.bf16.msrb.mxu3 %v4015_v62 }
  0xe6   :  { %2565 = vmatpush.bf16.msrb.mxu0 %v3990_v3  ;;  %v2339_v23 = vpop.f32.mrf.mxu2  ;;  %v2315_v26 = vpop.f32.mrf.mxu0 }
  0xe7   :  { %2578 = vmatpush.bf16.msrb.mxu1 %v3998_v4  ;;  %v2340_v24 = vadd.f32 %v2339_v23, %v2327_v18  ;;  %v2352_v25 = vpop.f32.mrf.mxu3  ;;  %v2328_v30 = vpop.f32.mrf.mxu1 }
  0xe8   :  { %2591 = vmatpush.bf16.msrb.mxu2 %v4006_v5 }
  0xe9   :  { %2604 = vmatpush.bf16.msrb.mxu3 %v4014_v6  ;;  %v2353_v27 = vadd.f32 %v2352_v25, %v2340_v24  ;;  %v4020_v24 = vld [vmem:[%s4915_s3 + $0x20] sm:$0xff]  ;;  %v4019_v25 = vld [vmem:[%s4915_s3 + $0x18] sm:$0xff] }
  0xea   :  { %2566 = vmatpush.bf16.msrb.mxu0 %v3989_v7 }
  0xeb   :  { %2579 = vmatpush.bf16.msrb.mxu1 %v3997_v8 }
  0xec   :  { %2592 = vmatpush.bf16.msrb.mxu2 %v4005_v9 }
  0xed   :  { %2605 = vmatpush.bf16.msrb.mxu3 %v4013_v10 }
  0xee   :  { %2567 = vmatpush.bf16.msrb.mxu0 %v3988_v13  ;;  %v2341_v39 = vpop.f32.mrf.mxu2 }
  0xef   :  { %2580 = vmatpush.bf16.msrb.mxu1 %v3996_v14  ;;  %v2354_v40 = vpop.f32.mrf.mxu3 }
  0xf0   :  { %2593 = vmatpush.bf16.msrb.mxu2 %v4004_v16 }
  0xf1   :  { %2606 = vmatpush.bf16.msrb.mxu3 %v4012_v17  ;;  %v4023_v17 = vld [vmem:[%s4915_s3 + $0x38] sm:$0xff] }
  0xf2   :  { %2568 = vmatpush.bf16.msrb.mxu0 %v3987_v19 }
  0xf3   :  { %2581 = vmatpush.bf16.msrb.mxu1 %v3995_v20  ;;  %v4022_v20 = vld [vmem:[%s4915_s3 + $0x30] sm:$0xff] }
  0xf4   :  { %2594 = vmatpush.bf16.msrb.mxu2 %v4003_v21  ;;  %v4021_v21 = vld [vmem:[%s4915_s3 + $0x28] sm:$0xff] }
  0xf5   :  { %2607 = vmatpush.bf16.msrb.mxu3 %v4011_v22 }
  0xf6   :  { %2569 = vmatpush.bf16.msrb.mxu0 %v3986_v28 }
  0xf7   :  { %2582 = vmatpush.bf16.msrb.mxu1 %v3994_v29  ;;  %v4017_v29 = vld [vmem:[%s4915_s3 + $0x8] sm:$0xff] }
  0xf8   :  { %2595 = vmatpush.bf16.msrb.mxu2 %v4002_v31 }
  0xf9   :  { %2608 = vmatpush.bf16.msrb.mxu3 %v4010_v32 }
  0xfa   :  { %2570 = vmatpush.bf16.msrb.mxu0 %v3985_v33 }
  0xfb   :  { %2583 = vmatpush.bf16.msrb.mxu1 %v3993_v34  ;;  %v4016_v34 = vld [vmem:[%s4915_s3] sm:$0xff] }
  0xfc   :  { %2596 = vmatpush.bf16.msrb.mxu2 %v4001_v36 }
  0xfd   :  { %2609 = vmatpush.bf16.msrb.mxu3 %v4009_v37 }
  0xfe   :  { %2571 = vmatpush.bf16.msrb.mxu0 %v3984_v43  ;;  %v2365_v53 = vpop.f32.mrf.mxu0 }
  0xff   :  { %2584 = vmatpush.bf16.msrb.mxu1 %v3992_v44  ;;  %v2366_v54 = vadd.f32 %v2365_v53, %v2353_v27  ;;  %v2378_v55 = vpop.f32.mrf.mxu1  ;;  %v4018_v27 = vld [vmem:[%s4915_s3 + $0x10] sm:$0xff] }
 0x100   :  { %2597 = vmatpush.bf16.msrb.mxu2 %v4000_v47 }
 0x101   :  { %2610 = vmatpush.bf16.msrb.mxu3 %v4008_v48  ;;  %2572 = vmatmul.bf16.vlgmr.msrb.gmra.mxu0 %v628_v49  ;;  %v2379_v56 = vadd.f32 %v2378_v55, %v2366_v54 }
 0x102   :  { %2585 = vmatmul.bf16.vlgmr.msrb.gmra.mxu1 %v629_v50  ;;  %2686 = vmatpush.bf16.msra.mxu0 %v4023_v17 }
 0x103   :  { %2598 = vmatmul.bf16.vlgmr.msrb.gmra.mxu2 %v630_v51 }
 0x104   :  { %2611 = vmatmul.bf16.vlgmr.msrb.gmra.mxu3 %v631_v52 }
 0x106   :  { %v2391_v57 = vpop.f32.mrf.mxu2  ;;  %v2367_v60 = vpop.f32.mrf.mxu0  ;;  %2687 = vmatpush.bf16.msra.mxu0 %v4022_v20 }
 0x107   :  { %v2392_v58 = vadd.f32 %v2391_v57, %v2379_v56  ;;  %v2404_v59 = vpop.f32.mrf.mxu3  ;;  %v2380_v62 = vpop.f32.mrf.mxu1 }
 0x109   :  { %v2405_v61 = vadd.f32 %v2404_v59, %v2392_v58  ;;  %v4025_v59 = vld [vmem:[%s4914_s4] ss:$0 sm:$0xff] }
 0x10a   :  { %2688 = vmatpush.bf16.msra.mxu0 %v4021_v21 }
 0x10e   :  { %v2393_v63 = vpop.f32.mrf.mxu2  ;;  %2689 = vmatpush.bf16.msra.mxu0 %v4020_v24 }
 0x10f   :  { %v2406_v0 = vpop.f32.mrf.mxu3 }
 0x112   :  { %2690 = vmatpush.bf16.msra.mxu0 %v4019_v25 }
 0x116   :  { %2691 = vmatpush.bf16.msra.mxu0 %v4018_v27 }
 0x11a   :  { %2692 = vmatpush.bf16.msra.mxu0 %v4017_v29 }
 0x11e   :  { %v2417_v1 = vpop.f32.mrf.mxu0  ;;  %2693 = vmatpush.bf16.msra.mxu0 %v4016_v34 }
 0x11f   :  { %v2418_v2 = vadd.f32 %v2417_v1, %v2405_v61  ;;  %v2430_v3 = vpop.f32.mrf.mxu1 }
 0x121   :  { %v2431_v4 = vadd.f32 %v2430_v3, %v2418_v2 }
 0x126   :  { %v2443_v5 = vpop.f32.mrf.mxu2  ;;  %v2419_v8 = vpop.f32.mrf.mxu0 }
 0x127   :  { %v2444_v6 = vadd.f32 %v2443_v5, %v2431_v4  ;;  %v2456_v7 = vpop.f32.mrf.mxu3  ;;  %v2432_v10 = vpop.f32.mrf.mxu1 }
 0x129   :  { %v2457_v9 = vadd.f32 %v2456_v7, %v2444_v6 }
 0x12e   :  { %v2445_v11 = vpop.f32.mrf.mxu2 }
 0x12f   :  { %v2458_v12 = vpop.f32.mrf.mxu3 }
 0x13e   :  { %v2469_v13 = vpop.f32.mrf.mxu0 }
 0x13f   :  { %v2482_v14 = vpop.f32.mrf.mxu1  ;;  %v2470_v31 = vadd.f32 %v2469_v13, %v2457_v9 }
 0x141   :  { %v2483_v36 = vadd.f32 %v2482_v14, %v2470_v31 }
 0x146   :  { %v2495_v15 = vpop.f32.mrf.mxu2  ;;  %v2471_v18 = vpop.f32.mrf.mxu0 }
 0x147   :  { %v2508_v16 = vpop.f32.mrf.mxu3  ;;  %v2484_v19 = vpop.f32.mrf.mxu1  ;;  %v2496_v37 = vadd.f32 %v2495_v15, %v2483_v36 }
 0x149   :  { %v2509_v40 = vadd.f32 %v2508_v16, %v2496_v37 }
 0x14e   :  { %v2497_v22 = vpop.f32.mrf.mxu2 }
 0x14f   :  { %v2510_v23 = vpop.f32.mrf.mxu3 }
 0x15e   :  { %v2521_v26 = vpop.f32.mrf.mxu0 }
 0x15f   :  { %v2534_v28 = vpop.f32.mrf.mxu1  ;;  %v2522_v41 = vadd.f32 %v2521_v26, %v2509_v40 }
 0x161   :  { %v2535_v42 = vadd.f32 %v2534_v28, %v2522_v41 }
 0x166   :  { %v2547_v30 = vpop.f32.mrf.mxu2  ;;  %v2523_v33 = vpop.f32.mrf.mxu0 }
 0x167   :  { %v2560_v32 = vpop.f32.mrf.mxu3  ;;  %v2536_v35 = vpop.f32.mrf.mxu1  ;;  %v2548_v43 = vadd.f32 %v2547_v30, %v2535_v42 }
 0x169   :  { %v2561_v44 = vadd.f32 %v2560_v32, %v2548_v43 }
 0x16e   :  { %v2549_v38 = vpop.f32.mrf.mxu2 }
 0x16f   :  { %v2562_v39 = vpop.f32.mrf.mxu3 }
 0x17e   :  { %v2573_v45 = vpop.f32.mrf.mxu0 }
 0x17f   :  { %v2586_v46 = vpop.f32.mrf.mxu1  ;;  %v2574_v47 = vadd.f32 %v2573_v45, %v2561_v44 }
 0x181   :  { %v2587_v48 = vadd.f32 %v2586_v46, %v2574_v47 }
 0x186   :  { %v2599_v49 = vpop.f32.mrf.mxu2  ;;  %v2575_v52 = vpop.f32.mrf.mxu0 }
 0x187   :  { %v2612_v50 = vpop.f32.mrf.mxu3  ;;  %v2600_v51 = vadd.f32 %v2599_v49, %v2587_v48  ;;  %v2588_v53 = vpop.f32.mrf.mxu1 }
 0x189   :  { %v2613_v54 = vadd.f32 %v2612_v50, %v2600_v51 }
 0x18b   :  { %v2616_v55 = vmax.f32 %v2613_v54, 0.0 }
 0x18d   :  { %v2617_v56 = vpack.c.bf16 %v2616_v55, %v2616_v55 }
 0x18e   :  { %v2601_v57 = vpop.f32.mrf.mxu2 }
 0x18f   :  { %v2614_v58 = vpop.f32.mrf.mxu3  ;;  %2694 = vmatmul.bf16.vlgmr.msra.gmra.mxu0 %v2617_v56 }
 0x20c   :  { %v2695_v60 = vpop.f32.mrf.mxu0 }
 0x20d   :  { %v2696_v61 = vadd.f32 %v4025_v59, %v2695_v60 }
 0x20f   :  { %2699 = vst [vmem:[%s4916_s5] sm:$0xff] %v2696_v61 }
 0x214   :  { %v2697_v62 = vpop.f32.mrf.mxu0 }

// kernel: cnn_forward.2
= control target key start
LH: loop header
LB: loop body
LE: loop exit
PB: predicated region body
PF: predicated region fallthrough
CT: control target
= control target key end

     0   :  { %vm11365_vm0 = vcmask 523264   ;;  %vm11376_vm2 = vcmask 1048320   ;;  %vm11368_vm5 = vcmask 785920   ;;  %vm11370_vm7 = vcmask 523520   ;;  %s11359_s1 = inlined_call_operand.vmem [shape: bf16[64,512], index: 1, kind: input, shape index: {}]   ;;  %s11360_s3 = inlined_call_operand.vmem [shape: bf16[8,128,128], index: 3, kind: input, shape index: {}]   ;;  %s11361_s0 = inlined_call_operand.vmem [shape: bf16[512,64], index: 0, kind: input, shape index: {}]   ;;  %s11362_s2 = inlined_call_operand.vmem [shape: f32[1,128], index: 2, kind: input, shape index: {}]   ;;  %s11363_s4 = inlined_call_operand.vmem [shape: f32[1,64], index: 4, kind: input, shape index: {}]   ;;  %s11364_s5 = inlined_call_operand.vmem [shape: bf16[512,64], index: 5, kind: output, shape index: {}]  }
   0x1   :  { %v7723_v0 = vld [vmem:[%s11359_s1 + $0x60] sm:$0xf]  ;;  %v8304_v1 = vld [vmem:[%s11359_s1 + $0x6c] sm:$0xf0]  ;;  %v7771_v2 = vld [vmem:[%s11359_s1 + $0x64] sm:$0xf] }
   0x2   :  { %v7724_v3 = vor.u32 %v8304_v1, %v7723_v0  ;;  %v8308_v4 = vld [vmem:[%s11359_s1 + $0x70] sm:$0xf0]  ;;  %v7819_v5 = vld [vmem:[%s11359_s1 + $0x68] sm:$0xf]  ;;  %v8312_v6 = vld [vmem:[%s11359_s1 + $0x74] sm:$0xf0] }
   0x3   :  { %v7772_v7 = vor.u32 %v8308_v4, %v7771_v2  ;;  %v7820_v8 = vor.u32 %v8312_v6, %v7819_v5  ;;  %v7867_v9 = vld [vmem:[%s11359_s1 + $0x6c] sm:$0xf]  ;;  %v8316_v10 = vld [vmem:[%s11359_s1 + $0x78] sm:$0xf0]  ;;  %v7719_v11 = vld [vmem:[%s11359_s1 + $0x40] sm:$0xf]  ;;  %v21_v5 = vlaneseq }
   0x4   :  { %763 = vmatpush.bf16.msra.mxu0 %v7724_v3  ;;  %v7868_v12 = vor.u32 %v8316_v10, %v7867_v9  ;;  %v8303_v13 = vld [vmem:[%s11359_s1 + $0x4c] sm:$0xf0]  ;;  %v7767_v14 = vld [vmem:[%s11359_s1 + $0x44] sm:$0xf]  ;;  %v8307_v15 = vld [vmem:[%s11359_s1 + $0x50] sm:$0xf0] }
   0x5   :  { %1092 = vmatpush.bf16.msra.mxu1 %v7772_v7  ;;  %1485 = vmatpush.bf16.msra.mxu2 %v7820_v8  ;;  %v7720_v16 = vor.u32 %v8303_v13, %v7719_v11  ;;  %v7768_v17 = vor.u32 %v8307_v15, %v7767_v14  ;;  %v7815_v18 = vld [vmem:[%s11359_s1 + $0x48] sm:$0xf]  ;;  %v8311_v19 = vld [vmem:[%s11359_s1 + $0x54] sm:$0xf0]  ;;  %v7863_v20 = vld [vmem:[%s11359_s1 + $0x4c] sm:$0xf] }
   0x6   :  { %1878 = vmatpush.bf16.msra.mxu3 %v7868_v12  ;;  %v7816_v21 = vor.u32 %v8311_v19, %v7815_v18  ;;  %v8315_v22 = vld [vmem:[%s11359_s1 + $0x58] sm:$0xf0]  ;;  %v7715_v23 = vld [vmem:[%s11359_s1 + $0x20] sm:$0xf]  ;;  %v8302_v24 = vld [vmem:[%s11359_s1 + $0x2c] sm:$0xf0] }
   0x7   :  { %v7864_v25 = vor.u32 %v8315_v22, %v7863_v20  ;;  %v7763_v26 = vld [vmem:[%s11359_s1 + $0x24] sm:$0xf]  ;;  %v8306_v27 = vld [vmem:[%s11359_s1 + $0x30] sm:$0xf0]  ;;  %v7811_v28 = vld [vmem:[%s11359_s1 + $0x28] sm:$0xf]  ;;  %v7716_v29 = vor.u32 %v8302_v24, %v7715_v23 }
   0x8   :  { %764 = vmatpush.bf16.msra.mxu0 %v7720_v16  ;;  %v8310_v30 = vld [vmem:[%s11359_s1 + $0x34] sm:$0xf0]  ;;  %v7859_v31 = vld [vmem:[%s11359_s1 + $0x2c] sm:$0xf]  ;;  %v8314_v32 = vld [vmem:[%s11359_s1 + $0x38] sm:$0xf0]  ;;  %v7764_v33 = vor.u32 %v8306_v27, %v7763_v26 }
   0x9   :  { %1093 = vmatpush.bf16.msra.mxu1 %v7768_v17  ;;  %1486 = vmatpush.bf16.msra.mxu2 %v7816_v21  ;;  %v7812_v34 = vor.u32 %v8310_v30, %v7811_v28  ;;  %v7711_v35 = vld [vmem:[%s11359_s1] sm:$0xf]  ;;  %v8301_v36 = vld [vmem:[%s11359_s1 + $0xc] sm:$0xf0]  ;;  %v7759_v37 = vld [vmem:[%s11359_s1 + $0x4] sm:$0xf]  ;;  %v7860_v38 = vor.u32 %v8314_v32, %v7859_v31 }
   0xa   :  { %1879 = vmatpush.bf16.msra.mxu3 %v7864_v25  ;;  %v8305_v39 = vld [vmem:[%s11359_s1 + $0x10] sm:$0xf0]  ;;  %v7807_v40 = vld [vmem:[%s11359_s1 + $0x8] sm:$0xf]  ;;  %v8309_v41 = vld [vmem:[%s11359_s1 + $0x14] sm:$0xf0]  ;;  %v7712_v44 = vor.u32 %v8301_v36, %v7711_v35 }
   0xb   :  { %v7855_v42 = vld [vmem:[%s11359_s1 + $0xc] sm:$0xf]  ;;  %v8313_v43 = vld [vmem:[%s11359_s1 + $0x18] sm:$0xf0]  ;;  %v7760_v45 = vor.u32 %v8305_v39, %v7759_v37  ;;  %v7808_v46 = vor.u32 %v8309_v41, %v7807_v40  ;;  %v8269_v49 = vld [vmem:[%s11361_s0] sm:$0xff]  ;;  %v8392_v1 = vmov 0.0  }
   0xc   :  { %765 = vmatpush.bf16.msra.mxu0 %v7716_v29  ;;  %v7856_v47 = vor.u32 %v8313_v43, %v7855_v42  ;;  %v8340_v48 = vld [vmem:[%s11360_s3 + $0x78] sm:$0xff]  ;;  %v8270_v53 = vld [vmem:[%s11361_s0 + $0x8] sm:$0xff]  ;;  %v8271_v54 = vld [vmem:[%s11361_s0 + $0x10] sm:$0xff]  ;;  %2559 = vst [vmem:[#allocation2] sm:$0xff] %v8392_v1  ;;  %v8631_v7 = vshrl.u32 %v21_v5, 7  ;;  %vm11369_vm9 = vcmask 261120  }
   0xd   :  { %1094 = vmatpush.bf16.msra.mxu1 %v7764_v33  ;;  %1487 = vmatpush.bf16.msra.mxu2 %v7812_v34  ;;  %v8348_v50 = vld [vmem:[%s11360_s3 + $0x178] sm:$0xff]  ;;  %v8339_v55 = vld [vmem:[%s11360_s3 + $0x70] sm:$0xff]  ;;  %v8273_v60 = vld [vmem:[%s11361_s0 + $0x20] sm:$0xff]  ;;  %2560 = vst [vmem:[#allocation2 + $0x8] sm:$0xff] %v8392_v1 }
   0xe   :  { %1880 = vmatpush.bf16.msra.mxu3 %v7860_v38  ;;  %v8324_v51 = vld [vmem:[%s11360_s3 + $0x38] sm:$0xff]  ;;  %v8323_v56 = vld [vmem:[%s11360_s3 + $0x30] sm:$0xff]  ;;  %v8274_v61 = vld [vmem:[%s11361_s0 + $0x28] sm:$0xff]  ;;  %2561 = vst [vmem:[#allocation2 + $0x10] sm:$0xff] %v8392_v1  ;;  %v86_v12 = vand.u32 7, %v8631_v7 }
   0xf   :  { %v8332_v52 = vld [vmem:[%s11360_s3 + $0x138] sm:$0xff]  ;;  %v8347_v57 = vld [vmem:[%s11360_s3 + $0x170] sm:$0xff]  ;;  %v8338_v63 = vld [vmem:[%s11360_s3 + $0x68] sm:$0xff]  ;;  %2562 = vst [vmem:[#allocation2 + $0x18] sm:$0xff] %v8392_v1 }
  0x10   :  { %766 = vmatpush.bf16.msra.mxu0 %v7712_v44  ;;  %v8331_v58 = vld [vmem:[%s11360_s3 + $0x130] sm:$0xff]  ;;  %v8272_v59 = vld [vmem:[%s11361_s0 + $0x18] sm:$0xff]  ;;  %2563 = vst [vmem:[#allocation2 + $0x20] sm:$0xff] %v8392_v1  ;;  %v8277_v2 = vld [vmem:[%s11361_s0 + $0x40] sm:$0xff]  ;;  %vm8652_vm1 = vcmp.lt.s32.totalorder %v86_v12, 7 }
  0x11   :  { %1095 = vmatpush.bf16.msra.mxu1 %v7760_v45  ;;  %1488 = vmatpush.bf16.msra.mxu2 %v7808_v46  ;;  %v8275_v62 = vld [vmem:[%s11361_s0 + $0x30] sm:$0xff]  ;;  %v8276_v0 = vld [vmem:[%s11361_s0 + $0x38] sm:$0xff]  ;;  %2564 = vst [vmem:[#allocation2 + $0x28] sm:$0xff] %v8392_v1  ;;  %v8639_v11 = vld [vmem:[%s11362_s2] ss:$0 sm:$0xff]  ;;  %v23_v46 = vadd.s32 8, %v8631_v7 }
  0x12   :  { %1881 = vmatpush.bf16.msra.mxu3 %v7856_v47  ;;  %2565 = vst [vmem:[#allocation2 + $0x30] sm:$0xff] %v8392_v1  ;;  %v8322_v22 = vld [vmem:[%s11360_s3 + $0x28] sm:$0xff]  ;;  %v8279_v36 = vld [vmem:[%s11361_s0 + $0x50] sm:$0xff] }
  0x13   :  { %7725 = vmatmul.msk.bf16.vlgmr.msra.gmra.mxu0 %vm11365_vm0, %v8269_v49  ;;  %2566 = vst [vmem:[#allocation2 + $0x38] sm:$0xff] %v8392_v1  ;;  %v8278_v25 = vld [vmem:[%s11361_s0 + $0x48] sm:$0xff] }
  0x14   :  { %7773 = vmatmul.msk.bf16.vlgmr.msra.gmra.mxu1 %vm11365_vm0, %v8269_v49  ;;  %7821 = vmatmul.msk.bf16.vlgmr.msra.gmra.mxu2 %vm11365_vm0, %v8269_v49  ;;  %2567 = vst [vmem:[#allocation2 + $0x40] sm:$0xff] %v8392_v1  ;;  %v8346_v28 = vld [vmem:[%s11360_s3 + $0x168] sm:$0xff] }
  0x15   :  { %3737 = vmatpush.bf16.msrb.mxu2 %v8340_v48  ;;  %7869 = vmatmul.msk.bf16.vlgmr.msra.gmra.mxu3 %vm11365_vm0, %v8269_v49  ;;  %2568 = vst [vmem:[#allocation2 + $0x48] sm:$0xff] %v8392_v1  ;;  %v8330_v31 = vld [vmem:[%s11360_s3 + $0x128] sm:$0xff]  ;;  %v24_v49 = vadd.s32 16, %v8631_v7 }
  0x16   :  { %3971 = vmatpush.bf16.msrb.mxu3 %v8348_v50  ;;  %3045 = vmatpush.bf16.msrb.mxu0 %v8324_v51  ;;  %2569 = vst [vmem:[#allocation2 + $0x50] sm:$0xff] %v8392_v1 }
  0x17   :  { %3279 = vmatpush.bf16.msrb.mxu1 %v8332_v52  ;;  %2570 = vst [vmem:[#allocation2 + $0x58] sm:$0xff] %v8392_v1  ;;  %v87_v52 = vand.u32 7, %v23_v46 }
  0x18   :  { %2571 = vst [vmem:[#allocation2 + $0x60] sm:$0xff] %v8392_v1 }
  0x19   :  { %3738 = vmatpush.bf16.msrb.mxu2 %v8339_v55  ;;  %2572 = vst [vmem:[#allocation2 + $0x68] sm:$0xff] %v8392_v1  ;;  %vm8749_vm3 = vcmp.lt.s32.totalorder %v87_v52, 7  ;;  %v30_v52 = vadd.s32 64, %v8631_v7 }
  0x1a   :  { %3046 = vmatpush.bf16.msrb.mxu0 %v8323_v56  ;;  %3972 = vmatpush.bf16.msrb.mxu3 %v8347_v57  ;;  %2573 = vst [vmem:[#allocation2 + $0x70] sm:$0xff] %v8392_v1  ;;  %v8280_v56 = vld [vmem:[%s11361_s0 + $0x58] sm:$0xff] }
  0x1b   :  { %3280 = vmatpush.bf16.msrb.mxu1 %v8331_v58  ;;  %2574 = vst [vmem:[#allocation2 + $0x78] sm:$0xff] %v8392_v1  ;;  %v88_v58 = vand.u32 7, %v24_v49 }
  0x1c   :  { %2575 = vst [vmem:[#allocation2 + $0x80] sm:$0xff] %v8392_v1 }
  0x1d   :  { %3739 = vmatpush.bf16.msrb.mxu2 %v8338_v63  ;;  %2576 = vst [vmem:[#allocation2 + $0x88] sm:$0xff] %v8392_v1  ;;  %vm8769_vm4 = vcmp.lt.s32.totalorder %v88_v58, 7 }
  0x1e   :  { %2577 = vst [vmem:[#allocation2 + $0x90] sm:$0xff] %v8392_v1  ;;  %3047 = vmatpush.bf16.msrb.mxu0 %v8322_v22  ;;  %3973 = vmatpush.bf16.msrb.mxu3 %v8346_v28 }
  0x1f   :  { %2578 = vst [vmem:[#allocation2 + $0x98] sm:$0xff] %v8392_v1  ;;  %3281 = vmatpush.bf16.msrb.mxu1 %v8330_v31  ;;  %v27_v31 = vadd.s32 40, %v8631_v7 }
  0x20   :  { %2579 = vst [vmem:[#allocation2 + $0xa0] sm:$0xff] %v8392_v1 }
  0x21   :  { %2580 = vst [vmem:[#allocation2 + $0xa8] sm:$0xff] %v8392_v1 }
  0x22   :  { %2581 = vst [vmem:[#allocation2 + $0xb0] sm:$0xff] %v8392_v1 }
  0x23   :  { %7726 = vmatmul.msk.bf16.gmra.mxu0 %vm11365_vm0, %v8270_v53  ;;  %2582 = vst [vmem:[#allocation2 + $0xb8] sm:$0xff] %v8392_v1 }
  0x24   :  { %7774 = vmatmul.msk.bf16.gmra.mxu1 %vm11365_vm0, %v8270_v53  ;;  %7822 = vmatmul.msk.bf16.gmra.mxu2 %vm11365_vm0, %v8270_v53  ;;  %2583 = vst [vmem:[#allocation2 + $0xc0] sm:$0xff] %v8392_v1 }
  0x25   :  { %7870 = vmatmul.msk.bf16.gmra.mxu3 %vm11365_vm0, %v8270_v53  ;;  %2584 = vst [vmem:[#allocation2 + $0xc8] sm:$0xff] %v8392_v1 }
  0x26   :  { %2585 = vst [vmem:[#allocation2 + $0xd0] sm:$0xff] %v8392_v1 }
  0x27   :  { %2586 = vst [vmem:[#allocation2 + $0xd8] sm:$0xff] %v8392_v1 }
  0x28   :  { %2587 = vst [vmem:[#allocation2 + $0xe0] sm:$0xff] %v8392_v1 }
  0x29   :  { %2588 = vst [vmem:[#allocation2 + $0xe8] sm:$0xff] %v8392_v1 }
  0x2a   :  { %2589 = vst [vmem:[#allocation2 + $0xf0] sm:$0xff] %v8392_v1 }
  0x2b   :  { %2590 = vst [vmem:[#allocation2 + $0xf8] sm:$0xff] %v8392_v1 }
  0x2c   :  { %2591 = vst [vmem:[#allocation2 + $0x100] sm:$0xff] %v8392_v1 }
  0x2d   :  { %2592 = vst [vmem:[#allocation2 + $0x108] sm:$0xff] %v8392_v1 }
  0x2e   :  { %2593 = vst [vmem:[#allocation2 + $0x110] sm:$0xff] %v8392_v1 }
  0x2f   :  { %2594 = vst [vmem:[#allocation2 + $0x118] sm:$0xff] %v8392_v1 }
  0x30   :  { %2595 = vst [vmem:[#allocation2 + $0x120] sm:$0xff] %v8392_v1 }
  0x31   :  { %2596 = vst [vmem:[#allocation2 + $0x128] sm:$0xff] %v8392_v1 }
  0x32   :  { %2597 = vst [vmem:[#allocation2 + $0x130] sm:$0xff] %v8392_v1 }
  0x33   :  { %7727 = vmatmul.msk.bf16.gmra.mxu0 %vm11365_vm0, %v8271_v54  ;;  %2598 = vst [vmem:[#allocation2 + $0x138] sm:$0xff] %v8392_v1 }
  0x34   :  { %7775 = vmatmul.msk.bf16.gmra.mxu1 %vm11365_vm0, %v8271_v54  ;;  %7823 = vmatmul.msk.bf16.gmra.mxu2 %vm11365_vm0, %v8271_v54  ;;  %2599 = vst [vmem:[#allocation2 + $0x140] sm:$0xff] %v8392_v1 }
  0x35   :  { %7871 = vmatmul.msk.bf16.gmra.mxu3 %vm11365_vm0, %v8271_v54  ;;  %2600 = vst [vmem:[#allocation2 + $0x148] sm:$0xff] %v8392_v1 }
  0x36   :  { %2601 = vst [vmem:[#allocation2 + $0x150] sm:$0xff] %v8392_v1 }
  0x37   :  { %2602 = vst [vmem:[#allocation2 + $0x158] sm:$0xff] %v8392_v1 }
  0x38   :  { %2603 = vst [vmem:[#allocation2 + $0x160] sm:$0xff] %v8392_v1 }
  0x39   :  { %2604 = vst [vmem:[#allocation2 + $0x168] sm:$0xff] %v8392_v1 }
  0x3a   :  { %2605 = vst [vmem:[#allocation2 + $0x170] sm:$0xff] %v8392_v1 }
  0x3b   :  { %2606 = vst [vmem:[#allocation2 + $0x178] sm:$0xff] %v8392_v1 }
  0x3c   :  { %2607 = vst [vmem:[#allocation2 + $0x180] sm:$0xff] %v8392_v1 }
  0x3d   :  { %2608 = vst [vmem:[#allocation2 + $0x188] sm:$0xff] %v8392_v1 }
  0x3e   :  { %2609 = vst [vmem:[#allocation2 + $0x190] sm:$0xff] %v8392_v1 }
  0x3f   :  { %2610 = vst [vmem:[#allocation2 + $0x198] sm:$0xff] %v8392_v1 }
  0x40   :  { %2611 = vst [vmem:[#allocation2 + $0x1a0] sm:$0xff] %v8392_v1 }
  0x41   :  { %2612 = vst [vmem:[#allocation2 + $0x1a8] sm:$0xff] %v8392_v1 }
  0x42   :  { %2613 = vst [vmem:[#allocation2 + $0x1b0] sm:$0xff] %v8392_v1 }
  0x43   :  { %7728 = vmatmul.msk.bf16.gmra.mxu0 %vm11365_vm0, %v8272_v59  ;;  %2614 = vst [vmem:[#allocation2 + $0x1b8] sm:$0xff] %v8392_v1 }
  0x44   :  { %7776 = vmatmul.msk.bf16.gmra.mxu1 %vm11365_vm0, %v8272_v59  ;;  %7824 = vmatmul.msk.bf16.gmra.mxu2 %vm11365_vm0, %v8272_v59  ;;  %2615 = vst [vmem:[#allocation2 + $0x1c0] sm:$0xff] %v8392_v1 }
  0x45   :  { %7872 = vmatmul.msk.bf16.gmra.mxu3 %vm11365_vm0, %v8272_v59  ;;  %2616 = vst [vmem:[#allocation2 + $0x1c8] sm:$0xff] %v8392_v1 }
  0x46   :  { %2617 = vst [vmem:[#allocation2 + $0x1d0] sm:$0xff] %v8392_v1 }
  0x47   :  { %2618 = vst [vmem:[#allocation2 + $0x1d8] sm:$0xff] %v8392_v1 }
  0x48   :  { %2619 = vst [vmem:[#allocation2 + $0x1e0] sm:$0xff] %v8392_v1 }
  0x49   :  { %2620 = vst [vmem:[#allocation2 + $0x1e8] sm:$0xff] %v8392_v1 }
  0x4a   :  { %2621 = vst [vmem:[#allocation2 + $0x1f0] sm:$0xff] %v8392_v1 }
  0x4b   :  { %2622 = vst [vmem:[#allocation2 + $0x1f8] sm:$0xff] %v8392_v1 }
  0x4c   :  { %2623 = vst [vmem:[#allocation2 + $0x200] sm:$0xff] %v8392_v1 }
  0x4d   :  { %2624 = vst [vmem:[#allocation2 + $0x208] sm:$0xff] %v8392_v1 }
  0x4e   :  { %2633 = vst.msk [vmem:[#allocation2 + $0x38] sm:$0xff] %vm11376_vm2, %v8392_v1 }
  0x4f   :  { %2641 = vst.msk [vmem:[#allocation2 + $0x78] sm:$0xff] %vm11376_vm2, %v8392_v1 }
  0x50   :  { %2649 = vst.msk [vmem:[#allocation2 + $0xb8] sm:$0xff] %vm11376_vm2, %v8392_v1 }
  0x51   :  { %2657 = vst.msk [vmem:[#allocation2 + $0xf8] sm:$0xff] %vm11376_vm2, %v8392_v1 }
  0x52   :  { %2665 = vst.msk [vmem:[#allocation2 + $0x138] sm:$0xff] %vm11376_vm2, %v8392_v1 }
  0x53   :  { %7729 = vmatmul.msk.bf16.gmra.mxu0 %vm11365_vm0, %v8273_v60  ;;  %2673 = vst.msk [vmem:[#allocation2 + $0x178] sm:$0xff] %vm11376_vm2, %v8392_v1 }
  0x54   :  { %7777 = vmatmul.msk.bf16.gmra.mxu1 %vm11365_vm0, %v8273_v60  ;;  %7825 = vmatmul.msk.bf16.gmra.mxu2 %vm11365_vm0, %v8273_v60  ;;  %2681 = vst.msk [vmem:[#allocation2 + $0x1b8] sm:$0xff] %vm11376_vm2, %v8392_v1 }
  0x55   :  { %7873 = vmatmul.msk.bf16.gmra.mxu3 %vm11365_vm0, %v8273_v60  ;;  %2689 = vst.msk [vmem:[#allocation2 + $0x1f8] sm:$0xff] %vm11376_vm2, %v8392_v1 }
  0x56   :  { %2754 = vst.msk [vmem:[#allocation2 + $0x1f9] sm:$0xff] %vm11368_vm5, %v8392_v1 }
  0x57   :  { %2819 = vst.msk [vmem:[#allocation2 + $0x200] sm:$0xff] %vm11370_vm7, %v8392_v1 }
  0x58   :  { %2884 = vst.msk [vmem:[#allocation2 + $0x201] sm:$0xff] %vm11369_vm9, %v8392_v1 }
  0x63   :  { %7730 = vmatmul.msk.bf16.gmra.mxu0 %vm11365_vm0, %v8274_v61 }
  0x64   :  { %7778 = vmatmul.msk.bf16.gmra.mxu1 %vm11365_vm0, %v8274_v61  ;;  %7826 = vmatmul.msk.bf16.gmra.mxu2 %vm11365_vm0, %v8274_v61 }
  0x65   :  { %7874 = vmatmul.msk.bf16.gmra.mxu3 %vm11365_vm0, %v8274_v61 }
  0x73   :  { %7731 = vmatmul.msk.bf16.gmra.mxu0 %vm11365_vm0, %v8275_v62 }
  0x74   :  { %7779 = vmatmul.msk.bf16.gmra.mxu1 %vm11365_vm0, %v8275_v62  ;;  %7827 = vmatmul.msk.bf16.gmra.mxu2 %vm11365_vm0, %v8275_v62 }
  0x75   :  { %7875 = vmatmul.msk.bf16.gmra.mxu3 %vm11365_vm0, %v8275_v62 }
  0x83   :  { %7732 = vmatmul.msk.bf16.gmra.mxu0 %vm11365_vm0, %v8276_v0 }
  0x84   :  { %7780 = vmatmul.msk.bf16.gmra.mxu1 %vm11365_vm0, %v8276_v0  ;;  %7828 = vmatmul.msk.bf16.gmra.mxu2 %vm11365_vm0, %v8276_v0 }
  0x85   :  { %7876 = vmatmul.msk.bf16.gmra.mxu3 %vm11365_vm0, %v8276_v0  ;;  %v25_v0 = vadd.s32 24, %v8631_v7 }
  0x90   :  { %v768_v3 = vpop.f32.mrf.mxu0 }
  0x91   :  { %v1097_v4 = vpop.f32.mrf.mxu1 }
  0x92   :  { %v1257_v6 = vmax.f32 %v768_v3, %v1097_v4  ;;  %v8337_v3 = vld [vmem:[%s11360_s3 + $0x60] sm:$0xff] }
  0x93   :  { %7733 = vmatmul.msk.bf16.gmra.mxu0 %vm11365_vm0, %v8277_v2  ;;  %3740 = vmatpush.bf16.msrb.mxu2 %v8337_v3 }
  0x94   :  { %7781 = vmatmul.msk.bf16.gmra.mxu1 %vm11365_vm0, %v8277_v2  ;;  %7829 = vmatmul.msk.bf16.gmra.mxu2 %vm11365_vm0, %v8277_v2 }
  0x95   :  { %7877 = vmatmul.msk.bf16.gmra.mxu3 %vm11365_vm0, %v8277_v2 }
  0x97   :  { %v1490_v8 = vpop.f32.mrf.mxu2 }
  0x98   :  { %v1650_v9 = vmax.f32 %v1257_v6, %v1490_v8  ;;  %v1883_v10 = vpop.f32.mrf.mxu3  ;;  %v8645_v14 = vpop.f32.mrf.mxu0 }
  0x99   :  { %v8647_v15 = vpop.f32.mrf.mxu1 }
  0x9a   :  { %v2043_v13 = vmax.f32 %v1650_v9, %v1883_v10  ;;  %v1258_v37 = vmax.f32 %v8645_v14, %v8647_v15  ;;  %v89_v10 = vand.u32 7, %v25_v0  ;;  %v26_v15 = vadd.s32 32, %v8631_v7 }
  0x9b   :  { %v31_v0 = vadd.s32 72, %v8631_v7 }
  0x9c   :  { %v2239_v16 = vadd.f32 %v8639_v11, %v2043_v13  ;;  %vm8798_vm6 = vcmp.lt.s32.totalorder %v89_v10, 7  ;;  %v8282_v10 = vld [vmem:[%s11361_s0 + $0x68] sm:$0xff] }
  0x9e   :  { %v2303_v18 = vmax.f32 %v2239_v16, 0.0 }
  0x9f   :  { %v1492_v20 = vpop.f32.mrf.mxu2 }
  0xa0   :  { %v8661_v19 = vsel %vm8652_vm1, %v2303_v18, 0.0  ;;  %v8664_v21 = vpop.f32.mrf.mxu3  ;;  %v773_v23 = vpop.f32.mrf.mxu0  ;;  %v1651_v38 = vmax.f32 %v1258_v37, %v1492_v20  ;;  %v8321_v20 = vld [vmem:[%s11360_s3 + $0x20] sm:$0xff] }
  0xa1   :  { %2626 = vst.msk [vmem:[#allocation2] sm:$0xff] %vm11376_vm2, %v8661_v19  ;;  %v1102_v24 = vpop.f32.mrf.mxu1  ;;  %3048 = vmatpush.bf16.msrb.mxu0 %v8321_v20 }
  0xa2   :  { %v1259_v39 = vmax.f32 %v773_v23, %v1102_v24  ;;  %v2044_v42 = vmax.f32 %v1651_v38, %v8664_v21  ;;  %v8345_v21 = vld [vmem:[%s11360_s3 + $0x160] sm:$0xff]  ;;  %v91_v38 = vand.u32 7, %v27_v31 }
  0xa3   :  { %7734 = vmatmul.msk.bf16.gmra.mxu0 %vm11365_vm0, %v8278_v25  ;;  %3974 = vmatpush.bf16.msrb.mxu3 %v8345_v21  ;;  %v11485_v21 = vmov 0 }
  0xa4   :  { %7782 = vmatmul.msk.bf16.gmra.mxu1 %vm11365_vm0, %v8278_v25  ;;  %7830 = vmatmul.msk.bf16.gmra.mxu2 %vm11365_vm0, %v8278_v25  ;;  %v2240_v48 = vadd.f32 %v8639_v11, %v2044_v42  ;;  %v8281_v42 = vld [vmem:[%s11361_s0 + $0x60] sm:$0xff]  ;;  %vm8842_vm10 = vcmp.lt.s32.totalorder %v91_v38, 7 }
  0xa5   :  { %7878 = vmatmul.msk.bf16.gmra.mxu3 %vm11365_vm0, %v8278_v25 }
  0xa6   :  { %v2304_v57 = vmax.f32 %v2240_v48, 0.0 }
  0xa7   :  { %v1495_v26 = vpop.f32.mrf.mxu2 }
  0xa8   :  { %v8687_v27 = vpop.f32.mrf.mxu3  ;;  %v775_v29 = vpop.f32.mrf.mxu0  ;;  %v1652_v43 = vmax.f32 %v1259_v39, %v1495_v26  ;;  %v8767_v5 = vsel %vm8749_vm3, %v2304_v57, 0.0  ;;  %v28_v39 = vadd.s32 48, %v8631_v7 }
  0xa9   :  { %v1104_v30 = vpop.f32.mrf.mxu1  ;;  %2627 = vst.msk [vmem:[#allocation2 + $0x8] sm:$0xff] %vm11376_vm2, %v8767_v5 }
  0xaa   :  { %v1260_v47 = vmax.f32 %v775_v29, %v1104_v30  ;;  %v2045_v50 = vmax.f32 %v1652_v43, %v8687_v27  ;;  %2691 = vst.msk [vmem:[#allocation2 + $0x1] sm:$0xff] %vm11368_vm5, %v8661_v19  ;;  %v90_v30 = vand.u32 7, %v26_v15  ;;  %v92_v49 = vand.u32 7, %v28_v39 }
  0xac   :  { %v2241_v59 = vadd.f32 %v8639_v11, %v2045_v50  ;;  %vm8823_vm8 = vcmp.lt.s32.totalorder %v90_v30, 7  ;;  %vm8860_vm11 = vcmp.lt.s32.totalorder %v92_v49, 7 }
  0xae   :  { %v2305_v8 = vmax.f32 %v2241_v59, 0.0 }
  0xaf   :  { %v1497_v32 = vpop.f32.mrf.mxu2 }
  0xb0   :  { %v8703_v33 = vpop.f32.mrf.mxu3  ;;  %v778_v34 = vpop.f32.mrf.mxu0  ;;  %v1653_v51 = vmax.f32 %v1260_v47, %v1497_v32  ;;  %v8794_v22 = vsel %vm8769_vm4, %v2305_v8, 0.0  ;;  %v8329_v32 = vld [vmem:[%s11360_s3 + $0x120] sm:$0xff] }
  0xb1   :  { %v1107_v35 = vpop.f32.mrf.mxu1  ;;  %2628 = vst.msk [vmem:[#allocation2 + $0x10] sm:$0xff] %vm11376_vm2, %v8794_v22  ;;  %3282 = vmatpush.bf16.msrb.mxu1 %v8329_v32 }
  0xb2   :  { %v1261_v53 = vmax.f32 %v778_v34, %v1107_v35  ;;  %v2046_v60 = vmax.f32 %v1653_v51, %v8703_v33  ;;  %2692 = vst.msk [vmem:[#allocation2 + $0x9] sm:$0xff] %vm11368_vm5, %v8767_v5 }
  0xb3   :  { %7735 = vmatmul.msk.bf16.gmra.mxu0 %vm11365_vm0, %v8279_v36  ;;  %2756 = vst.msk [vmem:[#allocation2 + $0x8] sm:$0xff] %vm11370_vm7, %v8661_v19 }
  0xb4   :  { %7783 = vmatmul.msk.bf16.gmra.mxu1 %vm11365_vm0, %v8279_v36  ;;  %7831 = vmatmul.msk.bf16.gmra.mxu2 %vm11365_vm0, %v8279_v36  ;;  %v2242_v9 = vadd.f32 %v8639_v11, %v2046_v60  ;;  %v94_v60 = vand.u32 7, %v30_v52 }
  0xb5   :  { %7879 = vmatmul.msk.bf16.gmra.mxu3 %vm11365_vm0, %v8279_v36 }
  0xb6   :  { %v2306_v23 = vmax.f32 %v2242_v9, 0.0  ;;  %vm8878_vm12 = vcmp.lt.s32.totalorder %v94_v60, 7 }
  0xb7   :  { %v1500_v40 = vpop.f32.mrf.mxu2 }
  0xb8   :  { %v8722_v41 = vpop.f32.mrf.mxu3  ;;  %v780_v44 = vpop.f32.mrf.mxu0  ;;  %v1654_v2 = vmax.f32 %v1261_v53, %v1500_v40  ;;  %v8816_v33 = vsel %vm8798_vm6, %v2306_v23, 0.0  ;;  %v11479_v53 = vmov 0 }
  0xb9   :  { %v1109_v45 = vpop.f32.mrf.mxu1  ;;  %2629 = vst.msk [vmem:[#allocation2 + $0x18] sm:$0xff] %vm11376_vm2, %v8816_v33  ;;  %v11480_v53 = vsel %vm8860_vm11, 4294967295, %v11479_v53 }
  0xba   :  { %v1262_v4 = vmax.f32 %v780_v44, %v1109_v45  ;;  %v2047_v12 = vmax.f32 %v1654_v2, %v8722_v41  ;;  %2693 = vst.msk [vmem:[#allocation2 + $0x11] sm:$0xff] %vm11368_vm5, %v8794_v22  ;;  %v11482_v2 = vmov 0 }
  0xbb   :  { %2757 = vst.msk [vmem:[#allocation2 + $0x10] sm:$0xff] %vm11370_vm7, %v8767_v5  ;;  %v11483_v2 = vsel %vm8878_vm12, 4294967295, %v11482_v2 }
  0xbc   :  { %v2243_v27 = vadd.f32 %v8639_v11, %v2047_v12  ;;  %2821 = vst.msk [vmem:[#allocation2 + $0x9] sm:$0xff] %vm11369_vm9, %v8661_v19 }
  0xbd   :  { %11481 = vst [vmem:[#allocation6_spill] sm:$0xff] %v11480_v53 }
  0xbe   :  { %v2307_v34 = vmax.f32 %v2243_v27, 0.0  ;;  %11484 = vst [vmem:[#allocation7_spill] sm:$0xff] %v11483_v2 }
  0xbf   :  { %v1502_v54 = vpop.f32.mrf.mxu2 }
  0xc0   :  { %v8737_v55 = vpop.f32.mrf.mxu3  ;;  %v783_v61 = vpop.f32.mrf.mxu0  ;;  %v1655_v13 = vmax.f32 %v1262_v4, %v1502_v54  ;;  %v2499_v45 = vsel %vm8823_vm8, %v2307_v34, 0.0  ;;  %v11488_v34 = vmov 0 }
  0xc1   :  { %v1112_v62 = vpop.f32.mrf.mxu1  ;;  %2630 = vst.msk [vmem:[#allocation2 + $0x20] sm:$0xff] %vm11376_vm2, %v2499_v45 }
  0xc2   :  { %v1263_v14 = vmax.f32 %v783_v61, %v1112_v62  ;;  %v2048_v28 = vmax.f32 %v1655_v13, %v8737_v55  ;;  %2694 = vst.msk [vmem:[#allocation2 + $0x19] sm:$0xff] %vm11368_vm5, %v8816_v33  ;;  %v95_v13 = vand.u32 7, %v31_v0 }
  0xc3   :  { %7736 = vmatmul.msk.bf16.gmra.mxu0 %vm11365_vm0, %v8280_v56  ;;  %2758 = vst.msk [vmem:[#allocation2 + $0x18] sm:$0xff] %vm11370_vm7, %v8794_v22 }
  0xc4   :  { %7784 = vmatmul.msk.bf16.gmra.mxu1 %vm11365_vm0, %v8280_v56  ;;  %7832 = vmatmul.msk.bf16.gmra.mxu2 %vm11365_vm0, %v8280_v56  ;;  %v2244_v35 = vadd.f32 %v8639_v11, %v2048_v28  ;;  %2822 = vst.msk [vmem:[#allocation2 + $0x11] sm:$0xff] %vm11369_vm9, %v8767_v5  ;;  %vm8902_vm13 = vcmp.lt.s32.totalorder %v95_v13, 7 }
  0xc5   :  { %7880 = vmatmul.msk.bf16.gmra.mxu3 %vm11365_vm0, %v8280_v56  ;;  %v11486_v21 = vsel %vm8902_vm13, 4294967295, %v11485_v21 }
  0xc6   :  { %v2308_v46 = vmax.f32 %v2244_v35, 0.0  ;;  %11487 = vst [vmem:[#allocation8_spill] sm:$0xff] %v11486_v21  ;;  %v33_v35 = vadd.s32 88, %v8631_v7 }
  0xc7   :  { %v1505_v16 = vpop.f32.mrf.mxu2 }
  0xc8   :  { %v1898_v18 = vpop.f32.mrf.mxu3  ;;  %v785_v24 = vpop.f32.mrf.mxu0  ;;  %v1656_v29 = vmax.f32 %v1263_v14, %v1505_v16  ;;  %v2500_v19 = vsel %vm8842_vm10, %v2308_v46, 0.0 }
  0xc9   :  { %v1114_v25 = vpop.f32.mrf.mxu1  ;;  %2631 = vst.msk [vmem:[#allocation2 + $0x28] sm:$0xff] %vm11376_vm2, %v2500_v19 }
  0xca   :  { %v2049_v36 = vmax.f32 %v1656_v29, %v1898_v18  ;;  %2695 = vst.msk [vmem:[#allocation2 + $0x21] sm:$0xff] %vm11368_vm5, %v2499_v45 }
  0xcb   :  { %2759 = vst.msk [vmem:[#allocation2 + $0x20] sm:$0xff] %vm11370_vm7, %v8816_v33 }
  0xcc   :  { %v2245_v47 = vadd.f32 %v8639_v11, %v2049_v36  ;;  %2823 = vst.msk [vmem:[#allocation2 + $0x19] sm:$0xff] %vm11369_vm9, %v8794_v22  ;;  %v32_v22 = vadd.s32 80, %v8631_v7 }
  0xce   :  { %v2309_v51 = vmax.f32 %v2245_v47, 0.0  ;;  %v96_v29 = vand.u32 7, %v32_v22 }
  0xcf   :  { %v1507_v40 = vpop.f32.mrf.mxu2 }
  0xd0   :  { %v1900_v41 = vpop.f32.mrf.mxu3  ;;  %v788_v43 = vpop.f32.mrf.mxu0  ;;  %v2501_v59 = vsel %vm8860_vm11, %v2309_v51, 0.0  ;;  %vm8923_vm14 = vcmp.lt.s32.totalorder %v96_v29, 7  ;;  %v34_v51 = vadd.s32 96, %v8631_v7 }
  0xd1   :  { %v1117_v44 = vpop.f32.mrf.mxu1  ;;  %2632 = vst.msk [vmem:[#allocation2 + $0x30] sm:$0xff] %vm11376_vm2, %v2501_v59  ;;  %v11489_v34 = vsel %vm8923_vm14, 4294967295, %v11488_v34 }
  0xd2   :  { %v1265_v50 = vmax.f32 %v788_v43, %v1117_v44  ;;  %2696 = vst.msk [vmem:[#allocation2 + $0x29] sm:$0xff] %vm11368_vm5, %v2500_v19  ;;  %v8283_v43 = vld [vmem:[%s11361_s0 + $0x70] sm:$0xff]  ;;  %v97_v44 = vand.u32 7, %v33_v35 }
  0xd3   :  { %7737 = vmatmul.msk.bf16.gmra.mxu0 %vm11365_vm0, %v8281_v42  ;;  %2697 = vst.msk [vmem:[#allocation2 + $0x31] sm:$0xff] %vm11368_vm5, %v2501_v59 }
  0xd4   :  { %7785 = vmatmul.msk.bf16.gmra.mxu1 %vm11365_vm0, %v8281_v42  ;;  %7833 = vmatmul.msk.bf16.gmra.mxu2 %vm11365_vm0, %v8281_v42  ;;  %2760 = vst.msk [vmem:[#allocation2 + $0x28] sm:$0xff] %vm11370_vm7, %v2499_v45  ;;  %vm8946_vm15 = vcmp.lt.s32.totalorder %v97_v44, 7 }
  0xd5   :  { %7881 = vmatmul.msk.bf16.gmra.mxu3 %vm11365_vm0, %v8281_v42  ;;  %2761 = vst.msk [vmem:[#allocation2 + $0x30] sm:$0xff] %vm11370_vm7, %v2500_v19 }
  0xd6   :  { %2824 = vst.msk [vmem:[#allocation2 + $0x21] sm:$0xff] %vm11369_vm9, %v8816_v33 }
  0xd7   :  { %v1510_v54 = vpop.f32.mrf.mxu2  ;;  %2825 = vst.msk [vmem:[#allocation2 + $0x29] sm:$0xff] %vm11369_vm9, %v2499_v45 }
  0xd8   :  { %v1903_v55 = vpop.f32.mrf.mxu3  ;;  %v1658_v56 = vmax.f32 %v1265_v50, %v1510_v54  ;;  %v790_v57 = vpop.f32.mrf.mxu0  ;;  %11490 = vst [vmem:[#allocation9_spill] sm:$0xff] %v11489_v34 }
  0xd9   :  { %v1119_v58 = vpop.f32.mrf.mxu1 }
  0xda   :  { %v2051_v61 = vmax.f32 %v1658_v56, %v1903_v55  ;;  %v1266_v4 = vmax.f32 %v790_v57, %v1119_v58  ;;  %v8336_v56 = vld [vmem:[%s11360_s3 + $0x58] sm:$0xff] }
  0xdb   :  { %3741 = vmatpush.bf16.msrb.mxu2 %v8336_v56 }
  0xdc   :  { %v2247_v62 = vadd.f32 %v8639_v11, %v2051_v61 }
  0xde   :  { %v2311_v3 = vmax.f32 %v2247_v62, 0.0 }
  0xdf   :  { %v1512_v5 = vpop.f32.mrf.mxu2 }
  0xe0   :  { %v1905_v8 = vpop.f32.mrf.mxu3  ;;  %v1659_v9 = vmax.f32 %v1266_v4, %v1512_v5  ;;  %v8890_v12 = vsel %vm8878_vm12, %v2311_v3, 0.0  ;;  %v793_v14 = vpop.f32.mrf.mxu0  ;;  %v11494_v3 = vmov 0  ;;  %v35_v4 = vadd.s32 104, %v8631_v7 }
  0xe1   :  { %v1122_v15 = vpop.f32.mrf.mxu1  ;;  %2634 = vst.msk [vmem:[#allocation2 + $0x40] sm:$0xff] %vm11376_vm2, %v8890_v12 }
  0xe2   :  { %v2052_v16 = vmax.f32 %v1659_v9, %v1905_v8  ;;  %v1267_v20 = vmax.f32 %v793_v14, %v1122_v15  ;;  %2698 = vst.msk [vmem:[#allocation2 + $0x39] sm:$0xff] %vm11368_vm5, %v8392_v1  ;;  %v99_v15 = vand.u32 7, %v35_v4  ;;  %v39_v4 = vadd.s32 136, %v8631_v7 }
  0xe3   :  { %7738 = vmatmul.msk.bf16.gmra.mxu0 %vm11365_vm0, %v8282_v10  ;;  %2762 = vst.msk [vmem:[#allocation2 + $0x38] sm:$0xff] %vm11370_vm7, %v2501_v59 }
  0xe4   :  { %v2248_v18 = vadd.f32 %v8639_v11, %v2052_v16  ;;  %7786 = vmatmul.msk.bf16.gmra.mxu1 %vm11365_vm0, %v8282_v10  ;;  %7834 = vmatmul.msk.bf16.gmra.mxu2 %vm11365_vm0, %v8282_v10  ;;  %2826 = vst.msk [vmem:[#allocation2 + $0x31] sm:$0xff] %vm11369_vm9, %v2500_v19  ;;  %v11491_v19 = vmov 0 }
  0xe5   :  { %7882 = vmatmul.msk.bf16.gmra.mxu3 %vm11365_vm0, %v8282_v10  ;;  %v11492_v19 = vsel %vm8946_vm15, 4294967295, %v11491_v19 }
  0xe6   :  { %v2312_v23 = vmax.f32 %v2248_v18, 0.0  ;;  %11493 = vst [vmem:[#allocation10_spill] sm:$0xff] %v11492_v19 }
  0xe7   :  { %v1515_v24 = vpop.f32.mrf.mxu2 }
  0xe8   :  { %v1908_v25 = vpop.f32.mrf.mxu3  ;;  %v8913_v27 = vsel %vm8902_vm13, %v2312_v23, 0.0  ;;  %v1660_v28 = vmax.f32 %v1267_v20, %v1515_v24  ;;  %v795_v30 = vpop.f32.mrf.mxu0  ;;  %v8320_v24 = vld [vmem:[%s11360_s3 + $0x18] sm:$0xff] }
  0xe9   :  { %2635 = vst.msk [vmem:[#allocation2 + $0x48] sm:$0xff] %vm11376_vm2, %v8913_v27  ;;  %v1124_v31 = vpop.f32.mrf.mxu1  ;;  %3049 = vmatpush.bf16.msrb.mxu0 %v8320_v24 }
  0xea   :  { %2699 = vst.msk [vmem:[#allocation2 + $0x41] sm:$0xff] %vm11368_vm5, %v8890_v12  ;;  %v2053_v32 = vmax.f32 %v1660_v28, %v1908_v25  ;;  %v1268_v38 = vmax.f32 %v795_v30, %v1124_v31  ;;  %v8344_v25 = vld [vmem:[%s11360_s3 + $0x158] sm:$0xff]  ;;  %v11499_v28 = vmov 0 }
  0xeb   :  { %2763 = vst.msk [vmem:[#allocation2 + $0x40] sm:$0xff] %vm11370_vm7, %v8392_v1  ;;  %3975 = vmatpush.bf16.msrb.mxu3 %v8344_v25  ;;  %v40_v25 = vadd.s32 144, %v8631_v7 }
  0xec   :  { %2827 = vst.msk [vmem:[#allocation2 + $0x39] sm:$0xff] %vm11369_vm9, %v2501_v59  ;;  %v2249_v33 = vadd.f32 %v8639_v11, %v2053_v32  ;;  %v98_v59 = vand.u32 7, %v34_v51 }
  0xee   :  { %v2313_v36 = vmax.f32 %v2249_v33, 0.0 }
  0xef   :  { %v1517_v39 = vpop.f32.mrf.mxu2 }
  0xf0   :  { %v1910_v40 = vpop.f32.mrf.mxu3  ;;  %v8930_v41 = vsel %vm8923_vm14, %v2313_v36, 0.0  ;;  %v1661_v42 = vmax.f32 %v1268_v38, %v1517_v39  ;;  %v798_v45 = vpop.f32.mrf.mxu0 }
  0xf1   :  { %2636 = vst.msk [vmem:[#allocation2 + $0x50] sm:$0xff] %vm11376_vm2, %v8930_v41  ;;  %v1127_v46 = vpop.f32.mrf.mxu1 }
  0xf2   :  { %2700 = vst.msk [vmem:[#allocation2 + $0x49] sm:$0xff] %vm11368_vm5, %v8913_v27  ;;  %v2054_v47 = vmax.f32 %v1661_v42, %v1910_v40  ;;  %v1269_v50 = vmax.f32 %v798_v45, %v1127_v46  ;;  %v8328_v42 = vld [vmem:[%s11360_s3 + $0x118] sm:$0xff] }
  0xf3   :  { %2764 = vst.msk [vmem:[#allocation2 + $0x48] sm:$0xff] %vm11370_vm7, %v8890_v12  ;;  %7739 = vmatmul.msk.bf16.gmra.mxu0 %vm11365_vm0, %v8283_v43  ;;  %3283 = vmatpush.bf16.msrb.mxu1 %v8328_v42 }
  0xf4   :  { %2828 = vst.msk [vmem:[#allocation2 + $0x41] sm:$0xff] %vm11369_vm9, %v8392_v1  ;;  %v2250_v49 = vadd.f32 %v8639_v11, %v2054_v47  ;;  %7787 = vmatmul.msk.bf16.gmra.mxu1 %vm11365_vm0, %v8283_v43  ;;  %7835 = vmatmul.msk.bf16.gmra.mxu2 %vm11365_vm0, %v8283_v43 }
  0xf5   :  { %7883 = vmatmul.msk.bf16.gmra.mxu3 %vm11365_vm0, %v8283_v43  ;;  %vm8969_vm0 = vcmp.lt.s32.totalorder %v98_v59, 7  ;;  %v11507_v43 = vmov 0 }
  0xf6   :  { %v2314_v52 = vmax.f32 %v2250_v49, 0.0  ;;  %v11495_v3 = vsel %vm8969_vm0, 4294967295, %v11494_v3 }
  0xf7   :  { %v1520_v54 = vpop.f32.mrf.mxu2  ;;  %11496 = vst [vmem:[#allocation11_spill] sm:$0xff] %v11495_v3 }
  0xf8   :  { %v1913_v55 = vpop.f32.mrf.mxu3  ;;  %v8958_v57 = vsel %vm8946_vm15, %v2314_v52, 0.0  ;;  %v1662_v58 = vmax.f32 %v1269_v50, %v1520_v54  ;;  %v800_v60 = vpop.f32.mrf.mxu0  ;;  %v38_v52 = vadd.s32 128, %v8631_v7 }
  0xf9   :  { %2637 = vst.msk [vmem:[#allocation2 + $0x58] sm:$0xff] %vm11376_vm2, %v8958_v57  ;;  %v1129_v61 = vpop.f32.mrf.mxu1 }
  0xfa   :  { %2701 = vst.msk [vmem:[#allocation2 + $0x51] sm:$0xff] %vm11368_vm5, %v8930_v41  ;;  %v2055_v62 = vmax.f32 %v1662_v58, %v1913_v55  ;;  %v1270_v8 = vmax.f32 %v800_v60, %v1129_v61  ;;  %v102_v58 = vand.u32 7, %v38_v52 }
  0xfb   :  { %2765 = vst.msk [vmem:[#allocation2 + $0x50] sm:$0xff] %vm11370_vm7, %v8913_v27 }
  0xfc   :  { %2829 = vst.msk [vmem:[#allocation2 + $0x49] sm:$0xff] %vm11369_vm9, %v8890_v12  ;;  %v2251_v0 = vadd.f32 %v8639_v11, %v2055_v62  ;;  %v8284_v12 = vld [vmem:[%s11361_s0 + $0x78] sm:$0xff] }
  0xfe   :  { %v2315_v5 = vmax.f32 %v2251_v0, 0.0  ;;  %v11519_v0 = vmov 0 }
  0xff   :  { %v1522_v9 = vpop.f32.mrf.mxu2 }
 0x100   :  { %v1915_v10 = vpop.f32.mrf.mxu3  ;;  %v2507_v13 = vsel %vm8969_vm0, %v2315_v5, 0.0  ;;  %v1663_v14 = vmax.f32 %v1270_v8, %v1522_v9  ;;  %v803_v16 = vpop.f32.mrf.mxu0  ;;  %vm11497_vm0 = vcmask 523264  }
 0x101   :  { %2638 = vst.msk [vmem:[#allocation2 + $0x60] sm:$0xff] %vm11376_vm2, %v2507_v13  ;;  %v1132_v18 = vpop.f32.mrf.mxu1  ;;  %vm11498_vm15 = vmmov %vm11497_vm0 }
 0x102   :  { %2702 = vst.msk [vmem:[#allocation2 + $0x59] sm:$0xff] %vm11368_vm5, %v8958_v57  ;;  %v2056_v20 = vmax.f32 %v1663_v14, %v1915_v10  ;;  %v1271_v23 = vmax.f32 %v803_v16, %v1132_v18  ;;  %vm8995_vm5 = vcmp.lt.s32.totalorder %v99_v15, 7  ;;  %v8286_v14 = vld [vmem:[%s11361_s0 + $0x88] sm:$0xff] }
 0x103   :  { %2766 = vst.msk [vmem:[#allocation2 + $0x58] sm:$0xff] %vm11370_vm7, %v8930_v41  ;;  %7740 = vmatmul.msk.bf16.gmra.mxu0 %vm11497_vm0, %v8284_v12  ;;  %v11500_v28 = vsel %vm8995_vm5, 4294967295, %v11499_v28  ;;  %vm11503_vm7 = vmmov %vm11497_vm0 }
 0x104   :  { %2830 = vst.msk [vmem:[#allocation2 + $0x51] sm:$0xff] %vm11369_vm9, %v8913_v27  ;;  %v2252_v22 = vadd.f32 %v8639_v11, %v2056_v20  ;;  %7788 = vmatmul.msk.bf16.gmra.mxu1 %vm11498_vm15, %v8284_v12  ;;  %vm11502_vm9 = vmmov %vm11497_vm0  ;;  %v36_v27 = vadd.s32 112, %v8631_v7  ;;  %vm11504_vm0 = vcmask 785920  }
 0x105   :  { %11501 = vst [vmem:[#allocation12_spill] sm:$0xff] %v11500_v28  ;;  %7836 = vmatmul.msk.bf16.gmra.mxu2 %vm11502_vm9, %v8284_v12  ;;  %7884 = vmatmul.msk.bf16.gmra.mxu3 %vm11503_vm7, %v8284_v12  ;;  %vm11505_vm7 = vcmask 523520   ;;  %vm11506_vm9 = vcmask 261120   ;;  %v103_v12 = vand.u32 7, %v39_v4 }
 0x106   :  { %v2316_v29 = vmax.f32 %v2252_v22, 0.0  ;;  %v100_v35 = vand.u32 7, %v36_v27  ;;  %v11528_v22 = vmov 0 }
 0x107   :  { %v1525_v30 = vpop.f32.mrf.mxu2 }
 0x108   :  { %v1918_v31 = vpop.f32.mrf.mxu3  ;;  %v2508_v32 = vsel %vm8995_vm5, %v2316_v29, 0.0  ;;  %v1664_v33 = vmax.f32 %v1271_v23, %v1525_v30  ;;  %v805_v36 = vpop.f32.mrf.mxu0  ;;  %vm9014_vm15 = vcmp.lt.s32.totalorder %v100_v35, 7  ;;  %vm11512_vm5 = vcmask 523264  }
 0x109   :  { %2639 = vst.msk [vmem:[#allocation2 + $0x68] sm:$0xff] %vm11376_vm2, %v2508_v32  ;;  %v1134_v38 = vpop.f32.mrf.mxu1  ;;  %v11508_v43 = vsel %vm9014_vm15, 4294967295, %v11507_v43  ;;  %vm11513_vm14 = vmmov %vm11512_vm5  ;;  %v104_v35 = vand.u32 7, %v40_v25 }
 0x10a   :  { %2703 = vst.msk [vmem:[#allocation2 + $0x61] sm:$0xff] %vm11504_vm0, %v2507_v13  ;;  %v2057_v39 = vmax.f32 %v1664_v33, %v1918_v31  ;;  %vm11515_vm13 = vmmov %vm11512_vm5 }
 0x10b   :  { %2767 = vst.msk [vmem:[#allocation2 + $0x60] sm:$0xff] %vm11505_vm7, %v8958_v57  ;;  %vm11510_vm7 = vmmov %vm11504_vm0 }
 0x10c   :  { %2831 = vst.msk [vmem:[#allocation2 + $0x59] sm:$0xff] %vm11506_vm9, %v8930_v41  ;;  %v2253_v40 = vadd.f32 %v8639_v11, %v2057_v39  ;;  %v8285_v41 = vld [vmem:[%s11361_s0 + $0x80] sm:$0xff]  ;;  %vm11511_vm9 = vcmask 523520   ;;  %vm11516_vm12 = vmmov %vm11512_vm5  ;;  %v11537_v39 = vmov 0 }
 0x10d   :  { %11509 = vst [vmem:[#allocation13_spill] sm:$0xff] %v11508_v43 }
 0x10e   :  { %v2317_v44 = vmax.f32 %v2253_v40, 0.0  ;;  %v41_v40 = vadd.s32 152, %v8631_v7 }
 0x10f   :  { %v1527_v45 = vpop.f32.mrf.mxu2 }
 0x110   :  { %v1920_v46 = vpop.f32.mrf.mxu3  ;;  %v2509_v47 = vsel %vm9014_vm15, %v2317_v44, 0.0  ;;  %v808_v49 = vpop.f32.mrf.mxu0  ;;  %vm11514_vm15 = vmmov %vm11511_vm9  ;;  %v105_v52 = vand.u32 7, %v41_v40  ;;  %v11562_v40 = vmov 0 }
 0x111   :  { %2640 = vst.msk [vmem:[#allocation2 + $0x70] sm:$0xff] %vm11376_vm2, %v2509_v47  ;;  %v1137_v50 = vpop.f32.mrf.mxu1  ;;  %vm11517_vm2 = vcmask 261120  }
 0x112   :  { %2704 = vst.msk [vmem:[#allocation2 + $0x69] sm:$0xff] %vm11504_vm0, %v2508_v32  ;;  %v1273_v51 = vmax.f32 %v808_v49, %v1137_v50  ;;  %vm11518_vm0 = vmmov %vm11517_vm2 }
 0x113   :  { %2705 = vst.msk [vmem:[#allocation2 + $0x71] sm:$0xff] %vm11510_vm7, %v2509_v47  ;;  %7741 = vmatmul.msk.bf16.gmra.mxu0 %vm11512_vm5, %v8285_v41  ;;  %vm9037_vm5 = vcmp.lt.s32.totalorder %v102_v58, 7  ;;  %v11547_v58 = vmov 0 }
 0x114   :  { %2768 = vst.msk [vmem:[#allocation2 + $0x68] sm:$0xff] %vm11511_vm9, %v2507_v13  ;;  %7789 = vmatmul.msk.bf16.gmra.mxu1 %vm11513_vm14, %v8285_v41  ;;  %v11520_v0 = vsel %vm9037_vm5, 4294967295, %v11519_v0  ;;  %vm11525_vm14 = vmmov %vm11518_vm0 }
 0x115   :  { %2769 = vst.msk [vmem:[#allocation2 + $0x70] sm:$0xff] %vm11514_vm15, %v2508_v32  ;;  %7837 = vmatmul.msk.bf16.gmra.mxu2 %vm11515_vm13, %v8285_v41  ;;  %7885 = vmatmul.msk.bf16.gmra.mxu3 %vm11516_vm12, %v8285_v41  ;;  %vm11523_vm12 = vmmov %vm11510_vm7  ;;  %vm11526_vm15 = vcmask 523264   ;;  %v8287_v41 = vld [vmem:[%s11361_s0 + $0x90] sm:$0xff] }
 0x116   :  { %2832 = vst.msk [vmem:[#allocation2 + $0x61] sm:$0xff] %vm11517_vm2, %v8958_v57  ;;  %vm11522_vm2 = vcmask 1048320   ;;  %vm11524_vm13 = vmmov %vm11511_vm9  ;;  %vm9058_vm9 = vcmp.lt.s32.totalorder %v103_v12, 7  ;;  %v11552_v12 = vmov 0 }
 0x117   :  { %2833 = vst.msk [vmem:[#allocation2 + $0x69] sm:$0xff] %vm11518_vm0, %v2507_v13  ;;  %v1530_v54 = vpop.f32.mrf.mxu2  ;;  %vm11527_vm7 = vmmov %vm11526_vm15  ;;  %v11529_v22 = vsel %vm9058_vm9, 4294967295, %v11528_v22 }
 0x118   :  { %v1923_v55 = vpop.f32.mrf.mxu3  ;;  %v1666_v56 = vmax.f32 %v1273_v51, %v1530_v54  ;;  %v810_v59 = vpop.f32.mrf.mxu0  ;;  %11521 = vst [vmem:[#allocation14_spill] sm:$0xff] %v11520_v0  ;;  %vm11531_vm0 = vmmov %vm11527_vm7 }
 0x119   :  { %v1139_v60 = vpop.f32.mrf.mxu1  ;;  %11530 = vst [vmem:[#allocation15_spill] sm:$0xff] %v11529_v22 }
 0x11a   :  { %v2059_v61 = vmax.f32 %v1666_v56, %v1923_v55  ;;  %v1274_v8 = vmax.f32 %v810_v59, %v1139_v60  ;;  %v42_v59 = vadd.s32 160, %v8631_v7 }
 0x11c   :  { %v2255_v62 = vadd.f32 %v8639_v11, %v2059_v61 }
 0x11e   :  { %v2319_v5 = vmax.f32 %v2255_v62, 0.0 }
 0x11f   :  { %v1532_v57 = vpop.f32.mrf.mxu2 }
 0x120   :  { %v1925_v9 = vpop.f32.mrf.mxu3  ;;  %v9044_v10 = vsel %vm9037_vm5, %v2319_v5, 0.0  ;;  %v1667_v13 = vmax.f32 %v1274_v8, %v1532_v57  ;;  %v813_v15 = vpop.f32.mrf.mxu0 }
 0x121   :  { %2642 = vst.msk [vmem:[#allocation2 + $0x80] sm:$0xff] %vm11522_vm2, %v9044_v10  ;;  %v1142_v16 = vpop.f32.mrf.mxu1  ;;  %vm11532_vm2 = vmmov %vm11531_vm0 }
 0x122   :  { %2706 = vst.msk [vmem:[#allocation2 + $0x79] sm:$0xff] %vm11523_vm12, %v8392_v1  ;;  %v2060_v18 = vmax.f32 %v1667_v13, %v1925_v9  ;;  %v1275_v23 = vmax.f32 %v813_v15, %v1142_v16  ;;  %vm11533_vm12 = vcmask 1048320   ;;  %v106_v9 = vand.u32 7, %v42_v59 }
 0x123   :  { %2770 = vst.msk [vmem:[#allocation2 + $0x78] sm:$0xff] %vm11524_vm13, %v2509_v47  ;;  %7742 = vmatmul.msk.bf16.gmra.mxu0 %vm11526_vm15, %v8286_v14  ;;  %vm11534_vm13 = vcmask 785920   ;;  %vm11536_vm15 = vcmask 261120   ;;  %v43_v15 = vadd.s32 168, %v8631_v7 }
 0x124   :  { %2834 = vst.msk [vmem:[#allocation2 + $0x71] sm:$0xff] %vm11525_vm14, %v2508_v32  ;;  %v2256_v20 = vadd.f32 %v8639_v11, %v2060_v18  ;;  %7790 = vmatmul.msk.bf16.gmra.mxu1 %vm11527_vm7, %v8286_v14  ;;  %vm11535_vm14 = vcmask 523520   ;;  %vm9077_vm7 = vcmp.lt.s32.totalorder %v104_v35, 7 }
 0x125   :  { %7838 = vmatmul.msk.bf16.gmra.mxu2 %vm11531_vm0, %v8286_v14  ;;  %7886 = vmatmul.msk.bf16.gmra.mxu3 %vm11532_vm2, %v8286_v14  ;;  %v11538_v39 = vsel %vm9077_vm7, 4294967295, %v11537_v39  ;;  %vm11540_vm0 = vmmov %vm11533_vm12 }
 0x126   :  { %v2320_v24 = vmax.f32 %v2256_v20, 0.0  ;;  %11539 = vst [vmem:[#allocation16_spill] sm:$0xff] %v11538_v39  ;;  %vm11541_vm2 = vmmov %vm11534_vm13 }
 0x127   :  { %v1535_v29 = vpop.f32.mrf.mxu2 }
 0x128   :  { %v9067_v27 = vsel %vm9058_vm9, %v2320_v24, 0.0  ;;  %v1928_v30 = vpop.f32.mrf.mxu3  ;;  %v1668_v31 = vmax.f32 %v1275_v23, %v1535_v29  ;;  %v815_v32 = vpop.f32.mrf.mxu0  ;;  %vm9102_vm9 = vcmp.lt.s32.totalorder %v105_v52, 7  ;;  %v8288_v24 = vld [vmem:[%s11361_s0 + $0x98] sm:$0xff] }
 0x129   :  { %2643 = vst.msk [vmem:[#allocation2 + $0x88] sm:$0xff] %vm11533_vm12, %v9067_v27  ;;  %v1144_v33 = vpop.f32.mrf.mxu1  ;;  %vm11542_vm12 = vmmov %vm11535_vm14  ;;  %v11548_v58 = vsel %vm9102_vm9, 4294967295, %v11547_v58 }
 0x12a   :  { %2707 = vst.msk [vmem:[#allocation2 + $0x81] sm:$0xff] %vm11534_vm13, %v9044_v10  ;;  %v2061_v36 = vmax.f32 %v1668_v31, %v1928_v30  ;;  %v1276_v44 = vmax.f32 %v815_v32, %v1144_v33  ;;  %vm11543_vm13 = vcmask 523264   ;;  %v107_v31 = vand.u32 7, %v43_v15 }
 0x12b   :  { %2771 = vst.msk [vmem:[#allocation2 + $0x80] sm:$0xff] %vm11535_vm14, %v8392_v1  ;;  %vm11544_vm14 = vmmov %vm11543_vm13 }
 0x12c   :  { %2835 = vst.msk [vmem:[#allocation2 + $0x79] sm:$0xff] %vm11536_vm15, %v2509_v47  ;;  %v2257_v38 = vadd.f32 %v8639_v11, %v2061_v36  ;;  %v8319_v36 = vld [vmem:[%s11360_s3 + $0x10] sm:$0xff] }
 0x12d   :  { %11549 = vst [vmem:[#allocation17_spill] sm:$0xff] %v11548_v58  ;;  %3050 = vmatpush.bf16.msrb.mxu0 %v8319_v36 }
 0x12e   :  { %v2321_v42 = vmax.f32 %v2257_v38, 0.0  ;;  %v8343_v38 = vld [vmem:[%s11360_s3 + $0x150] sm:$0xff] }
 0x12f   :  { %v1537_v45 = vpop.f32.mrf.mxu2  ;;  %3976 = vmatpush.bf16.msrb.mxu3 %v8343_v38 }
 0x130   :  { %v1930_v46 = vpop.f32.mrf.mxu3  ;;  %v9087_v49 = vsel %vm9077_vm7, %v2321_v42, 0.0  ;;  %v1669_v47 = vmax.f32 %v1276_v44, %v1537_v45  ;;  %v818_v50 = vpop.f32.mrf.mxu0  ;;  %vm11545_vm7 = vmmov %vm11543_vm13 }
 0x131   :  { %v1147_v51 = vpop.f32.mrf.mxu1  ;;  %2644 = vst.msk [vmem:[#allocation2 + $0x90] sm:$0xff] %vm11540_vm0, %v9087_v49  ;;  %vm11546_vm0 = vmmov %vm11545_vm7 }
 0x132   :  { %2708 = vst.msk [vmem:[#allocation2 + $0x89] sm:$0xff] %vm11541_vm2, %v9067_v27  ;;  %v2062_v54 = vmax.f32 %v1669_v47, %v1930_v46  ;;  %v1277_v56 = vmax.f32 %v818_v50, %v1147_v51 }
 0x133   :  { %2772 = vst.msk [vmem:[#allocation2 + $0x88] sm:$0xff] %vm11542_vm12, %v9044_v10  ;;  %7743 = vmatmul.msk.bf16.gmra.mxu0 %vm11543_vm13, %v8287_v41  ;;  %vm11551_vm13 = vmmov %vm11536_vm15 }
 0x134   :  { %7791 = vmatmul.msk.bf16.gmra.mxu1 %vm11544_vm14, %v8287_v41  ;;  %2836 = vst.msk [vmem:[#allocation2 + $0x81] sm:$0xff] %vm11536_vm15, %v8392_v1  ;;  %v2258_v55 = vadd.f32 %v8639_v11, %v2062_v54  ;;  %v8335_v1 = vld [vmem:[%s11360_s3 + $0x50] sm:$0xff]  ;;  %vm9123_vm14 = vcmp.lt.s32.totalorder %v106_v9, 7 }
 0x135   :  { %7839 = vmatmul.msk.bf16.gmra.mxu2 %vm11545_vm7, %v8287_v41  ;;  %7887 = vmatmul.msk.bf16.gmra.mxu3 %vm11546_vm0, %v8287_v41  ;;  %vm11550_vm7 = vcmask 1048320   ;;  %v11553_v12 = vsel %vm9123_vm14, 4294967295, %v11552_v12  ;;  %vm11556_vm0 = vmmov %vm11541_vm2 }
 0x136   :  { %v2322_v60 = vmax.f32 %v2258_v55, 0.0  ;;  %3742 = vmatpush.bf16.msrb.mxu2 %v8335_v1  ;;  %11554 = vst [vmem:[#allocation18_spill] sm:$0xff] %v11553_v12  ;;  %vm11555_vm15 = vmmov %vm11550_vm7  ;;  %v8327_v55 = vld [vmem:[%s11360_s3 + $0x110] sm:$0xff] }
 0x137   :  { %v1540_v61 = vpop.f32.mrf.mxu2  ;;  %3284 = vmatpush.bf16.msrb.mxu1 %v8327_v55 }
 0x138   :  { %v1933_v62 = vpop.f32.mrf.mxu3  ;;  %v9112_v4 = vsel %vm9102_vm9, %v2322_v60, 0.0  ;;  %v1670_v5 = vmax.f32 %v1277_v56, %v1540_v61  ;;  %v820_v8 = vpop.f32.mrf.mxu0  ;;  %v11569_v56 = vmov 0 }
 0x139   :  { %v1149_v57 = vpop.f32.mrf.mxu1  ;;  %2645 = vst.msk [vmem:[#allocation2 + $0x98] sm:$0xff] %vm11550_vm7, %v9112_v4  ;;  %vm11557_vm7 = vmmov %vm11542_vm12 }
 0x13a   :  { %2709 = vst.msk [vmem:[#allocation2 + $0x91] sm:$0xff] %vm11541_vm2, %v9087_v49  ;;  %v2063_v13 = vmax.f32 %v1670_v5, %v1933_v62  ;;  %v1278_v18 = vmax.f32 %v820_v8, %v1149_v57  ;;  %vm11558_vm2 = vcmask 523264   ;;  %v8289_v62 = vld [vmem:[%s11361_s0 + $0xa0] sm:$0xff]  ;;  %v46_v8 = vadd.s32 192, %v8631_v7 }
 0x13b   :  { %2773 = vst.msk [vmem:[#allocation2 + $0x90] sm:$0xff] %vm11542_vm12, %v9067_v27  ;;  %vm11559_vm12 = vmmov %vm11558_vm2 }
 0x13c   :  { %2837 = vst.msk [vmem:[#allocation2 + $0x89] sm:$0xff] %vm11551_vm13, %v9044_v10  ;;  %v2259_v14 = vadd.f32 %v8639_v11, %v2063_v13 }
 0x13e   :  { %v2323_v16 = vmax.f32 %v2259_v14, 0.0 }
 0x13f   :  { %v1542_v20 = vpop.f32.mrf.mxu2 }
 0x140   :  { %v1935_v23 = vpop.f32.mrf.mxu3  ;;  %v2515_v25 = vsel %vm9123_vm14, %v2323_v16, 0.0  ;;  %v1671_v10 = vmax.f32 %v1278_v18, %v1542_v20  ;;  %v823_v29 = vpop.f32.mrf.mxu0  ;;  %vm11560_vm14 = vmmov %vm11558_vm2  ;;  %v110_v16 = vand.u32 7, %v46_v8  ;;  %v9197_v20 = vld [vmem:[%s11362_s2] ss:$0 sm:$0xff] }
 0x141   :  { %v1152_v30 = vpop.f32.mrf.mxu1  ;;  %2646 = vst.msk [vmem:[#allocation2 + $0xa0] sm:$0xff] %vm11555_vm15, %v2515_v25  ;;  %vm11561_vm15 = vmmov %vm11558_vm2 }
 0x142   :  { %2710 = vst.msk [vmem:[#allocation2 + $0x99] sm:$0xff] %vm11556_vm0, %v9112_v4  ;;  %v2064_v32 = vmax.f32 %v1671_v10, %v1935_v23  ;;  %v1279_v35 = vmax.f32 %v823_v29, %v1152_v30  ;;  %vm9151_vm0 = vcmp.lt.s32.totalorder %v107_v31, 7  ;;  %v8290_v31 = vld [vmem:[%s11361_s0 + $0xa8] sm:$0xff] }
 0x143   :  { %2774 = vst.msk [vmem:[#allocation2 + $0x98] sm:$0xff] %vm11557_vm7, %v9087_v49  ;;  %7744 = vmatmul.msk.bf16.gmra.mxu0 %vm11558_vm2, %v8288_v24  ;;  %v11563_v40 = vsel %vm9151_vm0, 4294967295, %v11562_v40  ;;  %vm11566_vm7 = vcmask 785920   ;;  %vm11567_vm2 = vcmask 523520  }
 0x144   :  { %7792 = vmatmul.msk.bf16.gmra.mxu1 %vm11559_vm12, %v8288_v24  ;;  %2838 = vst.msk [vmem:[#allocation2 + $0x91] sm:$0xff] %vm11551_vm13, %v9067_v27  ;;  %v2260_v33 = vadd.f32 %v8639_v11, %v2064_v32  ;;  %v44_v27 = vadd.s32 176, %v8631_v7  ;;  %vm11568_vm12 = vmmov %vm11551_vm13 }
 0x145   :  { %7840 = vmatmul.msk.bf16.gmra.mxu2 %vm11560_vm14, %v8288_v24  ;;  %7888 = vmatmul.msk.bf16.gmra.mxu3 %vm11561_vm15, %v8288_v24  ;;  %11564 = vst [vmem:[#allocation19_spill] sm:$0xff] %v11563_v40  ;;  %vm11565_vm14 = vcmask 1048320   ;;  %v11582_v24 = vmov 0 }
 0x146   :  { %v2324_v42 = vmax.f32 %v2260_v33, 0.0  ;;  %v108_v51 = vand.u32 7, %v44_v27  ;;  %vm11572_vm15 = vmmov %vm11565_vm14  ;;  %v9214_v27 = vld [vmem:[#allocation2 + $0xc8] sm:$0xff] }
 0x147   :  { %v1545_v44 = vpop.f32.mrf.mxu2 }
 0x148   :  { %v1938_v45 = vpop.f32.mrf.mxu3  ;;  %v2516_v46 = vsel %vm9151_vm0, %v2324_v42, 0.0  ;;  %v1672_v41 = vmax.f32 %v1279_v35, %v1545_v44  ;;  %v825_v47 = vpop.f32.mrf.mxu0  ;;  %vm9168_vm13 = vcmp.lt.s32.totalorder %v108_v51, 7  ;;  %vm11576_vm0 = vcmask 523520  }
 0x149   :  { %v1154_v50 = vpop.f32.mrf.mxu1  ;;  %2647 = vst.msk [vmem:[#allocation2 + $0xa8] sm:$0xff] %vm11565_vm14, %v2516_v46  ;;  %v11570_v56 = vsel %vm9168_vm13, 4294967295, %v11569_v56  ;;  %vm11573_vm14 = vmmov %vm11566_vm7  ;;  %v48_v47 = vadd.s32 208, %v8631_v7 }
 0x14a   :  { %2711 = vst.msk [vmem:[#allocation2 + $0xa1] sm:$0xff] %vm11566_vm7, %v2515_v25  ;;  %v2065_v52 = vmax.f32 %v1672_v41, %v1938_v45  ;;  %vm11579_vm5 = vmmov %vm11576_vm0  ;;  %v11592_v41 = vmov 0 }
 0x14b   :  { %2775 = vst.msk [vmem:[#allocation2 + $0xa0] sm:$0xff] %vm11567_vm2, %v9112_v4  ;;  %vm11574_vm2 = vcmask 523264  }
 0x14c   :  { %2839 = vst.msk [vmem:[#allocation2 + $0x99] sm:$0xff] %vm11568_vm12, %v9087_v49  ;;  %v2261_v54 = vadd.f32 %v8639_v11, %v2065_v52  ;;  %vm11575_vm12 = vmmov %vm11574_vm2 }
 0x14d   :  { %11571 = vst [vmem:[#allocation20_spill] sm:$0xff] %v11570_v56  ;;  %vm11577_vm9 = vmmov %vm11574_vm2 }
 0x14e   :  { %v2325_v59 = vmax.f32 %v2261_v54, 0.0 }
 0x14f   :  { %v1547_v60 = vpop.f32.mrf.mxu2 }
 0x150   :  { %v1940_v61 = vpop.f32.mrf.mxu3  ;;  %v9177_v49 = vsel %vm9168_vm13, %v2325_v59, 0.0  ;;  %v828_v11 = vpop.f32.mrf.mxu0  ;;  %vm11578_vm13 = vmmov %vm11574_vm2  ;;  %v112_v60 = vand.u32 7, %v48_v47 }
 0x151   :  { %v1157_v1 = vpop.f32.mrf.mxu1  ;;  %2648 = vst.msk [vmem:[#allocation2 + $0xb0] sm:$0xff] %vm11572_vm15, %v9177_v49  ;;  %vm11580_vm15 = vcmask 261120  }
 0x152   :  { %2712 = vst.msk [vmem:[#allocation2 + $0xa9] sm:$0xff] %vm11573_vm14, %v2516_v46  ;;  %v1281_v5 = vmax.f32 %v828_v11, %v1157_v1  ;;  %vm11581_vm14 = vmmov %vm11580_vm15  ;;  %v11599_v11 = vmov 0  ;;  %v49_v1 = vadd.s32 216, %v8631_v7 }
 0x153   :  { %2713 = vst.msk [vmem:[#allocation2 + $0xb1] sm:$0xff] %vm11566_vm7, %v9177_v49  ;;  %7745 = vmatmul.msk.bf16.gmra.mxu0 %vm11574_vm2, %v8289_v62 }
 0x154   :  { %7793 = vmatmul.msk.bf16.gmra.mxu1 %vm11575_vm12, %v8289_v62  ;;  %2776 = vst.msk [vmem:[#allocation2 + $0xa8] sm:$0xff] %vm11576_vm0, %v2515_v25  ;;  %vm11586_vm0 = vmmov %vm11566_vm7 }
 0x155   :  { %7841 = vmatmul.msk.bf16.gmra.mxu2 %vm11577_vm9, %v8289_v62  ;;  %7889 = vmatmul.msk.bf16.gmra.mxu3 %vm11578_vm13, %v8289_v62  ;;  %2777 = vst.msk [vmem:[#allocation2 + $0xb0] sm:$0xff] %vm11579_vm5, %v2516_v46  ;;  %vm9200_vm5 = vcmp.lt.s32.totalorder %v110_v16, 7  ;;  %vm11585_vm9 = vcmask 1048320   ;;  %vm11587_vm13 = vcmask 523520   ;;  %vm11588_vm7 = vmmov %vm11574_vm2 }
 0x156   :  { %2840 = vst.msk [vmem:[#allocation2 + $0xa1] sm:$0xff] %vm11580_vm15, %v9112_v4  ;;  %v11583_v24 = vsel %vm9200_vm5, 4294967295, %v11582_v24  ;;  %v47_v4 = vadd.s32 200, %v8631_v7  ;;  %vm11589_vm12 = vmmov %vm11581_vm14 }
 0x157   :  { %2841 = vst.msk [vmem:[#allocation2 + $0xa9] sm:$0xff] %vm11581_vm14, %v2515_v25  ;;  %v1550_v57 = vpop.f32.mrf.mxu2  ;;  %vm11590_vm15 = vmmov %vm11574_vm2 }
 0x158   :  { %v1943_v9 = vpop.f32.mrf.mxu3  ;;  %v1674_v13 = vmax.f32 %v1281_v5, %v1550_v57  ;;  %v830_v14 = vpop.f32.mrf.mxu0  ;;  %11584 = vst [vmem:[#allocation21_spill] sm:$0xff] %v11583_v24  ;;  %v111_v38 = vand.u32 7, %v47_v4  ;;  %vm11591_vm14 = vmmov %vm11574_vm2 }
 0x159   :  { %v1159_v15 = vpop.f32.mrf.mxu1 }
 0x15a   :  { %v2067_v18 = vmax.f32 %v1674_v13, %v1943_v9  ;;  %v1282_v10 = vmax.f32 %v830_v14, %v1159_v15  ;;  %v8291_v13 = vld [vmem:[%s11361_s0 + $0xb0] sm:$0xff] }
 0x15c   :  { %v2263_v23 = vadd.f32 %v9197_v20, %v2067_v18  ;;  %v113_v18 = vand.u32 7, %v49_v1 }
 0x15e   :  { %v2327_v25 = vmax.f32 %v2263_v23, 0.0 }
 0x15f   :  { %v1552_v29 = vpop.f32.mrf.mxu2 }
 0x160   :  { %v1945_v30 = vpop.f32.mrf.mxu3  ;;  %v9210_v32 = vsel %vm9200_vm5, %v2327_v25, 0.0  ;;  %v1675_v33 = vmax.f32 %v1282_v10, %v1552_v29  ;;  %v833_v35 = vpop.f32.mrf.mxu0  ;;  %v11609_v10 = vmov 0  ;;  %v50_v29 = vadd.s32 224, %v8631_v7 }
 0x161   :  { %v1162_v36 = vpop.f32.mrf.mxu1  ;;  %2650 = vst.msk [vmem:[#allocation2 + $0xc0] sm:$0xff] %vm11585_vm9, %v9210_v32  ;;  %vm9226_vm9 = vcmp.lt.s32.totalorder %v111_v38, 7 }
 0x162   :  { %2714 = vst.msk [vmem:[#allocation2 + $0xb9] sm:$0xff] %vm11586_vm0, %v9214_v27  ;;  %v2068_v42 = vmax.f32 %v1675_v33, %v1945_v30  ;;  %v1283_v45 = vmax.f32 %v833_v35, %v1162_v36  ;;  %v11593_v41 = vsel %vm9226_vm9, 4294967295, %v11592_v41  ;;  %vm11595_vm0 = vcmask 1048320   ;;  %v8334_v35 = vld [vmem:[%s11360_s3 + $0x48] sm:$0xff] }
 0x163   :  { %2778 = vst.msk [vmem:[#allocation2 + $0xb8] sm:$0xff] %vm11587_vm13, %v9177_v49  ;;  %7746 = vmatmul.msk.bf16.gmra.mxu0 %vm11588_vm7, %v8290_v31  ;;  %vm11596_vm13 = vcmask 785920   ;;  %vm11597_vm7 = vcmask 523520   ;;  %3743 = vmatpush.bf16.msrb.mxu2 %v8334_v35 }
 0x164   :  { %7794 = vmatmul.msk.bf16.gmra.mxu1 %vm11574_vm2, %v8290_v31  ;;  %2842 = vst.msk [vmem:[#allocation2 + $0xb1] sm:$0xff] %vm11589_vm12, %v2516_v46  ;;  %v2264_v44 = vadd.f32 %v9197_v20, %v2068_v42  ;;  %vm11598_vm2 = vmmov %vm11589_vm12  ;;  %vm9244_vm12 = vcmp.lt.s32.totalorder %v112_v60, 7 }
 0x165   :  { %7842 = vmatmul.msk.bf16.gmra.mxu2 %vm11590_vm15, %v8290_v31  ;;  %7890 = vmatmul.msk.bf16.gmra.mxu3 %vm11591_vm14, %v8290_v31  ;;  %11594 = vst [vmem:[#allocation22_spill] sm:$0xff] %v11593_v41  ;;  %v11600_v11 = vsel %vm9244_vm12, 4294967295, %v11599_v11  ;;  %vm11602_vm15 = vmmov %vm11595_vm0 }
 0x166   :  { %v2328_v50 = vmax.f32 %v2264_v44, 0.0  ;;  %11601 = vst [vmem:[#allocation23_spill] sm:$0xff] %v11600_v11  ;;  %vm11603_vm14 = vmmov %vm11596_vm13 }
 0x167   :  { %v1555_v51 = vpop.f32.mrf.mxu2 }
 0x168   :  { %v1948_v52 = vpop.f32.mrf.mxu3  ;;  %v9233_v54 = vsel %vm9226_vm9, %v2328_v50, 0.0  ;;  %v1676_v46 = vmax.f32 %v1283_v45, %v1555_v51  ;;  %v835_v55 = vpop.f32.mrf.mxu0  ;;  %vm9269_vm9 = vcmp.lt.s32.totalorder %v113_v18, 7  ;;  %v114_v45 = vand.u32 7, %v50_v29 }
 0x169   :  { %v1164_v59 = vpop.f32.mrf.mxu1  ;;  %2651 = vst.msk [vmem:[#allocation2 + $0xc8] sm:$0xff] %vm11595_vm0, %v9233_v54  ;;  %vm11604_vm0 = vmmov %vm11597_vm7  ;;  %v11610_v10 = vsel %vm9269_vm9, 4294967295, %v11609_v10  ;;  %v11614_v51 = vmov 0 }
 0x16a   :  { %2715 = vst.msk [vmem:[#allocation2 + $0xc1] sm:$0xff] %vm11596_vm13, %v9210_v32  ;;  %v2069_v61 = vmax.f32 %v1676_v46, %v1948_v52  ;;  %v1284_v8 = vmax.f32 %v835_v55, %v1164_v59  ;;  %vm11605_vm13 = vcmask 523264   ;;  %v51_v52 = vadd.s32 232, %v8631_v7 }
 0x16b   :  { %2779 = vst.msk [vmem:[#allocation2 + $0xc0] sm:$0xff] %vm11597_vm7, %v9214_v27  ;;  %vm11606_vm7 = vmmov %vm11605_vm13 }
 0x16c   :  { %2843 = vst.msk [vmem:[#allocation2 + $0xb9] sm:$0xff] %vm11598_vm2, %v9177_v49  ;;  %v2265_v62 = vadd.f32 %v9197_v20, %v2069_v61  ;;  %v8292_v61 = vld [vmem:[%s11361_s0 + $0xb8] sm:$0xff] }
 0x16d   :  { %11611 = vst [vmem:[#allocation24_spill] sm:$0xff] %v11610_v10 }
 0x16e   :  { %v2329_v5 = vmax.f32 %v2265_v62, 0.0 }
 0x16f   :  { %v1557_v57 = vpop.f32.mrf.mxu2 }
 0x170   :  { %v1950_v9 = vpop.f32.mrf.mxu3  ;;  %v9254_v14 = vsel %vm9244_vm12, %v2329_v5, 0.0  ;;  %v1677_v49 = vmax.f32 %v1284_v8, %v1557_v57  ;;  %v838_v15 = vpop.f32.mrf.mxu0  ;;  %vm11607_vm12 = vmmov %vm11606_vm7  ;;  %v115_v8 = vand.u32 7, %v51_v52  ;;  %v8293_v52 = vld [vmem:[%s11361_s0 + $0xc0] sm:$0xff] }
 0x171   :  { %v1167_v16 = vpop.f32.mrf.mxu1  ;;  %2652 = vst.msk [vmem:[#allocation2 + $0xd0] sm:$0xff] %vm11602_vm15, %v9254_v14  ;;  %vm11608_vm15 = vmmov %vm11606_vm7 }
 0x172   :  { %2716 = vst.msk [vmem:[#allocation2 + $0xc9] sm:$0xff] %vm11603_vm14, %v9233_v54  ;;  %v2070_v23 = vmax.f32 %v1677_v49, %v1950_v9  ;;  %v1285_v25 = vmax.f32 %v838_v15, %v1167_v16  ;;  %v8318_v49 = vld [vmem:[%s11360_s3 + $0x8] sm:$0xff]  ;;  %v11624_v16 = vmov 0 }
 0x173   :  { %2780 = vst.msk [vmem:[#allocation2 + $0xc8] sm:$0xff] %vm11604_vm0, %v9210_v32  ;;  %7747 = vmatmul.msk.bf16.gmra.mxu0 %vm11605_vm13, %v8291_v13  ;;  %vm11613_vm13 = vmmov %vm11598_vm2  ;;  %v8342_v15 = vld [vmem:[%s11360_s3 + $0x148] sm:$0xff] }
 0x174   :  { %7795 = vmatmul.msk.bf16.gmra.mxu1 %vm11606_vm7, %v8291_v13  ;;  %2844 = vst.msk [vmem:[#allocation2 + $0xc1] sm:$0xff] %vm11598_vm2, %v9214_v27  ;;  %v2266_v4 = vadd.f32 %v9197_v20, %v2070_v23  ;;  %vm9290_vm7 = vcmp.lt.s32.totalorder %v114_v45, 7  ;;  %3051 = vmatpush.bf16.msrb.mxu0 %v8318_v49  ;;  %v11645_v49 = vmov 0 }
 0x175   :  { %7843 = vmatmul.msk.bf16.gmra.mxu2 %vm11607_vm12, %v8291_v13  ;;  %7891 = vmatmul.msk.bf16.gmra.mxu3 %vm11608_vm15, %v8291_v13  ;;  %vm11612_vm12 = vcmask 1048320   ;;  %v11615_v51 = vsel %vm9290_vm7, 4294967295, %v11614_v51  ;;  %vm11618_vm15 = vmmov %vm11603_vm14 }
 0x176   :  { %v2330_v30 = vmax.f32 %v2266_v4, 0.0  ;;  %11616 = vst [vmem:[#allocation25_spill] sm:$0xff] %v11615_v51  ;;  %vm11617_vm2 = vmmov %vm11612_vm12  ;;  %3977 = vmatpush.bf16.msrb.mxu3 %v8342_v15  ;;  %v55_v15 = vadd.s32 264, %v8631_v7 }
 0x177   :  { %v1560_v31 = vpop.f32.mrf.mxu2 }
 0x178   :  { %v1953_v33 = vpop.f32.mrf.mxu3  ;;  %v9279_v36 = vsel %vm9269_vm9, %v2330_v30, 0.0  ;;  %v1678_v38 = vmax.f32 %v1285_v25, %v1560_v31  ;;  %v840_v42 = vpop.f32.mrf.mxu0 }
 0x179   :  { %v1169_v44 = vpop.f32.mrf.mxu1  ;;  %2653 = vst.msk [vmem:[#allocation2 + $0xd8] sm:$0xff] %vm11612_vm12, %v9279_v36  ;;  %vm11619_vm12 = vmmov %vm11604_vm0 }
 0x17a   :  { %2717 = vst.msk [vmem:[#allocation2 + $0xd1] sm:$0xff] %vm11603_vm14, %v9254_v14  ;;  %v2071_v47 = vmax.f32 %v1678_v38, %v1953_v33  ;;  %v1286_v55 = vmax.f32 %v840_v42, %v1169_v44  ;;  %vm11620_vm14 = vcmask 523264   ;;  %v8326_v42 = vld [vmem:[%s11360_s3 + $0x108] sm:$0xff]  ;;  %v11631_v44 = vmov 0 }
 0x17b   :  { %2781 = vst.msk [vmem:[#allocation2 + $0xd0] sm:$0xff] %vm11604_vm0, %v9233_v54  ;;  %vm11621_vm0 = vmmov %vm11620_vm14  ;;  %3285 = vmatpush.bf16.msrb.mxu1 %v8326_v42 }
 0x17c   :  { %2845 = vst.msk [vmem:[#allocation2 + $0xc9] sm:$0xff] %vm11613_vm13, %v9210_v32  ;;  %v2267_v50 = vadd.f32 %v9197_v20, %v2071_v47 }
 0x17e   :  { %v2331_v46 = vmax.f32 %v2267_v50, 0.0 }
 0x17f   :  { %v1562_v59 = vpop.f32.mrf.mxu2 }
 0x180   :  { %v1955_v60 = vpop.f32.mrf.mxu3  ;;  %v2523_v62 = vsel %vm9290_vm7, %v2331_v46, 0.0  ;;  %v1679_v32 = vmax.f32 %v1286_v55, %v1562_v59  ;;  %v843_v1 = vpop.f32.mrf.mxu0  ;;  %vm11622_vm7 = vmmov %vm11621_vm0 }
 0x181   :  { %v1172_v5 = vpop.f32.mrf.mxu1  ;;  %2654 = vst.msk [vmem:[#allocation2 + $0xe0] sm:$0xff] %vm11617_vm2, %v2523_v62  ;;  %vm11623_vm2 = vmmov %vm11621_vm0 }
 0x182   :  { %2718 = vst.msk [vmem:[#allocation2 + $0xd9] sm:$0xff] %vm11618_vm15, %v9279_v36  ;;  %v2072_v57 = vmax.f32 %v1679_v32, %v1955_v60  ;;  %v1287_v13 = vmax.f32 %v843_v1, %v1172_v5  ;;  %vm9318_vm15 = vcmp.lt.s32.totalorder %v115_v8, 7  ;;  %v54_v60 = vadd.s32 256, %v8631_v7 }
 0x183   :  { %2782 = vst.msk [vmem:[#allocation2 + $0xd8] sm:$0xff] %vm11619_vm12, %v9254_v14  ;;  %7748 = vmatmul.msk.bf16.gmra.mxu0 %vm11620_vm14, %v8292_v61  ;;  %v11625_v16 = vsel %vm9318_vm15, 4294967295, %v11624_v16  ;;  %vm11628_vm12 = vcmask 785920   ;;  %vm11629_vm14 = vcmask 523520  }
 0x184   :  { %7796 = vmatmul.msk.bf16.gmra.mxu1 %vm11621_vm0, %v8292_v61  ;;  %2846 = vst.msk [vmem:[#allocation2 + $0xd1] sm:$0xff] %vm11613_vm13, %v9233_v54  ;;  %v2268_v9 = vadd.f32 %v9197_v20, %v2072_v57  ;;  %v52_v54 = vadd.s32 240, %v8631_v7  ;;  %vm11630_vm0 = vmmov %vm11613_vm13  ;;  %v118_v57 = vand.u32 7, %v54_v60 }
 0x185   :  { %7844 = vmatmul.msk.bf16.gmra.mxu2 %vm11622_vm7, %v8292_v61  ;;  %7892 = vmatmul.msk.bf16.gmra.mxu3 %vm11623_vm2, %v8292_v61  ;;  %11626 = vst [vmem:[#allocation26_spill] sm:$0xff] %v11625_v16  ;;  %vm11627_vm7 = vcmask 1048320  }
 0x186   :  { %v2332_v18 = vmax.f32 %v2268_v9, 0.0  ;;  %v116_v33 = vand.u32 7, %v52_v54  ;;  %vm11634_vm2 = vmmov %vm11627_vm7 }
 0x188   :  { %v1565_v23 = vpop.f32.mrf.mxu2  ;;  %v1958_v4 = vpop.f32.mrf.mxu3  ;;  %v2524_v25 = vsel %vm9318_vm15, %v2332_v18, 0.0  ;;  %vm9335_vm13 = vcmp.lt.s32.totalorder %v116_v33, 7  ;;  %vm11639_vm15 = vcmask 523520   ;;  %v119_v33 = vand.u32 7, %v55_v15 }
 0x189   :  { %v1680_v29 = vmax.f32 %v1287_v13, %v1565_v23  ;;  %v845_v30 = vpop.f32.mrf.mxu0  ;;  %v1174_v31 = vpop.f32.mrf.mxu1  ;;  %2655 = vst.msk [vmem:[#allocation2 + $0xe8] sm:$0xff] %vm11627_vm7, %v2524_v25  ;;  %v11632_v44 = vsel %vm9335_vm13, 4294967295, %v11631_v44  ;;  %vm11635_vm7 = vmmov %vm11628_vm12 }
 0x18a   :  { %2719 = vst.msk [vmem:[#allocation2 + $0xe1] sm:$0xff] %vm11628_vm12, %v2523_v62  ;;  %vm11636_vm12 = vmmov %vm11635_vm7 }
 0x18b   :  { %v2073_v35 = vmax.f32 %v1680_v29, %v1958_v4  ;;  %2783 = vst.msk [vmem:[#allocation2 + $0xe0] sm:$0xff] %vm11629_vm14, %v9279_v36  ;;  %vm11637_vm14 = vcmask 523264  }
 0x18c   :  { %2847 = vst.msk [vmem:[#allocation2 + $0xd9] sm:$0xff] %vm11630_vm0, %v9254_v14  ;;  %vm11638_vm0 = vmmov %vm11637_vm14 }
 0x18d   :  { %v2269_v38 = vadd.f32 %v9197_v20, %v2073_v35  ;;  %11633 = vst [vmem:[#allocation27_spill] sm:$0xff] %v11632_v44  ;;  %vm11640_vm9 = vmmov %vm11638_vm0 }
 0x18e   :  { %vm11641_vm5 = vmmov %vm11638_vm0 }
 0x18f   :  { %v2333_v45 = vmax.f32 %v2269_v38, 0.0 }
 0x190   :  { %v1567_v47 = vpop.f32.mrf.mxu2  ;;  %v1960_v50 = vpop.f32.mrf.mxu3 }
 0x191   :  { %v2525_v14 = vsel %vm9335_vm13, %v2333_v45, 0.0  ;;  %v848_v46 = vpop.f32.mrf.mxu0  ;;  %v1177_v55 = vpop.f32.mrf.mxu1  ;;  %vm11642_vm13 = vmmov %vm11639_vm15  ;;  %v11655_v45 = vmov 0  ;;  %v56_v47 = vadd.s32 272, %v8631_v7 }
 0x192   :  { %2656 = vst.msk [vmem:[#allocation2 + $0xf0] sm:$0xff] %vm11634_vm2, %v2525_v14  ;;  %v1289_v59 = vmax.f32 %v848_v46, %v1177_v55  ;;  %vm11643_vm2 = vcmask 261120  }
 0x193   :  { %2720 = vst.msk [vmem:[#allocation2 + $0xe9] sm:$0xff] %vm11635_vm7, %v2524_v25  ;;  %7749 = vmatmul.msk.bf16.gmra.mxu0 %vm11637_vm14, %v8293_v52  ;;  %vm11644_vm7 = vmmov %vm11643_vm2 }
 0x194   :  { %2721 = vst.msk [vmem:[#allocation2 + $0xf1] sm:$0xff] %vm11636_vm12, %v2525_v14  ;;  %7797 = vmatmul.msk.bf16.gmra.mxu1 %vm11638_vm0, %v8293_v52  ;;  %vm11651_vm14 = vmmov %vm11638_vm0 }
 0x195   :  { %2784 = vst.msk [vmem:[#allocation2 + $0xe8] sm:$0xff] %vm11639_vm15, %v2523_v62  ;;  %7845 = vmatmul.msk.bf16.gmra.mxu2 %vm11640_vm9, %v8293_v52  ;;  %7893 = vmatmul.msk.bf16.gmra.mxu3 %vm11641_vm5, %v8293_v52  ;;  %vm9358_vm9 = vcmp.lt.s32.totalorder %v118_v57, 7  ;;  %vm11648_vm5 = vcmask 1048320   ;;  %vm11649_vm15 = vmmov %vm11636_vm12 }
 0x196   :  { %2785 = vst.msk [vmem:[#allocation2 + $0xf0] sm:$0xff] %vm11642_vm13, %v2524_v25  ;;  %v11646_v49 = vsel %vm9358_vm9, 4294967295, %v11645_v49  ;;  %vm11650_vm12 = vmmov %vm11638_vm0 }
 0x197   :  { %2848 = vst.msk [vmem:[#allocation2 + $0xe1] sm:$0xff] %vm11643_vm2, %v9279_v36  ;;  %vm11652_vm0 = vmmov %vm11643_vm2 }
 0x198   :  { %2849 = vst.msk [vmem:[#allocation2 + $0xe9] sm:$0xff] %vm11644_vm7, %v2523_v62  ;;  %v1570_v61 = vpop.f32.mrf.mxu2  ;;  %v1963_v32 = vpop.f32.mrf.mxu3  ;;  %v8294_v62 = vld [vmem:[%s11361_s0 + $0xc8] sm:$0xff]  ;;  %vm11653_vm2 = vmmov %vm11650_vm12 }
 0x199   :  { %v1682_v1 = vmax.f32 %v1289_v59, %v1570_v61  ;;  %v850_v5 = vpop.f32.mrf.mxu0  ;;  %v1179_v8 = vpop.f32.mrf.mxu1  ;;  %11647 = vst [vmem:[#allocation28_spill] sm:$0xff] %v11646_v49  ;;  %vm11654_vm7 = vmmov %vm11653_vm2  ;;  %v120_v61 = vand.u32 7, %v56_v47 }
 0x19a   :  { %v1290_v18 = vmax.f32 %v850_v5, %v1179_v8  ;;  %v11662_v5 = vmov 0  ;;  %v57_v8 = vadd.s32 280, %v8631_v7 }
 0x19b   :  { %v2075_v9 = vmax.f32 %v1682_v1, %v1963_v32 }
 0x19d   :  { %v2271_v13 = vadd.f32 %v9197_v20, %v2075_v9 }
 0x19e   :  { %v3604_v44 = vld [vmem:[#allocation2 + $0xe1] sm:$0xff] }
 0x19f   :  { %v2335_v54 = vmax.f32 %v2271_v13, 0.0 }
 0x1a0   :  { %v1572_v36 = vpop.f32.mrf.mxu2  ;;  %v1965_v23 = vpop.f32.mrf.mxu3 }
 0x1a1   :  { %v9368_v4 = vsel %vm9358_vm9, %v2335_v54, 0.0  ;;  %v1683_v29 = vmax.f32 %v1290_v18, %v1572_v36  ;;  %v853_v30 = vpop.f32.mrf.mxu0  ;;  %v1182_v31 = vpop.f32.mrf.mxu1  ;;  %v8295_v54 = vld [vmem:[%s11361_s0 + $0xd0] sm:$0xff] }
 0x1a2   :  { %2658 = vst.msk [vmem:[#allocation2 + $0x100] sm:$0xff] %vm11648_vm5, %v9368_v4  ;;  %v1291_v42 = vmax.f32 %v853_v30, %v1182_v31  ;;  %vm9381_vm5 = vcmp.lt.s32.totalorder %v119_v33, 7  ;;  %v11672_v33 = vmov 0 }
 0x1a3   :  { %2722 = vst.msk [vmem:[#allocation2 + $0xf9] sm:$0xff] %vm11649_vm15, %v9214_v27  ;;  %v2076_v35 = vmax.f32 %v1683_v29, %v1965_v23  ;;  %7750 = vmatmul.msk.bf16.gmra.mxu0 %vm11650_vm12, %v8294_v62  ;;  %v11656_v45 = vsel %vm9381_vm5, 4294967295, %v11655_v45  ;;  %vm11658_vm15 = vcmask 1048320   ;;  %vm11660_vm12 = vcmask 523520  }
 0x1a4   :  { %2786 = vst.msk [vmem:[#allocation2 + $0xf8] sm:$0xff] %vm11642_vm13, %v2525_v14  ;;  %7798 = vmatmul.msk.bf16.gmra.mxu1 %vm11651_vm14, %v8294_v62  ;;  %vm11659_vm13 = vcmask 785920   ;;  %vm11661_vm14 = vmmov %vm11652_vm0 }
 0x1a5   :  { %2850 = vst.msk [vmem:[#allocation2 + $0xf1] sm:$0xff] %vm11652_vm0, %v2524_v25  ;;  %v2272_v38 = vadd.f32 %v9197_v20, %v2076_v35  ;;  %7846 = vmatmul.msk.bf16.gmra.mxu2 %vm11653_vm2, %v8294_v62  ;;  %7894 = vmatmul.msk.bf16.gmra.mxu3 %vm11654_vm7, %v8294_v62  ;;  %vm9398_vm0 = vcmp.lt.s32.totalorder %v120_v61, 7  ;;  %vm11665_vm2 = vmmov %vm11658_vm15  ;;  %v121_v62 = vand.u32 7, %v57_v8  ;;  %v58_v35 = vadd.s32 288, %v8631_v7 }
 0x1a6   :  { %11657 = vst [vmem:[#allocation29_spill] sm:$0xff] %v11656_v45  ;;  %v11663_v5 = vsel %vm9398_vm0, 4294967295, %v11662_v5  ;;  %vm11666_vm7 = vmmov %vm11659_vm13  ;;  %v59_v8 = vadd.s32 296, %v8631_v7 }
 0x1a7   :  { %v2336_v50 = vmax.f32 %v2272_v38, 0.0  ;;  %11664 = vst [vmem:[#allocation30_spill] sm:$0xff] %v11663_v5 }
 0x1a8   :  { %v1575_v52 = vpop.f32.mrf.mxu2  ;;  %v1968_v46 = vpop.f32.mrf.mxu3 }
 0x1a9   :  { %v9388_v55 = vsel %vm9381_vm5, %v2336_v50, 0.0  ;;  %v1684_v25 = vmax.f32 %v1291_v42, %v1575_v52  ;;  %v855_v59 = vpop.f32.mrf.mxu0  ;;  %v1184_v60 = vpop.f32.mrf.mxu1  ;;  %vm9423_vm5 = vcmp.lt.s32.totalorder %v121_v62, 7  ;;  %v8333_v50 = vld [vmem:[%s11360_s3 + $0x40] sm:$0xff]  ;;  %v123_v62 = vand.u32 7, %v59_v8 }
 0x1aa   :  { %2659 = vst.msk [vmem:[#allocation2 + $0x108] sm:$0xff] %vm11658_vm15, %v9388_v55  ;;  %v1292_v9 = vmax.f32 %v855_v59, %v1184_v60  ;;  %vm11667_vm15 = vmmov %vm11660_vm12  ;;  %v11673_v33 = vsel %vm9423_vm5, 4294967295, %v11672_v33  ;;  %v122_v60 = vand.u32 7, %v58_v35  ;;  %3744 = vmatpush.bf16.msrb.mxu2 %v8333_v50  ;;  %v8317_v35 = vld [vmem:[%s11360_s3] sm:$0xff] }
 0x1ab   :  { %2723 = vst.msk [vmem:[#allocation2 + $0x101] sm:$0xff] %vm11659_vm13, %v9368_v4  ;;  %v2077_v32 = vmax.f32 %v1684_v25, %v1968_v46  ;;  %vm11668_vm13 = vcmask 523264   ;;  %3052 = vmatpush.bf16.msrb.mxu0 %v8317_v35 }
 0x1ac   :  { %2787 = vst.msk [vmem:[#allocation2 + $0x100] sm:$0xff] %vm11660_vm12, %v9214_v27  ;;  %vm11669_vm12 = vmmov %vm11668_vm13  ;;  %v3606_v10 = vld [vmem:[#allocation2 + $0xf1] sm:$0xff] }
 0x1ad   :  { %2851 = vst.msk [vmem:[#allocation2 + $0xf9] sm:$0xff] %vm11661_vm14, %v2525_v14  ;;  %v2273_v1 = vadd.f32 %v9197_v20, %v2077_v32 }
 0x1ae   :  { %11674 = vst [vmem:[#allocation31_spill] sm:$0xff] %v11673_v33 }
 0x1af   :  { %v2337_v57 = vmax.f32 %v2273_v1, 0.0  ;;  %v11677_v1 = vmov 0 }
 0x1b0   :  { %v1577_v13 = vpop.f32.mrf.mxu2  ;;  %v1970_v15 = vpop.f32.mrf.mxu3 }
 0x1b1   :  { %v9408_v18 = vsel %vm9398_vm0, %v2337_v57, 0.0  ;;  %v1685_v14 = vmax.f32 %v1292_v9, %v1577_v13  ;;  %v858_v36 = vpop.f32.mrf.mxu0  ;;  %v1187_v23 = vpop.f32.mrf.mxu1  ;;  %vm11670_vm0 = vmmov %vm11669_vm12 }
 0x1b2   :  { %2660 = vst.msk [vmem:[#allocation2 + $0x110] sm:$0xff] %vm11665_vm2, %v9408_v18  ;;  %v1293_v31 = vmax.f32 %v858_v36, %v1187_v23  ;;  %vm11671_vm2 = vmmov %vm11670_vm0 }
 0x1b3   :  { %2724 = vst.msk [vmem:[#allocation2 + $0x109] sm:$0xff] %vm11666_vm7, %v9388_v55  ;;  %v2078_v29 = vmax.f32 %v1685_v14, %v1970_v15  ;;  %7751 = vmatmul.msk.bf16.gmra.mxu0 %vm11668_vm13, %v8295_v54  ;;  %vm11676_vm13 = vmmov %vm11661_vm14 }
 0x1b4   :  { %2788 = vst.msk [vmem:[#allocation2 + $0x108] sm:$0xff] %vm11667_vm15, %v9368_v4  ;;  %7799 = vmatmul.msk.bf16.gmra.mxu1 %vm11669_vm12, %v8295_v54  ;;  %vm9444_vm12 = vcmp.lt.s32.totalorder %v122_v60, 7 }
 0x1b5   :  { %2852 = vst.msk [vmem:[#allocation2 + $0x101] sm:$0xff] %vm11661_vm14, %v9214_v27  ;;  %v2274_v30 = vadd.f32 %v9197_v20, %v2078_v29  ;;  %7847 = vmatmul.msk.bf16.gmra.mxu2 %vm11670_vm0, %v8295_v54  ;;  %7895 = vmatmul.msk.bf16.gmra.mxu3 %vm11671_vm2, %v8295_v54  ;;  %vm11675_vm0 = vcmask 1048320   ;;  %v11678_v1 = vsel %vm9444_vm12, 4294967295, %v11677_v1  ;;  %v8296_v54 = vld [vmem:[%s11361_s0 + $0xd8] sm:$0xff]  ;;  %vm11681_vm2 = vmmov %vm11666_vm7 }
 0x1b6   :  { %11679 = vst [vmem:[#allocation32_spill] sm:$0xff] %v11678_v1  ;;  %vm11680_vm14 = vmmov %vm11675_vm0  ;;  %v3603_v1 = vld [vmem:[#allocation2 + $0xd9] sm:$0xff] }
 0x1b7   :  { %v2338_v38 = vmax.f32 %v2274_v30, 0.0 }
 0x1b8   :  { %v1580_v42 = vpop.f32.mrf.mxu2  ;;  %v1973_v47 = vpop.f32.mrf.mxu3 }
 0x1b9   :  { %v9433_v52 = vsel %vm9423_vm5, %v2338_v38, 0.0  ;;  %v1686_v46 = vmax.f32 %v1293_v31, %v1580_v42  ;;  %v860_v25 = vpop.f32.mrf.mxu0  ;;  %v1189_v59 = vpop.f32.mrf.mxu1  ;;  %v8341_v38 = vld [vmem:[%s11360_s3 + $0x140] sm:$0xff]  ;;  %v11687_v42 = vmov 0 }
 0x1ba   :  { %2661 = vst.msk [vmem:[#allocation2 + $0x118] sm:$0xff] %vm11675_vm0, %v9433_v52  ;;  %v1294_v9 = vmax.f32 %v860_v25, %v1189_v59  ;;  %vm11682_vm0 = vmmov %vm11667_vm15  ;;  %3978 = vmatpush.bf16.msrb.mxu3 %v8341_v38 }
 0x1bb   :  { %2725 = vst.msk [vmem:[#allocation2 + $0x111] sm:$0xff] %vm11666_vm7, %v9408_v18  ;;  %v2079_v61 = vmax.f32 %v1686_v46, %v1973_v47  ;;  %vm11683_vm7 = vcmask 523264  }
 0x1bc   :  { %2789 = vst.msk [vmem:[#allocation2 + $0x110] sm:$0xff] %vm11667_vm15, %v9388_v55  ;;  %vm11684_vm15 = vmmov %vm11683_vm7  ;;  %v3608_v40 = vld [vmem:[#allocation2 + $0x101] sm:$0xff] }
 0x1bd   :  { %2853 = vst.msk [vmem:[#allocation2 + $0x109] sm:$0xff] %vm11676_vm13, %v9368_v4  ;;  %v2275_v32 = vadd.f32 %v9197_v20, %v2079_v61 }
 0x1bf   :  { %v2339_v57 = vmax.f32 %v2275_v32, 0.0 }
 0x1c0   :  { %v1582_v13 = vpop.f32.mrf.mxu2  ;;  %v1975_v15 = vpop.f32.mrf.mxu3 }
 0x1c1   :  { %v2531_v14 = vsel %vm9444_vm12, %v2339_v57, 0.0  ;;  %v1687_v4 = vmax.f32 %v1294_v9, %v1582_v13  ;;  %v863_v36 = vpop.f32.mrf.mxu0  ;;  %v1192_v23 = vpop.f32.mrf.mxu1  ;;  %vm11685_vm12 = vmmov %vm11683_vm7  ;;  %v8325_v9 = vld [vmem:[%s11360_s3 + $0x100] sm:$0xff]  ;;  %v11694_v13 = vmov 0 }
 0x1c2   :  { %2662 = vst.msk [vmem:[#allocation2 + $0x120] sm:$0xff] %vm11680_vm14, %v2531_v14  ;;  %v1295_v31 = vmax.f32 %v863_v36, %v1192_v23  ;;  %vm11686_vm14 = vmmov %vm11683_vm7  ;;  %3286 = vmatpush.bf16.msrb.mxu1 %v8325_v9  ;;  %v8297_v36 = vld [vmem:[%s11361_s0 + $0xe0] sm:$0xff] }
 0x1c3   :  { %2726 = vst.msk [vmem:[#allocation2 + $0x119] sm:$0xff] %vm11681_vm2, %v9433_v52  ;;  %v2080_v29 = vmax.f32 %v1687_v4, %v1975_v15  ;;  %7752 = vmatmul.msk.bf16.gmra.mxu0 %vm11683_vm7, %v8296_v54  ;;  %vm9472_vm2 = vcmp.lt.s32.totalorder %v123_v62, 7  ;;  %vm11692_vm7 = vcmask 523520  }
 0x1c4   :  { %2790 = vst.msk [vmem:[#allocation2 + $0x118] sm:$0xff] %vm11682_vm0, %v9408_v18  ;;  %7800 = vmatmul.msk.bf16.gmra.mxu1 %vm11684_vm15, %v8296_v54  ;;  %v11688_v42 = vsel %vm9472_vm2, 4294967295, %v11687_v42  ;;  %vm11691_vm0 = vcmask 785920   ;;  %vm11693_vm15 = vmmov %vm11676_vm13  ;;  %v2918_v41 = vld [vmem:[#allocation2 + $0x108] sm:$0xff] }
 0x1c5   :  { %2854 = vst.msk [vmem:[#allocation2 + $0x111] sm:$0xff] %vm11676_vm13, %v9388_v55  ;;  %v2276_v30 = vadd.f32 %v9197_v20, %v2080_v29  ;;  %7848 = vmatmul.msk.bf16.gmra.mxu2 %vm11685_vm12, %v8296_v54  ;;  %7896 = vmatmul.msk.bf16.gmra.mxu3 %vm11686_vm14, %v8296_v54  ;;  %v60_v55 = vadd.s32 304, %v8631_v7  ;;  %vm11690_vm12 = vcmask 1048320  }
 0x1c6   :  { %11689 = vst [vmem:[#allocation33_spill] sm:$0xff] %v11688_v42  ;;  %vm11697_vm14 = vmmov %vm11690_vm12  ;;  %v3600_v42 = vld [vmem:[#allocation2 + $0xc1] sm:$0xff] }
 0x1c7   :  { %v2340_v47 = vmax.f32 %v2276_v30, 0.0  ;;  %v124_v32 = vand.u32 7, %v60_v55  ;;  %v62_v30 = vadd.s32 320, %v8631_v7 }
 0x1c8   :  { %v1585_v50 = vpop.f32.mrf.mxu2  ;;  %v1978_v46 = vpop.f32.mrf.mxu3 }
 0x1c9   :  { %v2532_v25 = vsel %vm9472_vm2, %v2340_v47, 0.0  ;;  %v1688_v59 = vmax.f32 %v1295_v31, %v1585_v50  ;;  %v865_v60 = vpop.f32.mrf.mxu0  ;;  %v1194_v61 = vpop.f32.mrf.mxu1  ;;  %vm9489_vm13 = vcmp.lt.s32.totalorder %v124_v32, 7  ;;  %vm11701_vm2 = vcmask 523520  }
 0x1ca   :  { %2663 = vst.msk [vmem:[#allocation2 + $0x128] sm:$0xff] %vm11690_vm12, %v2532_v25  ;;  %v11695_v13 = vsel %vm9489_vm13, 4294967295, %v11694_v13  ;;  %vm11698_vm12 = vmmov %vm11691_vm0  ;;  %v126_v50 = vand.u32 7, %v62_v30  ;;  %v11707_v60 = vmov 0  ;;  %v63_v61 = vadd.s32 328, %v8631_v7 }
 0x1cb   :  { %2727 = vst.msk [vmem:[#allocation2 + $0x121] sm:$0xff] %vm11691_vm0, %v2531_v14  ;;  %v2081_v8 = vmax.f32 %v1688_v59, %v1978_v46  ;;  %v11717_v30 = vmov 0 }
 0x1cc   :  { %2791 = vst.msk [vmem:[#allocation2 + $0x120] sm:$0xff] %vm11692_vm7, %v9433_v52  ;;  %vm11699_vm7 = vcmask 523264  }
 0x1cd   :  { %2855 = vst.msk [vmem:[#allocation2 + $0x119] sm:$0xff] %vm11693_vm15, %v9408_v18  ;;  %v2277_v57 = vadd.f32 %v9197_v20, %v2081_v8  ;;  %vm11700_vm15 = vmmov %vm11699_vm7 }
 0x1ce   :  { %11696 = vst [vmem:[#allocation34_spill] sm:$0xff] %v11695_v13  ;;  %vm11702_vm5 = vmmov %vm11699_vm7 }
 0x1cf   :  { %v2341_v15 = vmax.f32 %v2277_v57, 0.0  ;;  %vm11703_vm9 = vmmov %vm11702_vm5 }
 0x1d0   :  { %v1587_v54 = vpop.f32.mrf.mxu2  ;;  %v1980_v4 = vpop.f32.mrf.mxu3 }
 0x1d1   :  { %v2533_v18 = vsel %vm9489_vm13, %v2341_v15, 0.0  ;;  %v868_v23 = vpop.f32.mrf.mxu0  ;;  %v1197_v62 = vpop.f32.mrf.mxu1  ;;  %vm11704_vm13 = vmmov %vm11701_vm2 }
 0x1d2   :  { %2664 = vst.msk [vmem:[#allocation2 + $0x130] sm:$0xff] %vm11697_vm14, %v2533_v18  ;;  %v1297_v29 = vmax.f32 %v868_v23, %v1197_v62  ;;  %vm11705_vm14 = vcmask 261120  }
 0x1d3   :  { %2728 = vst.msk [vmem:[#allocation2 + $0x129] sm:$0xff] %vm11698_vm12, %v2532_v25  ;;  %7753 = vmatmul.msk.bf16.gmra.mxu0 %vm11699_vm7, %v8297_v36  ;;  %vm11706_vm12 = vmmov %vm11705_vm14 }
 0x1d4   :  { %2729 = vst.msk [vmem:[#allocation2 + $0x131] sm:$0xff] %vm11691_vm0, %v2533_v18  ;;  %7801 = vmatmul.msk.bf16.gmra.mxu1 %vm11700_vm15, %v8297_v36  ;;  %vm11714_vm15 = vmmov %vm11706_vm12  ;;  %v3611_v12 = vld [vmem:[#allocation2 + $0x119] sm:$0xff] }
 0x1d5   :  { %2792 = vst.msk [vmem:[#allocation2 + $0x128] sm:$0xff] %vm11701_vm2, %v2531_v14  ;;  %7849 = vmatmul.msk.bf16.gmra.mxu2 %vm11702_vm5, %v8297_v36  ;;  %7897 = vmatmul.msk.bf16.gmra.mxu3 %vm11703_vm9, %v8297_v36  ;;  %vm9512_vm5 = vcmp.lt.s32.totalorder %v126_v50, 7  ;;  %vm11710_vm9 = vcmask 1048320   ;;  %v127_v36 = vand.u32 7, %v63_v61  ;;  %vm11711_vm2 = vmmov %vm11691_vm0 }
 0x1d6   :  { %2793 = vst.msk [vmem:[#allocation2 + $0x130] sm:$0xff] %vm11704_vm13, %v2532_v25  ;;  %v11708_v60 = vsel %vm9512_vm5, 4294967295, %v11707_v60  ;;  %vm11712_vm0 = vmmov %vm11699_vm7 }
 0x1d7   :  { %2856 = vst.msk [vmem:[#allocation2 + $0x121] sm:$0xff] %vm11705_vm14, %v9433_v52  ;;  %vm11713_vm7 = vmmov %vm11712_vm0 }
 0x1d8   :  { %2857 = vst.msk [vmem:[#allocation2 + $0x129] sm:$0xff] %vm11706_vm12, %v2531_v14  ;;  %v1590_v31 = vpop.f32.mrf.mxu2  ;;  %v1983_v35 = vpop.f32.mrf.mxu3  ;;  %v8298_v14 = vld [vmem:[%s11361_s0 + $0xe8] sm:$0xff]  ;;  %vm11715_vm14 = vmmov %vm11712_vm0 }
 0x1d9   :  { %v1690_v38 = vmax.f32 %v1297_v29, %v1590_v31  ;;  %v870_v55 = vpop.f32.mrf.mxu0  ;;  %v1199_v47 = vpop.f32.mrf.mxu1  ;;  %11709 = vst [vmem:[#allocation35_spill] sm:$0xff] %v11708_v60  ;;  %vm11716_vm12 = vmmov %vm11712_vm0  ;;  %v64_v31 = vadd.s32 336, %v8631_v7 }
 0x1da   :  { %v1298_v8 = vmax.f32 %v870_v55, %v1199_v47 }
 0x1db   :  { %v2083_v46 = vmax.f32 %v1690_v38, %v1983_v35 }
 0x1dd   :  { %v2279_v59 = vadd.f32 %v9197_v20, %v2083_v46 }
 0x1de   :  { %v3612_v43 = vld [vmem:[#allocation2 + $0x121] sm:$0xff] }
 0x1df   :  { %v2343_v32 = vmax.f32 %v2279_v59, 0.0  ;;  %v128_v59 = vand.u32 7, %v64_v31 }
 0x1e0   :  { %v1592_v52 = vpop.f32.mrf.mxu2  ;;  %v1985_v57 = vpop.f32.mrf.mxu3 }
 0x1e1   :  { %v9522_v9 = vsel %vm9512_vm5, %v2343_v32, 0.0  ;;  %v1691_v15 = vmax.f32 %v1298_v8, %v1592_v52  ;;  %v873_v54 = vpop.f32.mrf.mxu0  ;;  %v1202_v4 = vpop.f32.mrf.mxu1  ;;  %v11724_v8 = vmov 0  ;;  %v65_v52 = vadd.s32 344, %v8631_v7 }
 0x1e2   :  { %2666 = vst.msk [vmem:[#allocation2 + $0x140] sm:$0xff] %vm11710_vm9, %v9522_v9  ;;  %v1299_v29 = vmax.f32 %v873_v54, %v1202_v4  ;;  %vm9535_vm9 = vcmp.lt.s32.totalorder %v127_v36, 7  ;;  %v8299_v4 = vld [vmem:[%s11361_s0 + $0xf0] sm:$0xff] }
 0x1e3   :  { %2730 = vst.msk [vmem:[#allocation2 + $0x139] sm:$0xff] %vm11711_vm2, %v9214_v27  ;;  %v2084_v23 = vmax.f32 %v1691_v15, %v1985_v57  ;;  %7754 = vmatmul.msk.bf16.gmra.mxu0 %vm11712_vm0, %v8298_v14  ;;  %v11718_v30 = vsel %vm9535_vm9, 4294967295, %v11717_v30  ;;  %vm11720_vm2 = vcmask 1048320   ;;  %vm11722_vm0 = vcmask 523520  }
 0x1e4   :  { %2794 = vst.msk [vmem:[#allocation2 + $0x138] sm:$0xff] %vm11704_vm13, %v2533_v18  ;;  %7802 = vmatmul.msk.bf16.gmra.mxu1 %vm11713_vm7, %v8298_v14  ;;  %vm11721_vm13 = vcmask 785920   ;;  %vm11723_vm7 = vmmov %vm11714_vm15 }
 0x1e5   :  { %2858 = vst.msk [vmem:[#allocation2 + $0x131] sm:$0xff] %vm11714_vm15, %v2532_v25  ;;  %v2280_v62 = vadd.f32 %v9197_v20, %v2084_v23  ;;  %7850 = vmatmul.msk.bf16.gmra.mxu2 %vm11715_vm14, %v8298_v14  ;;  %7898 = vmatmul.msk.bf16.gmra.mxu3 %vm11716_vm12, %v8298_v14  ;;  %vm9552_vm15 = vcmp.lt.s32.totalorder %v128_v59, 7  ;;  %vm11727_vm14 = vmmov %vm11720_vm2 }
 0x1e6   :  { %11719 = vst [vmem:[#allocation36_spill] sm:$0xff] %v11718_v30  ;;  %v11725_v8 = vsel %vm9552_vm15, 4294967295, %v11724_v8  ;;  %vm11728_vm12 = vmmov %vm11721_vm13  ;;  %v2910_v30 = vld [vmem:[#allocation2 + $0xc8] sm:$0xff] }
 0x1e7   :  { %v2344_v35 = vmax.f32 %v2280_v62, 0.0  ;;  %11726 = vst [vmem:[#allocation37_spill] sm:$0xff] %v11725_v8 }
 0x1e8   :  { %v1595_v38 = vpop.f32.mrf.mxu2  ;;  %v1988_v55 = vpop.f32.mrf.mxu3 }
 0x1e9   :  { %v9542_v47 = vsel %vm9535_vm9, %v2344_v35, 0.0  ;;  %v1692_v25 = vmax.f32 %v1299_v29, %v1595_v38  ;;  %v875_v50 = vpop.f32.mrf.mxu0  ;;  %v1204_v46 = vpop.f32.mrf.mxu1  ;;  %v129_v29 = vand.u32 7, %v65_v52 }
 0x1ea   :  { %2667 = vst.msk [vmem:[#allocation2 + $0x148] sm:$0xff] %vm11720_vm2, %v9542_v47  ;;  %v1300_v14 = vmax.f32 %v875_v50, %v1204_v46  ;;  %vm11729_vm2 = vmmov %vm11722_vm0 }
 0x1eb   :  { %2731 = vst.msk [vmem:[#allocation2 + $0x141] sm:$0xff] %vm11721_vm13, %v9522_v9  ;;  %v2085_v61 = vmax.f32 %v1692_v25, %v1988_v55  ;;  %vm11730_vm13 = vcmask 523264   ;;  %vm9577_vm9 = vcmp.lt.s32.totalorder %v129_v29, 7  ;;  %v11734_v55 = vmov 0 }
 0x1ec   :  { %2795 = vst.msk [vmem:[#allocation2 + $0x140] sm:$0xff] %vm11722_vm0, %v9214_v27  ;;  %vm11731_vm0 = vmmov %vm11730_vm13  ;;  %v11735_v55 = vsel %vm9577_vm9, 4294967295, %v11734_v55  ;;  %v66_v25 = vadd.s32 352, %v8631_v7  ;;  %v3614_v19 = vld [vmem:[#allocation2 + $0x131] sm:$0xff] }
 0x1ed   :  { %2859 = vst.msk [vmem:[#allocation2 + $0x139] sm:$0xff] %vm11723_vm7, %v2533_v18  ;;  %v2281_v32 = vadd.f32 %v9197_v20, %v2085_v61  ;;  %v8372_v61 = vld [vmem:[%s11360_s3 + $0xf8] sm:$0xff] }
 0x1ee   :  { %11736 = vst [vmem:[#allocation38_spill] sm:$0xff] %v11735_v55  ;;  %5633 = vmatpush.bf16.msra.mxu2 %v8372_v61  ;;  %v3598_v55 = vld [vmem:[#allocation2 + $0xb1] sm:$0xff] }
 0x1ef   :  { %v2345_v57 = vmax.f32 %v2281_v32, 0.0 }
 0x1f0   :  { %v1597_v15 = vpop.f32.mrf.mxu2  ;;  %v1990_v54 = vpop.f32.mrf.mxu3 }
 0x1f1   :  { %v9562_v36 = vsel %vm9552_vm15, %v2345_v57, 0.0  ;;  %v1693_v18 = vmax.f32 %v1300_v14, %v1597_v15  ;;  %v878_v23 = vpop.f32.mrf.mxu0  ;;  %v1207_v62 = vpop.f32.mrf.mxu1  ;;  %vm11732_vm15 = vmmov %vm11731_vm0  ;;  %v130_v15 = vand.u32 7, %v66_v25 }
 0x1f2   :  { %2668 = vst.msk [vmem:[#allocation2 + $0x150] sm:$0xff] %vm11727_vm14, %v9562_v36  ;;  %v1301_v38 = vmax.f32 %v878_v23, %v1207_v62  ;;  %vm11733_vm14 = vmmov %vm11731_vm0  ;;  %v67_v23 = vadd.s32 360, %v8631_v7 }
 0x1f3   :  { %2732 = vst.msk [vmem:[#allocation2 + $0x149] sm:$0xff] %vm11728_vm12, %v9542_v47  ;;  %v2086_v31 = vmax.f32 %v1693_v18, %v1990_v54  ;;  %7755 = vmatmul.msk.bf16.gmra.mxu0 %vm11730_vm13, %v8299_v4  ;;  %vm11738_vm13 = vmmov %vm11723_vm7  ;;  %v11739_v18 = vmov 0 }
 0x1f4   :  { %2796 = vst.msk [vmem:[#allocation2 + $0x148] sm:$0xff] %vm11729_vm2, %v9522_v9  ;;  %7803 = vmatmul.msk.bf16.gmra.mxu1 %vm11731_vm0, %v8299_v4  ;;  %vm9598_vm0 = vcmp.lt.s32.totalorder %v130_v15, 7  ;;  %v8380_v15 = vld [vmem:[%s11360_s3 + $0x1f8] sm:$0xff] }
 0x1f5   :  { %2860 = vst.msk [vmem:[#allocation2 + $0x141] sm:$0xff] %vm11723_vm7, %v9214_v27  ;;  %v2282_v35 = vadd.f32 %v9197_v20, %v2086_v31  ;;  %7851 = vmatmul.msk.bf16.gmra.mxu2 %vm11732_vm15, %v8299_v4  ;;  %7899 = vmatmul.msk.bf16.gmra.mxu3 %vm11733_vm14, %v8299_v4  ;;  %vm11737_vm15 = vcmask 1048320   ;;  %v11740_v18 = vsel %vm9598_vm0, 4294967295, %v11739_v18  ;;  %vm11743_vm14 = vmmov %vm11728_vm12 }
 0x1f6   :  { %11741 = vst [vmem:[#allocation39_spill] sm:$0xff] %v11740_v18  ;;  %vm11742_vm7 = vmmov %vm11737_vm15  ;;  %5867 = vmatpush.bf16.msra.mxu3 %v8380_v15  ;;  %v3582_v18 = vld [vmem:[#allocation2 + $0x31] sm:$0xff] }
 0x1f7   :  { %v2346_v50 = vmax.f32 %v2282_v35, 0.0 }
 0x1f8   :  { %v1600_v46 = vpop.f32.mrf.mxu2  ;;  %v1993_v59 = vpop.f32.mrf.mxu3 }
 0x1f9   :  { %v9587_v32 = vsel %vm9577_vm9, %v2346_v50, 0.0  ;;  %v1694_v52 = vmax.f32 %v1301_v38, %v1600_v46  ;;  %v880_v57 = vpop.f32.mrf.mxu0  ;;  %v1209_v14 = vpop.f32.mrf.mxu1  ;;  %v8300_v38 = vld [vmem:[%s11361_s0 + $0xf8] sm:$0xff] }
 0x1fa   :  { %2669 = vst.msk [vmem:[#allocation2 + $0x158] sm:$0xff] %vm11737_vm15, %v9587_v32  ;;  %v1302_v29 = vmax.f32 %v880_v57, %v1209_v14  ;;  %vm11744_vm15 = vmmov %vm11729_vm2  ;;  %v8356_v14 = vld [vmem:[%s11360_s3 + $0xb8] sm:$0xff] }
 0x1fb   :  { %2733 = vst.msk [vmem:[#allocation2 + $0x151] sm:$0xff] %vm11728_vm12, %v9562_v36  ;;  %v2087_v54 = vmax.f32 %v1694_v52, %v1993_v59  ;;  %v131_v59 = vand.u32 7, %v67_v23  ;;  %vm11745_vm12 = vcmask 523264   ;;  %4685 = vmatpush.bf16.msra.mxu0 %v8356_v14 }
 0x1fc   :  { %2797 = vst.msk [vmem:[#allocation2 + $0x150] sm:$0xff] %vm11729_vm2, %v9542_v47  ;;  %vm11746_vm2 = vmmov %vm11745_vm12 }
 0x1fd   :  { %2861 = vst.msk [vmem:[#allocation2 + $0x149] sm:$0xff] %vm11738_vm13, %v9522_v9  ;;  %v2283_v4 = vadd.f32 %v9197_v20, %v2087_v54  ;;  %v11749_v54 = vmov 0 }
 0x1ff   :  { %v2347_v62 = vmax.f32 %v2283_v4, 0.0 }
 0x200   :  { %v1602_v31 = vpop.f32.mrf.mxu2  ;;  %v1995_v35 = vpop.f32.mrf.mxu3 }
 0x201   :  { %v9608_v25 = vsel %vm9598_vm0, %v2347_v62, 0.0  ;;  %v1695_v9 = vmax.f32 %v1302_v29, %v1602_v31  ;;  %v883_v50 = vpop.f32.mrf.mxu0  ;;  %v1212_v46 = vpop.f32.mrf.mxu1  ;;  %vm11747_vm0 = vmmov %vm11746_vm2 }
 0x202   :  { %2670 = vst.msk [vmem:[#allocation2 + $0x160] sm:$0xff] %vm11742_vm7, %v9608_v25  ;;  %v1303_v57 = vmax.f32 %v883_v50, %v1212_v46  ;;  %vm11748_vm7 = vmmov %vm11747_vm0 }
 0x203   :  { %2734 = vst.msk [vmem:[#allocation2 + $0x159] sm:$0xff] %vm11743_vm14, %v9587_v32  ;;  %v2088_v61 = vmax.f32 %v1695_v9, %v1995_v35  ;;  %7756 = vmatmul.msk.bf16.gmra.mxu0 %vm11745_vm12, %v8300_v38  ;;  %vm9629_vm14 = vcmp.lt.s32.totalorder %v131_v59, 7  ;;  %vm11754_vm12 = vcmask 523520   ;;  %v8364_v59 = vld [vmem:[%s11360_s3 + $0x1b8] sm:$0xff] }
 0x204   :  { %2798 = vst.msk [vmem:[#allocation2 + $0x158] sm:$0xff] %vm11744_vm15, %v9562_v36  ;;  %7804 = vmatmul.msk.bf16.gmra.mxu1 %vm11746_vm2, %v8300_v38  ;;  %v11750_v54 = vsel %vm9629_vm14, 4294967295, %v11749_v54  ;;  %vm11753_vm15 = vcmask 785920   ;;  %vm11755_vm2 = vmmov %vm11738_vm13  ;;  %v2926_v21 = vld [vmem:[#allocation2 + $0x148] sm:$0xff] }
 0x205   :  { %2862 = vst.msk [vmem:[#allocation2 + $0x151] sm:$0xff] %vm11738_vm13, %v9542_v47  ;;  %v2284_v52 = vadd.f32 %v9197_v20, %v2088_v61  ;;  %7852 = vmatmul.msk.bf16.gmra.mxu2 %vm11747_vm0, %v8300_v38  ;;  %7900 = vmatmul.msk.bf16.gmra.mxu3 %vm11748_vm7, %v8300_v38  ;;  %v68_v47 = vadd.s32 368, %v8631_v7  ;;  %vm11752_vm0 = vcmask 1048320   ;;  %v11756_v61 = vmov 0 }
 0x206   :  { %11751 = vst [vmem:[#allocation40_spill] sm:$0xff] %v11750_v54  ;;  %4919 = vmatpush.bf16.msra.mxu1 %v8364_v59  ;;  %vm11759_vm7 = vmmov %vm11752_vm0  ;;  %v3578_v54 = vld [vmem:[#allocation2 + $0x11] sm:$0xff] }
 0x207   :  { %v2348_v4 = vmax.f32 %v2284_v52, 0.0  ;;  %v132_v9 = vand.u32 7, %v68_v47  ;;  %v3577_v47 = vld [vmem:[#allocation2 + $0x9] sm:$0xff] }
 0x208   :  { %v1605_v23 = vpop.f32.mrf.mxu2  ;;  %v1998_v62 = vpop.f32.mrf.mxu3 }
 0x209   :  { %v9636_v29 = vsel %vm9629_vm14, %v2348_v4, 0.0  ;;  %v1696_v31 = vmax.f32 %v1303_v57, %v1605_v23  ;;  %v885_v35 = vpop.f32.mrf.mxu0  ;;  %v1214_v38 = vpop.f32.mrf.mxu1  ;;  %vm9650_vm13 = vcmp.lt.s32.totalorder %v132_v9, 7  ;;  %v2886_v57 = vld [vmem:[#allocation2 + $0x8] sm:$0xff]  ;;  %vm11863_vm14 = vcmask 261120  }
 0x20a   :  { %2671 = vst.msk [vmem:[#allocation2 + $0x168] sm:$0xff] %vm11752_vm0, %v9636_v29  ;;  %v11757_v61 = vsel %vm9650_vm13, 4294967295, %v11756_v61  ;;  %v3576_v35 = vld [vmem:[#allocation2 + $0x1] sm:$0xff]  ;;  %vm11760_vm0 = vmmov %vm11753_vm15 }
 0x20b   :  { %2735 = vst.msk [vmem:[#allocation2 + $0x161] sm:$0xff] %vm11753_vm15, %v9608_v25  ;;  %v2089_v50 = vmax.f32 %v1696_v31, %v1998_v62  ;;  %v2885_v62 = vld [vmem:[#allocation2] sm:$0xff]  ;;  %v3640_v38 = vpack.c.bf16 %v3577_v47, %v3576_v35  ;;  %vm11761_vm15 = vmmov %vm11760_vm0  ;;  %v2888_v35 = vld [vmem:[#allocation2 + $0x18] sm:$0xff] }
 0x20c   :  { %2799 = vst.msk [vmem:[#allocation2 + $0x160] sm:$0xff] %vm11754_vm12, %v9587_v32  ;;  %v2949_v31 = vpack.c.bf16 %v2886_v57, %v2885_v62  ;;  %v71_v62 = vadd.s32 392, %v8631_v7 }
 0x20d   :  { %2863 = vst.msk [vmem:[#allocation2 + $0x159] sm:$0xff] %vm11755_vm2, %v9562_v36  ;;  %v2285_v46 = vadd.f32 %v9197_v20, %v2089_v50  ;;  %vm11762_vm2 = vmmov %vm11754_vm12  ;;  %v70_v50 = vadd.s32 384, %v8631_v7 }
 0x20e   :  { %11758 = vst [vmem:[#allocation41_spill] sm:$0xff] %v11757_v61  ;;  %v3579_v61 = vld [vmem:[#allocation2 + $0x19] sm:$0xff] }
 0x20f   :  { %v2349_v52 = vmax.f32 %v2285_v46, 0.0 }
 0x210   :  { %v1607_v14 = vpop.f32.mrf.mxu2  ;;  %v2000_v15 = vpop.f32.mrf.mxu3 }
 0x211   :  { %v9656_v4 = vsel %vm9650_vm13, %v2349_v52, 0.0  ;;  %v888_v36 = vpop.f32.mrf.mxu0  ;;  %v1217_v23 = vpop.f32.mrf.mxu1  ;;  %v134_v15 = vand.u32 7, %v70_v50 }
 0x212   :  { %2672 = vst.msk [vmem:[#allocation2 + $0x170] sm:$0xff] %vm11759_vm7, %v9656_v4  ;;  %v1305_v9 = vmax.f32 %v888_v36, %v1217_v23  ;;  %vm11763_vm7 = vcmask 261120   ;;  %v11765_v23 = vmov 0 }
 0x213   :  { %2736 = vst.msk [vmem:[#allocation2 + $0x169] sm:$0xff] %vm11760_vm0, %v9636_v29  ;;  %3053 = vmatmul.bf16.vlgmr.msrb.gmra.mxu0 %v2949_v31  ;;  %vm11764_vm0 = vmmov %vm11763_vm7 }
 0x214   :  { %2737 = vst.msk [vmem:[#allocation2 + $0x171] sm:$0xff] %vm11761_vm15, %v9656_v4  ;;  %3287 = vmatmul.bf16.vlgmr.msrb.gmra.mxu1 %v2949_v31  ;;  %vm9674_vm15 = vcmp.lt.s32.totalorder %v134_v15, 7  ;;  %v135_v15 = vand.u32 7, %v71_v62  ;;  %v11771_v62 = vmov 0 }
 0x215   :  { %2800 = vst.msk [vmem:[#allocation2 + $0x168] sm:$0xff] %vm11754_vm12, %v9608_v25  ;;  %3745 = vmatmul.bf16.vlgmr.msrb.gmra.mxu2 %v3640_v38  ;;  %3979 = vmatmul.bf16.vlgmr.msrb.gmra.mxu3 %v3640_v38  ;;  %v11766_v23 = vsel %vm9674_vm15, 4294967295, %v11765_v23  ;;  %vm11768_vm12 = vcmask 1048320  }
 0x216   :  { %2801 = vst.msk [vmem:[#allocation2 + $0x170] sm:$0xff] %vm11762_vm2, %v9636_v29  ;;  %vm11769_vm2 = vcmask 785920  }
 0x217   :  { %2864 = vst.msk [vmem:[#allocation2 + $0x161] sm:$0xff] %vm11763_vm7, %v9587_v32  ;;  %vm11770_vm7 = vcmask 523520  }
 0x218   :  { %2865 = vst.msk [vmem:[#allocation2 + $0x169] sm:$0xff] %vm11764_vm0, %v9608_v25  ;;  %v1610_v46 = vpop.f32.mrf.mxu2  ;;  %v2003_v59 = vpop.f32.mrf.mxu3 }
 0x219   :  { %v1698_v52 = vmax.f32 %v1305_v9, %v1610_v46  ;;  %v890_v57 = vpop.f32.mrf.mxu0  ;;  %v1219_v14 = vpop.f32.mrf.mxu1  ;;  %11767 = vst [vmem:[#allocation42_spill] sm:$0xff] %v11766_v23 }
 0x21a   :  { %v1306_v32 = vmax.f32 %v890_v57, %v1219_v14  ;;  %v3641_v14 = vpack.c.bf16 %v3579_v61, %v3578_v54 }
 0x21b   :  { %v2091_v47 = vmax.f32 %v1698_v52, %v2003_v59  ;;  %v2887_v52 = vld [vmem:[#allocation2 + $0x10] sm:$0xff] }
 0x21d   :  { %v2287_v36 = vadd.f32 %v9197_v20, %v2091_v47  ;;  %v2950_v47 = vpack.c.bf16 %v2888_v35, %v2887_v52 }
 0x21f   :  { %v2351_v31 = vmax.f32 %v2287_v36, 0.0 }
 0x220   :  { %v1612_v38 = vpop.f32.mrf.mxu2  ;;  %v2005_v25 = vpop.f32.mrf.mxu3 }
 0x221   :  { %v9681_v9 = vsel %vm9674_vm15, %v2351_v31, 0.0  ;;  %v1699_v50 = vmax.f32 %v1306_v32, %v1612_v38  ;;  %v893_v46 = vpop.f32.mrf.mxu0  ;;  %v1222_v59 = vpop.f32.mrf.mxu1  ;;  %v72_v32 = vadd.s32 400, %v8631_v7  ;;  %vm11777_vm15 = vcmask 261120  }
 0x222   :  { %2674 = vst.msk [vmem:[#allocation2 + $0x180] sm:$0xff] %vm11768_vm12, %v9681_v9  ;;  %v1307_v31 = vmax.f32 %v893_v46, %v1222_v59  ;;  %vm9692_vm12 = vcmp.lt.s32.totalorder %v135_v15, 7  ;;  %v11778_v15 = vmov 0 }
 0x223   :  { %2738 = vst.msk [vmem:[#allocation2 + $0x179] sm:$0xff] %vm11769_vm2, %v9214_v27  ;;  %v2092_v57 = vmax.f32 %v1699_v50, %v2005_v25  ;;  %3058 = vmatmul.bf16.gmra.mxu0 %v2950_v47  ;;  %v11772_v62 = vsel %vm9692_vm12, 4294967295, %v11771_v62  ;;  %vm11774_vm2 = vcmask 1048320   ;;  %v136_v46 = vand.u32 7, %v72_v32 }
 0x224   :  { %2802 = vst.msk [vmem:[#allocation2 + $0x178] sm:$0xff] %vm11770_vm7, %v9656_v4  ;;  %3292 = vmatmul.bf16.gmra.mxu1 %v2950_v47  ;;  %vm11775_vm7 = vcmask 785920   ;;  %v73_v47 = vadd.s32 408, %v8631_v7 }
 0x225   :  { %2866 = vst.msk [vmem:[#allocation2 + $0x171] sm:$0xff] %vm11764_vm0, %v9636_v29  ;;  %v2288_v36 = vadd.f32 %v9197_v20, %v2092_v57  ;;  %3750 = vmatmul.bf16.gmra.mxu2 %v3641_v14  ;;  %3984 = vmatmul.bf16.gmra.mxu3 %v3641_v14  ;;  %vm11776_vm0 = vcmask 523520  }
 0x226   :  { %11773 = vst [vmem:[#allocation43_spill] sm:$0xff] %v11772_v62 }
 0x227   :  { %v2352_v54 = vmax.f32 %v2288_v36, 0.0  ;;  %v2889_v36 = vld [vmem:[#allocation2 + $0x20] sm:$0xff] }
 0x228   :  { %v1615_v61 = vpop.f32.mrf.mxu2  ;;  %v2008_v35 = vpop.f32.mrf.mxu3 }
 0x229   :  { %v9699_v38 = vsel %vm9692_vm12, %v2352_v54, 0.0  ;;  %v1700_v25 = vmax.f32 %v1307_v31, %v1615_v61  ;;  %v895_v29 = vpop.f32.mrf.mxu0  ;;  %v1224_v50 = vpop.f32.mrf.mxu1  ;;  %vm9710_vm12 = vcmp.lt.s32.totalorder %v136_v46, 7  ;;  %v2890_v31 = vld [vmem:[#allocation2 + $0x28] sm:$0xff]  ;;  %v137_v46 = vand.u32 7, %v73_v47  ;;  %v9732_v47 = vld [vmem:[%s11362_s2] ss:$0 sm:$0xff] }
 0x22a   :  { %2675 = vst.msk [vmem:[#allocation2 + $0x188] sm:$0xff] %vm11774_vm2, %v9699_v38  ;;  %v11779_v15 = vsel %vm9710_vm12, 4294967295, %v11778_v15  ;;  %v1308_v14 = vmax.f32 %v895_v29, %v1224_v50  ;;  %v3580_v61 = vld [vmem:[#allocation2 + $0x21] sm:$0xff] }
 0x22b   :  { %2739 = vst.msk [vmem:[#allocation2 + $0x181] sm:$0xff] %vm11775_vm7, %v9681_v9  ;;  %v2093_v59 = vmax.f32 %v1700_v25, %v2008_v35  ;;  %v3581_v35 = vld [vmem:[#allocation2 + $0x29] sm:$0xff] }
 0x22c   :  { %2803 = vst.msk [vmem:[#allocation2 + $0x180] sm:$0xff] %vm11776_vm0, %v9214_v27  ;;  %v3642_v50 = vpack.c.bf16 %v3581_v35, %v3580_v61  ;;  %v8371_v35 = vld [vmem:[%s11360_s3 + $0xf0] sm:$0xff] }
 0x22d   :  { %2867 = vst.msk [vmem:[#allocation2 + $0x179] sm:$0xff] %vm11777_vm15, %v9656_v4  ;;  %v2289_v52 = vadd.f32 %v9197_v20, %v2093_v59  ;;  %vm11781_vm15 = vmmov %vm11774_vm2  ;;  %v2951_v59 = vpack.c.bf16 %v2890_v31, %v2889_v36  ;;  %v11785_v36 = vmov 0  ;;  %v74_v31 = vadd.s32 416, %v8631_v7  ;;  %5634 = vmatpush.bf16.msra.mxu2 %v8371_v35 }
 0x22e   :  { %11780 = vst [vmem:[#allocation44_spill] sm:$0xff] %v11779_v15  ;;  %vm11782_vm2 = vmmov %vm11775_vm7 }
 0x22f   :  { %v2353_v57 = vmax.f32 %v2289_v52, 0.0  ;;  %vm11783_vm7 = vmmov %vm11776_vm0  ;;  %v9725_v52 = vld [vmem:[#allocation2 + $0x198] sm:$0xff]  ;;  %vm11784_vm0 = vcmask 261120  }
 0x230   :  { %v1617_v32 = vpop.f32.mrf.mxu2  ;;  %v2010_v54 = vpop.f32.mrf.mxu3 }
 0x231   :  { %v9717_v27 = vsel %vm9710_vm12, %v2353_v57, 0.0  ;;  %v1701_v4 = vmax.f32 %v1308_v14, %v1617_v32  ;;  %v898_v20 = vpop.f32.mrf.mxu0  ;;  %v1227_v25 = vpop.f32.mrf.mxu1  ;;  %vm11791_vm12 = vcmask 261120  }
 0x232   :  { %2676 = vst.msk [vmem:[#allocation2 + $0x190] sm:$0xff] %vm11781_vm15, %v9717_v27  ;;  %v1309_v14 = vmax.f32 %v898_v20, %v1227_v25  ;;  %vm9735_vm15 = vcmp.lt.s32.totalorder %v137_v46, 7  ;;  %v138_v46 = vand.u32 7, %v74_v31 }
 0x233   :  { %2740 = vst.msk [vmem:[#allocation2 + $0x189] sm:$0xff] %vm11782_vm2, %v9699_v38  ;;  %v2094_v29 = vmax.f32 %v1701_v4, %v2010_v54  ;;  %3063 = vmatmul.bf16.gmra.mxu0 %v2951_v59  ;;  %v11786_v36 = vsel %vm9735_vm15, 4294967295, %v11785_v36  ;;  %vm11788_vm2 = vcmask 1048320  }
 0x234   :  { %2804 = vst.msk [vmem:[#allocation2 + $0x188] sm:$0xff] %vm11783_vm7, %v9681_v9  ;;  %3297 = vmatmul.bf16.gmra.mxu1 %v2951_v59  ;;  %vm11789_vm7 = vcmask 785920  }
 0x235   :  { %2868 = vst.msk [vmem:[#allocation2 + $0x181] sm:$0xff] %vm11784_vm0, %v9725_v52  ;;  %v2290_v57 = vadd.f32 %v9732_v47, %v2094_v29  ;;  %3755 = vmatmul.bf16.gmra.mxu2 %v3642_v50  ;;  %3989 = vmatmul.bf16.gmra.mxu3 %v3642_v50  ;;  %vm11790_vm0 = vcmask 523520  }
 0x236   :  { %11787 = vst [vmem:[#allocation45_spill] sm:$0xff] %v11786_v36 }
 0x237   :  { %v2354_v32 = vmax.f32 %v2290_v57, 0.0  ;;  %v11792_v57 = vmov 0 }
 0x238   :  { %v1620_v54 = vpop.f32.mrf.mxu2  ;;  %v2013_v61 = vpop.f32.mrf.mxu3 }
 0x239   :  { %v9745_v4 = vsel %vm9735_vm15, %v2354_v32, 0.0  ;;  %v1702_v20 = vmax.f32 %v1309_v14, %v1620_v54  ;;  %v900_v25 = vpop.f32.mrf.mxu0  ;;  %v1229_v59 = vpop.f32.mrf.mxu1  ;;  %vm9756_vm15 = vcmp.lt.s32.totalorder %v138_v46, 7  ;;  %v75_v14 = vadd.s32 424, %v8631_v7  ;;  %v2892_v54 = vld [vmem:[#allocation2 + $0x38] sm:$0xff] }
 0x23a   :  { %2677 = vst.msk [vmem:[#allocation2 + $0x198] sm:$0xff] %vm11788_vm2, %v9745_v4  ;;  %v11793_v57 = vsel %vm9756_vm15, 4294967295, %v11792_v57  ;;  %v1310_v32 = vmax.f32 %v900_v25, %v1229_v59 }
 0x23b   :  { %2741 = vst.msk [vmem:[#allocation2 + $0x191] sm:$0xff] %vm11789_vm7, %v9717_v27  ;;  %v2095_v29 = vmax.f32 %v1702_v20, %v2013_v61  ;;  %v3583_v61 = vld [vmem:[#allocation2 + $0x39] sm:$0xff]  ;;  %v139_v46 = vand.u32 7, %v75_v14  ;;  %v8355_v14 = vld [vmem:[%s11360_s3 + $0xb0] sm:$0xff] }
 0x23c   :  { %2805 = vst.msk [vmem:[#allocation2 + $0x190] sm:$0xff] %vm11790_vm0, %v9699_v38  ;;  %v3643_v59 = vpack.c.bf16 %v3583_v61, %v3582_v18  ;;  %v8379_v18 = vld [vmem:[%s11360_s3 + $0x1f0] sm:$0xff]  ;;  %4686 = vmatpush.bf16.msra.mxu0 %v8355_v14 }
 0x23d   :  { %2869 = vst.msk [vmem:[#allocation2 + $0x189] sm:$0xff] %vm11791_vm12, %v9681_v9  ;;  %v2291_v50 = vadd.f32 %v9732_v47, %v2095_v29  ;;  %v2891_v29 = vld [vmem:[#allocation2 + $0x30] sm:$0xff]  ;;  %vm11795_vm12 = vmmov %vm11788_vm2  ;;  %5868 = vmatpush.bf16.msra.mxu3 %v8379_v18 }
 0x23e   :  { %11794 = vst [vmem:[#allocation46_spill] sm:$0xff] %v11793_v57  ;;  %v2952_v23 = vpack.c.bf16 %v2892_v54, %v2891_v29  ;;  %vm11796_vm2 = vmmov %vm11789_vm7 }
 0x23f   :  { %v2355_v31 = vmax.f32 %v2291_v50, 0.0  ;;  %vm11797_vm7 = vmmov %vm11790_vm0  ;;  %vm11798_vm0 = vcmask 261120  }
 0x240   :  { %v1622_v35 = vpop.f32.mrf.mxu2  ;;  %v2015_v36 = vpop.f32.mrf.mxu3 }
 0x241   :  { %v9763_v20 = vsel %vm9756_vm15, %v2355_v31, 0.0  ;;  %v1703_v15 = vmax.f32 %v1310_v32, %v1622_v35  ;;  %v903_v9 = vpop.f32.mrf.mxu0  ;;  %v1232_v62 = vpop.f32.mrf.mxu1  ;;  %vm11805_vm15 = vcmask 261120  }
 0x242   :  { %2678 = vst.msk [vmem:[#allocation2 + $0x1a0] sm:$0xff] %vm11795_vm12, %v9763_v20  ;;  %v1311_v31 = vmax.f32 %v903_v9, %v1232_v62  ;;  %vm9780_vm12 = vcmp.lt.s32.totalorder %v139_v46, 7 }
 0x243   :  { %2742 = vst.msk [vmem:[#allocation2 + $0x199] sm:$0xff] %vm11796_vm2, %v9745_v4  ;;  %v2096_v25 = vmax.f32 %v1703_v15, %v2015_v36  ;;  %3068 = vmatmul.bf16.gmra.mxu0 %v2952_v23  ;;  %v11799_v15 = vmov 0  ;;  %vm11802_vm2 = vcmask 1048320  }
 0x244   :  { %2806 = vst.msk [vmem:[#allocation2 + $0x198] sm:$0xff] %vm11797_vm7, %v9717_v27  ;;  %3302 = vmatmul.bf16.gmra.mxu1 %v2952_v23  ;;  %v11800_v15 = vsel %vm9780_vm12, 4294967295, %v11799_v15  ;;  %v76_v23 = vadd.s32 432, %v8631_v7  ;;  %vm11803_vm7 = vcmask 785920  }
 0x245   :  { %2870 = vst.msk [vmem:[#allocation2 + $0x191] sm:$0xff] %vm11798_vm0, %v9699_v38  ;;  %v2292_v50 = vadd.f32 %v9732_v47, %v2096_v25  ;;  %3760 = vmatmul.bf16.gmra.mxu2 %v3643_v59  ;;  %3994 = vmatmul.bf16.gmra.mxu3 %v3643_v59  ;;  %vm11804_vm0 = vcmask 523520   ;;  %v8363_v25 = vld [vmem:[%s11360_s3 + $0x1b0] sm:$0xff]  ;;  %v11806_v59 = vmov 0 }
 0x246   :  { %11801 = vst [vmem:[#allocation47_spill] sm:$0xff] %v11800_v15  ;;  %v140_v9 = vand.u32 7, %v76_v23  ;;  %4920 = vmatpush.bf16.msra.mxu1 %v8363_v25  ;;  %v3584_v23 = vld [vmem:[#allocation2 + $0x41] sm:$0xff]  ;;  %v3586_v15 = vld [vmem:[#allocation2 + $0x51] sm:$0xff] }
 0x247   :  { %v2356_v38 = vmax.f32 %v2292_v50, 0.0 }
 0x248   :  { %v1625_v62 = vpop.f32.mrf.mxu2  ;;  %v2018_v36 = vpop.f32.mrf.mxu3 }
 0x249   :  { %v9787_v32 = vsel %vm9780_vm12, %v2356_v38, 0.0  ;;  %v1704_v54 = vmax.f32 %v1311_v31, %v1625_v62  ;;  %v905_v35 = vpop.f32.mrf.mxu0  ;;  %v1234_v61 = vpop.f32.mrf.mxu1  ;;  %vm9801_vm12 = vcmp.lt.s32.totalorder %v140_v9, 7  ;;  %v2894_v31 = vld [vmem:[#allocation2 + $0x48] sm:$0xff] }
 0x24a   :  { %2679 = vst.msk [vmem:[#allocation2 + $0x1a8] sm:$0xff] %vm11802_vm2, %v9787_v32  ;;  %v11807_v59 = vsel %vm9801_vm12, 4294967295, %v11806_v59  ;;  %v3585_v38 = vld [vmem:[#allocation2 + $0x49] sm:$0xff] }
 0x24b   :  { %2743 = vst.msk [vmem:[#allocation2 + $0x1a1] sm:$0xff] %vm11803_vm7, %v9763_v20  ;;  %v2097_v29 = vmax.f32 %v1704_v54, %v2018_v36  ;;  %v2893_v54 = vld [vmem:[#allocation2 + $0x40] sm:$0xff]  ;;  %v3644_v61 = vpack.c.bf16 %v3585_v38, %v3584_v23 }
 0x24c   :  { %2807 = vst.msk [vmem:[#allocation2 + $0x1a0] sm:$0xff] %vm11804_vm0, %v9745_v4  ;;  %v2953_v35 = vpack.c.bf16 %v2894_v31, %v2893_v54 }
 0x24d   :  { %2871 = vst.msk [vmem:[#allocation2 + $0x199] sm:$0xff] %vm11805_vm15, %v9717_v27  ;;  %v2293_v46 = vadd.f32 %v9732_v47, %v2097_v29  ;;  %vm11809_vm15 = vmmov %vm11802_vm2  ;;  %v78_v29 = vadd.s32 448, %v8631_v7 }
 0x24e   :  { %11808 = vst [vmem:[#allocation48_spill] sm:$0xff] %v11807_v59  ;;  %vm11810_vm2 = vmmov %vm11803_vm7  ;;  %v3587_v59 = vld [vmem:[#allocation2 + $0x59] sm:$0xff] }
 0x24f   :  { %v2357_v50 = vmax.f32 %v2293_v46, 0.0  ;;  %vm11811_vm7 = vmmov %vm11810_vm2 }
 0x250   :  { %v1627_v14 = vpop.f32.mrf.mxu2  ;;  %v2020_v18 = vpop.f32.mrf.mxu3 }
 0x251   :  { %v9807_v27 = vsel %vm9801_vm12, %v2357_v50, 0.0  ;;  %v908_v62 = vpop.f32.mrf.mxu0  ;;  %v1237_v36 = vpop.f32.mrf.mxu1  ;;  %vm11812_vm12 = vmmov %vm11804_vm0  ;;  %v142_v18 = vand.u32 7, %v78_v29 }
 0x252   :  { %2680 = vst.msk [vmem:[#allocation2 + $0x1b0] sm:$0xff] %vm11809_vm15, %v9807_v27  ;;  %v1313_v9 = vmax.f32 %v908_v62, %v1237_v36  ;;  %vm11813_vm15 = vcmask 261120   ;;  %v11815_v62 = vmov 0  ;;  %v79_v36 = vadd.s32 456, %v8631_v7 }
 0x253   :  { %2744 = vst.msk [vmem:[#allocation2 + $0x1a9] sm:$0xff] %vm11810_vm2, %v9787_v32  ;;  %3073 = vmatmul.bf16.gmra.mxu0 %v2953_v35  ;;  %vm11814_vm2 = vmmov %vm11813_vm15 }
 0x254   :  { %2745 = vst.msk [vmem:[#allocation2 + $0x1b1] sm:$0xff] %vm11811_vm7, %v9807_v27  ;;  %3307 = vmatmul.bf16.gmra.mxu1 %v2953_v35  ;;  %vm9825_vm7 = vcmp.lt.s32.totalorder %v142_v18, 7  ;;  %v2896_v35 = vld [vmem:[#allocation2 + $0x58] sm:$0xff]  ;;  %v143_v18 = vand.u32 7, %v79_v36  ;;  %v11821_v36 = vmov 0 }
 0x255   :  { %2808 = vst.msk [vmem:[#allocation2 + $0x1a8] sm:$0xff] %vm11804_vm0, %v9763_v20  ;;  %3765 = vmatmul.bf16.gmra.mxu2 %v3644_v61  ;;  %3999 = vmatmul.bf16.gmra.mxu3 %v3644_v61  ;;  %v11816_v62 = vsel %vm9825_vm7, 4294967295, %v11815_v62  ;;  %vm11819_vm0 = vcmask 785920  }
 0x256   :  { %2809 = vst.msk [vmem:[#allocation2 + $0x1b0] sm:$0xff] %vm11812_vm12, %v9787_v32  ;;  %vm11818_vm12 = vcmask 1048320  }
 0x257   :  { %2872 = vst.msk [vmem:[#allocation2 + $0x1a1] sm:$0xff] %vm11813_vm15, %v9745_v4  ;;  %vm11820_vm15 = vcmask 523520  }
 0x258   :  { %2873 = vst.msk [vmem:[#allocation2 + $0x1a9] sm:$0xff] %vm11814_vm2, %v9763_v20  ;;  %v1630_v46 = vpop.f32.mrf.mxu2  ;;  %v2023_v25 = vpop.f32.mrf.mxu3 }
 0x259   :  { %v1706_v50 = vmax.f32 %v1313_v9, %v1630_v46  ;;  %v910_v31 = vpop.f32.mrf.mxu0  ;;  %v1239_v14 = vpop.f32.mrf.mxu1  ;;  %11817 = vst [vmem:[#allocation49_spill] sm:$0xff] %v11816_v62 }
 0x25a   :  { %v1314_v4 = vmax.f32 %v910_v31, %v1239_v14  ;;  %v3645_v14 = vpack.c.bf16 %v3587_v59, %v3586_v15 }
 0x25b   :  { %v2099_v23 = vmax.f32 %v1706_v50, %v2023_v25  ;;  %v2895_v50 = vld [vmem:[#allocation2 + $0x50] sm:$0xff] }
 0x25d   :  { %v2295_v38 = vadd.f32 %v9732_v47, %v2099_v23  ;;  %v2954_v23 = vpack.c.bf16 %v2896_v35, %v2895_v50 }
 0x25f   :  { %v2359_v54 = vmax.f32 %v2295_v38, 0.0 }
 0x260   :  { %v1632_v61 = vpop.f32.mrf.mxu2  ;;  %v2025_v20 = vpop.f32.mrf.mxu3 }
 0x261   :  { %v9832_v9 = vsel %vm9825_vm7, %v2359_v54, 0.0  ;;  %v1707_v29 = vmax.f32 %v1314_v4, %v1632_v61  ;;  %v913_v46 = vpop.f32.mrf.mxu0  ;;  %v1242_v25 = vpop.f32.mrf.mxu1  ;;  %v80_v4 = vadd.s32 464, %v8631_v7  ;;  %vm11827_vm7 = vcmask 261120  }
 0x262   :  { %2682 = vst.msk [vmem:[#allocation2 + $0x1c0] sm:$0xff] %vm11818_vm12, %v9832_v9  ;;  %v1315_v54 = vmax.f32 %v913_v46, %v1242_v25  ;;  %vm9843_vm12 = vcmp.lt.s32.totalorder %v143_v18, 7  ;;  %v11828_v18 = vmov 0 }
 0x263   :  { %2746 = vst.msk [vmem:[#allocation2 + $0x1b9] sm:$0xff] %vm11819_vm0, %v9725_v52  ;;  %v2100_v31 = vmax.f32 %v1707_v29, %v2025_v20  ;;  %3078 = vmatmul.bf16.gmra.mxu0 %v2954_v23  ;;  %v11822_v36 = vsel %vm9843_vm12, 4294967295, %v11821_v36  ;;  %vm11824_vm0 = vcmask 1048320   ;;  %v144_v46 = vand.u32 7, %v80_v4 }
 0x264   :  { %2810 = vst.msk [vmem:[#allocation2 + $0x1b8] sm:$0xff] %vm11820_vm15, %v9807_v27  ;;  %3312 = vmatmul.bf16.gmra.mxu1 %v2954_v23  ;;  %vm11825_vm15 = vcmask 785920   ;;  %v81_v23 = vadd.s32 472, %v8631_v7 }
 0x265   :  { %2874 = vst.msk [vmem:[#allocation2 + $0x1b1] sm:$0xff] %vm11814_vm2, %v9787_v32  ;;  %v2296_v38 = vadd.f32 %v9732_v47, %v2100_v31  ;;  %3770 = vmatmul.bf16.gmra.mxu2 %v3645_v14  ;;  %4004 = vmatmul.bf16.gmra.mxu3 %v3645_v14  ;;  %vm11826_vm2 = vcmask 523520  }
 0x266   :  { %11823 = vst [vmem:[#allocation50_spill] sm:$0xff] %v11822_v36  ;;  %v145_v36 = vand.u32 7, %v81_v23  ;;  %v11835_v23 = vmov 0 }
 0x267   :  { %v2360_v15 = vmax.f32 %v2296_v38, 0.0  ;;  %v2897_v38 = vld [vmem:[#allocation2 + $0x60] sm:$0xff] }
 0x268   :  { %v1635_v59 = vpop.f32.mrf.mxu2  ;;  %v2028_v35 = vpop.f32.mrf.mxu3 }
 0x269   :  { %v9850_v61 = vsel %vm9843_vm12, %v2360_v15, 0.0  ;;  %v1708_v20 = vmax.f32 %v1315_v54, %v1635_v59  ;;  %v915_v32 = vpop.f32.mrf.mxu0  ;;  %v1244_v29 = vpop.f32.mrf.mxu1  ;;  %vm9861_vm12 = vcmp.lt.s32.totalorder %v144_v46, 7  ;;  %v2898_v54 = vld [vmem:[#allocation2 + $0x68] sm:$0xff] }
 0x26a   :  { %2683 = vst.msk [vmem:[#allocation2 + $0x1c8] sm:$0xff] %vm11824_vm0, %v9850_v61  ;;  %v11829_v18 = vsel %vm9861_vm12, 4294967295, %v11828_v18  ;;  %v1316_v14 = vmax.f32 %v915_v32, %v1244_v29  ;;  %v3588_v59 = vld [vmem:[#allocation2 + $0x61] sm:$0xff]  ;;  %v2955_v62 = vpack.c.bf16 %v2898_v54, %v2897_v38 }
 0x26b   :  { %2747 = vst.msk [vmem:[#allocation2 + $0x1c1] sm:$0xff] %vm11825_vm15, %v9832_v9  ;;  %v2101_v25 = vmax.f32 %v1708_v20, %v2028_v35  ;;  %v3589_v35 = vld [vmem:[#allocation2 + $0x69] sm:$0xff] }
 0x26c   :  { %2811 = vst.msk [vmem:[#allocation2 + $0x1c0] sm:$0xff] %vm11826_vm2, %v9725_v52  ;;  %v3646_v29 = vpack.c.bf16 %v3589_v35, %v3588_v59 }
 0x26d   :  { %2875 = vst.msk [vmem:[#allocation2 + $0x1b9] sm:$0xff] %vm11827_vm7, %v9807_v27  ;;  %v2297_v50 = vadd.f32 %v9732_v47, %v2101_v25  ;;  %vm11831_vm7 = vmmov %vm11824_vm0 }
 0x26e   :  { %11830 = vst [vmem:[#allocation51_spill] sm:$0xff] %v11829_v18  ;;  %vm11832_vm0 = vmmov %vm11825_vm15 }
 0x26f   :  { %v2361_v31 = vmax.f32 %v2297_v50, 0.0  ;;  %vm11833_vm15 = vmmov %vm11826_vm2  ;;  %vm11834_vm2 = vcmask 261120  }
 0x270   :  { %v1637_v4 = vpop.f32.mrf.mxu2  ;;  %v2030_v15 = vpop.f32.mrf.mxu3 }
 0x271   :  { %v9868_v20 = vsel %vm9861_vm12, %v2361_v31, 0.0  ;;  %v1709_v27 = vmax.f32 %v1316_v14, %v1637_v4  ;;  %v918_v25 = vpop.f32.mrf.mxu0  ;;  %v1247_v46 = vpop.f32.mrf.mxu1  ;;  %v82_v14 = vadd.s32 480, %v8631_v7  ;;  %vm11855_vm12 = vcmask 261120  }
 0x272   :  { %2684 = vst.msk [vmem:[#allocation2 + $0x1d0] sm:$0xff] %vm11831_vm7, %v9868_v20  ;;  %v1317_v31 = vmax.f32 %v918_v25, %v1247_v46  ;;  %vm9879_vm7 = vcmp.lt.s32.totalorder %v145_v36, 7  ;;  %v8354_v25 = vld [vmem:[%s11360_s3 + $0xa8] sm:$0xff] }
 0x273   :  { %2748 = vst.msk [vmem:[#allocation2 + $0x1c9] sm:$0xff] %vm11832_vm0, %v9850_v61  ;;  %v2102_v32 = vmax.f32 %v1709_v27, %v2030_v15  ;;  %3083 = vmatmul.bf16.gmra.mxu0 %v2955_v62  ;;  %v11836_v23 = vsel %vm9879_vm7, 4294967295, %v11835_v23  ;;  %vm11838_vm0 = vcmask 1048320   ;;  %v146_v35 = vand.u32 7, %v82_v14  ;;  %v8370_v27 = vld [vmem:[%s11360_s3 + $0xe8] sm:$0xff] }
 0x274   :  { %2812 = vst.msk [vmem:[#allocation2 + $0x1c8] sm:$0xff] %vm11833_vm15, %v9832_v9  ;;  %3317 = vmatmul.bf16.gmra.mxu1 %v2955_v62  ;;  %vm11839_vm15 = vcmask 785920   ;;  %v8378_v46 = vld [vmem:[%s11360_s3 + $0x1e8] sm:$0xff]  ;;  %5635 = vmatpush.bf16.msra.mxu2 %v8370_v27 }
 0x275   :  { %2876 = vst.msk [vmem:[#allocation2 + $0x1c1] sm:$0xff] %vm11834_vm2, %v9725_v52  ;;  %v2298_v50 = vadd.f32 %v9732_v47, %v2102_v32  ;;  %3775 = vmatmul.bf16.gmra.mxu2 %v3646_v29  ;;  %4009 = vmatmul.bf16.gmra.mxu3 %v3646_v29  ;;  %vm11840_vm2 = vcmask 523520   ;;  %v11842_v29 = vmov 0 }
 0x276   :  { %11837 = vst [vmem:[#allocation52_spill] sm:$0xff] %v11836_v23  ;;  %4687 = vmatpush.bf16.msra.mxu0 %v8354_v25  ;;  %5869 = vmatpush.bf16.msra.mxu3 %v8378_v46  ;;  %v8362_v23 = vld [vmem:[%s11360_s3 + $0x1a8] sm:$0xff]  ;;  %v3590_v46 = vld [vmem:[#allocation2 + $0x71] sm:$0xff] }
 0x277   :  { %v2362_v38 = vmax.f32 %v2298_v50, 0.0  ;;  %v83_v50 = vadd.s32 488, %v8631_v7  ;;  %4921 = vmatpush.bf16.msra.mxu1 %v8362_v23 }
 0x278   :  { %v1640_v54 = vpop.f32.mrf.mxu2  ;;  %v2033_v4 = vpop.f32.mrf.mxu3 }
 0x279   :  { %v9886_v62 = vsel %vm9879_vm7, %v2362_v38, 0.0  ;;  %v1710_v15 = vmax.f32 %v1317_v31, %v1640_v54  ;;  %v920_v52 = vpop.f32.mrf.mxu0  ;;  %v1249_v59 = vpop.f32.mrf.mxu1  ;;  %v2900_v38 = vld [vmem:[#allocation2 + $0x78] sm:$0xff]  ;;  %vm11848_vm7 = vcmask 261120  }
 0x27a   :  { %2685 = vst.msk [vmem:[#allocation2 + $0x1d8] sm:$0xff] %vm11838_vm0, %v9886_v62  ;;  %vm11841_vm0 = vcmask 261120   ;;  %v1318_v14 = vmax.f32 %v920_v52, %v1249_v59  ;;  %v147_v52 = vand.u32 7, %v83_v50  ;;  %v11849_v50 = vmov 0 }
 0x27b   :  { %2749 = vst.msk [vmem:[#allocation2 + $0x1d1] sm:$0xff] %vm11839_vm15, %v9868_v20  ;;  %v2103_v36 = vmax.f32 %v1710_v15, %v2033_v4  ;;  %vm9906_vm15 = vcmp.lt.s32.totalorder %v146_v35, 7  ;;  %v3591_v15 = vld [vmem:[#allocation2 + $0x79] sm:$0xff]  ;;  %v2899_v35 = vld [vmem:[#allocation2 + $0x70] sm:$0xff] }
 0x27c   :  { %2813 = vst.msk [vmem:[#allocation2 + $0x1d0] sm:$0xff] %vm11840_vm2, %v9850_v61  ;;  %v11843_v29 = vsel %vm9906_vm15, 4294967295, %v11842_v29  ;;  %vm11845_vm2 = vcmask 1048320   ;;  %v2956_v59 = vpack.c.bf16 %v2900_v38, %v2899_v35  ;;  %v84_v38 = vadd.s32 496, %v8631_v7 }
 0x27d   :  { %2877 = vst.msk [vmem:[#allocation2 + $0x1c9] sm:$0xff] %vm11841_vm0, %v9832_v9  ;;  %v2299_v32 = vadd.f32 %v9732_v47, %v2103_v36  ;;  %vm11846_vm0 = vcmask 785920  }
 0x27e   :  { %11844 = vst [vmem:[#allocation53_spill] sm:$0xff] %v11843_v29 }
 0x27f   :  { %v2363_v31 = vmax.f32 %v2299_v32, 0.0 }
 0x280   :  { %v1642_v54 = vpop.f32.mrf.mxu2  ;;  %v2035_v4 = vpop.f32.mrf.mxu3 }
 0x281   :  { %v9913_v9 = vsel %vm9906_vm15, %v2363_v31, 0.0  ;;  %v1711_v36 = vmax.f32 %v1318_v14, %v1642_v54  ;;  %v923_v27 = vpop.f32.mrf.mxu0  ;;  %v1252_v25 = vpop.f32.mrf.mxu1  ;;  %v3647_v31 = vpack.c.bf16 %v3591_v15, %v3590_v46  ;;  %vm11847_vm15 = vcmask 523520  }
 0x282   :  { %2686 = vst.msk [vmem:[#allocation2 + $0x1e0] sm:$0xff] %vm11845_vm2, %v9913_v9  ;;  %v1319_v54 = vmax.f32 %v923_v27, %v1252_v25  ;;  %vm9927_vm2 = vcmp.lt.s32.totalorder %v147_v52, 7  ;;  %v148_v27 = vand.u32 7, %v84_v38  ;;  %v11856_v52 = vmov 0  ;;  %v3593_v38 = vld [vmem:[#allocation2 + $0x89] sm:$0xff] }
 0x283   :  { %2750 = vst.msk [vmem:[#allocation2 + $0x1d9] sm:$0xff] %vm11846_vm0, %v9886_v62  ;;  %v2104_v32 = vmax.f32 %v1711_v36, %v2035_v4  ;;  %3088 = vmatmul.bf16.gmra.mxu0 %v2956_v59  ;;  %v11850_v50 = vsel %vm9927_vm2, 4294967295, %v11849_v50 }
 0x284   :  { %2814 = vst.msk [vmem:[#allocation2 + $0x1d8] sm:$0xff] %vm11847_vm15, %v9868_v20  ;;  %3322 = vmatmul.bf16.gmra.mxu1 %v2956_v59  ;;  %vm11853_vm15 = vmmov %vm11846_vm0  ;;  %vm11854_vm0 = vcmask 523520   ;;  %vm9942_vm13 = vcmp.lt.s32.totalorder %v148_v27, 7 }
 0x285   :  { %2878 = vst.msk [vmem:[#allocation2 + $0x1d1] sm:$0xff] %vm11848_vm7, %v9850_v61  ;;  %v2300_v14 = vadd.f32 %v9732_v47, %v2104_v32  ;;  %3780 = vmatmul.bf16.gmra.mxu2 %v3647_v31  ;;  %4014 = vmatmul.bf16.gmra.mxu3 %v3647_v31  ;;  %vm11852_vm7 = vcmask 1048320   ;;  %v11857_v52 = vsel %vm9942_vm13, 4294967295, %v11856_v52  ;;  %v2902_v32 = vld [vmem:[#allocation2 + $0x88] sm:$0xff] }
 0x286   :  { %11851 = vst [vmem:[#allocation54_spill] sm:$0xff] %v11850_v50  ;;  %v3596_v50 = vld [vmem:[#allocation2 + $0xa1] sm:$0xff] }
 0x287   :  { %v2364_v23 = vmax.f32 %v2300_v14, 0.0  ;;  %11858 = vst [vmem:[#allocation55_spill] sm:$0xff] %v11857_v52 }
 0x288   :  { %v1645_v4 = vpop.f32.mrf.mxu2  ;;  %v2038_v15 = vpop.f32.mrf.mxu3 }
 0x289   :  { %v2556_v36 = vsel %vm9927_vm2, %v2364_v23, 0.0  ;;  %v1712_v35 = vmax.f32 %v1319_v54, %v1645_v4  ;;  %v925_v59 = vpop.f32.mrf.mxu0  ;;  %v1254_v61 = vpop.f32.mrf.mxu1  ;;  %v3592_v54 = vld [vmem:[#allocation2 + $0x81] sm:$0xff]  ;;  %vm11861_vm2 = vmmov %vm11854_vm0 }
 0x28a   :  { %2687 = vst.msk [vmem:[#allocation2 + $0x1e8] sm:$0xff] %vm11852_vm7, %v2556_v36 }
 0x28b   :  { %2751 = vst.msk [vmem:[#allocation2 + $0x1e1] sm:$0xff] %vm11853_vm15, %v9913_v9  ;;  %v2105_v25 = vmax.f32 %v1712_v35, %v2038_v15  ;;  %v2901_v35 = vld [vmem:[#allocation2 + $0x80] sm:$0xff] }
 0x28c   :  { %2815 = vst.msk [vmem:[#allocation2 + $0x1e0] sm:$0xff] %vm11854_vm0, %v9886_v62 }
 0x28d   :  { %2879 = vst.msk [vmem:[#allocation2 + $0x1d9] sm:$0xff] %vm11855_vm12, %v9868_v20  ;;  %v2301_v7 = vadd.f32 %v9732_v47, %v2105_v25  ;;  %v2957_v20 = vpack.c.bf16 %v2902_v32, %v2901_v35  ;;  %vm11859_vm12 = vmmov %vm11853_vm15  ;;  %v3648_v47 = vpack.c.bf16 %v3593_v38, %v3592_v54  ;;  %v2904_v32 = vld [vmem:[#allocation2 + $0x98] sm:$0xff] }
 0x28e   :  { %vm11860_vm15 = vmmov %vm11859_vm12  ;;  %v3595_v54 = vld [vmem:[#allocation2 + $0x99] sm:$0xff] }
 0x28f   :  { %v2365_v46 = vmax.f32 %v2301_v7, 0.0 }
 0x290   :  { %v1647_v31 = vpop.f32.mrf.mxu2  ;;  %v2040_v14 = vpop.f32.mrf.mxu3 }
 0x291   :  { %v2557_v23 = vsel %vm9942_vm13, %v2365_v46, 0.0  ;;  %v3054_v4 = vpop.f32.mrf.mxu0  ;;  %v3288_v15 = vpop.f32.mrf.mxu1  ;;  %vm11862_vm13 = vmmov %vm11854_vm0 }
 0x292   :  { %2688 = vst.msk [vmem:[#allocation2 + $0x1f0] sm:$0xff] %vm11852_vm7, %v2557_v23  ;;  %vm11864_vm7 = vmmov %vm11863_vm14 }
 0x293   :  { %2752 = vst.msk [vmem:[#allocation2 + $0x1e9] sm:$0xff] %vm11859_vm12, %v2556_v36  ;;  %3093 = vmatmul.bf16.gmra.mxu0 %v2957_v20  ;;  %vm11865_vm12 = vmmov %vm11864_vm7 }
 0x294   :  { %2753 = vst.msk [vmem:[#allocation2 + $0x1f1] sm:$0xff] %vm11860_vm15, %v2557_v23  ;;  %3327 = vmatmul.bf16.gmra.mxu1 %v2957_v20  ;;  %vm11866_vm15 = vmmov %vm11864_vm7 }
 0x295   :  { %2816 = vst.msk [vmem:[#allocation2 + $0x1e8] sm:$0xff] %vm11854_vm0, %v9913_v9  ;;  %3785 = vmatmul.bf16.gmra.mxu2 %v3648_v47  ;;  %4019 = vmatmul.bf16.gmra.mxu3 %v3648_v47 }
 0x296   :  { %2817 = vst.msk [vmem:[#allocation2 + $0x1f0] sm:$0xff] %vm11861_vm2, %v2556_v36 }
 0x297   :  { %2818 = vst.msk [vmem:[#allocation2 + $0x1f8] sm:$0xff] %vm11862_vm13, %v2557_v23 }
 0x298   :  { %2880 = vst.msk [vmem:[#allocation2 + $0x1e1] sm:$0xff] %vm11863_vm14, %v9886_v62  ;;  %v3746_v59 = vpop.f32.mrf.mxu2  ;;  %v3980_v61 = vpop.f32.mrf.mxu3  ;;  %vm7512_vm14 = vcmask 519168  }
 0x299   :  { %2881 = vst.msk [vmem:[#allocation2 + $0x1e9] sm:$0xff] %vm11864_vm7, %v9913_v9  ;;  %v9959_v27 = vadd.f32 %v3746_v59, %v3054_v4  ;;  %v9961_v25 = vadd.f32 %v3980_v61, %v3288_v15  ;;  %v3056_v7 = vpop.f32.mrf.mxu0  ;;  %v3290_v46 = vpop.f32.mrf.mxu1  ;;  %v2903_v4 = vld [vmem:[#allocation2 + $0x90] sm:$0xff] }
 0x29a   :  { %2882 = vst.msk [vmem:[#allocation2 + $0x1f1] sm:$0xff] %vm11865_vm12, %v2556_v36  ;;  %v2958_v20 = vpack.c.bf16 %v2904_v32, %v2903_v4  ;;  %v3594_v15 = vld [vmem:[#allocation2 + $0x91] sm:$0xff]  ;;  %v3597_v32 = vld [vmem:[#allocation2 + $0xa9] sm:$0xff] }
 0x29b   :  { %2883 = vst.msk [vmem:[#allocation2 + $0x1f9] sm:$0xff] %vm11866_vm15, %v2557_v23  ;;  %v3649_v47 = vpack.c.bf16 %v3595_v54, %v3594_v15  ;;  %v3650_v18 = vpack.c.bf16 %v3597_v32, %v3596_v50  ;;  %v8353_v50 = vld [vmem:[%s11360_s3 + $0xa0] sm:$0xff] }
 0x29c   :  { %4688 = vmatpush.bf16.msra.mxu0 %v8353_v50  ;;  %v3599_v32 = vld [vmem:[#allocation2 + $0xb9] sm:$0xff] }
 0x29d   :  { %v3651_v8 = vpack.c.bf16 %v3599_v32, %v3598_v55  ;;  %v2909_v32 = vld [vmem:[#allocation2 + $0xc0] sm:$0xff] }
 0x2a0   :  { %v3748_v31 = vpop.f32.mrf.mxu2  ;;  %v3982_v14 = vpop.f32.mrf.mxu3 }
 0x2a1   :  { %v9965_v62 = vadd.f32 %v3748_v31, %v3056_v7  ;;  %v9967_v38 = vadd.f32 %v3982_v14, %v3290_v46  ;;  %v3059_v35 = vpop.f32.mrf.mxu0  ;;  %v3293_v9 = vpop.f32.mrf.mxu1  ;;  %v2905_v46 = vld [vmem:[#allocation2 + $0xa0] sm:$0xff]  ;;  %v2906_v14 = vld [vmem:[#allocation2 + $0xa8] sm:$0xff] }
 0x2a3   :  { %3098 = vmatmul.bf16.gmra.mxu0 %v2958_v20 }
 0x2a4   :  { %3332 = vmatmul.bf16.gmra.mxu1 %v2958_v20 }
 0x2a5   :  { %3790 = vmatmul.bf16.gmra.mxu2 %v3649_v47  ;;  %4024 = vmatmul.bf16.gmra.mxu3 %v3649_v47  ;;  %v2959_v47 = vpack.c.bf16 %v2906_v14, %v2905_v46 }
 0x2a8   :  { %v3751_v36 = vpop.f32.mrf.mxu2  ;;  %v3985_v23 = vpop.f32.mrf.mxu3 }
 0x2a9   :  { %v9969_v59 = vadd.f32 %v3751_v36, %v3059_v35  ;;  %v9971_v61 = vadd.f32 %v3985_v23, %v3293_v9  ;;  %v3061_v7 = vpop.f32.mrf.mxu0  ;;  %v3295_v31 = vpop.f32.mrf.mxu1  ;;  %v8369_v35 = vld [vmem:[%s11360_s3 + $0xe0] sm:$0xff] }
 0x2aa   :  { %5636 = vmatpush.bf16.msra.mxu2 %v8369_v35 }
 0x2b0   :  { %v3753_v29 = vpop.f32.mrf.mxu2  ;;  %v3987_v52 = vpop.f32.mrf.mxu3 }
 0x2b1   :  { %v9973_v4 = vadd.f32 %v3753_v29, %v3061_v7  ;;  %v9975_v54 = vadd.f32 %v3987_v52, %v3295_v31  ;;  %v3064_v20 = vpop.f32.mrf.mxu0  ;;  %v3298_v15 = vpop.f32.mrf.mxu1  ;;  %v2908_v31 = vld [vmem:[#allocation2 + $0xb8] sm:$0xff] }
 0x2b3   :  { %3103 = vmatmul.bf16.gmra.mxu0 %v2959_v47 }
 0x2b4   :  { %3337 = vmatmul.bf16.gmra.mxu1 %v2959_v47 }
 0x2b5   :  { %3795 = vmatmul.bf16.gmra.mxu2 %v3650_v18  ;;  %4029 = vmatmul.bf16.gmra.mxu3 %v3650_v18  ;;  %v8377_v18 = vld [vmem:[%s11360_s3 + $0x1e0] sm:$0xff] }
 0x2b6   :  { %5870 = vmatpush.bf16.msra.mxu3 %v8377_v18 }
 0x2b8   :  { %v3756_v9 = vpop.f32.mrf.mxu2  ;;  %v3990_v36 = vpop.f32.mrf.mxu3 }
 0x2b9   :  { %v9980_v23 = vadd.f32 %v3756_v9, %v3064_v20  ;;  %v9982_v29 = vadd.f32 %v3990_v36, %v3298_v15  ;;  %v3066_v52 = vpop.f32.mrf.mxu0  ;;  %v3300_v7 = vpop.f32.mrf.mxu1  ;;  %v2907_v9 = vld [vmem:[#allocation2 + $0xb0] sm:$0xff]  ;;  %v8361_v36 = vld [vmem:[%s11360_s3 + $0x1a0] sm:$0xff] }
 0x2ba   :  { %v2960_v57 = vpack.c.bf16 %v2908_v31, %v2907_v9  ;;  %4922 = vmatpush.bf16.msra.mxu1 %v8361_v36  ;;  %v3601_v31 = vld [vmem:[#allocation2 + $0xc9] sm:$0xff]  ;;  %v2961_v36 = vpack.c.bf16 %v2910_v30, %v2909_v32 }
 0x2bb   :  { %v2911_v32 = vld [vmem:[#allocation2 + $0xd0] sm:$0xff] }
 0x2c0   :  { %v3758_v46 = vpop.f32.mrf.mxu2  ;;  %v3992_v14 = vpop.f32.mrf.mxu3 }
 0x2c1   :  { %v9990_v20 = vadd.f32 %v3758_v46, %v3066_v52  ;;  %v9992_v15 = vadd.f32 %v3992_v14, %v3300_v7  ;;  %v3069_v47 = vpop.f32.mrf.mxu0  ;;  %v3303_v35 = vpop.f32.mrf.mxu1 }
 0x2c3   :  { %3108 = vmatmul.bf16.gmra.mxu0 %v2960_v57 }
 0x2c4   :  { %3342 = vmatmul.bf16.gmra.mxu1 %v2960_v57  ;;  %v3652_v57 = vpack.c.bf16 %v3601_v31, %v3600_v42 }
 0x2c5   :  { %3800 = vmatmul.bf16.gmra.mxu2 %v3651_v8  ;;  %4034 = vmatmul.bf16.gmra.mxu3 %v3651_v8 }
 0x2c8   :  { %v3761_v50 = vpop.f32.mrf.mxu2  ;;  %v3995_v52 = vpop.f32.mrf.mxu3 }
 0x2c9   :  { %v9997_v18 = vadd.f32 %v3761_v50, %v3069_v47  ;;  %v9999_v7 = vadd.f32 %v3995_v52, %v3303_v35  ;;  %v3071_v46 = vpop.f32.mrf.mxu0  ;;  %v3305_v14 = vpop.f32.mrf.mxu1 }
 0x2d0   :  { %v3763_v60 = vpop.f32.mrf.mxu2  ;;  %v3997_v13 = vpop.f32.mrf.mxu3 }
 0x2d1   :  { %v3074_v9 = vpop.f32.mrf.mxu0  ;;  %v3308_v55 = vpop.f32.mrf.mxu1  ;;  %v2912_v13 = vld [vmem:[#allocation2 + $0xd8] sm:$0xff] }
 0x2d3   :  { %3113 = vmatmul.bf16.gmra.mxu0 %v2961_v36 }
 0x2d4   :  { %3347 = vmatmul.bf16.gmra.mxu1 %v2961_v36  ;;  %v2962_v36 = vpack.c.bf16 %v2912_v13, %v2911_v32  ;;  %v3605_v13 = vld [vmem:[#allocation2 + $0xe9] sm:$0xff] }
 0x2d5   :  { %3805 = vmatmul.bf16.gmra.mxu2 %v3652_v57  ;;  %4039 = vmatmul.bf16.gmra.mxu3 %v3652_v57  ;;  %v3602_v57 = vld [vmem:[#allocation2 + $0xd1] sm:$0xff]  ;;  %v3654_v16 = vpack.c.bf16 %v3605_v13, %v3604_v44  ;;  %v3607_v13 = vld [vmem:[#allocation2 + $0xf9] sm:$0xff] }
 0x2d6   :  { %v3653_v5 = vpack.c.bf16 %v3603_v1, %v3602_v57  ;;  %v8352_v44 = vld [vmem:[%s11360_s3 + $0x98] sm:$0xff]  ;;  %v3655_v11 = vpack.c.bf16 %v3607_v13, %v3606_v10  ;;  %v2917_v13 = vld [vmem:[#allocation2 + $0x100] sm:$0xff] }
 0x2d7   :  { %4689 = vmatpush.bf16.msra.mxu0 %v8352_v44 }
 0x2d8   :  { %v3766_v8 = vpop.f32.mrf.mxu2  ;;  %v4000_v47 = vpop.f32.mrf.mxu3 }
 0x2d9   :  { %v10001_v35 = vadd.f32 %v3766_v8, %v3074_v9  ;;  %v10003_v50 = vadd.f32 %v4000_v47, %v3308_v55  ;;  %v3076_v52 = vpop.f32.mrf.mxu0  ;;  %v3310_v60 = vpop.f32.mrf.mxu1 }
 0x2e0   :  { %v3768_v46 = vpop.f32.mrf.mxu2  ;;  %v4002_v14 = vpop.f32.mrf.mxu3 }
 0x2e1   :  { %v10005_v33 = vadd.f32 %v3768_v46, %v3076_v52  ;;  %v10007_v30 = vadd.f32 %v4002_v14, %v3310_v60  ;;  %v3079_v42 = vpop.f32.mrf.mxu0  ;;  %v3313_v31 = vpop.f32.mrf.mxu1  ;;  %v2913_v60 = vld [vmem:[#allocation2 + $0xe0] sm:$0xff]  ;;  %v2914_v14 = vld [vmem:[#allocation2 + $0xe8] sm:$0xff] }
 0x2e2   :  { %v2963_v57 = vpack.c.bf16 %v2914_v14, %v2913_v60 }
 0x2e3   :  { %3118 = vmatmul.bf16.gmra.mxu0 %v2962_v36 }
 0x2e4   :  { %3352 = vmatmul.bf16.gmra.mxu1 %v2962_v36 }
 0x2e5   :  { %3810 = vmatmul.bf16.gmra.mxu2 %v3653_v5  ;;  %4044 = vmatmul.bf16.gmra.mxu3 %v3653_v5 }
 0x2e8   :  { %v3771_v9 = vpop.f32.mrf.mxu2  ;;  %v4005_v55 = vpop.f32.mrf.mxu3 }
 0x2e9   :  { %v10009_v8 = vadd.f32 %v3771_v9, %v3079_v42  ;;  %v10011_v47 = vadd.f32 %v4005_v55, %v3313_v31  ;;  %v3081_v52 = vpop.f32.mrf.mxu0  ;;  %v3315_v46 = vpop.f32.mrf.mxu1  ;;  %v8368_v42 = vld [vmem:[%s11360_s3 + $0xd8] sm:$0xff] }
 0x2ea   :  { %5637 = vmatpush.bf16.msra.mxu2 %v8368_v42 }
 0x2f0   :  { %v3773_v45 = vpop.f32.mrf.mxu2  ;;  %v4007_v49 = vpop.f32.mrf.mxu3 }
 0x2f1   :  { %v10013_v32 = vadd.f32 %v3773_v45, %v3081_v52  ;;  %v10015_v1 = vadd.f32 %v4007_v49, %v3315_v46  ;;  %v3084_v36 = vpop.f32.mrf.mxu0  ;;  %v3318_v5 = vpop.f32.mrf.mxu1  ;;  %v2916_v46 = vld [vmem:[#allocation2 + $0xf8] sm:$0xff] }
 0x2f3   :  { %3123 = vmatmul.bf16.gmra.mxu0 %v2963_v57 }
 0x2f4   :  { %3357 = vmatmul.bf16.gmra.mxu1 %v2963_v57 }
 0x2f5   :  { %3815 = vmatmul.bf16.gmra.mxu2 %v3654_v16  ;;  %4049 = vmatmul.bf16.gmra.mxu3 %v3654_v16  ;;  %v8376_v16 = vld [vmem:[%s11360_s3 + $0x1d8] sm:$0xff] }
 0x2f6   :  { %5871 = vmatpush.bf16.msra.mxu3 %v8376_v16 }
 0x2f8   :  { %v3776_v31 = vpop.f32.mrf.mxu2  ;;  %v4010_v9 = vpop.f32.mrf.mxu3 }
 0x2f9   :  { %v10020_v55 = vadd.f32 %v3776_v31, %v3084_v36  ;;  %v10022_v45 = vadd.f32 %v4010_v9, %v3318_v5  ;;  %v3086_v49 = vpop.f32.mrf.mxu0  ;;  %v3320_v52 = vpop.f32.mrf.mxu1  ;;  %v2915_v31 = vld [vmem:[#allocation2 + $0xf0] sm:$0xff]  ;;  %v8360_v9 = vld [vmem:[%s11360_s3 + $0x198] sm:$0xff] }
 0x2fa   :  { %v2964_v51 = vpack.c.bf16 %v2916_v46, %v2915_v31  ;;  %4923 = vmatpush.bf16.msra.mxu1 %v8360_v9  ;;  %v3609_v46 = vld [vmem:[#allocation2 + $0x109] sm:$0xff]  ;;  %v2965_v9 = vpack.c.bf16 %v2918_v41, %v2917_v13 }
 0x2fb   :  { %v2919_v13 = vld [vmem:[#allocation2 + $0x110] sm:$0xff] }
 0x300   :  { %v3778_v60 = vpop.f32.mrf.mxu2  ;;  %v4012_v14 = vpop.f32.mrf.mxu3 }
 0x301   :  { %v10030_v36 = vadd.f32 %v3778_v60, %v3086_v49  ;;  %v10032_v5 = vadd.f32 %v4012_v14, %v3320_v52  ;;  %v3089_v57 = vpop.f32.mrf.mxu0  ;;  %v3323_v42 = vpop.f32.mrf.mxu1 }
 0x303   :  { %3128 = vmatmul.bf16.gmra.mxu0 %v2964_v51 }
 0x304   :  { %3362 = vmatmul.bf16.gmra.mxu1 %v2964_v51  ;;  %v3656_v51 = vpack.c.bf16 %v3609_v46, %v3608_v40 }
 0x305   :  { %3820 = vmatmul.bf16.gmra.mxu2 %v3655_v11  ;;  %4054 = vmatmul.bf16.gmra.mxu3 %v3655_v11 }
 0x308   :  { %v3781_v44 = vpop.f32.mrf.mxu2  ;;  %v4015_v49 = vpop.f32.mrf.mxu3 }
 0x309   :  { %v10037_v16 = vadd.f32 %v3781_v44, %v3089_v57  ;;  %v10039_v52 = vadd.f32 %v4015_v49, %v3323_v42  ;;  %v3091_v60 = vpop.f32.mrf.mxu0  ;;  %v3325_v14 = vpop.f32.mrf.mxu1 }
 0x310   :  { %v3783_v24 = vpop.f32.mrf.mxu2  ;;  %v4017_v56 = vpop.f32.mrf.mxu3 }
 0x311   :  { %v3094_v31 = vpop.f32.mrf.mxu0  ;;  %v3328_v10 = vpop.f32.mrf.mxu1  ;;  %v2920_v56 = vld [vmem:[#allocation2 + $0x118] sm:$0xff] }
 0x313   :  { %3133 = vmatmul.bf16.gmra.mxu0 %v2965_v9 }
 0x314   :  { %3367 = vmatmul.bf16.gmra.mxu1 %v2965_v9  ;;  %v2966_v9 = vpack.c.bf16 %v2920_v56, %v2919_v13  ;;  %v3613_v56 = vld [vmem:[#allocation2 + $0x129] sm:$0xff] }
 0x315   :  { %3825 = vmatmul.bf16.gmra.mxu2 %v3656_v51  ;;  %4059 = vmatmul.bf16.gmra.mxu3 %v3656_v51  ;;  %v3610_v51 = vld [vmem:[#allocation2 + $0x111] sm:$0xff]  ;;  %v3658_v28 = vpack.c.bf16 %v3613_v56, %v3612_v43  ;;  %v3615_v56 = vld [vmem:[#allocation2 + $0x139] sm:$0xff] }
 0x316   :  { %v3657_v39 = vpack.c.bf16 %v3611_v12, %v3610_v51  ;;  %v8351_v43 = vld [vmem:[%s11360_s3 + $0x90] sm:$0xff]  ;;  %v3659_v34 = vpack.c.bf16 %v3615_v56, %v3614_v19  ;;  %v2925_v56 = vld [vmem:[#allocation2 + $0x140] sm:$0xff] }
 0x317   :  { %4690 = vmatpush.bf16.msra.mxu0 %v8351_v43 }
 0x318   :  { %v3786_v11 = vpop.f32.mrf.mxu2  ;;  %v4020_v57 = vpop.f32.mrf.mxu3 }
 0x319   :  { %v10041_v42 = vadd.f32 %v3786_v11, %v3094_v31  ;;  %v10043_v44 = vadd.f32 %v4020_v57, %v3328_v10  ;;  %v3096_v49 = vpop.f32.mrf.mxu0  ;;  %v3330_v24 = vpop.f32.mrf.mxu1 }
 0x320   :  { %v3788_v60 = vpop.f32.mrf.mxu2  ;;  %v4022_v14 = vpop.f32.mrf.mxu3 }
 0x321   :  { %v10045_v58 = vadd.f32 %v3788_v60, %v3096_v49  ;;  %v10047_v41 = vadd.f32 %v4022_v14, %v3330_v24  ;;  %v3099_v40 = vpop.f32.mrf.mxu0  ;;  %v3333_v46 = vpop.f32.mrf.mxu1  ;;  %v2921_v24 = vld [vmem:[#allocation2 + $0x120] sm:$0xff]  ;;  %v2922_v14 = vld [vmem:[#allocation2 + $0x128] sm:$0xff] }
 0x322   :  { %v2967_v51 = vpack.c.bf16 %v2922_v14, %v2921_v24 }
 0x323   :  { %3138 = vmatmul.bf16.gmra.mxu0 %v2966_v9 }
 0x324   :  { %3372 = vmatmul.bf16.gmra.mxu1 %v2966_v9 }
 0x325   :  { %3830 = vmatmul.bf16.gmra.mxu2 %v3657_v39  ;;  %4064 = vmatmul.bf16.gmra.mxu3 %v3657_v39 }
 0x328   :  { %v3791_v31 = vpop.f32.mrf.mxu2  ;;  %v4025_v10 = vpop.f32.mrf.mxu3 }
 0x329   :  { %v10049_v11 = vadd.f32 %v3791_v31, %v3099_v40  ;;  %v10051_v57 = vadd.f32 %v4025_v10, %v3333_v46  ;;  %v3101_v49 = vpop.f32.mrf.mxu0  ;;  %v3335_v60 = vpop.f32.mrf.mxu1  ;;  %v8367_v40 = vld [vmem:[%s11360_s3 + $0xd0] sm:$0xff] }
 0x32a   :  { %5638 = vmatpush.bf16.msra.mxu2 %v8367_v40 }
 0x330   :  { %v3793_v22 = vpop.f32.mrf.mxu2  ;;  %v4027_v0 = vpop.f32.mrf.mxu3 }
 0x331   :  { %v10053_v13 = vadd.f32 %v3793_v22, %v3101_v49  ;;  %v10055_v12 = vadd.f32 %v4027_v0, %v3335_v60  ;;  %v3104_v9 = vpop.f32.mrf.mxu0  ;;  %v3338_v39 = vpop.f32.mrf.mxu1  ;;  %v2924_v60 = vld [vmem:[#allocation2 + $0x138] sm:$0xff] }
 0x333   :  { %3143 = vmatmul.bf16.gmra.mxu0 %v2967_v51 }
 0x334   :  { %3377 = vmatmul.bf16.gmra.mxu1 %v2967_v51 }
 0x335   :  { %3835 = vmatmul.bf16.gmra.mxu2 %v3658_v28  ;;  %4069 = vmatmul.bf16.gmra.mxu3 %v3658_v28  ;;  %v8375_v28 = vld [vmem:[%s11360_s3 + $0x1d0] sm:$0xff] }
 0x336   :  { %5872 = vmatpush.bf16.msra.mxu3 %v8375_v28 }
 0x338   :  { %v3796_v46 = vpop.f32.mrf.mxu2  ;;  %v4030_v31 = vpop.f32.mrf.mxu3 }
 0x339   :  { %v10060_v10 = vadd.f32 %v3796_v46, %v3104_v9  ;;  %v10062_v22 = vadd.f32 %v4030_v31, %v3338_v39  ;;  %v3106_v0 = vpop.f32.mrf.mxu0  ;;  %v3340_v49 = vpop.f32.mrf.mxu1  ;;  %v2923_v46 = vld [vmem:[#allocation2 + $0x130] sm:$0xff] }
 0x33a   :  { %v8359_v31 = vld [vmem:[%s11360_s3 + $0x190] sm:$0xff]  ;;  %v2968_v3 = vpack.c.bf16 %v2924_v60, %v2923_v46 }
 0x33b   :  { %4924 = vmatpush.bf16.msra.mxu1 %v8359_v31  ;;  %v3617_v60 = vld [vmem:[#allocation2 + $0x149] sm:$0xff]  ;;  %v2969_v31 = vpack.c.bf16 %v2926_v21, %v2925_v56 }
 0x33c   :  { %v2927_v56 = vld [vmem:[#allocation2 + $0x150] sm:$0xff] }
 0x340   :  { %v3798_v24 = vpop.f32.mrf.mxu2  ;;  %v4032_v14 = vpop.f32.mrf.mxu3 }
 0x341   :  { %v10070_v9 = vadd.f32 %v3798_v24, %v3106_v0  ;;  %v10072_v39 = vadd.f32 %v4032_v14, %v3340_v49  ;;  %v3109_v51 = vpop.f32.mrf.mxu0  ;;  %v3343_v40 = vpop.f32.mrf.mxu1 }
 0x343   :  { %11867 = vst [vmem:[#allocation56_spill] sm:$0xff] %v10070_v9  ;;  %3148 = vmatmul.bf16.gmra.mxu0 %v2968_v3 }
 0x344   :  { %11868 = vst [vmem:[#allocation57_spill] sm:$0xff] %v10072_v39  ;;  %3382 = vmatmul.bf16.gmra.mxu1 %v2968_v3  ;;  %v3616_v39 = vld [vmem:[#allocation2 + $0x141] sm:$0xff] }
 0x345   :  { %3840 = vmatmul.bf16.gmra.mxu2 %v3659_v34  ;;  %4074 = vmatmul.bf16.gmra.mxu3 %v3659_v34  ;;  %v3660_v3 = vpack.c.bf16 %v3617_v60, %v3616_v39 }
 0x348   :  { %v3801_v43 = vpop.f32.mrf.mxu2  ;;  %v4035_v0 = vpop.f32.mrf.mxu3 }
 0x349   :  { %v10077_v28 = vadd.f32 %v3801_v43, %v3109_v51  ;;  %v10079_v49 = vadd.f32 %v4035_v0, %v3343_v40  ;;  %v3111_v24 = vpop.f32.mrf.mxu0  ;;  %v3345_v14 = vpop.f32.mrf.mxu1 }
 0x34b   :  { %11869 = vst [vmem:[#allocation58_spill] sm:$0xff] %v10077_v28 }
 0x34c   :  { %11870 = vst [vmem:[#allocation59_spill] sm:$0xff] %v10079_v49  ;;  %v3619_v49 = vld [vmem:[#allocation2 + $0x159] sm:$0xff] }
 0x350   :  { %v3803_v2 = vpop.f32.mrf.mxu2  ;;  %v4037_v53 = vpop.f32.mrf.mxu3 }
 0x351   :  { %v3114_v46 = vpop.f32.mrf.mxu0  ;;  %v3348_v19 = vpop.f32.mrf.mxu1  ;;  %v2928_v53 = vld [vmem:[#allocation2 + $0x158] sm:$0xff] }
 0x353   :  { %3153 = vmatmul.bf16.gmra.mxu0 %v2969_v31 }
 0x354   :  { %3387 = vmatmul.bf16.gmra.mxu1 %v2969_v31  ;;  %v2970_v31 = vpack.c.bf16 %v2928_v53, %v2927_v56  ;;  %v3621_v53 = vld [vmem:[#allocation2 + $0x169] sm:$0xff] }
 0x355   :  { %3845 = vmatmul.bf16.gmra.mxu2 %v3660_v3  ;;  %4079 = vmatmul.bf16.gmra.mxu3 %v3660_v3  ;;  %v3618_v3 = vld [vmem:[#allocation2 + $0x151] sm:$0xff] }
 0x356   :  { %v3661_v9 = vpack.c.bf16 %v3619_v49, %v3618_v3 }
 0x358   :  { %v3806_v34 = vpop.f32.mrf.mxu2  ;;  %v4040_v51 = vpop.f32.mrf.mxu3 }
 0x359   :  { %v10081_v40 = vadd.f32 %v3806_v34, %v3114_v46  ;;  %v10083_v43 = vadd.f32 %v4040_v51, %v3348_v19  ;;  %v3116_v0 = vpop.f32.mrf.mxu0  ;;  %v3350_v2 = vpop.f32.mrf.mxu1 }
 0x35b   :  { %11871 = vst [vmem:[#allocation60_spill] sm:$0xff] %v10081_v40 }
 0x35c   :  { %11872 = vst [vmem:[#allocation61_spill] sm:$0xff] %v10083_v43  ;;  %v3620_v43 = vld [vmem:[#allocation2 + $0x161] sm:$0xff] }
 0x35d   :  { %v3662_v40 = vpack.c.bf16 %v3621_v53, %v3620_v43  ;;  %v8350_v43 = vld [vmem:[%s11360_s3 + $0x88] sm:$0xff]  ;;  %v3623_v53 = vld [vmem:[#allocation2 + $0x179] sm:$0xff] }
 0x35e   :  { %4691 = vmatpush.bf16.msra.mxu0 %v8350_v43 }
 0x360   :  { %v3808_v24 = vpop.f32.mrf.mxu2  ;;  %v4042_v14 = vpop.f32.mrf.mxu3 }
 0x361   :  { %v10085_v28 = vadd.f32 %v3808_v24, %v3116_v0  ;;  %v10087_v21 = vadd.f32 %v4042_v14, %v3350_v2  ;;  %v3119_v39 = vpop.f32.mrf.mxu0  ;;  %v3353_v60 = vpop.f32.mrf.mxu1  ;;  %v2929_v2 = vld [vmem:[#allocation2 + $0x160] sm:$0xff]  ;;  %v2930_v14 = vld [vmem:[#allocation2 + $0x168] sm:$0xff] }
 0x362   :  { %v2971_v3 = vpack.c.bf16 %v2930_v14, %v2929_v2 }
 0x363   :  { %11873 = vst [vmem:[#allocation62_spill] sm:$0xff] %v10085_v28  ;;  %3158 = vmatmul.bf16.gmra.mxu0 %v2970_v31 }
 0x364   :  { %11874 = vst [vmem:[#allocation63_spill] sm:$0xff] %v10087_v21  ;;  %3392 = vmatmul.bf16.gmra.mxu1 %v2970_v31 }
 0x365   :  { %3850 = vmatmul.bf16.gmra.mxu2 %v3661_v9  ;;  %4084 = vmatmul.bf16.gmra.mxu3 %v3661_v9 }
 0x368   :  { %v3811_v46 = vpop.f32.mrf.mxu2  ;;  %v4045_v19 = vpop.f32.mrf.mxu3 }
 0x369   :  { %v10089_v34 = vadd.f32 %v3811_v46, %v3119_v39  ;;  %v10091_v51 = vadd.f32 %v4045_v19, %v3353_v60  ;;  %v3121_v0 = vpop.f32.mrf.mxu0  ;;  %v3355_v24 = vpop.f32.mrf.mxu1  ;;  %v8366_v39 = vld [vmem:[%s11360_s3 + $0xc8] sm:$0xff] }
 0x36a   :  { %5639 = vmatpush.bf16.msra.mxu2 %v8366_v39 }
 0x36b   :  { %11875 = vst [vmem:[#allocation64_spill] sm:$0xff] %v10089_v34 }
 0x36c   :  { %11876 = vst [vmem:[#allocation65_spill] sm:$0xff] %v10091_v51  ;;  %v3624_v51 = vld [vmem:[#allocation2 + $0x181] sm:$0xff] }
 0x370   :  { %v3813_v21 = vpop.f32.mrf.mxu2  ;;  %v4047_v28 = vpop.f32.mrf.mxu3 }
 0x371   :  { %v10093_v56 = vadd.f32 %v3813_v21, %v3121_v0  ;;  %v10095_v49 = vadd.f32 %v4047_v28, %v3355_v24  ;;  %v3124_v31 = vpop.f32.mrf.mxu0  ;;  %v3358_v9 = vpop.f32.mrf.mxu1  ;;  %v2932_v24 = vld [vmem:[#allocation2 + $0x178] sm:$0xff] }
 0x373   :  { %11877 = vst [vmem:[#allocation66_spill] sm:$0xff] %v10093_v56  ;;  %3163 = vmatmul.bf16.gmra.mxu0 %v2971_v3 }
 0x374   :  { %11878 = vst [vmem:[#allocation67_spill] sm:$0xff] %v10095_v49  ;;  %3397 = vmatmul.bf16.gmra.mxu1 %v2971_v3 }
 0x375   :  { %3855 = vmatmul.bf16.gmra.mxu2 %v3662_v40  ;;  %4089 = vmatmul.bf16.gmra.mxu3 %v3662_v40  ;;  %v8374_v40 = vld [vmem:[%s11360_s3 + $0x1c8] sm:$0xff] }
 0x376   :  { %5873 = vmatpush.bf16.msra.mxu3 %v8374_v40 }
 0x378   :  { %v3816_v60 = vpop.f32.mrf.mxu2  ;;  %v4050_v46 = vpop.f32.mrf.mxu3 }
 0x379   :  { %v10100_v19 = vadd.f32 %v3816_v60, %v3124_v31  ;;  %v10102_v21 = vadd.f32 %v4050_v46, %v3358_v9  ;;  %v3126_v28 = vpop.f32.mrf.mxu0  ;;  %v3360_v0 = vpop.f32.mrf.mxu1  ;;  %v2931_v60 = vld [vmem:[#allocation2 + $0x170] sm:$0xff]  ;;  %v8358_v46 = vld [vmem:[%s11360_s3 + $0x188] sm:$0xff] }
 0x37a   :  { %4925 = vmatpush.bf16.msra.mxu1 %v8358_v46 }
 0x37b   :  { %11879 = vst [vmem:[#allocation68_spill] sm:$0xff] %v10100_v19  ;;  %v3622_v19 = vld [vmem:[#allocation2 + $0x171] sm:$0xff] }
 0x37c   :  { %11880 = vst [vmem:[#allocation69_spill] sm:$0xff] %v10102_v21  ;;  %v2972_v21 = vpack.c.bf16 %v2932_v24, %v2931_v60  ;;  %v3663_v49 = vpack.c.bf16 %v3623_v53, %v3622_v19  ;;  %v3625_v24 = vld [vmem:[#allocation2 + $0x189] sm:$0xff]  ;;  %v2933_v53 = vld [vmem:[#allocation2 + $0x180] sm:$0xff] }
 0x380   :  { %v3818_v2 = vpop.f32.mrf.mxu2  ;;  %v4052_v14 = vpop.f32.mrf.mxu3 }
 0x381   :  { %v10110_v31 = vadd.f32 %v3818_v2, %v3126_v28  ;;  %v10112_v9 = vadd.f32 %v4052_v14, %v3360_v0  ;;  %v3129_v3 = vpop.f32.mrf.mxu0  ;;  %v3363_v39 = vpop.f32.mrf.mxu1 }
 0x383   :  { %11881 = vst [vmem:[#allocation70_spill] sm:$0xff] %v10110_v31  ;;  %3168 = vmatmul.bf16.gmra.mxu0 %v2972_v21 }
 0x384   :  { %11882 = vst [vmem:[#allocation71_spill] sm:$0xff] %v10112_v9  ;;  %3402 = vmatmul.bf16.gmra.mxu1 %v2972_v21  ;;  %v2934_v9 = vld [vmem:[#allocation2 + $0x188] sm:$0xff]  ;;  %v3664_v21 = vpack.c.bf16 %v3625_v24, %v3624_v51 }
 0x385   :  { %3860 = vmatmul.bf16.gmra.mxu2 %v3663_v49  ;;  %4094 = vmatmul.bf16.gmra.mxu3 %v3663_v49  ;;  %v2973_v46 = vpack.c.bf16 %v2934_v9, %v2933_v53  ;;  %v2935_v53 = vld [vmem:[#allocation2 + $0x190] sm:$0xff] }
 0x388   :  { %v3821_v43 = vpop.f32.mrf.mxu2  ;;  %v4055_v28 = vpop.f32.mrf.mxu3 }
 0x389   :  { %v10117_v40 = vadd.f32 %v3821_v43, %v3129_v3  ;;  %v10119_v0 = vadd.f32 %v4055_v28, %v3363_v39  ;;  %v3131_v2 = vpop.f32.mrf.mxu0  ;;  %v3365_v14 = vpop.f32.mrf.mxu1 }
 0x38b   :  { %11883 = vst [vmem:[#allocation72_spill] sm:$0xff] %v10117_v40 }
 0x38c   :  { %11884 = vst [vmem:[#allocation73_spill] sm:$0xff] %v10119_v0  ;;  %v3627_v0 = vld [vmem:[#allocation2 + $0x199] sm:$0xff] }
 0x390   :  { %v3823_v31 = vpop.f32.mrf.mxu2  ;;  %v4057_v56 = vpop.f32.mrf.mxu3 }
 0x391   :  { %v3134_v60 = vpop.f32.mrf.mxu0  ;;  %v3368_v19 = vpop.f32.mrf.mxu1  ;;  %v2936_v56 = vld [vmem:[#allocation2 + $0x198] sm:$0xff] }
 0x393   :  { %3173 = vmatmul.bf16.gmra.mxu0 %v2973_v46 }
 0x394   :  { %3407 = vmatmul.bf16.gmra.mxu1 %v2973_v46  ;;  %v2974_v46 = vpack.c.bf16 %v2936_v56, %v2935_v53  ;;  %v3629_v56 = vld [vmem:[#allocation2 + $0x1a9] sm:$0xff] }
 0x395   :  { %3865 = vmatmul.bf16.gmra.mxu2 %v3664_v21  ;;  %4099 = vmatmul.bf16.gmra.mxu3 %v3664_v21  ;;  %v3626_v21 = vld [vmem:[#allocation2 + $0x191] sm:$0xff] }
 0x396   :  { %v3665_v34 = vpack.c.bf16 %v3627_v0, %v3626_v21 }
 0x398   :  { %v3826_v49 = vpop.f32.mrf.mxu2  ;;  %v4060_v3 = vpop.f32.mrf.mxu3 }
 0x399   :  { %v10121_v39 = vadd.f32 %v3826_v49, %v3134_v60  ;;  %v10123_v43 = vadd.f32 %v4060_v3, %v3368_v19  ;;  %v3136_v28 = vpop.f32.mrf.mxu0  ;;  %v3370_v31 = vpop.f32.mrf.mxu1 }
 0x39b   :  { %11885 = vst [vmem:[#allocation74_spill] sm:$0xff] %v10121_v39 }
 0x39c   :  { %11886 = vst [vmem:[#allocation75_spill] sm:$0xff] %v10123_v43  ;;  %v3628_v43 = vld [vmem:[#allocation2 + $0x1a1] sm:$0xff] }
 0x39d   :  { %v3666_v39 = vpack.c.bf16 %v3629_v56, %v3628_v43  ;;  %v8349_v43 = vld [vmem:[%s11360_s3 + $0x80] sm:$0xff] }
 0x39e   :  { %4692 = vmatpush.bf16.msra.mxu0 %v8349_v43  ;;  %v3631_v56 = vld [vmem:[#allocation2 + $0x1b9] sm:$0xff] }
 0x3a0   :  { %v3828_v2 = vpop.f32.mrf.mxu2  ;;  %v4062_v14 = vpop.f32.mrf.mxu3 }
 0x3a1   :  { %v10125_v40 = vadd.f32 %v3828_v2, %v3136_v28  ;;  %v10127_v9 = vadd.f32 %v4062_v14, %v3370_v31  ;;  %v3139_v51 = vpop.f32.mrf.mxu0  ;;  %v3373_v24 = vpop.f32.mrf.mxu1  ;;  %v2937_v31 = vld [vmem:[#allocation2 + $0x1a0] sm:$0xff]  ;;  %v2938_v14 = vld [vmem:[#allocation2 + $0x1a8] sm:$0xff] }
 0x3a2   :  { %v2975_v21 = vpack.c.bf16 %v2938_v14, %v2937_v31 }
 0x3a3   :  { %11887 = vst [vmem:[#allocation76_spill] sm:$0xff] %v10125_v40  ;;  %3178 = vmatmul.bf16.gmra.mxu0 %v2974_v46 }
 0x3a4   :  { %11888 = vst [vmem:[#allocation77_spill] sm:$0xff] %v10127_v9  ;;  %3412 = vmatmul.bf16.gmra.mxu1 %v2974_v46 }
 0x3a5   :  { %3870 = vmatmul.bf16.gmra.mxu2 %v3665_v34  ;;  %4104 = vmatmul.bf16.gmra.mxu3 %v3665_v34 }
 0x3a8   :  { %v3831_v60 = vpop.f32.mrf.mxu2  ;;  %v4065_v19 = vpop.f32.mrf.mxu3 }
 0x3a9   :  { %v10129_v49 = vadd.f32 %v3831_v60, %v3139_v51  ;;  %v10131_v3 = vadd.f32 %v4065_v19, %v3373_v24  ;;  %v3141_v28 = vpop.f32.mrf.mxu0  ;;  %v3375_v2 = vpop.f32.mrf.mxu1  ;;  %v8365_v51 = vld [vmem:[%s11360_s3 + $0xc0] sm:$0xff] }
 0x3aa   :  { %5640 = vmatpush.bf16.msra.mxu2 %v8365_v51 }
 0x3ab   :  { %11889 = vst [vmem:[#allocation78_spill] sm:$0xff] %v10129_v49 }
 0x3ac   :  { %11890 = vst [vmem:[#allocation79_spill] sm:$0xff] %v10131_v3  ;;  %v3632_v3 = vld [vmem:[#allocation2 + $0x1c1] sm:$0xff] }
 0x3b0   :  { %v3833_v9 = vpop.f32.mrf.mxu2  ;;  %v4067_v40 = vpop.f32.mrf.mxu3 }
 0x3b1   :  { %v10133_v53 = vadd.f32 %v3833_v9, %v3141_v28  ;;  %v10135_v0 = vadd.f32 %v4067_v40, %v3375_v2  ;;  %v3144_v46 = vpop.f32.mrf.mxu0  ;;  %v3378_v34 = vpop.f32.mrf.mxu1  ;;  %v2940_v2 = vld [vmem:[#allocation2 + $0x1b8] sm:$0xff] }
 0x3b3   :  { %11891 = vst [vmem:[#allocation80_spill] sm:$0xff] %v10133_v53  ;;  %3183 = vmatmul.bf16.gmra.mxu0 %v2975_v21 }
 0x3b4   :  { %11892 = vst [vmem:[#allocation81_spill] sm:$0xff] %v10135_v0  ;;  %3417 = vmatmul.bf16.gmra.mxu1 %v2975_v21 }
 0x3b5   :  { %3875 = vmatmul.bf16.gmra.mxu2 %v3666_v39  ;;  %4109 = vmatmul.bf16.gmra.mxu3 %v3666_v39  ;;  %v8373_v39 = vld [vmem:[%s11360_s3 + $0x1c0] sm:$0xff] }
 0x3b6   :  { %5874 = vmatpush.bf16.msra.mxu3 %v8373_v39 }
 0x3b8   :  { %v3836_v24 = vpop.f32.mrf.mxu2  ;;  %v4070_v60 = vpop.f32.mrf.mxu3 }
 0x3b9   :  { %v10140_v19 = vadd.f32 %v3836_v24, %v3144_v46  ;;  %v10142_v9 = vadd.f32 %v4070_v60, %v3378_v34  ;;  %v3146_v40 = vpop.f32.mrf.mxu0  ;;  %v3380_v28 = vpop.f32.mrf.mxu1  ;;  %v2939_v24 = vld [vmem:[#allocation2 + $0x1b0] sm:$0xff]  ;;  %v8357_v60 = vld [vmem:[%s11360_s3 + $0x180] sm:$0xff]  ;;  %s8393_s3 = smov 64  }
 0x3ba   :  { %4926 = vmatpush.bf16.msra.mxu1 %v8357_v60 }
 0x3bb   :  { %11893 = vst [vmem:[#allocation82_spill] sm:$0xff] %v10140_v19  ;;  %v3630_v19 = vld [vmem:[#allocation2 + $0x1b1] sm:$0xff] }
 0x3bc   :  { %11894 = vst [vmem:[#allocation83_spill] sm:$0xff] %v10142_v9  ;;  %v2976_v9 = vpack.c.bf16 %v2940_v2, %v2939_v24  ;;  %v3667_v0 = vpack.c.bf16 %v3631_v56, %v3630_v19  ;;  %v3633_v2 = vld [vmem:[#allocation2 + $0x1c9] sm:$0xff]  ;;  %v2941_v56 = vld [vmem:[#allocation2 + $0x1c0] sm:$0xff] }
 0x3c0   :  { %v3838_v31 = vpop.f32.mrf.mxu2  ;;  %v4072_v14 = vpop.f32.mrf.mxu3 }
 0x3c1   :  { %v10150_v46 = vadd.f32 %v3838_v31, %v3146_v40  ;;  %v10152_v34 = vadd.f32 %v4072_v14, %v3380_v28  ;;  %v3149_v21 = vpop.f32.mrf.mxu0  ;;  %v3383_v51 = vpop.f32.mrf.mxu1 }
 0x3c3   :  { %11895 = vst [vmem:[#allocation84_spill] sm:$0xff] %v10150_v46  ;;  %3188 = vmatmul.bf16.gmra.mxu0 %v2976_v9 }
 0x3c4   :  { %11896 = vst [vmem:[#allocation85_spill] sm:$0xff] %v10152_v34  ;;  %3422 = vmatmul.bf16.gmra.mxu1 %v2976_v9  ;;  %v2942_v34 = vld [vmem:[#allocation2 + $0x1c8] sm:$0xff]  ;;  %v3668_v9 = vpack.c.bf16 %v3633_v2, %v3632_v3 }
 0x3c5   :  { %3880 = vmatmul.bf16.gmra.mxu2 %v3667_v0  ;;  %4114 = vmatmul.bf16.gmra.mxu3 %v3667_v0  ;;  %v2977_v60 = vpack.c.bf16 %v2942_v34, %v2941_v56  ;;  %v2943_v56 = vld [vmem:[#allocation2 + $0x1d0] sm:$0xff] }
 0x3c8   :  { %v3841_v43 = vpop.f32.mrf.mxu2  ;;  %v4075_v40 = vpop.f32.mrf.mxu3 }
 0x3c9   :  { %v10157_v39 = vadd.f32 %v3841_v43, %v3149_v21  ;;  %v10159_v28 = vadd.f32 %v4075_v40, %v3383_v51  ;;  %v3151_v31 = vpop.f32.mrf.mxu0  ;;  %v3385_v14 = vpop.f32.mrf.mxu1 }
 0x3cb   :  { %11897 = vst [vmem:[#allocation86_spill] sm:$0xff] %v10157_v39 }
 0x3cc   :  { %11898 = vst [vmem:[#allocation87_spill] sm:$0xff] %v10159_v28  ;;  %v3635_v28 = vld [vmem:[#allocation2 + $0x1d9] sm:$0xff] }
 0x3d0   :  { %v3843_v46 = vpop.f32.mrf.mxu2  ;;  %v4077_v53 = vpop.f32.mrf.mxu3 }
 0x3d1   :  { %v3154_v24 = vpop.f32.mrf.mxu0  ;;  %v3388_v19 = vpop.f32.mrf.mxu1  ;;  %v2944_v53 = vld [vmem:[#allocation2 + $0x1d8] sm:$0xff] }
 0x3d3   :  { %3193 = vmatmul.bf16.gmra.mxu0 %v2977_v60 }
 0x3d4   :  { %3427 = vmatmul.bf16.gmra.mxu1 %v2977_v60  ;;  %v2978_v60 = vpack.c.bf16 %v2944_v53, %v2943_v56  ;;  %v3637_v53 = vld [vmem:[#allocation2 + $0x1e9] sm:$0xff] }
 0x3d5   :  { %3885 = vmatmul.bf16.gmra.mxu2 %v3668_v9  ;;  %4119 = vmatmul.bf16.gmra.mxu3 %v3668_v9  ;;  %v3634_v9 = vld [vmem:[#allocation2 + $0x1d1] sm:$0xff] }
 0x3d6   :  { %v3669_v49 = vpack.c.bf16 %v3635_v28, %v3634_v9 }
 0x3d8   :  { %v3846_v0 = vpop.f32.mrf.mxu2  ;;  %v4080_v21 = vpop.f32.mrf.mxu3 }
 0x3d9   :  { %v10161_v51 = vadd.f32 %v3846_v0, %v3154_v24  ;;  %v10163_v43 = vadd.f32 %v4080_v21, %v3388_v19  ;;  %v3156_v40 = vpop.f32.mrf.mxu0  ;;  %v3390_v46 = vpop.f32.mrf.mxu1 }
 0x3db   :  { %11899 = vst [vmem:[#allocation88_spill] sm:$0xff] %v10161_v51 }
 0x3dc   :  { %11900 = vst [vmem:[#allocation89_spill] sm:$0xff] %v10163_v43  ;;  %v3636_v43 = vld [vmem:[#allocation2 + $0x1e1] sm:$0xff] }
 0x3dd   :  { %v3670_v51 = vpack.c.bf16 %v3637_v53, %v3636_v43 }
 0x3e0   :  { %v3848_v31 = vpop.f32.mrf.mxu2  ;;  %v4082_v14 = vpop.f32.mrf.mxu3 }
 0x3e1   :  { %v10165_v39 = vadd.f32 %v3848_v31, %v3156_v40  ;;  %v10167_v34 = vadd.f32 %v4082_v14, %v3390_v46  ;;  %v3159_v3 = vpop.f32.mrf.mxu0  ;;  %v3393_v2 = vpop.f32.mrf.mxu1  ;;  %v2945_v46 = vld [vmem:[#allocation2 + $0x1e0] sm:$0xff]  ;;  %v2946_v14 = vld [vmem:[#allocation2 + $0x1e8] sm:$0xff] }
 0x3e2   :  { %v2979_v9 = vpack.c.bf16 %v2946_v14, %v2945_v46 }
 0x3e3   :  { %11901 = vst [vmem:[#allocation90_spill] sm:$0xff] %v10165_v39  ;;  %3198 = vmatmul.bf16.gmra.mxu0 %v2978_v60 }
 0x3e4   :  { %11902 = vst [vmem:[#allocation91_spill] sm:$0xff] %v10167_v34  ;;  %3432 = vmatmul.bf16.gmra.mxu1 %v2978_v60 }
 0x3e5   :  { %3890 = vmatmul.bf16.gmra.mxu2 %v3669_v49  ;;  %4124 = vmatmul.bf16.gmra.mxu3 %v3669_v49 }
 0x3e8   :  { %v3851_v24 = vpop.f32.mrf.mxu2  ;;  %v4085_v19 = vpop.f32.mrf.mxu3 }
 0x3e9   :  { %v10169_v0 = vadd.f32 %v3851_v24, %v3159_v3  ;;  %v10171_v21 = vadd.f32 %v4085_v19, %v3393_v2  ;;  %v3161_v40 = vpop.f32.mrf.mxu0  ;;  %v3395_v31 = vpop.f32.mrf.mxu1 }
 0x3eb   :  { %11903 = vst [vmem:[#allocation92_spill] sm:$0xff] %v10169_v0 }
 0x3ec   :  { %11904 = vst [vmem:[#allocation93_spill] sm:$0xff] %v10171_v21 }
 0x3f0   :  { %v3853_v34 = vpop.f32.mrf.mxu2  ;;  %v4087_v39 = vpop.f32.mrf.mxu3 }
 0x3f1   :  { %v10173_v56 = vadd.f32 %v3853_v34, %v3161_v40  ;;  %v10175_v28 = vadd.f32 %v4087_v39, %v3395_v31  ;;  %v3164_v60 = vpop.f32.mrf.mxu0  ;;  %v3398_v49 = vpop.f32.mrf.mxu1  ;;  %v2947_v34 = vld [vmem:[#allocation2 + $0x1f0] sm:$0xff]  ;;  %v2948_v40 = vld [vmem:[#allocation2 + $0x1f8] sm:$0xff] }
 0x3f2   :  { %v2980_v53 = vpack.c.bf16 %v2948_v40, %v2947_v34  ;;  %v4524_v34 = vld [vmem:[#allocation2 + $0x8] sm:$0xff] }
 0x3f3   :  { %11905 = vst [vmem:[#allocation94_spill] sm:$0xff] %v10173_v56  ;;  %3203 = vmatmul.bf16.gmra.mxu0 %v2979_v9  ;;  %v3639_v56 = vld [vmem:[#allocation2 + $0x1f9] sm:$0xff] }
 0x3f4   :  { %11906 = vst [vmem:[#allocation95_spill] sm:$0xff] %v10175_v28  ;;  %3437 = vmatmul.bf16.gmra.mxu1 %v2979_v9  ;;  %v3638_v28 = vld [vmem:[#allocation2 + $0x1f1] sm:$0xff] }
 0x3f5   :  { %3895 = vmatmul.bf16.gmra.mxu2 %v3670_v51  ;;  %4129 = vmatmul.bf16.gmra.mxu3 %v3670_v51  ;;  %v3671_v9 = vpack.c.bf16 %v3639_v56, %v3638_v28  ;;  %v5472_v28 = vld [vmem:[#allocation2 + $0x9] sm:$0xff] }
 0x3f8   :  { %v3856_v3 = vpop.f32.mrf.mxu2  ;;  %v4090_v2 = vpop.f32.mrf.mxu3 }
 0x3f9   :  { %v10177_v24 = vadd.f32 %v3856_v3, %v3164_v60  ;;  %v10179_v19 = vadd.f32 %v4090_v2, %v3398_v49  ;;  %v3166_v21 = vpop.f32.mrf.mxu0  ;;  %v3400_v0 = vpop.f32.mrf.mxu1 }
 0x3fb   :  { %11907 = vst [vmem:[#allocation96_spill] sm:$0xff] %v10177_v24 }
 0x3fc   :  { %11908 = vst [vmem:[#allocation97_spill] sm:$0xff] %v10179_v19 }
 0x400   :  { %v3858_v39 = vpop.f32.mrf.mxu2  ;;  %v4092_v31 = vpop.f32.mrf.mxu3 }
 0x401   :  { %v10181_v46 = vadd.f32 %v3858_v39, %v3166_v21  ;;  %v10183_v43 = vadd.f32 %v4092_v31, %v3400_v0  ;;  %v3169_v14 = vpop.f32.mrf.mxu0  ;;  %v3403_v51 = vpop.f32.mrf.mxu1  ;;  %v4525_v21 = vld [vmem:[#allocation2 + $0x10] sm:$0xff] }
 0x402   :  { %v5473_v31 = vld [vmem:[#allocation2 + $0x11] sm:$0xff]  ;;  %v4588_v56 = vpack.c.bf16 %v4525_v21, %v4524_v34 }
 0x403   :  { %11909 = vst [vmem:[#allocation98_spill] sm:$0xff] %v10181_v46  ;;  %3208 = vmatmul.bf16.gmra.mxu0 %v2980_v53  ;;  %v5536_v40 = vpack.c.bf16 %v5473_v31, %v5472_v28 }
 0x404   :  { %11910 = vst [vmem:[#allocation99_spill] sm:$0xff] %v10183_v43  ;;  %3442 = vmatmul.bf16.gmra.mxu1 %v2980_v53 }
 0x405   :  { %3900 = vmatmul.bf16.gmra.mxu2 %v3671_v9  ;;  %4134 = vmatmul.bf16.gmra.mxu3 %v3671_v9 }
 0x408   :  { %v3861_v60 = vpop.f32.mrf.mxu2  ;;  %v4095_v49 = vpop.f32.mrf.mxu3 }
 0x409   :  { %v10185_v3 = vadd.f32 %v3861_v60, %v3169_v14  ;;  %v10187_v2 = vadd.f32 %v4095_v49, %v3403_v51  ;;  %v3171_v19 = vpop.f32.mrf.mxu0  ;;  %v3405_v24 = vpop.f32.mrf.mxu1  ;;  %v4527_v60 = vld [vmem:[#allocation2 + $0x20] sm:$0xff] }
 0x40b   :  { %11911 = vst [vmem:[#allocation100_spill] sm:$0xff] %v10185_v3 }
 0x40c   :  { %11912 = vst [vmem:[#allocation101_spill] sm:$0xff] %v10187_v2 }
 0x410   :  { %v3863_v39 = vpop.f32.mrf.mxu2  ;;  %v4097_v0 = vpop.f32.mrf.mxu3 }
 0x411   :  { %v3174_v43 = vpop.f32.mrf.mxu0  ;;  %v3408_v46 = vpop.f32.mrf.mxu1  ;;  %v5475_v0 = vld [vmem:[#allocation2 + $0x21] sm:$0xff] }
 0x413   :  { %4693 = vmatmul.bf16.vlgmr.msra.gmra.mxu0 %v4588_v56 }
 0x414   :  { %4927 = vmatmul.bf16.vlgmr.msra.gmra.mxu1 %v4588_v56  ;;  %v4526_v56 = vld [vmem:[#allocation2 + $0x18] sm:$0xff] }
 0x415   :  { %5641 = vmatmul.bf16.vlgmr.msra.gmra.mxu2 %v5536_v40  ;;  %5875 = vmatmul.bf16.vlgmr.msra.gmra.mxu3 %v5536_v40  ;;  %v4589_v28 = vpack.c.bf16 %v4527_v60, %v4526_v56  ;;  %v5474_v40 = vld [vmem:[#allocation2 + $0x19] sm:$0xff] }
 0x416   :  { %v5537_v3 = vpack.c.bf16 %v5475_v0, %v5474_v40  ;;  %v5476_v40 = vld [vmem:[#allocation2 + $0x29] sm:$0xff] }
 0x418   :  { %v3866_v14 = vpop.f32.mrf.mxu2  ;;  %v4100_v53 = vpop.f32.mrf.mxu3 }
 0x419   :  { %v10189_v51 = vadd.f32 %v3866_v14, %v3174_v43  ;;  %v10191_v19 = vadd.f32 %v4100_v53, %v3408_v46  ;;  %v3176_v24 = vpop.f32.mrf.mxu0  ;;  %v3410_v9 = vpop.f32.mrf.mxu1 }
 0x41b   :  { %11913 = vst [vmem:[#allocation102_spill] sm:$0xff] %v10189_v51 }
 0x41c   :  { %11914 = vst [vmem:[#allocation103_spill] sm:$0xff] %v10191_v19 }
 0x420   :  { %v3868_v49 = vpop.f32.mrf.mxu2  ;;  %v4102_v39 = vpop.f32.mrf.mxu3 }
 0x421   :  { %v10193_v2 = vadd.f32 %v3868_v49, %v3176_v24  ;;  %v10195_v21 = vadd.f32 %v4102_v39, %v3410_v9  ;;  %v3179_v31 = vpop.f32.mrf.mxu0  ;;  %v3413_v34 = vpop.f32.mrf.mxu1  ;;  %v4529_v9 = vld [vmem:[#allocation2 + $0x30] sm:$0xff] }
 0x423   :  { %11915 = vst [vmem:[#allocation104_spill] sm:$0xff] %v10193_v2  ;;  %4698 = vmatmul.bf16.gmra.mxu0 %v4589_v28  ;;  %v5477_v2 = vld [vmem:[#allocation2 + $0x31] sm:$0xff] }
 0x424   :  { %11916 = vst [vmem:[#allocation105_spill] sm:$0xff] %v10195_v21  ;;  %4932 = vmatmul.bf16.gmra.mxu1 %v4589_v28  ;;  %v4528_v28 = vld [vmem:[#allocation2 + $0x28] sm:$0xff]  ;;  %v5538_v51 = vpack.c.bf16 %v5477_v2, %v5476_v40  ;;  %v5478_v40 = vld [vmem:[#allocation2 + $0x39] sm:$0xff] }
 0x425   :  { %5646 = vmatmul.bf16.gmra.mxu2 %v5537_v3  ;;  %5880 = vmatmul.bf16.gmra.mxu3 %v5537_v3  ;;  %v4590_v3 = vpack.c.bf16 %v4529_v9, %v4528_v28 }
 0x428   :  { %v3871_v46 = vpop.f32.mrf.mxu2  ;;  %v4105_v43 = vpop.f32.mrf.mxu3 }
 0x429   :  { %v10197_v14 = vadd.f32 %v3871_v46, %v3179_v31  ;;  %v10199_v53 = vadd.f32 %v4105_v43, %v3413_v34  ;;  %v3181_v24 = vpop.f32.mrf.mxu0  ;;  %v3415_v49 = vpop.f32.mrf.mxu1 }
 0x42b   :  { %11917 = vst [vmem:[#allocation106_spill] sm:$0xff] %v10197_v14 }
 0x42c   :  { %11918 = vst [vmem:[#allocation107_spill] sm:$0xff] %v10199_v53 }
 0x430   :  { %v3873_v39 = vpop.f32.mrf.mxu2  ;;  %v4107_v21 = vpop.f32.mrf.mxu3 }
 0x431   :  { %v10201_v19 = vadd.f32 %v3873_v39, %v3181_v24  ;;  %v10203_v60 = vadd.f32 %v4107_v21, %v3415_v49  ;;  %v3184_v0 = vpop.f32.mrf.mxu0  ;;  %v3418_v56 = vpop.f32.mrf.mxu1  ;;  %v4531_v21 = vld [vmem:[#allocation2 + $0x40] sm:$0xff] }
 0x433   :  { %11919 = vst [vmem:[#allocation108_spill] sm:$0xff] %v10201_v19  ;;  %4703 = vmatmul.bf16.gmra.mxu0 %v4590_v3  ;;  %v5479_v19 = vld [vmem:[#allocation2 + $0x41] sm:$0xff] }
 0x434   :  { %11920 = vst [vmem:[#allocation109_spill] sm:$0xff] %v10203_v60  ;;  %4937 = vmatmul.bf16.gmra.mxu1 %v4590_v3  ;;  %v4530_v3 = vld [vmem:[#allocation2 + $0x38] sm:$0xff]  ;;  %v5539_v14 = vpack.c.bf16 %v5479_v19, %v5478_v40  ;;  %v5480_v40 = vld [vmem:[#allocation2 + $0x49] sm:$0xff] }
 0x435   :  { %5651 = vmatmul.bf16.gmra.mxu2 %v5538_v51  ;;  %5885 = vmatmul.bf16.gmra.mxu3 %v5538_v51  ;;  %v4591_v51 = vpack.c.bf16 %v4531_v21, %v4530_v3  ;;  %v4532_v3 = vld [vmem:[#allocation2 + $0x48] sm:$0xff] }
 0x438   :  { %v3876_v31 = vpop.f32.mrf.mxu2  ;;  %v4110_v34 = vpop.f32.mrf.mxu3 }
 0x439   :  { %v10205_v46 = vadd.f32 %v3876_v31, %v3184_v0  ;;  %v10207_v43 = vadd.f32 %v4110_v34, %v3418_v56  ;;  %v3186_v24 = vpop.f32.mrf.mxu0  ;;  %v3420_v39 = vpop.f32.mrf.mxu1 }
 0x43b   :  { %11921 = vst [vmem:[#allocation110_spill] sm:$0xff] %v10205_v46 }
 0x43c   :  { %11922 = vst [vmem:[#allocation111_spill] sm:$0xff] %v10207_v43 }
 0x440   :  { %v3878_v49 = vpop.f32.mrf.mxu2  ;;  %v4112_v60 = vpop.f32.mrf.mxu3 }
 0x441   :  { %v10209_v53 = vadd.f32 %v3878_v49, %v3186_v24  ;;  %v10211_v9 = vadd.f32 %v4112_v60, %v3420_v39  ;;  %v3189_v2 = vpop.f32.mrf.mxu0  ;;  %v3423_v28 = vpop.f32.mrf.mxu1  ;;  %v4533_v60 = vld [vmem:[#allocation2 + $0x50] sm:$0xff] }
 0x442   :  { %v4592_v19 = vpack.c.bf16 %v4533_v60, %v4532_v3 }
 0x443   :  { %11923 = vst [vmem:[#allocation112_spill] sm:$0xff] %v10209_v53  ;;  %4708 = vmatmul.bf16.gmra.mxu0 %v4591_v51  ;;  %v5481_v53 = vld [vmem:[#allocation2 + $0x51] sm:$0xff] }
 0x444   :  { %11924 = vst [vmem:[#allocation113_spill] sm:$0xff] %v10211_v9  ;;  %4942 = vmatmul.bf16.gmra.mxu1 %v4591_v51  ;;  %v5540_v51 = vpack.c.bf16 %v5481_v53, %v5480_v40 }
 0x445   :  { %5656 = vmatmul.bf16.gmra.mxu2 %v5539_v14  ;;  %5890 = vmatmul.bf16.gmra.mxu3 %v5539_v14 }
 0x448   :  { %v3881_v0 = vpop.f32.mrf.mxu2  ;;  %v4115_v56 = vpop.f32.mrf.mxu3 }
 0x449   :  { %v10213_v31 = vadd.f32 %v3881_v0, %v3189_v2  ;;  %v10215_v34 = vadd.f32 %v4115_v56, %v3423_v28  ;;  %v3191_v24 = vpop.f32.mrf.mxu0  ;;  %v3425_v49 = vpop.f32.mrf.mxu1 }
 0x44b   :  { %11925 = vst [vmem:[#allocation114_spill] sm:$0xff] %v10213_v31 }
 0x44c   :  { %11926 = vst [vmem:[#allocation115_spill] sm:$0xff] %v10215_v34  ;;  %v5483_v34 = vld [vmem:[#allocation2 + $0x61] sm:$0xff] }
 0x450   :  { %v3883_v39 = vpop.f32.mrf.mxu2  ;;  %v4117_v9 = vpop.f32.mrf.mxu3 }
 0x451   :  { %v3194_v43 = vpop.f32.mrf.mxu0  ;;  %v3428_v21 = vpop.f32.mrf.mxu1  ;;  %v4535_v9 = vld [vmem:[#allocation2 + $0x60] sm:$0xff] }
 0x453   :  { %4713 = vmatmul.bf16.gmra.mxu0 %v4592_v19 }
 0x454   :  { %4947 = vmatmul.bf16.gmra.mxu1 %v4592_v19  ;;  %v4534_v19 = vld [vmem:[#allocation2 + $0x58] sm:$0xff] }
 0x455   :  { %5661 = vmatmul.bf16.gmra.mxu2 %v5540_v51  ;;  %5895 = vmatmul.bf16.gmra.mxu3 %v5540_v51  ;;  %v4593_v40 = vpack.c.bf16 %v4535_v9, %v4534_v19  ;;  %v5482_v51 = vld [vmem:[#allocation2 + $0x59] sm:$0xff] }
 0x456   :  { %v5541_v46 = vpack.c.bf16 %v5483_v34, %v5482_v51  ;;  %v5484_v51 = vld [vmem:[#allocation2 + $0x69] sm:$0xff] }
 0x458   :  { %v3886_v14 = vpop.f32.mrf.mxu2  ;;  %v4120_v2 = vpop.f32.mrf.mxu3 }
 0x459   :  { %v10217_v28 = vadd.f32 %v3886_v14, %v3194_v43  ;;  %v10219_v0 = vadd.f32 %v4120_v2, %v3428_v21  ;;  %v3196_v56 = vpop.f32.mrf.mxu0  ;;  %v3430_v24 = vpop.f32.mrf.mxu1 }
 0x45b   :  { %11927 = vst [vmem:[#allocation116_spill] sm:$0xff] %v10217_v28 }
 0x45c   :  { %11928 = vst [vmem:[#allocation117_spill] sm:$0xff] %v10219_v0 }
 0x460   :  { %v3888_v49 = vpop.f32.mrf.mxu2  ;;  %v4122_v39 = vpop.f32.mrf.mxu3 }
 0x461   :  { %v10221_v31 = vadd.f32 %v3888_v49, %v3196_v56  ;;  %v10223_v60 = vadd.f32 %v4122_v39, %v3430_v24  ;;  %v3199_v53 = vpop.f32.mrf.mxu0  ;;  %v3433_v3 = vpop.f32.mrf.mxu1  ;;  %v4537_v24 = vld [vmem:[#allocation2 + $0x70] sm:$0xff] }
 0x463   :  { %11929 = vst [vmem:[#allocation118_spill] sm:$0xff] %v10221_v31  ;;  %4718 = vmatmul.bf16.gmra.mxu0 %v4593_v40  ;;  %v5485_v31 = vld [vmem:[#allocation2 + $0x71] sm:$0xff] }
 0x464   :  { %11930 = vst [vmem:[#allocation119_spill] sm:$0xff] %v10223_v60  ;;  %4952 = vmatmul.bf16.gmra.mxu1 %v4593_v40  ;;  %v4536_v40 = vld [vmem:[#allocation2 + $0x68] sm:$0xff]  ;;  %v5542_v28 = vpack.c.bf16 %v5485_v31, %v5484_v51  ;;  %v5486_v51 = vld [vmem:[#allocation2 + $0x79] sm:$0xff] }
 0x465   :  { %5666 = vmatmul.bf16.gmra.mxu2 %v5541_v46  ;;  %5900 = vmatmul.bf16.gmra.mxu3 %v5541_v46  ;;  %v4594_v46 = vpack.c.bf16 %v4537_v24, %v4536_v40 }
 0x468   :  { %v3891_v43 = vpop.f32.mrf.mxu2  ;;  %v4125_v21 = vpop.f32.mrf.mxu3 }
 0x469   :  { %v10225_v14 = vadd.f32 %v3891_v43, %v3199_v53  ;;  %v10227_v2 = vadd.f32 %v4125_v21, %v3433_v3  ;;  %v3201_v56 = vpop.f32.mrf.mxu0  ;;  %v3435_v49 = vpop.f32.mrf.mxu1 }
 0x46b   :  { %11931 = vst [vmem:[#allocation120_spill] sm:$0xff] %v10225_v14 }
 0x46c   :  { %11932 = vst [vmem:[#allocation121_spill] sm:$0xff] %v10227_v2 }
 0x470   :  { %v3893_v39 = vpop.f32.mrf.mxu2  ;;  %v4127_v60 = vpop.f32.mrf.mxu3 }
 0x471   :  { %v10229_v0 = vadd.f32 %v3893_v39, %v3201_v56  ;;  %v10231_v9 = vadd.f32 %v4127_v60, %v3435_v49  ;;  %v3204_v34 = vpop.f32.mrf.mxu0  ;;  %v3438_v19 = vpop.f32.mrf.mxu1  ;;  %v4539_v60 = vld [vmem:[#allocation2 + $0x80] sm:$0xff] }
 0x473   :  { %11933 = vst [vmem:[#allocation122_spill] sm:$0xff] %v10229_v0  ;;  %4723 = vmatmul.bf16.gmra.mxu0 %v4594_v46  ;;  %v5487_v0 = vld [vmem:[#allocation2 + $0x81] sm:$0xff] }
 0x474   :  { %11934 = vst [vmem:[#allocation123_spill] sm:$0xff] %v10231_v9  ;;  %4957 = vmatmul.bf16.gmra.mxu1 %v4594_v46  ;;  %v4538_v46 = vld [vmem:[#allocation2 + $0x78] sm:$0xff]  ;;  %v5543_v14 = vpack.c.bf16 %v5487_v0, %v5486_v51  ;;  %v5488_v51 = vld [vmem:[#allocation2 + $0x89] sm:$0xff] }
 0x475   :  { %5671 = vmatmul.bf16.gmra.mxu2 %v5542_v28  ;;  %5905 = vmatmul.bf16.gmra.mxu3 %v5542_v28  ;;  %v4595_v28 = vpack.c.bf16 %v4539_v60, %v4538_v46  ;;  %v4540_v46 = vld [vmem:[#allocation2 + $0x88] sm:$0xff] }
 0x478   :  { %v3896_v53 = vpop.f32.mrf.mxu2  ;;  %v4130_v3 = vpop.f32.mrf.mxu3 }
 0x479   :  { %v10233_v43 = vadd.f32 %v3896_v53, %v3204_v34  ;;  %v10235_v21 = vadd.f32 %v4130_v3, %v3438_v19  ;;  %v3206_v56 = vpop.f32.mrf.mxu0  ;;  %v3440_v39 = vpop.f32.mrf.mxu1 }
 0x47b   :  { %11935 = vst [vmem:[#allocation124_spill] sm:$0xff] %v10235_v21 }
 0x480   :  { %v3898_v49 = vpop.f32.mrf.mxu2  ;;  %v4132_v9 = vpop.f32.mrf.mxu3 }
 0x481   :  { %v10237_v2 = vadd.f32 %v3898_v49, %v3206_v56  ;;  %v10239_v24 = vadd.f32 %v4132_v9, %v3440_v39  ;;  %v3209_v31 = vpop.f32.mrf.mxu0  ;;  %v3443_v40 = vpop.f32.mrf.mxu1  ;;  %v4541_v9 = vld [vmem:[#allocation2 + $0x90] sm:$0xff] }
 0x482   :  { %v4596_v0 = vpack.c.bf16 %v4541_v9, %v4540_v46  ;;  %v5491_v9 = vld [vmem:[#allocation2 + $0xa1] sm:$0xff] }
 0x483   :  { %11936 = vst [vmem:[#allocation125_spill] sm:$0xff] %v10237_v2  ;;  %4728 = vmatmul.bf16.gmra.mxu0 %v4595_v28 }
 0x484   :  { %11937 = vst [vmem:[#allocation126_spill] sm:$0xff] %v10239_v24  ;;  %4962 = vmatmul.bf16.gmra.mxu1 %v4595_v28  ;;  %v5489_v24 = vld [vmem:[#allocation2 + $0x91] sm:$0xff] }
 0x485   :  { %5676 = vmatmul.bf16.gmra.mxu2 %v5543_v14  ;;  %5910 = vmatmul.bf16.gmra.mxu3 %v5543_v14  ;;  %v5544_v28 = vpack.c.bf16 %v5489_v24, %v5488_v51 }
 0x488   :  { %v3901_v34 = vpop.f32.mrf.mxu2  ;;  %v4135_v19 = vpop.f32.mrf.mxu3 }
 0x489   :  { %v10241_v53 = vadd.f32 %v3901_v34, %v3209_v31  ;;  %v10243_v3 = vadd.f32 %v4135_v19, %v3443_v40  ;;  %v3211_v56 = vpop.f32.mrf.mxu0  ;;  %v3445_v49 = vpop.f32.mrf.mxu1 }
 0x48b   :  { %11938 = vst [vmem:[#allocation127_spill] sm:$0xff] %v10243_v3  ;;  %v4558_v3 = vld [vmem:[#allocation2 + $0x118] sm:$0xff] }
 0x490   :  { %v3903_v39 = vpop.f32.mrf.mxu2  ;;  %v4137_v21 = vpop.f32.mrf.mxu3 }
 0x491   :  { %v4694_v2 = vpop.f32.mrf.mxu0  ;;  %v4928_v60 = vpop.f32.mrf.mxu1 }
 0x492   :  { %v5152_v14 = vadd.f32 %v4694_v2, %v9959_v27  ;;  %v5344_v31 = vadd.f32 %v4928_v60, %v9961_v25  ;;  %v4543_v27 = vld [vmem:[#allocation2 + $0xa0] sm:$0xff] }
 0x493   :  { %4733 = vmatmul.bf16.gmra.mxu0 %v4596_v0 }
 0x494   :  { %4967 = vmatmul.bf16.gmra.mxu1 %v4596_v0  ;;  %v4542_v0 = vld [vmem:[#allocation2 + $0x98] sm:$0xff] }
 0x495   :  { %5681 = vmatmul.bf16.gmra.mxu2 %v5544_v28  ;;  %5915 = vmatmul.bf16.gmra.mxu3 %v5544_v28  ;;  %v4597_v51 = vpack.c.bf16 %v4543_v27, %v4542_v0  ;;  %v5490_v28 = vld [vmem:[#allocation2 + $0x99] sm:$0xff]  ;;  %v5493_v0 = vld [vmem:[#allocation2 + $0xb1] sm:$0xff] }
 0x498   :  { %v5642_v40 = vpop.f32.mrf.mxu2  ;;  %v5876_v34 = vpop.f32.mrf.mxu3 }
 0x499   :  { %v10247_v19 = vadd.f32 %v5642_v40, %v5152_v14  ;;  %v10249_v21 = vadd.f32 %v5876_v34, %v5344_v31  ;;  %v4696_v56 = vpop.f32.mrf.mxu0  ;;  %v4930_v49 = vpop.f32.mrf.mxu1  ;;  %v5545_v14 = vpack.c.bf16 %v5491_v9, %v5490_v28 }
 0x49a   :  { %v5153_v24 = vadd.f32 %v4696_v56, %v9965_v62  ;;  %v5345_v62 = vadd.f32 %v4930_v49, %v9967_v38  ;;  %v4545_v49 = vld [vmem:[#allocation2 + $0xb0] sm:$0xff] }
 0x49b   :  { %6932 = vrot.lane.b32.xlu2 %v10249_v21, %s8393_s3  ;;  %6612 = vrot.lane.b32.xlu0 %v10247_v19, %s8393_s3 }
 0x4a0   :  { %v5644_v2 = vpop.f32.mrf.mxu2  ;;  %v5878_v25 = vpop.f32.mrf.mxu3 }
 0x4a1   :  { %v10256_v39 = vadd.f32 %v5644_v2, %v5153_v24  ;;  %v4699_v60 = vpop.f32.mrf.mxu0  ;;  %v4933_v46 = vpop.f32.mrf.mxu1  ;;  %v10262_v56 = vadd.f32 %v5878_v25, %v5345_v62  ;;  %v4544_v62 = vld [vmem:[#allocation2 + $0xa8] sm:$0xff] }
 0x4a2   :  { %v5154_v31 = vadd.f32 %v4699_v60, %v9969_v59  ;;  %v5346_v9 = vadd.f32 %v4933_v46, %v9971_v61 }
 0x4a3   :  { %6614 = vrot.lane.b32.xlu0 %v10256_v39, %s8393_s3  ;;  %4738 = vmatmul.bf16.gmra.mxu0 %v4597_v51 }
 0x4a4   :  { %4972 = vmatmul.bf16.gmra.mxu1 %v4597_v51 }
 0x4a5   :  { %5686 = vmatmul.bf16.gmra.mxu2 %v5545_v14  ;;  %5920 = vmatmul.bf16.gmra.mxu3 %v5545_v14 }
 0x4a8   :  { %v5647_v40 = vpop.f32.mrf.mxu2  ;;  %v5881_v34 = vpop.f32.mrf.mxu3 }
 0x4a9   :  { %v10264_v24 = vadd.f32 %v5647_v40, %v5154_v31  ;;  %v4701_v27 = vpop.f32.mrf.mxu0  ;;  %v4935_v2 = vpop.f32.mrf.mxu1  ;;  %v10272_v25 = vadd.f32 %v5881_v34, %v5346_v9  ;;  %v4598_v31 = vpack.c.bf16 %v4545_v49, %v4544_v62  ;;  %v5492_v40 = vld [vmem:[#allocation2 + $0xa9] sm:$0xff] }
 0x4aa   :  { %v5347_v38 = vadd.f32 %v4935_v2, %v9975_v54  ;;  %v5546_v61 = vpack.c.bf16 %v5493_v0, %v5492_v40  ;;  %v5155_v54 = vadd.f32 %v4701_v27, %v9973_v4 }
 0x4ab   :  { %6934 = vrot.lane.b32.xlu0 %v10262_v56, %s8393_s3  ;;  %6616 = vrot.lane.b32.xlu1 %v10264_v24, %s8393_s3 }
 0x4b0   :  { %v5649_v59 = vpop.f32.mrf.mxu2  ;;  %v5883_v60 = vpop.f32.mrf.mxu3 }
 0x4b1   :  { %v10274_v51 = vadd.f32 %v5883_v60, %v5347_v38  ;;  %v4704_v28 = vpop.f32.mrf.mxu0  ;;  %v4938_v14 = vpop.f32.mrf.mxu1  ;;  %v10283_v38 = vadd.f32 %v5649_v59, %v5155_v54  ;;  %v4546_v54 = vld [vmem:[#allocation2 + $0xb8] sm:$0xff] }
 0x4b2   :  { %v5156_v46 = vadd.f32 %v4704_v28, %v9980_v23  ;;  %v5348_v34 = vadd.f32 %v4938_v14, %v9982_v29  ;;  %v4547_v29 = vld [vmem:[#allocation2 + $0xc0] sm:$0xff] }
 0x4b3   :  { %6938 = vrot.lane.b32.xlu2 %v10274_v51, %s8393_s3  ;;  %6936 = vrot.lane.b32.xlu1 %v10272_v25, %s8393_s3  ;;  %v5495_v28 = vld [vmem:[#allocation2 + $0xc1] sm:$0xff] }
 0x4b4   :  { %4743 = vmatmul.bf16.gmra.mxu0 %v4598_v31  ;;  %4977 = vmatmul.bf16.gmra.mxu1 %v4598_v31 }
 0x4b5   :  { %5691 = vmatmul.bf16.gmra.mxu2 %v5546_v61  ;;  %5925 = vmatmul.bf16.gmra.mxu3 %v5546_v61 }
 0x4b8   :  { %v5652_v2 = vpop.f32.mrf.mxu2  ;;  %v5886_v9 = vpop.f32.mrf.mxu3 }
 0x4b9   :  { %v10285_v49 = vadd.f32 %v5652_v2, %v5156_v46  ;;  %v10287_v60 = vadd.f32 %v5886_v9, %v5348_v34  ;;  %v4706_v62 = vpop.f32.mrf.mxu0  ;;  %v4940_v0 = vpop.f32.mrf.mxu1  ;;  %v4599_v46 = vpack.c.bf16 %v4547_v29, %v4546_v54  ;;  %v5494_v34 = vld [vmem:[#allocation2 + $0xb9] sm:$0xff] }
 0x4ba   :  { %v5157_v4 = vadd.f32 %v4706_v62, %v9990_v20  ;;  %v5349_v23 = vadd.f32 %v4940_v0, %v9992_v15  ;;  %v5547_v2 = vpack.c.bf16 %v5495_v28, %v5494_v34 }
 0x4bb   :  { %6940 = vrot.lane.b32.xlu0 %v10287_v60, %s8393_s3  ;;  %6618 = vrot.lane.b32.xlu1 %v10283_v38, %s8393_s3 }
 0x4bc   :  { %6620 = vrot.lane.b32.xlu2 %v10285_v49, %s8393_s3 }
 0x4c0   :  { %v5654_v27 = vpop.f32.mrf.mxu2  ;;  %v5888_v59 = vpop.f32.mrf.mxu3 }
 0x4c1   :  { %v10297_v14 = vadd.f32 %v5654_v27, %v5157_v4  ;;  %v10299_v31 = vadd.f32 %v5888_v59, %v5349_v23  ;;  %v4709_v40 = vpop.f32.mrf.mxu0  ;;  %v4943_v61 = vpop.f32.mrf.mxu1  ;;  %v4549_v27 = vld [vmem:[#allocation2 + $0xd0] sm:$0xff] }
 0x4c2   :  { %v5158_v20 = vadd.f32 %v4709_v40, %v9997_v18  ;;  %v5350_v15 = vadd.f32 %v4943_v61, %v9999_v7  ;;  %v5497_v18 = vld [vmem:[#allocation2 + $0xd1] sm:$0xff]  ;;  %v4548_v61 = vld [vmem:[#allocation2 + $0xc8] sm:$0xff] }
 0x4c3   :  { %6942 = vrot.lane.b32.xlu1 %v10299_v31, %s8393_s3  ;;  %v4600_v54 = vpack.c.bf16 %v4549_v27, %v4548_v61 }
 0x4c4   :  { %6622 = vrot.lane.b32.xlu2 %v10297_v14, %s8393_s3  ;;  %4748 = vmatmul.bf16.gmra.mxu0 %v4599_v46 }
 0x4c5   :  { %4982 = vmatmul.bf16.gmra.mxu1 %v4599_v46  ;;  %5696 = vmatmul.bf16.gmra.mxu2 %v5547_v2  ;;  %v5496_v46 = vld [vmem:[#allocation2 + $0xc9] sm:$0xff] }
 0x4c6   :  { %5930 = vmatmul.bf16.gmra.mxu3 %v5547_v2  ;;  %v5548_v34 = vpack.c.bf16 %v5497_v18, %v5496_v46 }
 0x4c8   :  { %v5657_v9 = vpop.f32.mrf.mxu2  ;;  %v5891_v62 = vpop.f32.mrf.mxu3 }
 0x4c9   :  { %v10307_v0 = vadd.f32 %v5657_v9, %v5158_v20  ;;  %v10309_v4 = vadd.f32 %v5891_v62, %v5350_v15  ;;  %v4711_v23 = vpop.f32.mrf.mxu0  ;;  %v4945_v29 = vpop.f32.mrf.mxu1 }
 0x4cb   :  { %6624 = vrot.lane.b32.xlu0 %v10307_v0, %s8393_s3 }
 0x4cc   :  { %6944 = vrot.lane.b32.xlu2 %v10309_v4, %s8393_s3 }
 0x4d0   :  { %v5659_v59 = vpop.f32.mrf.mxu2  ;;  %v5893_v28 = vpop.f32.mrf.mxu3 }
 0x4d1   :  { %v4714_v40 = vpop.f32.mrf.mxu0  ;;  %v4948_v7 = vpop.f32.mrf.mxu1  ;;  %v4551_v28 = vld [vmem:[#allocation2 + $0xe0] sm:$0xff] }
 0x4d2   :  { %v5160_v2 = vadd.f32 %v4714_v40, %v10001_v35  ;;  %v5352_v20 = vadd.f32 %v4948_v7, %v10003_v50  ;;  %v5499_v40 = vld [vmem:[#allocation2 + $0xe1] sm:$0xff] }
 0x4d4   :  { %4753 = vmatmul.bf16.gmra.mxu0 %v4600_v54 }
 0x4d5   :  { %4987 = vmatmul.bf16.gmra.mxu1 %v4600_v54  ;;  %5701 = vmatmul.bf16.gmra.mxu2 %v5548_v34 }
 0x4d6   :  { %5935 = vmatmul.bf16.gmra.mxu3 %v5548_v34  ;;  %v4550_v34 = vld [vmem:[#allocation2 + $0xd8] sm:$0xff] }
 0x4d8   :  { %v5662_v15 = vpop.f32.mrf.mxu2  ;;  %v5896_v9 = vpop.f32.mrf.mxu3 }
 0x4d9   :  { %v10317_v62 = vadd.f32 %v5662_v15, %v5160_v2  ;;  %v10319_v23 = vadd.f32 %v5896_v9, %v5352_v20  ;;  %v4716_v29 = vpop.f32.mrf.mxu0  ;;  %v4950_v59 = vpop.f32.mrf.mxu1  ;;  %v4601_v2 = vpack.c.bf16 %v4551_v28, %v4550_v34  ;;  %v5498_v20 = vld [vmem:[#allocation2 + $0xd9] sm:$0xff] }
 0x4da   :  { %v5161_v27 = vadd.f32 %v4716_v29, %v10005_v33  ;;  %v5353_v35 = vadd.f32 %v4950_v59, %v10007_v30  ;;  %v5549_v33 = vpack.c.bf16 %v5499_v40, %v5498_v20 }
 0x4db   :  { %6948 = vrot.lane.b32.xlu0 %v10319_v23, %s8393_s3  ;;  %6628 = vrot.lane.b32.xlu1 %v10317_v62, %s8393_s3 }
 0x4e0   :  { %v5664_v50 = vpop.f32.mrf.mxu2  ;;  %v5898_v18 = vpop.f32.mrf.mxu3 }
 0x4e1   :  { %v10327_v7 = vadd.f32 %v5664_v50, %v5161_v27  ;;  %v10329_v61 = vadd.f32 %v5898_v18, %v5353_v35  ;;  %v4719_v54 = vpop.f32.mrf.mxu0  ;;  %v4953_v46 = vpop.f32.mrf.mxu1  ;;  %v4553_v18 = vld [vmem:[#allocation2 + $0xf0] sm:$0xff] }
 0x4e2   :  { %v5162_v30 = vadd.f32 %v4719_v54, %v10009_v8  ;;  %v5354_v15 = vadd.f32 %v4953_v46, %v10011_v47  ;;  %v5501_v54 = vld [vmem:[#allocation2 + $0xf1] sm:$0xff] }
 0x4e3   :  { %6950 = vrot.lane.b32.xlu1 %v10329_v61, %s8393_s3  ;;  %6630 = vrot.lane.b32.xlu2 %v10327_v7, %s8393_s3 }
 0x4e4   :  { %4758 = vmatmul.bf16.gmra.mxu0 %v4601_v2 }
 0x4e5   :  { %4992 = vmatmul.bf16.gmra.mxu1 %v4601_v2  ;;  %5706 = vmatmul.bf16.gmra.mxu2 %v5549_v33 }
 0x4e6   :  { %5940 = vmatmul.bf16.gmra.mxu3 %v5549_v33  ;;  %v4552_v33 = vld [vmem:[#allocation2 + $0xe8] sm:$0xff] }
 0x4e8   :  { %v5667_v9 = vpop.f32.mrf.mxu2  ;;  %v5901_v29 = vpop.f32.mrf.mxu3 }
 0x4e9   :  { %v10337_v59 = vadd.f32 %v5667_v9, %v5162_v30  ;;  %v10339_v27 = vadd.f32 %v5901_v29, %v5354_v15  ;;  %v4721_v35 = vpop.f32.mrf.mxu0  ;;  %v4955_v28 = vpop.f32.mrf.mxu1  ;;  %v5500_v30 = vld [vmem:[#allocation2 + $0xe9] sm:$0xff]  ;;  %v4602_v15 = vpack.c.bf16 %v4553_v18, %v4552_v33 }
 0x4ea   :  { %v5163_v50 = vadd.f32 %v4721_v35, %v10013_v32  ;;  %v5355_v8 = vadd.f32 %v4955_v28, %v10015_v1  ;;  %v5550_v32 = vpack.c.bf16 %v5501_v54, %v5500_v30 }
 0x4eb   :  { %6952 = vrot.lane.b32.xlu2 %v10339_v27, %s8393_s3  ;;  %6632 = vrot.lane.b32.xlu0 %v10337_v59, %s8393_s3 }
 0x4f0   :  { %v5669_v47 = vpop.f32.mrf.mxu2  ;;  %v5903_v40 = vpop.f32.mrf.mxu3 }
 0x4f1   :  { %v10347_v46 = vadd.f32 %v5669_v47, %v5163_v50  ;;  %v10349_v34 = vadd.f32 %v5903_v40, %v5355_v8  ;;  %v4724_v2 = vpop.f32.mrf.mxu0  ;;  %v4958_v20 = vpop.f32.mrf.mxu1  ;;  %v4555_v40 = vld [vmem:[#allocation2 + $0x100] sm:$0xff] }
 0x4f2   :  { %v5164_v1 = vadd.f32 %v4724_v2, %v10020_v55  ;;  %v5356_v9 = vadd.f32 %v4958_v20, %v10022_v45  ;;  %v5503_v2 = vld [vmem:[#allocation2 + $0x101] sm:$0xff] }
 0x4f3   :  { %6954 = vrot.lane.b32.xlu0 %v10349_v34, %s8393_s3  ;;  %6634 = vrot.lane.b32.xlu1 %v10347_v46, %s8393_s3 }
 0x4f4   :  { %4763 = vmatmul.bf16.gmra.mxu0 %v4602_v15 }
 0x4f5   :  { %5711 = vmatmul.bf16.gmra.mxu2 %v5550_v32  ;;  %4997 = vmatmul.bf16.gmra.mxu1 %v4602_v15 }
 0x4f6   :  { %5945 = vmatmul.bf16.gmra.mxu3 %v5550_v32  ;;  %v4554_v32 = vld [vmem:[#allocation2 + $0xf8] sm:$0xff] }
 0x4f8   :  { %v5672_v29 = vpop.f32.mrf.mxu2  ;;  %v5906_v35 = vpop.f32.mrf.mxu3 }
 0x4f9   :  { %v10357_v28 = vadd.f32 %v5672_v29, %v5164_v1  ;;  %v10359_v50 = vadd.f32 %v5906_v35, %v5356_v9  ;;  %v4726_v8 = vpop.f32.mrf.mxu0  ;;  %v4960_v18 = vpop.f32.mrf.mxu1  ;;  %v4603_v1 = vpack.c.bf16 %v4555_v40, %v4554_v32  ;;  %v5502_v9 = vld [vmem:[#allocation2 + $0xf9] sm:$0xff] }
 0x4fa   :  { %v5165_v47 = vadd.f32 %v4726_v8, %v10030_v36  ;;  %v5357_v55 = vadd.f32 %v4960_v18, %v10032_v5  ;;  %v5551_v36 = vpack.c.bf16 %v5503_v2, %v5502_v9  ;;  %v5505_v9 = vld [vmem:[#allocation2 + $0x111] sm:$0xff] }
 0x4fb   :  { %6956 = vrot.lane.b32.xlu1 %v10359_v50, %s8393_s3  ;;  %6636 = vrot.lane.b32.xlu2 %v10357_v28, %s8393_s3 }
 0x500   :  { %v5674_v45 = vpop.f32.mrf.mxu2  ;;  %v5908_v54 = vpop.f32.mrf.mxu3 }
 0x501   :  { %v10367_v20 = vadd.f32 %v5674_v45, %v5165_v47  ;;  %v10369_v33 = vadd.f32 %v5908_v54, %v5357_v55  ;;  %v4729_v30 = vpop.f32.mrf.mxu0  ;;  %v4963_v15 = vpop.f32.mrf.mxu1 }
 0x502   :  { %v5166_v5 = vadd.f32 %v4729_v30, %v10037_v16  ;;  %v5358_v29 = vadd.f32 %v4963_v15, %v10039_v52  ;;  %v6933_v45 = vpop.permute.xlu2 %6932  ;;  %v10389_v52 = vld [vmem:[%s11363_s4] ss:$0 sm:$0xff]  ;;  %v4557_v30 = vld [vmem:[#allocation2 + $0x110] sm:$0xff] }
 0x503   :  { %6958 = vrot.lane.b32.xlu2 %v10369_v33, %s8393_s3  ;;  %6638 = vrot.lane.b32.xlu0 %v10367_v20, %s8393_s3  ;;  %v7124_v16 = vmax.f32 %v10249_v21, %v6933_v45 }
 0x504   :  { %4768 = vmatmul.bf16.gmra.mxu0 %v4603_v1 }
 0x505   :  { %5002 = vmatmul.bf16.gmra.mxu1 %v4603_v1  ;;  %5716 = vmatmul.bf16.gmra.mxu2 %v5551_v36 }
 0x506   :  { %5950 = vmatmul.bf16.gmra.mxu3 %v5551_v36 }
 0x508   :  { %v5677_v35 = vpop.f32.mrf.mxu2  ;;  %v5911_v8 = vpop.f32.mrf.mxu3 }
 0x509   :  { %v10377_v18 = vadd.f32 %v5677_v35, %v5166_v5  ;;  %v10379_v47 = vadd.f32 %v5911_v8, %v5358_v29  ;;  %v4731_v55 = vpop.f32.mrf.mxu0  ;;  %v4965_v40 = vpop.f32.mrf.mxu1  ;;  %v4556_v29 = vld [vmem:[#allocation2 + $0x108] sm:$0xff] }
 0x50a   :  { %v4604_v8 = vpack.c.bf16 %v4557_v30, %v4556_v29  ;;  %v5504_v55 = vld [vmem:[#allocation2 + $0x109] sm:$0xff] }
 0x50b   :  { %6960 = vrot.lane.b32.xlu0 %v10379_v47, %s8393_s3  ;;  %6640 = vrot.lane.b32.xlu1 %v10377_v18, %s8393_s3  ;;  %v5552_v21 = vpack.c.bf16 %v5505_v9, %v5504_v55  ;;  %v4559_v55 = vld [vmem:[#allocation2 + $0x120] sm:$0xff] }
 0x50d   :  { %v6613_v54 = vpop.permute.xlu0 %6612  ;;  %v10405_v29 = vpop.permute.xlu2 %6938 }
 0x50e   :  { %v6804_v2 = vmax.f32 %v10247_v19, %v6613_v54 }
 0x510   :  { %v7188_v15 = vmax.f32 %v6804_v2, %v7124_v16  ;;  %v5679_v32 = vpop.f32.mrf.mxu2  ;;  %v5913_v1 = vpop.f32.mrf.mxu3 }
 0x511   :  { %v4734_v36 = vpop.f32.mrf.mxu0  ;;  %v4968_v5 = vpop.f32.mrf.mxu1 }
 0x512   :  { %v7256_v35 = vadd.f32 %v10389_v52, %v7188_v15  ;;  %v5168_v16 = vadd.f32 %v4734_v36, %v10041_v42  ;;  %v5360_v2 = vadd.f32 %v4968_v5, %v10043_v44 }
 0x514   :  { %v7320_v40 = vmax.f32 %v7256_v35, 0.0  ;;  %4773 = vmatmul.bf16.gmra.mxu0 %v4604_v8 }
 0x515   :  { %5007 = vmatmul.bf16.gmra.mxu1 %v4604_v8  ;;  %5721 = vmatmul.bf16.gmra.mxu2 %v5552_v21  ;;  %v6615_v45 = vpop.permute.xlu0 %6614 }
 0x516   :  { %v7384_v19 = vsel %vm8652_vm1, %v7320_v40, 0.0  ;;  %5955 = vmatmul.bf16.gmra.mxu3 %v5552_v21  ;;  %v6805_v36 = vmax.f32 %v10256_v39, %v6615_v45  ;;  %v4605_v45 = vpack.c.bf16 %v4559_v55, %v4558_v3 }
 0x517   :  { %v7448_v54 = vpack.c.bf16 %v7384_v19, %v7384_v19 }
 0x518   :  { %v5682_v32 = vpop.f32.mrf.mxu2  ;;  %v5916_v15 = vpop.f32.mrf.mxu3 }
 0x519   :  { %7513 = vst.msk [vmem:[%s11364_s5] sm:$0xf] %vm7512_vm14, %v7448_v54  ;;  %v10401_v30 = vadd.f32 %v5682_v32, %v5168_v16  ;;  %v10403_v1 = vadd.f32 %v5916_v15, %v5360_v2  ;;  %v4736_v9 = vpop.f32.mrf.mxu0  ;;  %v4970_v17 = vpop.f32.mrf.mxu1  ;;  %v5507_v54 = vld [vmem:[#allocation2 + $0x121] sm:$0xff] }
 0x51a   :  { %v5169_v35 = vadd.f32 %v4736_v9, %v10045_v58  ;;  %v5361_v8 = vadd.f32 %v4970_v17, %v10047_v41  ;;  %v6621_v9 = vpop.permute.xlu2 %6620 }
 0x51b   :  { %6964 = vrot.lane.b32.xlu1 %v10403_v1, %s8393_s3  ;;  %6644 = vrot.lane.b32.xlu2 %v10401_v30, %s8393_s3 }
 0x51d   :  { %v6935_v42 = vpop.permute.xlu0 %6934  ;;  %v6617_v44 = vpop.permute.xlu1 %6616 }
 0x51e   :  { %v7125_v5 = vmax.f32 %v10262_v56, %v6935_v42  ;;  %v5506_v56 = vld [vmem:[#allocation2 + $0x119] sm:$0xff] }
 0x51f   :  { %v5553_v58 = vpack.c.bf16 %v5507_v54, %v5506_v56 }
 0x520   :  { %v7189_v21 = vmax.f32 %v6805_v36, %v7125_v5  ;;  %v5684_v40 = vpop.f32.mrf.mxu2  ;;  %v5918_v19 = vpop.f32.mrf.mxu3  ;;  %v6806_v36 = vmax.f32 %v10264_v24, %v6617_v44 }
 0x521   :  { %v10415_v16 = vadd.f32 %v5684_v40, %v5169_v35  ;;  %v10417_v2 = vadd.f32 %v5918_v19, %v5361_v8  ;;  %v4739_v32 = vpop.f32.mrf.mxu0  ;;  %v4973_v15 = vpop.f32.mrf.mxu1 }
 0x522   :  { %v7257_v39 = vadd.f32 %v10389_v52, %v7189_v21  ;;  %v5170_v35 = vadd.f32 %v4739_v32, %v10049_v11  ;;  %v5362_v8 = vadd.f32 %v4973_v15, %v10051_v57  ;;  %v7127_v57 = vmax.f32 %v10274_v51, %v10405_v29 }
 0x523   :  { %6966 = vrot.lane.b32.xlu2 %v10417_v2, %s8393_s3  ;;  %6646 = vrot.lane.b32.xlu0 %v10415_v16, %s8393_s3  ;;  %v6808_v15 = vmax.f32 %v10285_v49, %v6621_v9 }
 0x524   :  { %v7321_v41 = vmax.f32 %v7257_v39, 0.0  ;;  %4778 = vmatmul.bf16.gmra.mxu0 %v4605_v45 }
 0x525   :  { %5012 = vmatmul.bf16.gmra.mxu1 %v4605_v45  ;;  %5726 = vmatmul.bf16.gmra.mxu2 %v5553_v58  ;;  %v6937_v17 = vpop.permute.xlu1 %6936 }
 0x526   :  { %v7385_v42 = vsel %vm8749_vm3, %v7321_v41, 0.0  ;;  %5960 = vmatmul.bf16.gmra.mxu3 %v5553_v58  ;;  %v7126_v3 = vmax.f32 %v10272_v25, %v6937_v17  ;;  %v6623_v58 = vpop.permute.xlu2 %6622 }
 0x527   :  { %v7449_v5 = vpack.c.bf16 %v7385_v42, %v7385_v42 }
 0x528   :  { %v7190_v55 = vmax.f32 %v6806_v36, %v7126_v3  ;;  %v5687_v21 = vpop.f32.mrf.mxu2  ;;  %v5921_v40 = vpop.f32.mrf.mxu3  ;;  %v4561_v36 = vld [vmem:[#allocation2 + $0x130] sm:$0xff] }
 0x529   :  { %7514 = vst.msk [vmem:[%s11364_s5 + $0x4] sm:$0xf] %vm7512_vm14, %v7449_v5  ;;  %v10434_v63 = vadd.f32 %v5687_v21, %v5170_v35  ;;  %v10436_v19 = vadd.f32 %v5921_v40, %v5362_v8  ;;  %v4741_v24 = vpop.f32.mrf.mxu0  ;;  %v4975_v44 = vpop.f32.mrf.mxu1  ;;  %v5509_v35 = vld [vmem:[#allocation2 + $0x131] sm:$0xff] }
 0x52a   :  { %v7258_v25 = vadd.f32 %v10389_v52, %v7190_v55  ;;  %v5171_v17 = vadd.f32 %v4741_v24, %v10053_v13  ;;  %v5363_v42 = vadd.f32 %v4975_v44, %v10055_v12  ;;  %v4560_v13 = vld [vmem:[#allocation2 + $0x128] sm:$0xff] }
 0x52b   :  { %6968 = vrot.lane.b32.xlu0 %v10436_v19, %s8393_s3  ;;  %6648 = vrot.lane.b32.xlu1 %v10434_v63, %s8393_s3  ;;  %v4606_v8 = vpack.c.bf16 %v4561_v36, %v4560_v13  ;;  %v5508_v55 = vld [vmem:[#allocation2 + $0x129] sm:$0xff]  ;;  %v4563_v13 = vld [vmem:[#allocation2 + $0x140] sm:$0xff] }
 0x52c   :  { %v7322_v11 = vmax.f32 %v7258_v25, 0.0  ;;  %v5554_v21 = vpack.c.bf16 %v5509_v35, %v5508_v55  ;;  %v6809_v25 = vmax.f32 %v10297_v14, %v6623_v58  ;;  %v5511_v55 = vld [vmem:[#allocation2 + $0x141] sm:$0xff] }
 0x52d   :  { %v6941_v54 = vpop.permute.xlu0 %6940  ;;  %v6619_v32 = vpop.permute.xlu1 %6618 }
 0x52e   :  { %v7386_v39 = vsel %vm8769_vm4, %v7322_v11, 0.0  ;;  %v7128_v45 = vmax.f32 %v10287_v60, %v6941_v54  ;;  %v6807_v56 = vmax.f32 %v10283_v38, %v6619_v32 }
 0x52f   :  { %v7450_v41 = vpack.c.bf16 %v7386_v39, %v7386_v39 }
 0x530   :  { %v7192_v3 = vmax.f32 %v6808_v15, %v7128_v45  ;;  %v7191_v51 = vmax.f32 %v6807_v56, %v7127_v57  ;;  %v5689_v29 = vpop.f32.mrf.mxu2  ;;  %v5923_v5 = vpop.f32.mrf.mxu3 }
 0x531   :  { %7515 = vst.msk [vmem:[%s11364_s5 + $0x8] sm:$0xf] %vm7512_vm14, %v7450_v41  ;;  %v10456_v6 = vadd.f32 %v5689_v29, %v5171_v17  ;;  %v10458_v38 = vadd.f32 %v5923_v5, %v5363_v42  ;;  %v4744_v49 = vpop.f32.mrf.mxu0  ;;  %v4978_v60 = vpop.f32.mrf.mxu1  ;;  %v11939_v5 = vld [vmem:[#allocation56_spill] sm:$0xff] }
 0x532   :  { %v7260_v12 = vadd.f32 %v10389_v52, %v7192_v3  ;;  %v7259_v9 = vadd.f32 %v10389_v52, %v7191_v51  ;;  %v5172_v39 = vadd.f32 %v4744_v49, %v10060_v10  ;;  %v5364_v45 = vadd.f32 %v4978_v60, %v10062_v22  ;;  %v6945_v22 = vpop.permute.xlu2 %6944  ;;  %v11940_v49 = vld [vmem:[#allocation57_spill] sm:$0xff] }
 0x533   :  { %6970 = vrot.lane.b32.xlu1 %v10458_v38, %s8393_s3  ;;  %6650 = vrot.lane.b32.xlu2 %v10456_v6, %s8393_s3  ;;  %v7130_v36 = vmax.f32 %v10309_v4, %v6945_v22 }
 0x534   :  { %v7324_v40 = vmax.f32 %v7260_v12, 0.0  ;;  %v7323_v24 = vmax.f32 %v7259_v9, 0.0  ;;  %4783 = vmatmul.bf16.gmra.mxu0 %v4606_v8 }
 0x535   :  { %5017 = vmatmul.bf16.gmra.mxu1 %v4606_v8  ;;  %5731 = vmatmul.bf16.gmra.mxu2 %v5554_v21  ;;  %v6943_v44 = vpop.permute.xlu1 %6942 }
 0x536   :  { %v7388_v11 = vsel %vm8823_vm8, %v7324_v40, 0.0  ;;  %v7387_v57 = vsel %vm8798_vm6, %v7323_v24, 0.0  ;;  %5965 = vmatmul.bf16.gmra.mxu3 %v5554_v21  ;;  %v7129_v54 = vmax.f32 %v10299_v31, %v6943_v44  ;;  %v4562_v21 = vld [vmem:[#allocation2 + $0x138] sm:$0xff] }
 0x537   :  { %v7452_v32 = vpack.c.bf16 %v7388_v11, %v7388_v11  ;;  %v7451_v15 = vpack.c.bf16 %v7387_v57, %v7387_v57  ;;  %v4607_v44 = vpack.c.bf16 %v4563_v13, %v4562_v21  ;;  %v5512_v21 = vld [vmem:[#allocation2 + $0x149] sm:$0xff] }
 0x538   :  { %v7193_v56 = vmax.f32 %v6809_v25, %v7129_v54  ;;  %v5692_v41 = vpop.f32.mrf.mxu2  ;;  %v5926_v17 = vpop.f32.mrf.mxu3  ;;  %v5510_v25 = vld [vmem:[#allocation2 + $0x139] sm:$0xff] }
 0x539   :  { %7517 = vst.msk [vmem:[%s11364_s5 + $0x10] sm:$0xf] %vm7512_vm14, %v7452_v32  ;;  %v10478_v37 = vadd.f32 %v5692_v41, %v5172_v39  ;;  %v10480_v26 = vadd.f32 %v5926_v17, %v5364_v45  ;;  %v4746_v14 = vpop.f32.mrf.mxu0  ;;  %v4980_v31 = vpop.f32.mrf.mxu1  ;;  %v5555_v11 = vpack.c.bf16 %v5511_v55, %v5510_v25  ;;  %v11942_v39 = vld [vmem:[#allocation58_spill] sm:$0xff]  ;;  %v11946_v54 = vld [vmem:[#allocation60_spill] sm:$0xff] }
 0x53a   :  { %7516 = vst.msk [vmem:[%s11364_s5 + $0xc] sm:$0xf] %vm7512_vm14, %v7451_v15  ;;  %v7261_v10 = vadd.f32 %v10389_v52, %v7193_v56  ;;  %v5173_v35 = vadd.f32 %v4746_v14, %v11939_v5  ;;  %v5365_v60 = vadd.f32 %v4980_v31, %v11940_v49  ;;  %v11943_v56 = vld [vmem:[#allocation59_spill] sm:$0xff] }
 0x53b   :  { %6972 = vrot.lane.b32.xlu2 %v10480_v26, %s8393_s3  ;;  %6652 = vrot.lane.b32.xlu0 %v10478_v37, %s8393_s3 }
 0x53c   :  { %v7325_v58 = vmax.f32 %v7261_v10, 0.0 }
 0x53d   :  { %v6625_v42 = vpop.permute.xlu0 %6624  ;;  %v6631_v5 = vpop.permute.xlu2 %6630 }
 0x53e   :  { %v7389_v3 = vsel %vm8842_vm10, %v7325_v58, 0.0  ;;  %v6810_v51 = vmax.f32 %v10307_v0, %v6625_v42 }
 0x53f   :  { %v7453_v29 = vpack.c.bf16 %v7389_v3, %v7389_v3 }
 0x540   :  { %v7194_v12 = vmax.f32 %v6810_v51, %v7130_v36  ;;  %v5694_v9 = vpop.f32.mrf.mxu2  ;;  %v5928_v8 = vpop.f32.mrf.mxu3 }
 0x541   :  { %7518 = vst.msk [vmem:[%s11364_s5 + $0x14] sm:$0xf] %vm7512_vm14, %v7453_v29  ;;  %v10501_v4 = vadd.f32 %v5694_v9, %v5173_v35  ;;  %v10503_v48 = vadd.f32 %v5928_v8, %v5365_v60  ;;  %v4749_v0 = vpop.f32.mrf.mxu0  ;;  %v4565_v29 = vld [vmem:[#allocation2 + $0x150] sm:$0xff]  ;;  %v4564_v9 = vld [vmem:[#allocation2 + $0x148] sm:$0xff] }
 0x542   :  { %v7262_v40 = vadd.f32 %v10389_v52, %v7194_v12  ;;  %v4983_v24 = vpop.f32.mrf.mxu1  ;;  %v5174_v45 = vadd.f32 %v4749_v0, %v11942_v39  ;;  %v5513_v60 = vld [vmem:[#allocation2 + $0x151] sm:$0xff]  ;;  %v4608_v0 = vpack.c.bf16 %v4565_v29, %v4564_v9 }
 0x543   :  { %6974 = vrot.lane.b32.xlu0 %v10503_v48, %s8393_s3  ;;  %6654 = vrot.lane.b32.xlu1 %v10501_v4, %s8393_s3  ;;  %v5366_v41 = vadd.f32 %v4983_v24, %v11943_v56 }
 0x544   :  { %v7326_v57 = vmax.f32 %v7262_v40, 0.0  ;;  %4788 = vmatmul.bf16.gmra.mxu0 %v4607_v44  ;;  %v5556_v40 = vpack.c.bf16 %v5513_v60, %v5512_v21 }
 0x545   :  { %5022 = vmatmul.bf16.gmra.mxu1 %v4607_v44  ;;  %5736 = vmatmul.bf16.gmra.mxu2 %v5555_v11  ;;  %v11944_v44 = vld [vmem:[#allocation7_spill] sm:$0xff] }
 0x546   :  { %v7390_v32 = vsel %vm8860_vm11, %v7326_v57, 0.0  ;;  %5970 = vmatmul.bf16.gmra.mxu3 %v5555_v11  ;;  %vm11945_vm1 = vnez %v11944_v44 }
 0x547   :  { %v7454_v15 = vpack.c.bf16 %v7390_v32, %v7390_v32 }
 0x548   :  { %v5697_v17 = vpop.f32.mrf.mxu2 }
 0x549   :  { %7519 = vst.msk [vmem:[%s11364_s5 + $0x18] sm:$0xf] %vm7512_vm14, %v7454_v15  ;;  %v10518_v14 = vadd.f32 %v5697_v17, %v5174_v45  ;;  %v5931_v31 = vpop.f32.mrf.mxu3  ;;  %v4751_v10 = vpop.f32.mrf.mxu0  ;;  %v11947_v15 = vld [vmem:[#allocation61_spill] sm:$0xff] }
 0x54a   :  { %v10520_v22 = vadd.f32 %v5931_v31, %v5366_v41  ;;  %v4985_v58 = vpop.f32.mrf.mxu1 }
 0x54b   :  { %6656 = vrot.lane.b32.xlu2 %v10518_v14, %s8393_s3  ;;  %v6953_v58 = vpop.permute.xlu2 %6952 }
 0x54c   :  { %6976 = vrot.lane.b32.xlu1 %v10520_v22, %s8393_s3 }
 0x54d   :  { %v6949_v42 = vpop.permute.xlu0 %6948  ;;  %v6629_v36 = vpop.permute.xlu1 %6628 }
 0x54e   :  { %v7132_v3 = vmax.f32 %v10319_v23, %v6949_v42  ;;  %v6812_v51 = vmax.f32 %v10317_v62, %v6629_v36  ;;  %v6813_v62 = vmax.f32 %v10327_v7, %v6631_v5 }
 0x550   :  { %v7196_v35 = vmax.f32 %v6812_v51, %v7132_v3  ;;  %v5699_v49 = vpop.f32.mrf.mxu2  ;;  %v7134_v3 = vmax.f32 %v10339_v27, %v6953_v58  ;;  %v11948_v51 = vld [vmem:[#allocation8_spill] sm:$0xff]  ;;  %v11955_v58 = vld [vmem:[#allocation65_spill] sm:$0xff] }
 0x551   :  { %v5933_v13 = vpop.f32.mrf.mxu3  ;;  %v4754_v12 = vpop.f32.mrf.mxu0  ;;  %vm11949_vm3 = vnez %v11948_v51  ;;  %v11950_v49 = vld [vmem:[#allocation62_spill] sm:$0xff] }
 0x552   :  { %v7264_v8 = vadd.f32 %v10389_v52, %v7196_v35  ;;  %v4988_v55 = vpop.f32.mrf.mxu1  ;;  %v5176_v32 = vadd.f32 %v4754_v12, %v11946_v54  ;;  %v4567_v13 = vld [vmem:[#allocation2 + $0x160] sm:$0xff]  ;;  %v11951_v12 = vld [vmem:[#allocation63_spill] sm:$0xff] }
 0x553   :  { %v5368_v39 = vadd.f32 %v4988_v55, %v11947_v15  ;;  %v11952_v15 = vld [vmem:[#allocation9_spill] sm:$0xff] }
 0x554   :  { %v7328_v24 = vmax.f32 %v7264_v8, 0.0  ;;  %4793 = vmatmul.bf16.gmra.mxu0 %v4608_v0  ;;  %vm11953_vm4 = vnez %v11952_v15 }
 0x555   :  { %5027 = vmatmul.bf16.gmra.mxu1 %v4608_v0  ;;  %5741 = vmatmul.bf16.gmra.mxu2 %v5556_v40  ;;  %v6951_v23 = vpop.permute.xlu1 %6950  ;;  %v5515_v0 = vld [vmem:[#allocation2 + $0x161] sm:$0xff] }
 0x556   :  { %v7392_v25 = vsel %vm11945_vm1, %v7328_v24, 0.0  ;;  %5975 = vmatmul.bf16.gmra.mxu3 %v5556_v40  ;;  %v7133_v11 = vmax.f32 %v10329_v61, %v6951_v23  ;;  %v4566_v24 = vld [vmem:[#allocation2 + $0x158] sm:$0xff] }
 0x557   :  { %v7456_v57 = vpack.c.bf16 %v7392_v25, %v7392_v25  ;;  %v4609_v44 = vpack.c.bf16 %v4567_v13, %v4566_v24  ;;  %v5514_v25 = vld [vmem:[#allocation2 + $0x159] sm:$0xff] }
 0x558   :  { %v7197_v45 = vmax.f32 %v6813_v62, %v7133_v11  ;;  %v5702_v56 = vpop.f32.mrf.mxu2  ;;  %v5557_v11 = vpack.c.bf16 %v5515_v0, %v5514_v25  ;;  %v11958_v0 = vld [vmem:[#allocation66_spill] sm:$0xff]  ;;  %v11959_v24 = vld [vmem:[#allocation67_spill] sm:$0xff] }
 0x559   :  { %7521 = vst.msk [vmem:[%s11364_s5 + $0x20] sm:$0xf] %vm7512_vm14, %v7456_v57  ;;  %v10539_v41 = vadd.f32 %v5702_v56, %v5176_v32  ;;  %v5936_v7 = vpop.f32.mrf.mxu3  ;;  %v4756_v17 = vpop.f32.mrf.mxu0  ;;  %v5517_v25 = vld [vmem:[#allocation2 + $0x171] sm:$0xff] }
 0x55a   :  { %v7265_v31 = vadd.f32 %v10389_v52, %v7197_v45  ;;  %v10542_v10 = vadd.f32 %v5936_v7, %v5368_v39  ;;  %v4990_v61 = vpop.f32.mrf.mxu1  ;;  %v5177_v60 = vadd.f32 %v4756_v17, %v11950_v49  ;;  %v11954_v17 = vld [vmem:[#allocation64_spill] sm:$0xff] }
 0x55b   :  { %6660 = vrot.lane.b32.xlu0 %v10539_v41, %s8393_s3  ;;  %v5369_v9 = vadd.f32 %v4990_v61, %v11951_v12  ;;  %v6637_v61 = vpop.permute.xlu2 %6636  ;;  %v11956_v12 = vld [vmem:[#allocation10_spill] sm:$0xff] }
 0x55c   :  { %v7329_v42 = vmax.f32 %v7265_v31, 0.0  ;;  %6980 = vrot.lane.b32.xlu2 %v10542_v10, %s8393_s3  ;;  %v6816_v13 = vmax.f32 %v10357_v28, %v6637_v61  ;;  %vm11957_vm6 = vnez %v11956_v12 }
 0x55d   :  { %v6633_v36 = vpop.permute.xlu0 %6632 }
 0x55e   :  { %v7393_v29 = vsel %vm11949_vm3, %v7329_v42, 0.0  ;;  %v6814_v5 = vmax.f32 %v10337_v59, %v6633_v36 }
 0x55f   :  { %v7457_v35 = vpack.c.bf16 %v7393_v29, %v7393_v29 }
 0x560   :  { %v7198_v8 = vmax.f32 %v6814_v5, %v7134_v3  ;;  %v5704_v55 = vpop.f32.mrf.mxu2 }
 0x561   :  { %7522 = vst.msk [vmem:[%s11364_s5 + $0x24] sm:$0xf] %vm7512_vm14, %v7457_v35  ;;  %v10558_v27 = vadd.f32 %v5704_v55, %v5177_v60  ;;  %v5938_v21 = vpop.f32.mrf.mxu3  ;;  %v4759_v40 = vpop.f32.mrf.mxu0 }
 0x562   :  { %v7266_v59 = vadd.f32 %v10389_v52, %v7198_v8  ;;  %v10561_v23 = vadd.f32 %v5938_v21, %v5369_v9  ;;  %v4993_v62 = vpop.f32.mrf.mxu1  ;;  %v5178_v31 = vadd.f32 %v4759_v40, %v11954_v17  ;;  %v4569_v40 = vld [vmem:[#allocation2 + $0x170] sm:$0xff] }
 0x563   :  { %6662 = vrot.lane.b32.xlu1 %v10558_v27, %s8393_s3  ;;  %v5370_v42 = vadd.f32 %v4993_v62, %v11955_v58  ;;  %v11960_v58 = vld [vmem:[#allocation11_spill] sm:$0xff] }
 0x564   :  { %v7330_v57 = vmax.f32 %v7266_v59, 0.0  ;;  %6982 = vrot.lane.b32.xlu0 %v10561_v23, %s8393_s3  ;;  %4798 = vmatmul.bf16.gmra.mxu0 %v4609_v44  ;;  %vm11961_vm8 = vnez %v11960_v58 }
 0x565   :  { %5032 = vmatmul.bf16.gmra.mxu1 %v4609_v44  ;;  %5746 = vmatmul.bf16.gmra.mxu2 %v5557_v11  ;;  %v6955_v54 = vpop.permute.xlu0 %6954  ;;  %v6635_v32 = vpop.permute.xlu1 %6634 }
 0x566   :  { %v7394_v39 = vsel %vm11953_vm4, %v7330_v57, 0.0  ;;  %5980 = vmatmul.bf16.gmra.mxu3 %v5557_v11  ;;  %v7135_v45 = vmax.f32 %v10349_v34, %v6955_v54  ;;  %v6815_v56 = vmax.f32 %v10347_v46, %v6635_v32  ;;  %v4568_v54 = vld [vmem:[#allocation2 + $0x168] sm:$0xff] }
 0x567   :  { %v7458_v7 = vpack.c.bf16 %v7394_v39, %v7394_v39  ;;  %v4610_v39 = vpack.c.bf16 %v4569_v40, %v4568_v54  ;;  %v11964_v40 = vld [vmem:[#allocation12_spill] sm:$0xff]  ;;  %v11967_v54 = vld [vmem:[#allocation71_spill] sm:$0xff] }
 0x568   :  { %v7199_v36 = vmax.f32 %v6815_v56, %v7135_v45  ;;  %v5707_v3 = vpop.f32.mrf.mxu2  ;;  %v5516_v45 = vld [vmem:[#allocation2 + $0x169] sm:$0xff]  ;;  %v6959_v56 = vpop.permute.xlu2 %6958  ;;  %vm11965_vm10 = vnez %v11964_v40 }
 0x569   :  { %7523 = vst.msk [vmem:[%s11364_s5 + $0x28] sm:$0xf] %vm7512_vm14, %v7458_v7  ;;  %v10577_v51 = vadd.f32 %v5707_v3, %v5178_v31  ;;  %v5941_v29 = vpop.f32.mrf.mxu3  ;;  %v4761_v5 = vpop.f32.mrf.mxu0  ;;  %v5558_v7 = vpack.c.bf16 %v5517_v25, %v5516_v45  ;;  %v7137_v61 = vmax.f32 %v10369_v33, %v6959_v56  ;;  %v11966_v25 = vld [vmem:[#allocation70_spill] sm:$0xff]  ;;  %v5519_v45 = vld [vmem:[#allocation2 + $0x181] sm:$0xff] }
 0x56a   :  { %v7267_v34 = vadd.f32 %v10389_v52, %v7199_v36  ;;  %v10580_v46 = vadd.f32 %v5941_v29, %v5370_v42  ;;  %v4995_v35 = vpop.f32.mrf.mxu1  ;;  %v5179_v21 = vadd.f32 %v4761_v5, %v11958_v0  ;;  %v11962_v29 = vld [vmem:[#allocation68_spill] sm:$0xff] }
 0x56b   :  { %6664 = vrot.lane.b32.xlu2 %v10577_v51, %s8393_s3  ;;  %v5371_v59 = vadd.f32 %v4995_v35, %v11959_v24 }
 0x56c   :  { %v7331_v49 = vmax.f32 %v7267_v34, 0.0  ;;  %6984 = vrot.lane.b32.xlu1 %v10580_v46, %s8393_s3  ;;  %v11963_v34 = vld [vmem:[#allocation69_spill] sm:$0xff] }
 0x56d   :  { %v6957_v60 = vpop.permute.xlu1 %6956 }
 0x56e   :  { %v7395_v9 = vsel %vm11957_vm6, %v7331_v49, 0.0  ;;  %v7136_v8 = vmax.f32 %v10359_v50, %v6957_v60 }
 0x56f   :  { %v7459_v55 = vpack.c.bf16 %v7395_v9, %v7395_v9 }
 0x570   :  { %v7200_v62 = vmax.f32 %v6816_v13, %v7136_v8  ;;  %v5709_v44 = vpop.f32.mrf.mxu2 }
 0x571   :  { %7524 = vst.msk [vmem:[%s11364_s5 + $0x2c] sm:$0xf] %vm7512_vm14, %v7459_v55  ;;  %v10596_v28 = vadd.f32 %v5709_v44, %v5179_v21  ;;  %v5943_v11 = vpop.f32.mrf.mxu3  ;;  %v4764_v57 = vpop.f32.mrf.mxu0 }
 0x572   :  { %v7268_v50 = vadd.f32 %v10389_v52, %v7200_v62  ;;  %v10599_v32 = vadd.f32 %v5943_v11, %v5371_v59  ;;  %v4998_v15 = vpop.f32.mrf.mxu1  ;;  %v5180_v5 = vadd.f32 %v4764_v57, %v11962_v29  ;;  %v4571_v57 = vld [vmem:[#allocation2 + $0x180] sm:$0xff]  ;;  %v11968_v29 = vld [vmem:[#allocation13_spill] sm:$0xff] }
 0x573   :  { %6666 = vrot.lane.b32.xlu0 %v10596_v28, %s8393_s3  ;;  %v5372_v35 = vadd.f32 %v4998_v15, %v11963_v34  ;;  %vm11969_vm11 = vnez %v11968_v29  ;;  %v11974_v29 = vld [vmem:[#allocation74_spill] sm:$0xff] }
 0x574   :  { %v7332_v17 = vmax.f32 %v7268_v50, 0.0  ;;  %6986 = vrot.lane.b32.xlu2 %v10599_v32, %s8393_s3  ;;  %4803 = vmatmul.bf16.gmra.mxu0 %v4610_v39 }
 0x575   :  { %5037 = vmatmul.bf16.gmra.mxu1 %v4610_v39  ;;  %5751 = vmatmul.bf16.gmra.mxu2 %v5558_v7  ;;  %v6639_v31 = vpop.permute.xlu0 %6638 }
 0x576   :  { %v7396_v42 = vsel %vm11961_vm8, %v7332_v17, 0.0  ;;  %5985 = vmatmul.bf16.gmra.mxu3 %v5558_v7  ;;  %v6817_v36 = vmax.f32 %v10367_v20, %v6639_v31  ;;  %v4570_v17 = vld [vmem:[#allocation2 + $0x178] sm:$0xff] }
 0x577   :  { %v7460_v3 = vpack.c.bf16 %v7396_v42, %v7396_v42  ;;  %v4611_v58 = vpack.c.bf16 %v4571_v57, %v4570_v17  ;;  %v5518_v42 = vld [vmem:[#allocation2 + $0x179] sm:$0xff]  ;;  %v5521_v57 = vld [vmem:[#allocation2 + $0x191] sm:$0xff] }
 0x578   :  { %v7201_v49 = vmax.f32 %v6817_v36, %v7137_v61  ;;  %v5712_v60 = vpop.f32.mrf.mxu2  ;;  %v5559_v36 = vpack.c.bf16 %v5519_v45, %v5518_v42 }
 0x579   :  { %7525 = vst.msk [vmem:[%s11364_s5 + $0x30] sm:$0xf] %vm7512_vm14, %v7460_v3  ;;  %v10615_v13 = vadd.f32 %v5712_v60, %v5180_v5  ;;  %v5946_v33 = vpop.f32.mrf.mxu3  ;;  %v4766_v12 = vpop.f32.mrf.mxu0 }
 0x57a   :  { %v7269_v9 = vadd.f32 %v10389_v52, %v7201_v49  ;;  %v10618_v8 = vadd.f32 %v5946_v33, %v5372_v35  ;;  %v5000_v20 = vpop.f32.mrf.mxu1  ;;  %v5181_v11 = vadd.f32 %v4766_v12, %v11966_v25  ;;  %v11970_v35 = vld [vmem:[#allocation72_spill] sm:$0xff]  ;;  %v6645_v60 = vpop.permute.xlu2 %6644  ;;  %v11971_v33 = vld [vmem:[#allocation73_spill] sm:$0xff] }
 0x57b   :  { %6668 = vrot.lane.b32.xlu1 %v10615_v13, %s8393_s3  ;;  %v5373_v50 = vadd.f32 %v5000_v20, %v11967_v54 }
 0x57c   :  { %v7333_v55 = vmax.f32 %v7269_v9, 0.0  ;;  %6988 = vrot.lane.b32.xlu0 %v10618_v8, %s8393_s3 }
 0x57d   :  { %v6961_v0 = vpop.permute.xlu0 %6960  ;;  %v6641_v21 = vpop.permute.xlu1 %6640 }
 0x57e   :  { %v7397_v24 = vsel %vm11965_vm10, %v7333_v55, 0.0  ;;  %v7138_v59 = vmax.f32 %v10379_v47, %v6961_v0  ;;  %v6818_v62 = vmax.f32 %v10377_v18, %v6641_v21 }
 0x57f   :  { %v7461_v44 = vpack.c.bf16 %v7397_v24, %v7397_v24 }
 0x580   :  { %v7202_v15 = vmax.f32 %v6818_v62, %v7138_v59  ;;  %v5714_v39 = vpop.f32.mrf.mxu2  ;;  %v6820_v59 = vmax.f32 %v10401_v30, %v6645_v60 }
 0x581   :  { %7526 = vst.msk [vmem:[%s11364_s5 + $0x34] sm:$0xf] %vm7512_vm14, %v7461_v44  ;;  %v10634_v56 = vadd.f32 %v5714_v39, %v5181_v11  ;;  %v5948_v7 = vpop.f32.mrf.mxu3  ;;  %v4769_v47 = vpop.f32.mrf.mxu0  ;;  %v4573_v44 = vld [vmem:[#allocation2 + $0x190] sm:$0xff] }
 0x582   :  { %v7270_v18 = vadd.f32 %v10389_v52, %v7202_v15  ;;  %v10637_v31 = vadd.f32 %v5948_v7, %v5373_v50  ;;  %v5003_v61 = vpop.f32.mrf.mxu1  ;;  %v5182_v49 = vadd.f32 %v4769_v47, %v11970_v35  ;;  %v4572_v15 = vld [vmem:[#allocation2 + $0x188] sm:$0xff]  ;;  %v6967_v17 = vpop.permute.xlu2 %6966 }
 0x583   :  { %6670 = vrot.lane.b32.xlu2 %v10634_v56, %s8393_s3  ;;  %v5374_v12 = vadd.f32 %v5003_v61, %v11971_v33  ;;  %v4612_v7 = vpack.c.bf16 %v4573_v44, %v4572_v15  ;;  %v5520_v47 = vld [vmem:[#allocation2 + $0x189] sm:$0xff] }
 0x584   :  { %v7334_v3 = vmax.f32 %v7270_v18, 0.0  ;;  %6990 = vrot.lane.b32.xlu1 %v10637_v31, %s8393_s3  ;;  %4808 = vmatmul.bf16.gmra.mxu0 %v4611_v58  ;;  %v5560_v18 = vpack.c.bf16 %v5521_v57, %v5520_v47  ;;  %v11978_v57 = vld [vmem:[#allocation76_spill] sm:$0xff] }
 0x585   :  { %5042 = vmatmul.bf16.gmra.mxu1 %v4611_v58  ;;  %5756 = vmatmul.bf16.gmra.mxu2 %v5559_v36  ;;  %v11972_v58 = vld [vmem:[#allocation14_spill] sm:$0xff] }
 0x586   :  { %v7398_v5 = vsel %vm11969_vm11, %v7334_v3, 0.0  ;;  %5990 = vmatmul.bf16.gmra.mxu3 %v5559_v36  ;;  %vm11973_vm13 = vnez %v11972_v58 }
 0x587   :  { %v7462_v34 = vpack.c.bf16 %v7398_v5, %v7398_v5 }
 0x588   :  { %v5717_v9 = vpop.f32.mrf.mxu2 }
 0x589   :  { %7527 = vst.msk [vmem:[%s11364_s5 + $0x38] sm:$0xf] %vm7512_vm14, %v7462_v34  ;;  %v10651_v20 = vadd.f32 %v5717_v9, %v5182_v49  ;;  %v5951_v55 = vpop.f32.mrf.mxu3  ;;  %v4771_v0 = vpop.f32.mrf.mxu0  ;;  %v11975_v34 = vld [vmem:[#allocation75_spill] sm:$0xff] }
 0x58a   :  { %v10653_v21 = vadd.f32 %v5951_v55, %v5374_v12  ;;  %v5005_v40 = vpop.f32.mrf.mxu1 }
 0x58b   :  { %6672 = vrot.lane.b32.xlu0 %v10651_v20, %s8393_s3 }
 0x58c   :  { %6992 = vrot.lane.b32.xlu2 %v10653_v21, %s8393_s3 }
 0x58d   :  { %v6965_v24 = vpop.permute.xlu1 %6964  ;;  %v6651_v15 = vpop.permute.xlu2 %6650 }
 0x58e   :  { %v7140_v62 = vmax.f32 %v10403_v1, %v6965_v24  ;;  %v7141_v1 = vmax.f32 %v10417_v2, %v6967_v17  ;;  %v5523_v17 = vld [vmem:[#allocation2 + $0x1a1] sm:$0xff] }
 0x590   :  { %v7204_v25 = vmax.f32 %v6820_v59, %v7140_v62  ;;  %v5719_v11 = vpop.f32.mrf.mxu2  ;;  %v11976_v59 = vld [vmem:[#allocation15_spill] sm:$0xff] }
 0x591   :  { %v5953_v54 = vpop.f32.mrf.mxu3  ;;  %v4774_v50 = vpop.f32.mrf.mxu0  ;;  %vm11977_vm2 = vnez %v11976_v59 }
 0x592   :  { %v7272_v39 = vadd.f32 %v10389_v52, %v7204_v25  ;;  %v5008_v45 = vpop.f32.mrf.mxu1  ;;  %v5184_v5 = vadd.f32 %v4774_v50, %v11974_v29  ;;  %v4575_v50 = vld [vmem:[#allocation2 + $0x1a0] sm:$0xff] }
 0x593   :  { %v5376_v35 = vadd.f32 %v5008_v45, %v11975_v34  ;;  %v6823_v34 = vmax.f32 %v10456_v6, %v6651_v15  ;;  %v11984_v15 = vld [vmem:[#allocation17_spill] sm:$0xff] }
 0x594   :  { %v7336_v61 = vmax.f32 %v7272_v39, 0.0  ;;  %4813 = vmatmul.bf16.gmra.mxu0 %v4612_v7  ;;  %v11979_v39 = vld [vmem:[#allocation77_spill] sm:$0xff]  ;;  %vm11985_vm7 = vnez %v11984_v15 }
 0x595   :  { %5047 = vmatmul.bf16.gmra.mxu1 %v4612_v7  ;;  %5761 = vmatmul.bf16.gmra.mxu2 %v5560_v18  ;;  %v6647_v30 = vpop.permute.xlu0 %6646 }
 0x596   :  { %v7400_v42 = vsel %vm11973_vm13, %v7336_v61, 0.0  ;;  %5995 = vmatmul.bf16.gmra.mxu3 %v5560_v18  ;;  %v6821_v36 = vmax.f32 %v10415_v16, %v6647_v30 }
 0x597   :  { %v7464_v3 = vpack.c.bf16 %v7400_v42, %v7400_v42 }
 0x598   :  { %v7205_v49 = vmax.f32 %v6821_v36, %v7141_v1  ;;  %v5722_v60 = vpop.f32.mrf.mxu2  ;;  %v5522_v36 = vld [vmem:[#allocation2 + $0x199] sm:$0xff] }
 0x599   :  { %7529 = vst.msk [vmem:[%s11364_s5 + $0x40] sm:$0xf] %vm7512_vm14, %v7464_v3  ;;  %v10672_v33 = vadd.f32 %v5722_v60, %v5184_v5  ;;  %v5956_v2 = vpop.f32.mrf.mxu3  ;;  %v4776_v12 = vpop.f32.mrf.mxu0  ;;  %v5561_v3 = vpack.c.bf16 %v5523_v17, %v5522_v36 }
 0x59a   :  { %v7273_v9 = vadd.f32 %v10389_v52, %v7205_v49  ;;  %v10675_v55 = vadd.f32 %v5956_v2, %v5376_v35  ;;  %v5010_v16 = vpop.f32.mrf.mxu1  ;;  %v5185_v54 = vadd.f32 %v4776_v12, %v11978_v57  ;;  %v11980_v35 = vld [vmem:[#allocation16_spill] sm:$0xff]  ;;  %v11982_v12 = vld [vmem:[#allocation78_spill] sm:$0xff] }
 0x59b   :  { %6676 = vrot.lane.b32.xlu1 %v10672_v33, %s8393_s3  ;;  %v5377_v45 = vadd.f32 %v5010_v16, %v11979_v39  ;;  %vm11981_vm0 = vnez %v11980_v35  ;;  %v11983_v16 = vld [vmem:[#allocation79_spill] sm:$0xff] }
 0x59c   :  { %v7337_v0 = vmax.f32 %v7273_v9, 0.0  ;;  %6996 = vrot.lane.b32.xlu0 %v10675_v55, %s8393_s3 }
 0x59d   :  { %v6969_v40 = vpop.permute.xlu0 %6968  ;;  %v6649_v24 = vpop.permute.xlu1 %6648 }
 0x59e   :  { %v7401_v62 = vsel %vm11977_vm2, %v7337_v0, 0.0  ;;  %v7142_v44 = vmax.f32 %v10436_v19, %v6969_v40  ;;  %v6822_v25 = vmax.f32 %v10434_v63, %v6649_v24  ;;  %v4574_v63 = vld [vmem:[#allocation2 + $0x198] sm:$0xff] }
 0x59f   :  { %v7465_v11 = vpack.c.bf16 %v7401_v62, %v7401_v62  ;;  %v4613_v42 = vpack.c.bf16 %v4575_v50, %v4574_v63 }
 0x5a0   :  { %v7206_v7 = vmax.f32 %v6822_v25, %v7142_v44  ;;  %v5724_v47 = vpop.f32.mrf.mxu2 }
 0x5a1   :  { %7530 = vst.msk [vmem:[%s11364_s5 + $0x44] sm:$0xf] %vm7512_vm14, %v7465_v11  ;;  %v10691_v18 = vadd.f32 %v5724_v47, %v5185_v54  ;;  %v5958_v19 = vpop.f32.mrf.mxu3  ;;  %v4779_v61 = vpop.f32.mrf.mxu0  ;;  %v11986_v47 = vld [vmem:[#allocation80_spill] sm:$0xff] }
 0x5a2   :  { %v7274_v30 = vadd.f32 %v10389_v52, %v7206_v7  ;;  %v10694_v1 = vadd.f32 %v5958_v19, %v5377_v45  ;;  %v5013_v58 = vpop.f32.mrf.mxu1  ;;  %v5186_v9 = vadd.f32 %v4779_v61, %v11982_v12  ;;  %v6973_v11 = vpop.permute.xlu2 %6972  ;;  %v4577_v19 = vld [vmem:[#allocation2 + $0x1b0] sm:$0xff]  ;;  %v11987_v61 = vld [vmem:[#allocation81_spill] sm:$0xff] }
 0x5a3   :  { %6678 = vrot.lane.b32.xlu2 %v10691_v18, %s8393_s3  ;;  %v5378_v0 = vadd.f32 %v5013_v58, %v11983_v16  ;;  %v7144_v50 = vmax.f32 %v10480_v26, %v6973_v11  ;;  %v11988_v16 = vld [vmem:[#allocation18_spill] sm:$0xff] }
 0x5a4   :  { %v7338_v29 = vmax.f32 %v7274_v30, 0.0  ;;  %6998 = vrot.lane.b32.xlu1 %v10694_v1, %s8393_s3  ;;  %4818 = vmatmul.bf16.gmra.mxu0 %v4613_v42  ;;  %vm11989_vm12 = vnez %v11988_v16  ;;  %v5526_v16 = vld [vmem:[#allocation2 + $0x1b9] sm:$0xff] }
 0x5a5   :  { %5052 = vmatmul.bf16.gmra.mxu1 %v4613_v42  ;;  %5766 = vmatmul.bf16.gmra.mxu2 %v5561_v3  ;;  %v6971_v5 = vpop.permute.xlu1 %6970  ;;  %v5525_v42 = vld [vmem:[#allocation2 + $0x1b1] sm:$0xff] }
 0x5a6   :  { %v7402_v49 = vsel %vm11981_vm0, %v7338_v29, 0.0  ;;  %6000 = vmatmul.bf16.gmra.mxu3 %v5561_v3  ;;  %v7143_v60 = vmax.f32 %v10458_v38, %v6971_v5  ;;  %v4576_v29 = vld [vmem:[#allocation2 + $0x1a8] sm:$0xff] }
 0x5a7   :  { %v7466_v2 = vpack.c.bf16 %v7402_v49, %v7402_v49  ;;  %v4614_v35 = vpack.c.bf16 %v4577_v19, %v4576_v29  ;;  %v5524_v49 = vld [vmem:[#allocation2 + $0x1a9] sm:$0xff] }
 0x5a8   :  { %v7207_v40 = vmax.f32 %v6823_v34, %v7143_v60  ;;  %v5727_v24 = vpop.f32.mrf.mxu2  ;;  %v5562_v60 = vpack.c.bf16 %v5525_v42, %v5524_v49 }
 0x5a9   :  { %7531 = vst.msk [vmem:[%s11364_s5 + $0x48] sm:$0xf] %vm7512_vm14, %v7466_v2  ;;  %v10710_v59 = vadd.f32 %v5727_v24, %v5186_v9  ;;  %v5961_v6 = vpop.f32.mrf.mxu3  ;;  %v4781_v62 = vpop.f32.mrf.mxu0 }
 0x5aa   :  { %v7275_v44 = vadd.f32 %v10389_v52, %v7207_v40  ;;  %v10713_v25 = vadd.f32 %v5961_v6, %v5378_v0  ;;  %v5015_v38 = vpop.f32.mrf.mxu1  ;;  %v5187_v17 = vadd.f32 %v4781_v62, %v11986_v47  ;;  %v11990_v62 = vld [vmem:[#allocation82_spill] sm:$0xff] }
 0x5ab   :  { %6680 = vrot.lane.b32.xlu0 %v10710_v59, %s8393_s3  ;;  %v5379_v63 = vadd.f32 %v5015_v38, %v11987_v61  ;;  %v11991_v38 = vld [vmem:[#allocation83_spill] sm:$0xff] }
 0x5ac   :  { %v7339_v57 = vmax.f32 %v7275_v44, 0.0  ;;  %7000 = vrot.lane.b32.xlu2 %v10713_v25, %s8393_s3 }
 0x5ad   :  { %v6653_v54 = vpop.permute.xlu0 %6652 }
 0x5ae   :  { %v7403_v39 = vsel %vm11985_vm7, %v7339_v57, 0.0  ;;  %v6824_v45 = vmax.f32 %v10478_v37, %v6653_v54 }
 0x5af   :  { %v7467_v7 = vpack.c.bf16 %v7403_v39, %v7403_v39 }
 0x5b0   :  { %v7208_v30 = vmax.f32 %v6824_v45, %v7144_v50  ;;  %v5729_v58 = vpop.f32.mrf.mxu2 }
 0x5b1   :  { %7532 = vst.msk [vmem:[%s11364_s5 + $0x4c] sm:$0xf] %vm7512_vm14, %v7467_v7  ;;  %v10729_v26 = vadd.f32 %v5729_v58, %v5187_v17  ;;  %v5963_v36 = vpop.f32.mrf.mxu3  ;;  %v4784_v3 = vpop.f32.mrf.mxu0  ;;  %v11992_v17 = vld [vmem:[#allocation19_spill] sm:$0xff]  ;;  %v11994_v58 = vld [vmem:[#allocation84_spill] sm:$0xff] }
 0x5b2   :  { %v7276_v37 = vadd.f32 %v10389_v52, %v7208_v30  ;;  %v10732_v5 = vadd.f32 %v5963_v36, %v5379_v63  ;;  %v5018_v34 = vpop.f32.mrf.mxu1  ;;  %v5188_v44 = vadd.f32 %v4784_v3, %v11990_v62  ;;  %v6657_v7 = vpop.permute.xlu2 %6656  ;;  %vm11993_vm15 = vnez %v11992_v17  ;;  %v4579_v36 = vld [vmem:[#allocation2 + $0x1c0] sm:$0xff]  ;;  %v11995_v3 = vld [vmem:[#allocation85_spill] sm:$0xff] }
 0x5b3   :  { %6682 = vrot.lane.b32.xlu1 %v10729_v26, %s8393_s3  ;;  %v5380_v11 = vadd.f32 %v5018_v34, %v11991_v38  ;;  %v6826_v63 = vmax.f32 %v10518_v14, %v6657_v7  ;;  %v5527_v34 = vld [vmem:[#allocation2 + $0x1c1] sm:$0xff]  ;;  %v11998_v38 = vld [vmem:[#allocation86_spill] sm:$0xff] }
 0x5b4   :  { %v7340_v2 = vmax.f32 %v7276_v37, 0.0  ;;  %7002 = vrot.lane.b32.xlu0 %v10732_v5, %s8393_s3  ;;  %4823 = vmatmul.bf16.gmra.mxu0 %v4614_v35  ;;  %v11996_v62 = vld [vmem:[#allocation20_spill] sm:$0xff] }
 0x5b5   :  { %5057 = vmatmul.bf16.gmra.mxu1 %v4614_v35  ;;  %5771 = vmatmul.bf16.gmra.mxu2 %v5562_v60  ;;  %v6975_v12 = vpop.permute.xlu0 %6974  ;;  %v6655_v9 = vpop.permute.xlu1 %6654  ;;  %vm11997_vm1 = vnez %v11996_v62 }
 0x5b6   :  { %v7404_v0 = vsel %vm11989_vm12, %v7340_v2, 0.0  ;;  %6005 = vmatmul.bf16.gmra.mxu3 %v5562_v60  ;;  %v7145_v40 = vmax.f32 %v10503_v48, %v6975_v12  ;;  %v6825_v24 = vmax.f32 %v10501_v4, %v6655_v9  ;;  %v4578_v2 = vld [vmem:[#allocation2 + $0x1b8] sm:$0xff] }
 0x5b7   :  { %v7468_v6 = vpack.c.bf16 %v7404_v0, %v7404_v0  ;;  %v10774_v0 = vld [vmem:[%s11363_s4] ss:$0 sm:$0xff] }
 0x5b8   :  { %v7209_v57 = vmax.f32 %v6825_v24, %v7145_v40  ;;  %v5732_v54 = vpop.f32.mrf.mxu2  ;;  %v5563_v24 = vpack.c.bf16 %v5527_v34, %v5526_v16 }
 0x5b9   :  { %7533 = vst.msk [vmem:[%s11364_s5 + $0x50] sm:$0xf] %vm7512_vm14, %v7468_v6  ;;  %v10748_v50 = vadd.f32 %v5732_v54, %v5188_v44  ;;  %v5966_v15 = vpop.f32.mrf.mxu3  ;;  %v4786_v39 = vpop.f32.mrf.mxu0  ;;  %v11999_v54 = vld [vmem:[#allocation87_spill] sm:$0xff] }
 0x5ba   :  { %v7277_v48 = vadd.f32 %v10389_v52, %v7209_v57  ;;  %v10751_v45 = vadd.f32 %v5966_v15, %v5380_v11  ;;  %v5020_v4 = vpop.f32.mrf.mxu1  ;;  %v5189_v52 = vadd.f32 %v4786_v39, %v11994_v58  ;;  %v4581_v58 = vld [vmem:[#allocation2 + $0x1d0] sm:$0xff] }
 0x5bb   :  { %6684 = vrot.lane.b32.xlu2 %v10748_v50, %s8393_s3  ;;  %v5381_v29 = vadd.f32 %v5020_v4, %v11995_v3 }
 0x5bc   :  { %v7341_v47 = vmax.f32 %v7277_v48, 0.0  ;;  %7004 = vrot.lane.b32.xlu1 %v10751_v45, %s8393_s3 }
 0x5be   :  { %v7405_v19 = vsel %vm11993_vm15, %v7341_v47, 0.0  ;;  %v6977_v61 = vpop.permute.xlu1 %6976 }
 0x5bf   :  { %v7469_v30 = vpack.c.bf16 %v7405_v19, %v7405_v19  ;;  %v7146_v42 = vmax.f32 %v10520_v22, %v6977_v61  ;;  %v4615_v22 = vpack.c.bf16 %v4579_v36, %v4578_v2  ;;  %v6981_v19 = vpop.permute.xlu2 %6980  ;;  %v5529_v36 = vld [vmem:[#allocation2 + $0x1d1] sm:$0xff] }
 0x5c0   :  { %v5734_v37 = vpop.f32.mrf.mxu2 }
 0x5c1   :  { %7534 = vst.msk [vmem:[%s11364_s5 + $0x54] sm:$0xf] %vm7512_vm14, %v7469_v30  ;;  %v7210_v35 = vmax.f32 %v6826_v63, %v7146_v42  ;;  %v10767_v49 = vadd.f32 %v5734_v37, %v5189_v52  ;;  %v5968_v60 = vpop.f32.mrf.mxu3  ;;  %v4789_v14 = vpop.f32.mrf.mxu0  ;;  %v7148_v63 = vmax.f32 %v10542_v10, %v6981_v19  ;;  %v4580_v37 = vld [vmem:[#allocation2 + $0x1c8] sm:$0xff] }
 0x5c2   :  { %v10769_v12 = vadd.f32 %v5968_v60, %v5381_v29  ;;  %v5023_v9 = vpop.f32.mrf.mxu1  ;;  %v5190_v11 = vadd.f32 %v4789_v14, %v11998_v38  ;;  %v4616_v60 = vpack.c.bf16 %v4581_v58, %v4580_v37  ;;  %v5528_v14 = vld [vmem:[#allocation2 + $0x1c9] sm:$0xff]  ;;  %v12007_v37 = vld [vmem:[#allocation91_spill] sm:$0xff] }
 0x5c3   :  { %v7278_v40 = vadd.f32 %v10774_v0, %v7210_v35  ;;  %6686 = vrot.lane.b32.xlu0 %v10767_v49, %s8393_s3  ;;  %v5382_v15 = vadd.f32 %v5023_v9, %v11999_v54  ;;  %v5564_v2 = vpack.c.bf16 %v5529_v36, %v5528_v14 }
 0x5c4   :  { %7006 = vrot.lane.b32.xlu2 %v10769_v12, %s8393_s3  ;;  %4828 = vmatmul.bf16.gmra.mxu0 %v4615_v22 }
 0x5c5   :  { %v7342_v6 = vmax.f32 %v7278_v40, 0.0  ;;  %5062 = vmatmul.bf16.gmra.mxu1 %v4615_v22  ;;  %5776 = vmatmul.bf16.gmra.mxu2 %v5563_v24  ;;  %v12000_v22 = vld [vmem:[#allocation21_spill] sm:$0xff] }
 0x5c6   :  { %6010 = vmatmul.bf16.gmra.mxu3 %v5563_v24  ;;  %vm12001_vm3 = vnez %v12000_v22  ;;  %v4582_v22 = vld [vmem:[#allocation2 + $0x1d8] sm:$0xff] }
 0x5c7   :  { %v7406_v44 = vsel %vm11997_vm1, %v7342_v6, 0.0  ;;  %v12002_v6 = vld [vmem:[#allocation88_spill] sm:$0xff]  ;;  %v6665_v38 = vpop.permute.xlu2 %6664 }
 0x5c8   :  { %v7470_v57 = vpack.c.bf16 %v7406_v44, %v7406_v44  ;;  %v5737_v39 = vpop.f32.mrf.mxu2 }
 0x5c9   :  { %v10785_v48 = vadd.f32 %v5737_v39, %v5190_v11  ;;  %v5971_v4 = vpop.f32.mrf.mxu3  ;;  %v4791_v7 = vpop.f32.mrf.mxu0  ;;  %v12003_v11 = vld [vmem:[#allocation89_spill] sm:$0xff] }
 0x5ca   :  { %7535 = vst.msk [vmem:[%s11364_s5 + $0x58] sm:$0xf] %vm7512_vm14, %v7470_v57  ;;  %v10791_v47 = vadd.f32 %v5971_v4, %v5382_v15  ;;  %v5025_v17 = vpop.f32.mrf.mxu1 }
 0x5cb   :  { %6688 = vrot.lane.b32.xlu1 %v10785_v48, %s8393_s3 }
 0x5cc   :  { %7008 = vrot.lane.b32.xlu0 %v10791_v47, %s8393_s3 }
 0x5cd   :  { %v6661_v61 = vpop.permute.xlu0 %6660 }
 0x5ce   :  { %v6828_v30 = vmax.f32 %v10539_v41, %v6661_v61 }
 0x5d0   :  { %v7212_v52 = vmax.f32 %v6828_v30, %v7148_v63  ;;  %v5739_v42 = vpop.f32.mrf.mxu2  ;;  %v6830_v63 = vmax.f32 %v10577_v51, %v6665_v38  ;;  %v12004_v30 = vld [vmem:[#allocation22_spill] sm:$0xff] }
 0x5d1   :  { %v5973_v3 = vpop.f32.mrf.mxu3  ;;  %v4794_v29 = vpop.f32.mrf.mxu0  ;;  %vm12005_vm4 = vnez %v12004_v30 }
 0x5d2   :  { %v7280_v34 = vadd.f32 %v10774_v0, %v7212_v52  ;;  %v5028_v35 = vpop.f32.mrf.mxu1  ;;  %v5192_v62 = vadd.f32 %v4794_v29, %v12002_v6  ;;  %v12006_v52 = vld [vmem:[#allocation90_spill] sm:$0xff]  ;;  %v4583_v3 = vld [vmem:[#allocation2 + $0x1e0] sm:$0xff] }
 0x5d3   :  { %v5384_v57 = vadd.f32 %v5028_v35, %v12003_v11 }
 0x5d4   :  { %v7344_v9 = vmax.f32 %v7280_v34, 0.0  ;;  %4833 = vmatmul.bf16.gmra.mxu0 %v4616_v60 }
 0x5d5   :  { %5067 = vmatmul.bf16.gmra.mxu1 %v4616_v60  ;;  %5781 = vmatmul.bf16.gmra.mxu2 %v5564_v2  ;;  %v6663_v10 = vpop.permute.xlu1 %6662  ;;  %v5531_v60 = vld [vmem:[#allocation2 + $0x1e1] sm:$0xff] }
 0x5d6   :  { %v7408_v41 = vsel %vm12001_vm3, %v7344_v9, 0.0  ;;  %6015 = vmatmul.bf16.gmra.mxu3 %v5564_v2  ;;  %v6983_v16 = vpop.permute.xlu0 %6982  ;;  %v6829_v40 = vmax.f32 %v10558_v27, %v6663_v10 }
 0x5d7   :  { %v7472_v24 = vpack.c.bf16 %v7408_v41, %v7408_v41  ;;  %v7149_v44 = vmax.f32 %v10561_v23, %v6983_v16  ;;  %v4617_v41 = vpack.c.bf16 %v4583_v3, %v4582_v22  ;;  %v5530_v16 = vld [vmem:[#allocation2 + $0x1d9] sm:$0xff]  ;;  %v4585_v22 = vld [vmem:[#allocation2 + $0x1f0] sm:$0xff] }
 0x5d8   :  { %v5742_v54 = vpop.f32.mrf.mxu2  ;;  %v5565_v6 = vpack.c.bf16 %v5531_v60, %v5530_v16  ;;  %v12012_v3 = vld [vmem:[#allocation24_spill] sm:$0xff]  ;;  %v12014_v60 = vld [vmem:[#allocation94_spill] sm:$0xff] }
 0x5d9   :  { %7537 = vst.msk [vmem:[%s11364_s5 + $0x60] sm:$0xf] %vm7512_vm14, %v7472_v24  ;;  %v7213_v15 = vmax.f32 %v6829_v40, %v7149_v44  ;;  %v10810_v39 = vadd.f32 %v5742_v54, %v5192_v62  ;;  %v5976_v4 = vpop.f32.mrf.mxu3  ;;  %v4796_v7 = vpop.f32.mrf.mxu0  ;;  %vm12013_vm8 = vnez %v12012_v3 }
 0x5da   :  { %v10812_v27 = vadd.f32 %v5976_v4, %v5384_v57  ;;  %v5030_v17 = vpop.f32.mrf.mxu1  ;;  %v5193_v42 = vadd.f32 %v4796_v7, %v12006_v52  ;;  %v6987_v40 = vpop.permute.xlu2 %6986  ;;  %v12008_v57 = vld [vmem:[#allocation23_spill] sm:$0xff] }
 0x5db   :  { %v7281_v19 = vadd.f32 %v10774_v0, %v7213_v15  ;;  %6692 = vrot.lane.b32.xlu2 %v10810_v39, %s8393_s3  ;;  %v5385_v34 = vadd.f32 %v5030_v17, %v12007_v37  ;;  %v7151_v38 = vmax.f32 %v10599_v32, %v6987_v40  ;;  %vm12009_vm6 = vnez %v12008_v57  ;;  %v12010_v15 = vld [vmem:[#allocation92_spill] sm:$0xff]  ;;  %v12011_v17 = vld [vmem:[#allocation93_spill] sm:$0xff] }
 0x5dc   :  { %7012 = vrot.lane.b32.xlu1 %v10812_v27, %s8393_s3 }
 0x5dd   :  { %v7345_v23 = vmax.f32 %v7281_v19, 0.0 }
 0x5de   :  { %v6985_v61 = vpop.permute.xlu1 %6984 }
 0x5df   :  { %v7409_v58 = vsel %vm12005_vm4, %v7345_v23, 0.0  ;;  %v7150_v36 = vmax.f32 %v10580_v46, %v6985_v61 }
 0x5e0   :  { %v7473_v29 = vpack.c.bf16 %v7409_v58, %v7409_v58  ;;  %v5744_v35 = vpop.f32.mrf.mxu2 }
 0x5e1   :  { %v7214_v14 = vmax.f32 %v6830_v63, %v7150_v36  ;;  %v10825_v2 = vadd.f32 %v5744_v35, %v5193_v42  ;;  %v5978_v9 = vpop.f32.mrf.mxu3  ;;  %v4799_v10 = vpop.f32.mrf.mxu0 }
 0x5e2   :  { %7538 = vst.msk [vmem:[%s11364_s5 + $0x64] sm:$0xf] %vm7512_vm14, %v7473_v29  ;;  %v10831_v51 = vadd.f32 %v5978_v9, %v5385_v34  ;;  %v5033_v46 = vpop.f32.mrf.mxu1  ;;  %v5194_v4 = vadd.f32 %v4799_v10, %v12010_v15  ;;  %v4584_v10 = vld [vmem:[#allocation2 + $0x1e8] sm:$0xff] }
 0x5e3   :  { %v7282_v24 = vadd.f32 %v10774_v0, %v7214_v14  ;;  %6694 = vrot.lane.b32.xlu0 %v10825_v2, %s8393_s3  ;;  %v5386_v19 = vadd.f32 %v5033_v46, %v12011_v17  ;;  %v6671_v46 = vpop.permute.xlu2 %6670  ;;  %v4618_v57 = vpack.c.bf16 %v4585_v22, %v4584_v10 }
 0x5e4   :  { %7014 = vrot.lane.b32.xlu2 %v10831_v51, %s8393_s3  ;;  %4838 = vmatmul.bf16.gmra.mxu0 %v4617_v41  ;;  %v6833_v17 = vmax.f32 %v10634_v56, %v6671_v46  ;;  %v12020_v46 = vld [vmem:[#allocation26_spill] sm:$0xff] }
 0x5e5   :  { %v7346_v62 = vmax.f32 %v7282_v24, 0.0  ;;  %5072 = vmatmul.bf16.gmra.mxu1 %v4617_v41  ;;  %5786 = vmatmul.bf16.gmra.mxu2 %v5565_v6  ;;  %v6667_v44 = vpop.permute.xlu0 %6666  ;;  %v12015_v41 = vld [vmem:[#allocation95_spill] sm:$0xff]  ;;  %v5532_v24 = vld [vmem:[#allocation2 + $0x1e9] sm:$0xff]  ;;  %vm12021_vm11 = vnez %v12020_v46 }
 0x5e6   :  { %6020 = vmatmul.bf16.gmra.mxu3 %v5565_v6  ;;  %v6831_v11 = vmax.f32 %v10596_v28, %v6667_v44  ;;  %v5533_v6 = vld [vmem:[#allocation2 + $0x1f1] sm:$0xff] }
 0x5e7   :  { %v7410_v54 = vsel %vm12009_vm6, %v7346_v62, 0.0  ;;  %v5566_v15 = vpack.c.bf16 %v5533_v6, %v5532_v24  ;;  %v4586_v24 = vld [vmem:[#allocation2 + $0x1f8] sm:$0xff]  ;;  %v4587_v6 = vld [vmem:[#allocation2 + $0x200] sm:$0xff] }
 0x5e8   :  { %v7474_v7 = vpack.c.bf16 %v7410_v54, %v7410_v54  ;;  %v7215_v23 = vmax.f32 %v6831_v11, %v7151_v38  ;;  %v5747_v61 = vpop.f32.mrf.mxu2 }
 0x5e9   :  { %v10844_v63 = vadd.f32 %v5747_v61, %v5194_v4  ;;  %v5981_v30 = vpop.f32.mrf.mxu3  ;;  %v4801_v58 = vpop.f32.mrf.mxu0  ;;  %v12018_v61 = vld [vmem:[#allocation96_spill] sm:$0xff] }
 0x5ea   :  { %7539 = vst.msk [vmem:[%s11364_s5 + $0x68] sm:$0xf] %vm7512_vm14, %v7474_v7  ;;  %v7283_v28 = vadd.f32 %v10774_v0, %v7215_v23  ;;  %v10851_v32 = vadd.f32 %v5981_v30, %v5386_v19  ;;  %v5035_v52 = vpop.f32.mrf.mxu1  ;;  %v5195_v14 = vadd.f32 %v4801_v58, %v12014_v60  ;;  %v12016_v19 = vld [vmem:[#allocation25_spill] sm:$0xff] }
 0x5eb   :  { %6696 = vrot.lane.b32.xlu1 %v10844_v63, %s8393_s3  ;;  %v5387_v16 = vadd.f32 %v5035_v52, %v12015_v41  ;;  %vm12017_vm10 = vnez %v12016_v19  ;;  %v12019_v52 = vld [vmem:[#allocation97_spill] sm:$0xff]  ;;  %v6993_v60 = vpop.permute.xlu2 %6992 }
 0x5ec   :  { %v7347_v42 = vmax.f32 %v7283_v28, 0.0  ;;  %7016 = vrot.lane.b32.xlu0 %v10851_v32, %s8393_s3  ;;  %v7154_v10 = vmax.f32 %v10653_v21, %v6993_v60 }
 0x5ed   :  { %v6669_v36 = vpop.permute.xlu1 %6668 }
 0x5ee   :  { %v7411_v29 = vsel %vm12013_vm8, %v7347_v42, 0.0  ;;  %v6989_v37 = vpop.permute.xlu0 %6988  ;;  %v6832_v34 = vmax.f32 %v10615_v13, %v6669_v36 }
 0x5ef   :  { %v7475_v35 = vpack.c.bf16 %v7411_v29, %v7411_v29  ;;  %v7152_v9 = vmax.f32 %v10618_v8, %v6989_v37 }
 0x5f0   :  { %v5749_v40 = vpop.f32.mrf.mxu2 }
 0x5f1   :  { %7540 = vst.msk [vmem:[%s11364_s5 + $0x6c] sm:$0xf] %vm7512_vm14, %v7475_v35  ;;  %v7216_v62 = vmax.f32 %v6832_v34, %v7152_v9  ;;  %v10867_v13 = vadd.f32 %v5749_v40, %v5195_v14  ;;  %v5983_v44 = vpop.f32.mrf.mxu3  ;;  %v4804_v38 = vpop.f32.mrf.mxu0 }
 0x5f2   :  { %v10869_v11 = vadd.f32 %v5983_v44, %v5387_v16  ;;  %v5038_v8 = vpop.f32.mrf.mxu1  ;;  %v5196_v30 = vadd.f32 %v4804_v38, %v12018_v61  ;;  %v12022_v16 = vld [vmem:[#allocation98_spill] sm:$0xff]  ;;  %v12023_v44 = vld [vmem:[#allocation99_spill] sm:$0xff] }
 0x5f3   :  { %v7284_v54 = vadd.f32 %v10774_v0, %v7216_v62  ;;  %6698 = vrot.lane.b32.xlu2 %v10867_v13, %s8393_s3  ;;  %v5388_v42 = vadd.f32 %v5038_v8, %v12019_v52 }
 0x5f4   :  { %7018 = vrot.lane.b32.xlu1 %v10869_v11, %s8393_s3  ;;  %4843 = vmatmul.bf16.gmra.mxu0 %v4618_v57 }
 0x5f5   :  { %v7348_v4 = vmax.f32 %v7284_v54, 0.0  ;;  %5077 = vmatmul.bf16.gmra.mxu1 %v4618_v57  ;;  %5791 = vmatmul.bf16.gmra.mxu2 %v5566_v15  ;;  %v5534_v54 = vld [vmem:[#allocation2 + $0x1f9] sm:$0xff] }
 0x5f6   :  { %6025 = vmatmul.bf16.gmra.mxu3 %v5566_v15  ;;  %v6991_v7 = vpop.permute.xlu1 %6990  ;;  %v5535_v15 = vld [vmem:[#allocation2 + $0x201] sm:$0xff] }
 0x5f7   :  { %v7412_v23 = vsel %vm12017_vm10, %v7348_v4, 0.0  ;;  %v7153_v58 = vmax.f32 %v10637_v31, %v6991_v7  ;;  %v5567_v61 = vpack.c.bf16 %v5535_v15, %v5534_v54  ;;  %v12028_v15 = vld [vmem:[#allocation28_spill] sm:$0xff] }
 0x5f8   :  { %v7476_v28 = vpack.c.bf16 %v7412_v23, %v7412_v23  ;;  %v5752_v36 = vpop.f32.mrf.mxu2  ;;  %v4619_v23 = vpack.c.bf16 %v4587_v6, %v4586_v24  ;;  %vm12029_vm2 = vnez %v12028_v15 }
 0x5f9   :  { %v7217_v3 = vmax.f32 %v6833_v17, %v7153_v58  ;;  %v10882_v29 = vadd.f32 %v5752_v36, %v5196_v30  ;;  %v5986_v37 = vpop.f32.mrf.mxu3  ;;  %v4806_v34 = vpop.f32.mrf.mxu0  ;;  %v12024_v58 = vld [vmem:[#allocation27_spill] sm:$0xff] }
 0x5fa   :  { %7541 = vst.msk [vmem:[%s11364_s5 + $0x70] sm:$0xf] %vm7512_vm14, %v7476_v28  ;;  %v10888_v56 = vadd.f32 %v5986_v37, %v5388_v42  ;;  %v5040_v35 = vpop.f32.mrf.mxu1  ;;  %v5197_v40 = vadd.f32 %v4806_v34, %v12022_v16  ;;  %vm12025_vm13 = vnez %v12024_v58  ;;  %v12026_v42 = vld [vmem:[#allocation100_spill] sm:$0xff] }
 0x5fb   :  { %v7285_v31 = vadd.f32 %v10774_v0, %v7217_v3  ;;  %6700 = vrot.lane.b32.xlu0 %v10882_v29, %s8393_s3  ;;  %v5389_v38 = vadd.f32 %v5040_v35, %v12023_v44  ;;  %v12027_v3 = vld [vmem:[#allocation101_spill] sm:$0xff] }
 0x5fc   :  { %7020 = vrot.lane.b32.xlu2 %v10888_v56, %s8393_s3 }
 0x5fd   :  { %v7349_v14 = vmax.f32 %v7285_v31, 0.0  ;;  %v6673_v9 = vpop.permute.xlu0 %6672  ;;  %v6679_v16 = vpop.permute.xlu2 %6678 }
 0x5fe   :  { %v6834_v22 = vmax.f32 %v10651_v20, %v6673_v9  ;;  %v6837_v54 = vmax.f32 %v10691_v18, %v6679_v16 }
 0x5ff   :  { %v7413_v41 = vsel %vm12021_vm11, %v7349_v14, 0.0 }
 0x600   :  { %v7477_v62 = vpack.c.bf16 %v7413_v41, %v7413_v41  ;;  %v7218_v8 = vmax.f32 %v6834_v22, %v7154_v10  ;;  %v5754_v57 = vpop.f32.mrf.mxu2 }
 0x601   :  { %v10901_v4 = vadd.f32 %v5754_v57, %v5197_v40  ;;  %v5988_v7 = vpop.f32.mrf.mxu3  ;;  %v4809_v21 = vpop.f32.mrf.mxu0 }
 0x602   :  { %7542 = vst.msk [vmem:[%s11364_s5 + $0x74] sm:$0xf] %vm7512_vm14, %v7477_v62  ;;  %v7286_v20 = vadd.f32 %v10774_v0, %v7218_v8  ;;  %v10908_v17 = vadd.f32 %v5988_v7, %v5389_v38  ;;  %v5043_v19 = vpop.f32.mrf.mxu1  ;;  %v5198_v36 = vadd.f32 %v4809_v21, %v12026_v42  ;;  %v12030_v21 = vld [vmem:[#allocation102_spill] sm:$0xff] }
 0x603   :  { %6702 = vrot.lane.b32.xlu1 %v10901_v4, %s8393_s3  ;;  %v5390_v37 = vadd.f32 %v5043_v19, %v12027_v3  ;;  %v12031_v19 = vld [vmem:[#allocation103_spill] sm:$0xff] }
 0x604   :  { %v7350_v30 = vmax.f32 %v7286_v20, 0.0  ;;  %7022 = vrot.lane.b32.xlu0 %v10908_v17, %s8393_s3  ;;  %4848 = vmatmul.bf16.gmra.mxu0 %v4619_v23 }
 0x605   :  { %5082 = vmatmul.bf16.gmra.mxu1 %v4619_v23  ;;  %5796 = vmatmul.bf16.gmra.mxu2 %v5567_v61 }
 0x606   :  { %v7414_v28 = vsel %vm12025_vm13, %v7350_v30, 0.0  ;;  %6030 = vmatmul.bf16.gmra.mxu3 %v5567_v61 }
 0x607   :  { %v7478_v52 = vpack.c.bf16 %v7414_v28, %v7414_v28 }
 0x608   :  { %v5757_v34 = vpop.f32.mrf.mxu2 }
 0x609   :  { %7543 = vst.msk [vmem:[%s11364_s5 + $0x78] sm:$0xf] %vm7512_vm14, %v7478_v52  ;;  %v10922_v35 = vadd.f32 %v5757_v34, %v5198_v36  ;;  %v5991_v60 = vpop.f32.mrf.mxu3  ;;  %v4811_v31 = vpop.f32.mrf.mxu0 }
 0x60a   :  { %v10924_v14 = vadd.f32 %v5991_v60, %v5390_v37  ;;  %v5045_v9 = vpop.f32.mrf.mxu1  ;;  %v7001_v36 = vpop.permute.xlu2 %7000  ;;  %v12032_v31 = vld [vmem:[#allocation29_spill] sm:$0xff] }
 0x60b   :  { %6704 = vrot.lane.b32.xlu2 %v10922_v35, %s8393_s3  ;;  %v7158_v34 = vmax.f32 %v10713_v25, %v7001_v36  ;;  %vm12033_vm0 = vnez %v12032_v31  ;;  %v12040_v31 = vld [vmem:[#allocation31_spill] sm:$0xff] }
 0x60c   :  { %7024 = vrot.lane.b32.xlu1 %v10924_v14, %s8393_s3  ;;  %vm12041_vm12 = vnez %v12040_v31 }
 0x60d   :  { %v6677_v10 = vpop.permute.xlu1 %6676 }
 0x60e   :  { %v6997_v22 = vpop.permute.xlu0 %6996  ;;  %v6836_v46 = vmax.f32 %v10672_v33, %v6677_v10  ;;  %v12034_v10 = vld [vmem:[#allocation104_spill] sm:$0xff] }
 0x60f   :  { %v7156_v41 = vmax.f32 %v10675_v55, %v6997_v22 }
 0x610   :  { %v5759_v40 = vpop.f32.mrf.mxu2 }
 0x611   :  { %v7220_v24 = vmax.f32 %v6836_v46, %v7156_v41  ;;  %v5993_v6 = vpop.f32.mrf.mxu3  ;;  %v4814_v62 = vpop.f32.mrf.mxu0  ;;  %v12035_v41 = vld [vmem:[#allocation105_spill] sm:$0xff] }
 0x612   :  { %v5048_v44 = vpop.f32.mrf.mxu1  ;;  %v5200_v20 = vadd.f32 %v4814_v62, %v12030_v21 }
 0x613   :  { %v7288_v38 = vadd.f32 %v10774_v0, %v7220_v24  ;;  %v5392_v23 = vadd.f32 %v5048_v44, %v12031_v19 }
 0x615   :  { %v7352_v8 = vmax.f32 %v7288_v38, 0.0 }
 0x616   :  { %v6999_v57 = vpop.permute.xlu1 %6998 }
 0x617   :  { %v7416_v7 = vsel %vm12029_vm2, %v7352_v8, 0.0  ;;  %v7157_v33 = vmax.f32 %v10694_v1, %v6999_v57 }
 0x618   :  { %v7480_v55 = vpack.c.bf16 %v7416_v7, %v7416_v7  ;;  %v5762_v61 = vpop.f32.mrf.mxu2 }
 0x619   :  { %v7221_v30 = vmax.f32 %v6837_v54, %v7157_v33  ;;  %v10939_v58 = vadd.f32 %v5762_v61, %v5200_v20  ;;  %v5996_v28 = vpop.f32.mrf.mxu3  ;;  %v4816_v52 = vpop.f32.mrf.mxu0  ;;  %v12036_v54 = vld [vmem:[#allocation30_spill] sm:$0xff]  ;;  %v12039_v61 = vld [vmem:[#allocation107_spill] sm:$0xff] }
 0x61a   :  { %7545 = vst.msk [vmem:[%s11364_s5 + $0x80] sm:$0xf] %vm7512_vm14, %v7480_v55  ;;  %v10945_v18 = vadd.f32 %v5996_v28, %v5392_v23  ;;  %v5050_v42 = vpop.f32.mrf.mxu1  ;;  %v5201_v22 = vadd.f32 %v4816_v52, %v12034_v10  ;;  %vm12037_vm7 = vnez %v12036_v54  ;;  %v12038_v33 = vld [vmem:[#allocation106_spill] sm:$0xff]  ;;  %v6685_v23 = vpop.permute.xlu2 %6684  ;;  %v12042_v10 = vld [vmem:[#allocation108_spill] sm:$0xff] }
 0x61b   :  { %v7289_v1 = vadd.f32 %v10774_v0, %v7221_v30  ;;  %6708 = vrot.lane.b32.xlu0 %v10939_v58, %s8393_s3  ;;  %v5393_v16 = vadd.f32 %v5050_v42, %v12035_v41 }
 0x61c   :  { %7028 = vrot.lane.b32.xlu2 %v10945_v18, %s8393_s3 }
 0x61d   :  { %v7353_v3 = vmax.f32 %v7289_v1, 0.0  ;;  %v6681_v37 = vpop.permute.xlu0 %6680 }
 0x61e   :  { %v6838_v60 = vmax.f32 %v10710_v59, %v6681_v37 }
 0x61f   :  { %v7417_v9 = vsel %vm12033_vm0, %v7353_v3, 0.0 }
 0x620   :  { %v7481_v46 = vpack.c.bf16 %v7417_v9, %v7417_v9  ;;  %v7222_v40 = vmax.f32 %v6838_v60, %v7158_v34  ;;  %v5764_v24 = vpop.f32.mrf.mxu2  ;;  %v6840_v60 = vmax.f32 %v10748_v50, %v6685_v23 }
 0x621   :  { %v10958_v6 = vadd.f32 %v5764_v24, %v5201_v22  ;;  %v5998_v62 = vpop.f32.mrf.mxu3  ;;  %v4819_v44 = vpop.f32.mrf.mxu0 }
 0x622   :  { %7546 = vst.msk [vmem:[%s11364_s5 + $0x84] sm:$0xf] %vm7512_vm14, %v7481_v46  ;;  %v7290_v59 = vadd.f32 %v10774_v0, %v7222_v40  ;;  %v10965_v25 = vadd.f32 %v5998_v62, %v5393_v16  ;;  %v5053_v38 = vpop.f32.mrf.mxu1  ;;  %v5202_v55 = vadd.f32 %v4819_v44, %v12038_v33  ;;  %v12043_v16 = vld [vmem:[#allocation109_spill] sm:$0xff] }
 0x623   :  { %6710 = vrot.lane.b32.xlu1 %v10958_v6, %s8393_s3  ;;  %v5394_v30 = vadd.f32 %v5053_v38, %v12039_v61  ;;  %v12047_v61 = vld [vmem:[#allocation111_spill] sm:$0xff] }
 0x624   :  { %v7354_v8 = vmax.f32 %v7290_v59, 0.0  ;;  %7030 = vrot.lane.b32.xlu0 %v10965_v25, %s8393_s3 }
 0x625   :  { %v6683_v57 = vpop.permute.xlu1 %6682 }
 0x626   :  { %v7418_v15 = vsel %vm12037_vm7, %v7354_v8, 0.0  ;;  %v7003_v7 = vpop.permute.xlu0 %7002  ;;  %v6839_v21 = vmax.f32 %v10729_v26, %v6683_v57  ;;  %v7007_v57 = vpop.permute.xlu2 %7006 }
 0x627   :  { %v7482_v20 = vpack.c.bf16 %v7418_v15, %v7418_v15  ;;  %v7159_v19 = vmax.f32 %v10732_v5, %v7003_v7  ;;  %v7161_v7 = vmax.f32 %v10769_v12, %v7007_v57 }
 0x628   :  { %v5767_v28 = vpop.f32.mrf.mxu2 }
 0x629   :  { %7547 = vst.msk [vmem:[%s11364_s5 + $0x88] sm:$0xf] %vm7512_vm14, %v7482_v20  ;;  %v7223_v52 = vmax.f32 %v6839_v21, %v7159_v19  ;;  %v10981_v42 = vadd.f32 %v5767_v28, %v5202_v55  ;;  %v6001_v36 = vpop.f32.mrf.mxu3  ;;  %v4821_v1 = vpop.f32.mrf.mxu0  ;;  %v12044_v20 = vld [vmem:[#allocation32_spill] sm:$0xff]  ;;  %v12046_v55 = vld [vmem:[#allocation110_spill] sm:$0xff] }
 0x62a   :  { %v10983_v26 = vadd.f32 %v6001_v36, %v5394_v30  ;;  %v5055_v3 = vpop.f32.mrf.mxu1  ;;  %v5203_v22 = vadd.f32 %v4821_v1, %v12042_v10  ;;  %vm12045_vm15 = vnez %v12044_v20 }
 0x62b   :  { %v7291_v37 = vadd.f32 %v10774_v0, %v7223_v52  ;;  %6712 = vrot.lane.b32.xlu2 %v10981_v42, %s8393_s3  ;;  %v5395_v40 = vadd.f32 %v5055_v3, %v12043_v16 }
 0x62c   :  { %7032 = vrot.lane.b32.xlu1 %v10983_v26, %s8393_s3 }
 0x62d   :  { %v7355_v5 = vmax.f32 %v7291_v37, 0.0 }
 0x62e   :  { %v7005_v34 = vpop.permute.xlu1 %7004 }
 0x62f   :  { %v7419_v9 = vsel %vm12041_vm12, %v7355_v5, 0.0  ;;  %v7160_v46 = vmax.f32 %v10751_v45, %v7005_v34 }
 0x630   :  { %v7483_v41 = vpack.c.bf16 %v7419_v9, %v7419_v9  ;;  %v5769_v24 = vpop.f32.mrf.mxu2 }
 0x631   :  { %v7224_v62 = vmax.f32 %v6840_v60, %v7160_v46  ;;  %v10996_v44 = vadd.f32 %v5769_v24, %v5203_v22  ;;  %v6003_v59 = vpop.f32.mrf.mxu3  ;;  %v4824_v38 = vpop.f32.mrf.mxu0  ;;  %v12048_v60 = vld [vmem:[#allocation33_spill] sm:$0xff]  ;;  %v12050_v46 = vld [vmem:[#allocation112_spill] sm:$0xff] }
 0x632   :  { %7548 = vst.msk [vmem:[%s11364_s5 + $0x8c] sm:$0xf] %vm7512_vm14, %v7483_v41  ;;  %v11002_v50 = vadd.f32 %v6003_v59, %v5395_v40  ;;  %v5058_v8 = vpop.f32.mrf.mxu1  ;;  %v5204_v19 = vadd.f32 %v4824_v38, %v12046_v55  ;;  %vm12049_vm1 = vnez %v12048_v60  ;;  %v12051_v40 = vld [vmem:[#allocation113_spill] sm:$0xff] }
 0x633   :  { %v7292_v45 = vadd.f32 %v10774_v0, %v7224_v62  ;;  %6714 = vrot.lane.b32.xlu0 %v10996_v44, %s8393_s3  ;;  %v5396_v30 = vadd.f32 %v5058_v8, %v12047_v61 }
 0x634   :  { %7034 = vrot.lane.b32.xlu2 %v11002_v50, %s8393_s3 }
 0x635   :  { %v7356_v54 = vmax.f32 %v7292_v45, 0.0  ;;  %v6687_v15 = vpop.permute.xlu0 %6686 }
 0x636   :  { %v6841_v21 = vmax.f32 %v10767_v49, %v6687_v15  ;;  %v12052_v15 = vld [vmem:[#allocation34_spill] sm:$0xff] }
 0x637   :  { %v7420_v33 = vsel %vm12045_vm15, %v7356_v54, 0.0  ;;  %vm12053_vm3 = vnez %v12052_v15 }
 0x638   :  { %v7484_v23 = vpack.c.bf16 %v7420_v33, %v7420_v33  ;;  %v7225_v28 = vmax.f32 %v6841_v21, %v7161_v7  ;;  %v5772_v52 = vpop.f32.mrf.mxu2  ;;  %v12054_v21 = vld [vmem:[#allocation114_spill] sm:$0xff]  ;;  %v6693_v33 = vpop.permute.xlu2 %6692 }
 0x639   :  { %v11015_v36 = vadd.f32 %v5772_v52, %v5204_v19  ;;  %v6006_v1 = vpop.f32.mrf.mxu3  ;;  %v4826_v3 = vpop.f32.mrf.mxu0  ;;  %v12055_v19 = vld [vmem:[#allocation115_spill] sm:$0xff] }
 0x63a   :  { %7549 = vst.msk [vmem:[%s11364_s5 + $0x90] sm:$0xf] %vm7512_vm14, %v7484_v23  ;;  %v7293_v49 = vadd.f32 %v10774_v0, %v7225_v28  ;;  %v11022_v12 = vadd.f32 %v6006_v1, %v5396_v30  ;;  %v5060_v37 = vpop.f32.mrf.mxu1  ;;  %v5205_v41 = vadd.f32 %v4826_v3, %v12050_v46 }
 0x63b   :  { %6716 = vrot.lane.b32.xlu1 %v11015_v36, %s8393_s3  ;;  %v5397_v24 = vadd.f32 %v5060_v37, %v12051_v40  ;;  %v6844_v37 = vmax.f32 %v10810_v39, %v6693_v33  ;;  %v12057_v39 = vld [vmem:[#allocation116_spill] sm:$0xff] }
 0x63c   :  { %v7357_v5 = vmax.f32 %v7293_v49, 0.0  ;;  %7036 = vrot.lane.b32.xlu0 %v11022_v12, %s8393_s3 }
 0x63d   :  { %v6689_v34 = vpop.permute.xlu1 %6688 }
 0x63e   :  { %v7421_v31 = vsel %vm12049_vm1, %v7357_v5, 0.0  ;;  %v7009_v9 = vpop.permute.xlu0 %7008  ;;  %v6842_v10 = vmax.f32 %v10785_v48, %v6689_v34 }
 0x63f   :  { %v7485_v22 = vpack.c.bf16 %v7421_v31, %v7421_v31  ;;  %v7162_v16 = vmax.f32 %v10791_v47, %v7009_v9 }
 0x640   :  { %v5774_v62 = vpop.f32.mrf.mxu2 }
 0x641   :  { %7550 = vst.msk [vmem:[%s11364_s5 + $0x94] sm:$0xf] %vm7512_vm14, %v7485_v22  ;;  %v7226_v59 = vmax.f32 %v6842_v10, %v7162_v16  ;;  %v11038_v38 = vadd.f32 %v5774_v62, %v5205_v41  ;;  %v6008_v8 = vpop.f32.mrf.mxu3  ;;  %v4829_v57 = vpop.f32.mrf.mxu0  ;;  %v12063_v62 = vld [vmem:[#allocation37_spill] sm:$0xff] }
 0x642   :  { %v11040_v45 = vadd.f32 %v6008_v8, %v5397_v24  ;;  %v5063_v48 = vpop.f32.mrf.mxu1  ;;  %v5206_v20 = vadd.f32 %v4829_v57, %v12054_v21  ;;  %v7015_v22 = vpop.permute.xlu2 %7014  ;;  %v12058_v57 = vld [vmem:[#allocation117_spill] sm:$0xff]  ;;  %vm12064_vm4 = vnez %v12063_v62 }
 0x643   :  { %v7294_v54 = vadd.f32 %v10774_v0, %v7226_v59  ;;  %6718 = vrot.lane.b32.xlu2 %v11038_v38, %s8393_s3  ;;  %v5398_v23 = vadd.f32 %v5063_v48, %v12055_v19  ;;  %v7165_v40 = vmax.f32 %v10831_v51, %v7015_v22  ;;  %v12059_v19 = vld [vmem:[#allocation36_spill] sm:$0xff] }
 0x644   :  { %7038 = vrot.lane.b32.xlu1 %v11040_v45, %s8393_s3 }
 0x645   :  { %v7358_v47 = vmax.f32 %v7294_v54, 0.0 }
 0x647   :  { %v7422_v7 = vsel %vm12053_vm3, %v7358_v47, 0.0 }
 0x648   :  { %v7486_v55 = vpack.c.bf16 %v7422_v7, %v7422_v7  ;;  %v5777_v61 = vpop.f32.mrf.mxu2 }
 0x649   :  { %v11051_v30 = vadd.f32 %v5777_v61, %v5206_v20  ;;  %v6011_v28 = vpop.f32.mrf.mxu3  ;;  %v4831_v52 = vpop.f32.mrf.mxu0 }
 0x64a   :  { %7551 = vst.msk [vmem:[%s11364_s5 + $0x98] sm:$0xf] %vm7512_vm14, %v7486_v55  ;;  %v11057_v1 = vadd.f32 %v6011_v28, %v5398_v23  ;;  %v5065_v3 = vpop.f32.mrf.mxu1 }
 0x64b   :  { %6720 = vrot.lane.b32.xlu0 %v11051_v30, %s8393_s3  ;;  %v12061_v3 = vld [vmem:[#allocation118_spill] sm:$0xff] }
 0x64c   :  { %7040 = vrot.lane.b32.xlu2 %v11057_v1, %s8393_s3 }
 0x64e   :  { %v7013_v49 = vpop.permute.xlu1 %7012 }
 0x64f   :  { %v7164_v5 = vmax.f32 %v10812_v27, %v7013_v49 }
 0x650   :  { %v5779_v34 = vpop.f32.mrf.mxu2 }
 0x651   :  { %v7228_v60 = vmax.f32 %v6844_v37, %v7164_v5  ;;  %v6013_v31 = vpop.f32.mrf.mxu3  ;;  %v4834_v9 = vpop.f32.mrf.mxu0  ;;  %v12062_v34 = vld [vmem:[#allocation119_spill] sm:$0xff] }
 0x652   :  { %v5068_v10 = vpop.f32.mrf.mxu1  ;;  %v5208_v8 = vadd.f32 %v4834_v9, %v12057_v39  ;;  %v6699_v5 = vpop.permute.xlu2 %6698  ;;  %v12065_v39 = vld [vmem:[#allocation120_spill] sm:$0xff] }
 0x653   :  { %v7296_v46 = vadd.f32 %v10774_v0, %v7228_v60  ;;  %v5400_v48 = vadd.f32 %v5068_v10, %v12058_v57 }
 0x655   :  { %v7360_v41 = vmax.f32 %v7296_v46, 0.0  ;;  %v6695_v16 = vpop.permute.xlu0 %6694 }
 0x656   :  { %v6845_v24 = vmax.f32 %v10825_v2, %v6695_v16 }
 0x657   :  { %v7424_v59 = vsel %vm9512_vm5, %v7360_v41, 0.0  ;;  %vm12060_vm5 = vnez %v12059_v19 }
 0x658   :  { %v7488_v27 = vpack.c.bf16 %v7424_v59, %v7424_v59  ;;  %v7229_v54 = vmax.f32 %v6845_v24, %v7165_v40  ;;  %v5782_v47 = vpop.f32.mrf.mxu2  ;;  %v6847_v24 = vmax.f32 %v10867_v13, %v6699_v5 }
 0x659   :  { %v11072_v15 = vadd.f32 %v5782_v47, %v5208_v8  ;;  %v6016_v7 = vpop.f32.mrf.mxu3  ;;  %v4836_v21 = vpop.f32.mrf.mxu0 }
 0x65a   :  { %7553 = vst.msk [vmem:[%s11364_s5 + $0xa0] sm:$0xf] %vm7512_vm14, %v7488_v27  ;;  %v7297_v2 = vadd.f32 %v10774_v0, %v7229_v54  ;;  %v11079_v51 = vadd.f32 %v6016_v7, %v5400_v48  ;;  %v5070_v20 = vpop.f32.mrf.mxu1  ;;  %v5209_v49 = vadd.f32 %v4836_v21, %v12061_v3  ;;  %v12066_v48 = vld [vmem:[#allocation121_spill] sm:$0xff] }
 0x65b   :  { %6724 = vrot.lane.b32.xlu1 %v11072_v15, %s8393_s3  ;;  %v5401_v60 = vadd.f32 %v5070_v20, %v12062_v34  ;;  %v12069_v34 = vld [vmem:[#allocation123_spill] sm:$0xff] }
 0x65c   :  { %v7361_v33 = vmax.f32 %v7297_v2, 0.0  ;;  %7044 = vrot.lane.b32.xlu0 %v11079_v51, %s8393_s3 }
 0x65d   :  { %v6697_v55 = vpop.permute.xlu1 %6696 }
 0x65e   :  { %v7425_v23 = vsel %vm12060_vm5, %v7361_v33, 0.0  ;;  %v7017_v61 = vpop.permute.xlu0 %7016  ;;  %v6846_v28 = vmax.f32 %v10844_v63, %v6697_v55  ;;  %v7021_v55 = vpop.permute.xlu2 %7020 }
 0x65f   :  { %v7489_v52 = vpack.c.bf16 %v7425_v23, %v7425_v23  ;;  %v7166_v37 = vmax.f32 %v10851_v32, %v7017_v61  ;;  %v7168_v61 = vmax.f32 %v10888_v56, %v7021_v55 }
 0x660   :  { %v5784_v31 = vpop.f32.mrf.mxu2 }
 0x661   :  { %7554 = vst.msk [vmem:[%s11364_s5 + $0xa4] sm:$0xf] %vm7512_vm14, %v7489_v52  ;;  %v7230_v9 = vmax.f32 %v6846_v28, %v7166_v37  ;;  %v11095_v10 = vadd.f32 %v5784_v31, %v5209_v49  ;;  %v6018_v22 = vpop.f32.mrf.mxu3  ;;  %v4839_v46 = vpop.f32.mrf.mxu0  ;;  %v12068_v49 = vld [vmem:[#allocation122_spill] sm:$0xff] }
 0x662   :  { %v11097_v63 = vadd.f32 %v6018_v22, %v5401_v60  ;;  %v5073_v41 = vpop.f32.mrf.mxu1  ;;  %v5210_v8 = vadd.f32 %v4839_v46, %v12065_v39 }
 0x663   :  { %v7298_v16 = vadd.f32 %v10774_v0, %v7230_v9  ;;  %6726 = vrot.lane.b32.xlu2 %v11095_v10, %s8393_s3  ;;  %v5402_v54 = vadd.f32 %v5073_v41, %v12066_v48 }
 0x664   :  { %7046 = vrot.lane.b32.xlu1 %v11097_v63, %s8393_s3 }
 0x665   :  { %v7362_v32 = vmax.f32 %v7298_v16, 0.0 }
 0x666   :  { %v7019_v40 = vpop.permute.xlu1 %7018 }
 0x667   :  { %v7426_v59 = vsel %vm12064_vm4, %v7362_v32, 0.0  ;;  %v7167_v27 = vmax.f32 %v10869_v11, %v7019_v40 }
 0x668   :  { %v7490_v57 = vpack.c.bf16 %v7426_v59, %v7426_v59  ;;  %v5787_v47 = vpop.f32.mrf.mxu2 }
 0x669   :  { %v7231_v7 = vmax.f32 %v6847_v24, %v7167_v27  ;;  %v11110_v21 = vadd.f32 %v5787_v47, %v5210_v8  ;;  %v6021_v2 = vpop.f32.mrf.mxu3  ;;  %v4841_v20 = vpop.f32.mrf.mxu0  ;;  %v12070_v24 = vld [vmem:[#allocation39_spill] sm:$0xff] }
 0x66a   :  { %7555 = vst.msk [vmem:[%s11364_s5 + $0xa8] sm:$0xf] %vm7512_vm14, %v7490_v57  ;;  %v11116_v13 = vadd.f32 %v6021_v2, %v5402_v54  ;;  %v5075_v33 = vpop.f32.mrf.mxu1  ;;  %v5211_v37 = vadd.f32 %v4841_v20, %v12068_v49 }
 0x66b   :  { %v7299_v11 = vadd.f32 %v10774_v0, %v7231_v7  ;;  %6728 = vrot.lane.b32.xlu0 %v11110_v21, %s8393_s3  ;;  %v5403_v60 = vadd.f32 %v5075_v33, %v12069_v34 }
 0x66c   :  { %7048 = vrot.lane.b32.xlu2 %v11116_v13, %s8393_s3 }
 0x66d   :  { %v7363_v19 = vmax.f32 %v7299_v11, 0.0  ;;  %v6701_v23 = vpop.permute.xlu0 %6700  ;;  %v12072_v11 = vld [vmem:[#allocation40_spill] sm:$0xff] }
 0x66e   :  { %v6848_v28 = vmax.f32 %v10882_v29, %v6701_v23  ;;  %vm12073_vm6 = vnez %v12072_v11  ;;  %v12074_v23 = vld [vmem:[#allocation125_spill] sm:$0xff] }
 0x66f   :  { %v7427_v3 = vsel %vm9577_vm9, %v7363_v19, 0.0  ;;  %vm12071_vm9 = vnez %v12070_v24  ;;  %v12078_v24 = vld [vmem:[#allocation127_spill] sm:$0xff] }
 0x670   :  { %v7491_v5 = vpack.c.bf16 %v7427_v3, %v7427_v3  ;;  %v7232_v31 = vmax.f32 %v6848_v28, %v7168_v61  ;;  %v5789_v9 = vpop.f32.mrf.mxu2  ;;  %v12075_v3 = vld [vmem:[#allocation126_spill] sm:$0xff] }
 0x671   :  { %v11129_v22 = vadd.f32 %v5789_v9, %v5211_v37  ;;  %v6023_v46 = vpop.f32.mrf.mxu3  ;;  %v4844_v41 = vpop.f32.mrf.mxu0 }
 0x672   :  { %7556 = vst.msk [vmem:[%s11364_s5 + $0xac] sm:$0xf] %vm7512_vm14, %v7491_v5  ;;  %v7300_v29 = vadd.f32 %v10774_v0, %v7232_v31  ;;  %v11136_v56 = vadd.f32 %v6023_v46, %v5403_v60  ;;  %v5078_v16 = vpop.f32.mrf.mxu1  ;;  %v5212_v27 = vadd.f32 %v4844_v41, %v10233_v43  ;;  %v6705_v43 = vpop.permute.xlu2 %6704  ;;  %v12076_v41 = vld [vmem:[#allocation41_spill] sm:$0xff] }
 0x673   :  { %6730 = vrot.lane.b32.xlu1 %v11129_v22, %s8393_s3  ;;  %v6850_v55 = vmax.f32 %v10922_v35, %v6705_v43  ;;  %vm12077_vm8 = vnez %v12076_v41 }
 0x674   :  { %v7364_v32 = vmax.f32 %v7300_v29, 0.0  ;;  %7050 = vrot.lane.b32.xlu0 %v11136_v56, %s8393_s3 }
 0x675   :  { %v6703_v40 = vpop.permute.xlu1 %6702 }
 0x676   :  { %v7428_v62 = vsel %vm12071_vm9, %v7364_v32, 0.0  ;;  %v7023_v59 = vpop.permute.xlu0 %7022  ;;  %v6849_v39 = vmax.f32 %v10901_v4, %v6703_v40 }
 0x677   :  { %v7492_v8 = vpack.c.bf16 %v7428_v62, %v7428_v62  ;;  %v7169_v57 = vmax.f32 %v10908_v17, %v7023_v59 }
 0x678   :  { %v5792_v48 = vpop.f32.mrf.mxu2 }
 0x679   :  { %7557 = vst.msk [vmem:[%s11364_s5 + $0xb0] sm:$0xf] %vm7512_vm14, %v7492_v8  ;;  %v7233_v54 = vmax.f32 %v6849_v39, %v7169_v57  ;;  %v11151_v47 = vadd.f32 %v5792_v48, %v5212_v27  ;;  %v6026_v7 = vpop.f32.mrf.mxu3  ;;  %v4846_v2 = vpop.f32.mrf.mxu0 }
 0x67a   :  { %v5080_v20 = vpop.f32.mrf.mxu1  ;;  %v5213_v61 = vadd.f32 %v4846_v2, %v12074_v23 }
 0x67b   :  { %v7301_v33 = vadd.f32 %v10774_v0, %v7233_v54  ;;  %6732 = vrot.lane.b32.xlu2 %v11151_v47, %s8393_s3  ;;  %v5405_v49 = vadd.f32 %v5080_v20, %v12075_v3  ;;  %v7029_v54 = vpop.permute.xlu2 %7028 }
 0x67c   :  { %v7172_v2 = vmax.f32 %v10945_v18, %v7029_v54 }
 0x67d   :  { %v7365_v4 = vmax.f32 %v7301_v33, 0.0  ;;  %v12079_v33 = vld [vmem:[#allocation124_spill] sm:$0xff] }
 0x67e   :  { %v7025_v17 = vpop.permute.xlu1 %7024  ;;  %v5404_v43 = vadd.f32 %v5078_v16, %v12079_v33 }
 0x67f   :  { %v7429_v19 = vsel %vm12073_vm6, %v7365_v4, 0.0  ;;  %v7170_v28 = vmax.f32 %v10924_v14, %v7025_v17 }
 0x680   :  { %v7493_v52 = vpack.c.bf16 %v7429_v19, %v7429_v19  ;;  %v5794_v37 = vpop.f32.mrf.mxu2 }
 0x681   :  { %v7234_v5 = vmax.f32 %v6850_v55, %v7170_v28  ;;  %v11162_v34 = vadd.f32 %v5794_v37, %v5213_v61  ;;  %v6028_v60 = vpop.f32.mrf.mxu3  ;;  %v4849_v31 = vpop.f32.mrf.mxu0  ;;  %v11194_v55 = vadd.f32 %v6026_v7, %v5404_v43  ;;  %v12080_v28 = vld [vmem:[#allocation42_spill] sm:$0xff]  ;;  %v11210_v7 = vld [vmem:[%s11363_s4] ss:$0 sm:$0xff] }
 0x682   :  { %7558 = vst.msk [vmem:[%s11364_s5 + $0xb4] sm:$0xf] %vm7512_vm14, %v7493_v52  ;;  %v11168_v35 = vadd.f32 %v6028_v60, %v5405_v49  ;;  %v5083_v9 = vpop.f32.mrf.mxu1  ;;  %v5214_v32 = vadd.f32 %v4849_v31, %v10241_v53  ;;  %vm12081_vm10 = vnez %v12080_v28  ;;  %v12082_v31 = vld [vmem:[#allocation43_spill] sm:$0xff] }
 0x683   :  { %v7302_v46 = vadd.f32 %v10774_v0, %v7234_v5  ;;  %6734 = vrot.lane.b32.xlu0 %v11162_v34, %s8393_s3  ;;  %v5406_v62 = vadd.f32 %v5083_v9, %v12078_v24  ;;  %vm12083_vm11 = vnez %v12082_v31  ;;  %v12092_v31 = vld [vmem:[#allocation48_spill] sm:$0xff] }
 0x684   :  { %7054 = vrot.lane.b32.xlu2 %v11168_v35, %s8393_s3  ;;  %vm12093_vm12 = vnez %v12092_v31 }
 0x685   :  { %v7366_v14 = vmax.f32 %v7302_v46, 0.0  ;;  %v6713_v49 = vpop.permute.xlu2 %6712 }
 0x687   :  { %v7430_v29 = vsel %vm12077_vm8, %v7366_v14, 0.0 }
 0x688   :  { %v7494_v40 = vpack.c.bf16 %v7430_v29, %v7430_v29  ;;  %v5797_v59 = vpop.f32.mrf.mxu2 }
 0x689   :  { %v11179_v39 = vadd.f32 %v5797_v59, %v5214_v32  ;;  %v6031_v8 = vpop.f32.mrf.mxu3  ;;  %v4851_v27 = vpop.f32.mrf.mxu0 }
 0x68a   :  { %7559 = vst.msk [vmem:[%s11364_s5 + $0xb8] sm:$0xf] %vm7512_vm14, %v7494_v40  ;;  %v11185_v57 = vadd.f32 %v6031_v8, %v5406_v62  ;;  %v5085_v48 = vpop.f32.mrf.mxu1  ;;  %v12084_v62 = vld [vmem:[#allocation44_spill] sm:$0xff] }
 0x68b   :  { %6736 = vrot.lane.b32.xlu1 %v11179_v39, %s8393_s3  ;;  %vm12085_vm13 = vnez %v12084_v62  ;;  %v12094_v62 = vld [vmem:[#allocation49_spill] sm:$0xff] }
 0x68c   :  { %7056 = vrot.lane.b32.xlu0 %v11185_v57, %s8393_s3  ;;  %vm12095_vm15 = vnez %v12094_v62 }
 0x68d   :  { %v6709_v53 = vpop.permute.xlu0 %6708 }
 0x68e   :  { %v6852_v20 = vmax.f32 %v10939_v58, %v6709_v53  ;;  %v7035_v41 = vpop.permute.xlu2 %7034  ;;  %v12086_v53 = vld [vmem:[#allocation45_spill] sm:$0xff] }
 0x68f   :  { %v7175_v24 = vmax.f32 %v11002_v50, %v7035_v41  ;;  %vm12087_vm2 = vnez %v12086_v53 }
 0x690   :  { %v7236_v4 = vmax.f32 %v6852_v20, %v7172_v2  ;;  %v5799_v17 = vpop.f32.mrf.mxu2 }
 0x691   :  { %v6033_v11 = vpop.f32.mrf.mxu3 }
 0x692   :  { %v7304_v19 = vadd.f32 %v10774_v0, %v7236_v4 }
 0x693   :  { %7052 = vrot.lane.b32.xlu1 %v11194_v55, %s8393_s3 }
 0x694   :  { %v7368_v23 = vmax.f32 %v7304_v19, 0.0 }
 0x695   :  { %v6711_v61 = vpop.permute.xlu1 %6710 }
 0x696   :  { %v7432_v52 = vsel %vm12081_vm10, %v7368_v23, 0.0  ;;  %v7031_v18 = vpop.permute.xlu0 %7030  ;;  %v6853_v58 = vmax.f32 %v10958_v6, %v6711_v61  ;;  %v6854_v6 = vmax.f32 %v10981_v42, %v6713_v49  ;;  %v12088_v61 = vld [vmem:[#allocation46_spill] sm:$0xff] }
 0x697   :  { %v7496_v3 = vpack.c.bf16 %v7432_v52, %v7432_v52  ;;  %v7173_v16 = vmax.f32 %v10965_v25, %v7031_v18  ;;  %vm12089_vm0 = vnez %v12088_v61 }
 0x699   :  { %7561 = vst.msk [vmem:[%s11364_s5 + $0xc0] sm:$0xf] %vm7512_vm14, %v7496_v3  ;;  %v7237_v0 = vmax.f32 %v6853_v58, %v7173_v16 }
 0x69b   :  { %v7305_v37 = vadd.f32 %v11210_v7, %v7237_v0  ;;  %v12090_v0 = vld [vmem:[#allocation47_spill] sm:$0xff] }
 0x69c   :  { %vm12091_vm7 = vnez %v12090_v0  ;;  %v12102_v0 = vld [vmem:[#allocation54_spill] sm:$0xff] }
 0x69d   :  { %v7369_v5 = vmax.f32 %v7305_v37, 0.0  ;;  %v6719_v43 = vpop.permute.xlu2 %6718  ;;  %vm12103_vm4 = vnez %v12102_v0 }
 0x69e   :  { %v7033_v60 = vpop.permute.xlu1 %7032  ;;  %v6857_v23 = vmax.f32 %v11038_v38, %v6719_v43 }
 0x69f   :  { %v7433_v25 = vsel %vm12083_vm11, %v7369_v5, 0.0  ;;  %v7174_v9 = vmax.f32 %v10983_v26, %v7033_v60 }
 0x6a0   :  { %v7497_v46 = vpack.c.bf16 %v7433_v25, %v7433_v25 }
 0x6a1   :  { %v7238_v14 = vmax.f32 %v6854_v6, %v7174_v9 }
 0x6a2   :  { %7562 = vst.msk [vmem:[%s11364_s5 + $0xc4] sm:$0xf] %vm7512_vm14, %v7497_v46 }
 0x6a3   :  { %v7306_v29 = vadd.f32 %v11210_v7, %v7238_v14 }
 0x6a5   :  { %v7370_v32 = vmax.f32 %v7306_v29, 0.0  ;;  %v6715_v40 = vpop.permute.xlu0 %6714 }
 0x6a6   :  { %v6855_v42 = vmax.f32 %v10996_v44, %v6715_v40  ;;  %v7041_v18 = vpop.permute.xlu2 %7040 }
 0x6a7   :  { %v7434_v59 = vsel %vm12085_vm13, %v7370_v32, 0.0  ;;  %v7178_v49 = vmax.f32 %v11057_v1, %v7041_v18 }
 0x6a8   :  { %v7498_v26 = vpack.c.bf16 %v7434_v59, %v7434_v59  ;;  %v7239_v8 = vmax.f32 %v6855_v42, %v7175_v24 }
 0x6aa   :  { %7563 = vst.msk [vmem:[%s11364_s5 + $0xc8] sm:$0xf] %vm7512_vm14, %v7498_v26  ;;  %v7307_v27 = vadd.f32 %v11210_v7, %v7239_v8 }
 0x6ac   :  { %v7371_v48 = vmax.f32 %v7307_v27, 0.0 }
 0x6ad   :  { %v6717_v54 = vpop.permute.xlu1 %6716 }
 0x6ae   :  { %v7435_v2 = vsel %vm12087_vm2, %v7371_v48, 0.0  ;;  %v7037_v50 = vpop.permute.xlu0 %7036  ;;  %v6856_v44 = vmax.f32 %v11015_v36, %v6717_v54 }
 0x6af   :  { %v7499_v20 = vpack.c.bf16 %v7435_v2, %v7435_v2  ;;  %v7176_v33 = vmax.f32 %v11022_v12, %v7037_v50  ;;  %v12096_v2 = vld [vmem:[#allocation50_spill] sm:$0xff] }
 0x6b0   :  { %vm12097_vm1 = vnez %v12096_v2 }
 0x6b1   :  { %7564 = vst.msk [vmem:[%s11364_s5 + $0xcc] sm:$0xf] %vm7512_vm14, %v7499_v20  ;;  %v7240_v4 = vmax.f32 %v6856_v44, %v7176_v33 }
 0x6b3   :  { %v7308_v17 = vadd.f32 %v11210_v7, %v7240_v4  ;;  %v12098_v4 = vld [vmem:[#allocation51_spill] sm:$0xff] }
 0x6b4   :  { %vm12099_vm3 = vnez %v12098_v4 }
 0x6b5   :  { %v7372_v11 = vmax.f32 %v7308_v17, 0.0 }
 0x6b6   :  { %v7039_v19 = vpop.permute.xlu1 %7038 }
 0x6b7   :  { %v7436_v28 = vsel %vm12089_vm0, %v7372_v11, 0.0  ;;  %v7177_v36 = vmax.f32 %v11040_v45, %v7039_v19 }
 0x6b8   :  { %v7500_v52 = vpack.c.bf16 %v7436_v28, %v7436_v28 }
 0x6b9   :  { %v7241_v12 = vmax.f32 %v6857_v23, %v7177_v36 }
 0x6ba   :  { %7565 = vst.msk [vmem:[%s11364_s5 + $0xd0] sm:$0xf] %vm7512_vm14, %v7500_v52  ;;  %v12100_v52 = vld [vmem:[#allocation52_spill] sm:$0xff] }
 0x6bb   :  { %v7309_v58 = vadd.f32 %v11210_v7, %v7241_v12  ;;  %vm12101_vm5 = vnez %v12100_v52 }
 0x6bd   :  { %v7373_v3 = vmax.f32 %v7309_v58, 0.0  ;;  %v6721_v16 = vpop.permute.xlu0 %6720  ;;  %v6727_v41 = vpop.permute.xlu2 %6726 }
 0x6be   :  { %v6858_v38 = vmax.f32 %v11051_v30, %v6721_v16  ;;  %v6861_v42 = vmax.f32 %v11095_v10, %v6727_v41 }
 0x6bf   :  { %v7437_v37 = vsel %vm12091_vm7, %v7373_v3, 0.0 }
 0x6c0   :  { %v7501_v45 = vpack.c.bf16 %v7437_v37, %v7437_v37  ;;  %v7242_v5 = vmax.f32 %v6858_v38, %v7178_v49 }
 0x6c2   :  { %7566 = vst.msk [vmem:[%s11364_s5 + $0xd4] sm:$0xf] %vm7512_vm14, %v7501_v45  ;;  %v7310_v60 = vadd.f32 %v11210_v7, %v7242_v5 }
 0x6c4   :  { %v7374_v6 = vmax.f32 %v7310_v60, 0.0 }
 0x6c6   :  { %v7438_v25 = vsel %vm12093_vm12, %v7374_v6, 0.0 }
 0x6c7   :  { %v7502_v9 = vpack.c.bf16 %v7438_v25, %v7438_v25 }
 0x6c9   :  { %7567 = vst.msk [vmem:[%s11364_s5 + $0xd8] sm:$0xf] %vm7512_vm14, %v7502_v9 }
 0x6cd   :  { %v6725_v30 = vpop.permute.xlu1 %6724 }
 0x6ce   :  { %v7045_v1 = vpop.permute.xlu0 %7044  ;;  %v6860_v46 = vmax.f32 %v11072_v15, %v6725_v30  ;;  %v7049_v15 = vpop.permute.xlu2 %7048 }
 0x6cf   :  { %v7180_v14 = vmax.f32 %v11079_v51, %v7045_v1  ;;  %v7182_v53 = vmax.f32 %v11116_v13, %v7049_v15 }
 0x6d1   :  { %v7244_v29 = vmax.f32 %v6860_v46, %v7180_v14  ;;  %v12104_v14 = vld [vmem:[#allocation55_spill] sm:$0xff] }
 0x6d2   :  { %vm12105_vm9 = vnez %v12104_v14 }
 0x6d3   :  { %v7312_v32 = vadd.f32 %v11210_v7, %v7244_v29 }
 0x6d5   :  { %v7376_v40 = vmax.f32 %v7312_v32, 0.0 }
 0x6d6   :  { %v7047_v24 = vpop.permute.xlu1 %7046  ;;  %v6733_v23 = vpop.permute.xlu2 %6732 }
 0x6d7   :  { %v7440_v59 = vsel %vm12095_vm15, %v7376_v40, 0.0  ;;  %v7181_v26 = vmax.f32 %v11097_v63, %v7047_v24  ;;  %v6864_v1 = vmax.f32 %v11151_v47, %v6733_v23  ;;  %v12106_v40 = vld [vmem:[#allocation53_spill] sm:$0xff] }
 0x6d8   :  { %v7504_v8 = vpack.c.bf16 %v7440_v59, %v7440_v59  ;;  %vm12107_vm6 = vnez %v12106_v40 }
 0x6d9   :  { %v7245_v27 = vmax.f32 %v6861_v42, %v7181_v26 }
 0x6da   :  { %7569 = vst.msk [vmem:[%s11364_s5 + $0xe0] sm:$0xf] %vm7512_vm14, %v7504_v8 }
 0x6db   :  { %v7313_v51 = vadd.f32 %v11210_v7, %v7245_v27 }
 0x6dd   :  { %v7377_v48 = vmax.f32 %v7313_v51, 0.0  ;;  %v6729_v54 = vpop.permute.xlu0 %6728 }
 0x6de   :  { %v6862_v10 = vmax.f32 %v11110_v21, %v6729_v54 }
 0x6df   :  { %v7441_v50 = vsel %vm12097_vm1, %v7377_v48, 0.0 }
 0x6e0   :  { %v7505_v63 = vpack.c.bf16 %v7441_v50, %v7441_v50  ;;  %v7246_v44 = vmax.f32 %v6862_v10, %v7182_v53 }
 0x6e2   :  { %7570 = vst.msk [vmem:[%s11364_s5 + $0xe4] sm:$0xf] %vm7512_vm14, %v7505_v63  ;;  %v7314_v20 = vadd.f32 %v11210_v7, %v7246_v44 }
 0x6e4   :  { %v7378_v33 = vmax.f32 %v7314_v20, 0.0 }
 0x6e5   :  { %v6731_v43 = vpop.permute.xlu1 %6730 }
 0x6e6   :  { %v7442_v17 = vsel %vm12099_vm3, %v7378_v33, 0.0  ;;  %v7051_v13 = vpop.permute.xlu0 %7050  ;;  %v6863_v21 = vmax.f32 %v11129_v22, %v6731_v43  ;;  %v7055_v22 = vpop.permute.xlu2 %7054 }
 0x6e7   :  { %v7506_v11 = vpack.c.bf16 %v7442_v17, %v7442_v17  ;;  %v7183_v19 = vmax.f32 %v11136_v56, %v7051_v13  ;;  %v8394_v56 = vmov 0.0|0.0   ;;  %v7185_v3 = vmax.f32 %v11168_v35, %v7055_v22 }
 0x6e8   :  { %7520 = vst.msk [vmem:[%s11364_s5 + $0x1c] sm:$0xf] %vm7512_vm14, %v8394_v56 }
 0x6e9   :  { %7571 = vst.msk [vmem:[%s11364_s5 + $0xe8] sm:$0xf] %vm7512_vm14, %v7506_v11  ;;  %v7247_v61 = vmax.f32 %v6863_v21, %v7183_v19 }
 0x6ea   :  { %7528 = vst.msk [vmem:[%s11364_s5 + $0x3c] sm:$0xf] %vm7512_vm14, %v8394_v56 }
 0x6eb   :  { %v7315_v28 = vadd.f32 %v11210_v7, %v7247_v61  ;;  %7536 = vst.msk [vmem:[%s11364_s5 + $0x5c] sm:$0xf] %vm7512_vm14, %v8394_v56 }
 0x6ec   :  { %7544 = vst.msk [vmem:[%s11364_s5 + $0x7c] sm:$0xf] %vm7512_vm14, %v8394_v56 }
 0x6ed   :  { %v7379_v36 = vmax.f32 %v7315_v28, 0.0  ;;  %7552 = vst.msk [vmem:[%s11364_s5 + $0x9c] sm:$0xf] %vm7512_vm14, %v8394_v56 }
 0x6ee   :  { %7560 = vst.msk [vmem:[%s11364_s5 + $0xbc] sm:$0xf] %vm7512_vm14, %v8394_v56 }
 0x6ef   :  { %v7443_v12 = vsel %vm12101_vm5, %v7379_v36, 0.0  ;;  %7568 = vst.msk [vmem:[%s11364_s5 + $0xdc] sm:$0xf] %vm7512_vm14, %v8394_v56 }
 0x6f0   :  { %v7507_v18 = vpack.c.bf16 %v7443_v12, %v7443_v12  ;;  %7576 = vst.msk [vmem:[%s11364_s5 + $0xfc] sm:$0xf] %vm7512_vm14, %v8394_v56 }
 0x6f2   :  { %7572 = vst.msk [vmem:[%s11364_s5 + $0xec] sm:$0xf] %vm7512_vm14, %v7507_v18 }
 0x6f5   :  { %v6735_v58 = vpop.permute.xlu0 %6734 }
 0x6f6   :  { %v6865_v16 = vmax.f32 %v11162_v34, %v6735_v58 }
 0x6f8   :  { %v7249_v49 = vmax.f32 %v6865_v16, %v7185_v3 }
 0x6fa   :  { %v7317_v34 = vadd.f32 %v11210_v7, %v7249_v49 }
 0x6fc   :  { %v7381_v35 = vmax.f32 %v7317_v34, 0.0 }
 0x6fd   :  { %v6737_v38 = vpop.permute.xlu1 %6736 }
 0x6fe   :  { %v7445_v37 = vsel %vm12103_vm4, %v7381_v35, 0.0  ;;  %v7057_v45 = vpop.permute.xlu0 %7056  ;;  %v6866_v5 = vmax.f32 %v11179_v39, %v6737_v38 }
 0x6ff   :  { %v7509_v60 = vpack.c.bf16 %v7445_v37, %v7445_v37  ;;  %v7186_v6 = vmax.f32 %v11185_v57, %v7057_v45 }
 0x701   :  { %7574 = vst.msk [vmem:[%s11364_s5 + $0xf4] sm:$0xf] %vm7512_vm14, %v7509_v60  ;;  %v7250_v31 = vmax.f32 %v6866_v5, %v7186_v6 }
 0x703   :  { %v7318_v25 = vadd.f32 %v11210_v7, %v7250_v31 }
 0x705   :  { %v7382_v9 = vmax.f32 %v7318_v25, 0.0  ;;  %v7053_v30 = vpop.permute.xlu1 %7052 }
 0x706   :  { %v7184_v46 = vmax.f32 %v11194_v55, %v7053_v30 }
 0x707   :  { %v7446_v39 = vsel %vm12105_vm9, %v7382_v9, 0.0 }
 0x708   :  { %v7510_v41 = vpack.c.bf16 %v7446_v39, %v7446_v39  ;;  %v7248_v29 = vmax.f32 %v6864_v1, %v7184_v46 }
 0x70a   :  { %7575 = vst.msk [vmem:[%s11364_s5 + $0xf8] sm:$0xf] %vm7512_vm14, %v7510_v41  ;;  %v7316_v57 = vadd.f32 %v11210_v7, %v7248_v29 }
 0x70c   :  { %v7380_v32 = vmax.f32 %v7316_v57, 0.0 }
 0x70e   :  { %v7444_v24 = vsel %vm12107_vm6, %v7380_v32, 0.0 }
 0x70f   :  { %v7508_v42 = vpack.c.bf16 %v7444_v24, %v7444_v24 }
 0x711   :  { %7573 = vst.msk [vmem:[%s11364_s5 + $0xf0] sm:$0xf] %vm7512_vm14, %v7508_v42 }

</bundles_post_ra>
